<compile_context>
chip_gen: v5e
topology: v5e:2x2
jax: 0.10.0
libtpu: 0.0.40
codegen_flags: <defaults>
</compile_context>

<pallas_src>
import math
import functools
import numpy as np

import jax
import jax.numpy as jnp
from jax.experimental import pallas as pl
from jax.experimental.pallas import tpu as pltpu


COMPUTE_DTYPE = jnp.bfloat16      # MXU-friendly matmul input dtype
PARAM_DTYPE = jnp.float32         # LN scale/shift, biases, tables stay f32
VMEM_LIMIT = 32 * 1024 * 1024     # safe on v5e/v6e (128 MiB phys) and v7x (64 MiB phys)


# ------------------------------- helpers -------------------------------------

def _gelu(y):
    # TODO(synk): PyTorch nn.GELU default is exact (erf) GELU; tanh approximation used here.
    c = math.sqrt(2.0 / math.pi)
    return 0.5 * y * (1.0 + jnp.tanh(c * (y + 0.044715 * y * y * y)))


def _round_up(x, m):
    return ((x + m - 1) // m) * m


def _pick_tile(dim, target, align):
    """Largest tile <= target that is a multiple of `align` and divides `dim`;
    falls back to the full dim (always a legal Pallas block size)."""
    if dim <= target:
        return dim
    t = (target // align) * align
    while t >= align:
        if dim % t == 0:
            return t
        t -= align
    return dim


def _largest_divisor(n, cap):
    for d in range(min(n, max(int(cap), 1)), 0, -1):
        if n % d == 0:
            return d
    return 1


def _row_tile(M, target, align=16):
    """Row-tile size for (tokens, channels) kernels: 16-aligned (bf16 sublane
    packing), capped at `target`, preferring an even number of grid steps
    (v7x megacore sharding).  Rows are zero-padded to the tile size."""
    t = min(int(target), _round_up(M, align))
    t = max(align, (t // align) * align)
    n = -(-M // t)
    if n > 1 and n % 2 == 1 and t % (2 * align) == 0:
        t //= 2
    return t


def _pad_rows(x, tm):
    """Zero-pad the leading (row) dim of a 2-D array to a multiple of tm."""
    M = x.shape[0]
    Mp = _round_up(M, tm)
    if Mp != M:
        x = jnp.pad(x, ((0, Mp - M), (0, 0)))
    return x, M


# ----------------------------- Pallas kernels --------------------------------

def _matmul_kernel(x_ref, w_ref, b_ref, o_ref, acc_ref, *, activation):
    k = pl.program_id(2)

    @pl.when(k == 0)
    def _():
        acc_ref[...] = jnp.zeros_like(acc_ref)

    acc_ref[...] += jnp.dot(x_ref[...], w_ref[...],
                            preferred_element_type=jnp.float32)

    @pl.when(k == pl.num_programs(2) - 1)
    def _():
        y = acc_ref[...] + b_ref[...].astype(jnp.float32)
        if activation == "gelu":
            y = _gelu(y)
        o_ref[...] = y.astype(o_ref.dtype)


def pallas_linear(x, w, b=None, activation=None):
    """y = act(x @ w + b); x: (M, K), w: (K, N), b: (N,) or None. Tiled."""
    K = x.shape[1]
    N = w.shape[1]
    if b is None:
        b = jnp.zeros((N,), PARAM_DTYPE)
    b2 = b.reshape(1, N)

    tm = _row_tile(x.shape[0], 256)
    x, M0 = _pad_rows(x, tm)
    M = x.shape[0]
    tn = _pick_tile(N, 256, 128)
    tk = _pick_tile(K, 512, 128)

    kern = functools.partial(_matmul_kernel, activation=activation)
    flops = 2 * M * N * K
    bytes_acc = (M * K + K * N) * x.dtype.itemsize + M * N * x.dtype.itemsize
    out = pl.pallas_call(
        kern,
        out_shape=jax.ShapeDtypeStruct((M, N), x.dtype),
        grid=(M // tm, N // tn, K // tk),
        in_specs=[
            pl.BlockSpec((tm, tk), lambda i, j, k: (i, k)),
            pl.BlockSpec((tk, tn), lambda i, j, k: (k, j)),
            pl.BlockSpec((1, tn), lambda i, j, k: (0, j)),
        ],
        out_specs=pl.BlockSpec((tm, tn), lambda i, j, k: (i, j)),
        scratch_shapes=[pltpu.VMEM((tm, tn), jnp.float32)],
        compiler_params=pltpu.CompilerParams(
            dimension_semantics=("parallel", "parallel", "arbitrary"),
            vmem_limit_bytes=VMEM_LIMIT),
        cost_estimate=pl.CostEstimate(flops=flops, transcendentals=0,
                                      bytes_accessed=bytes_acc),
    )(x, w, b2)
    return out[:M0]


def _layernorm_kernel(x_ref, g_ref, b_ref, o_ref, *, eps):
    x = x_ref[...].astype(jnp.float32)
    mu = jnp.mean(x, axis=-1, keepdims=True)
    var = jnp.mean((x - mu) ** 2, axis=-1, keepdims=True)
    y = (x - mu) * jax.lax.rsqrt(var + eps)
    y = y * g_ref[...].astype(jnp.float32) + b_ref[...].astype(jnp.float32)
    o_ref[...] = y.astype(o_ref.dtype)


def pallas_layernorm(x, gamma, beta, eps=1e-5):
    """LayerNorm over the last dim; x: (M, C). Row-tiled (mem-bound -> big tiles)."""
    C = x.shape[1]
    # target ~2 MiB per block (per review: 512-row tiles were overhead-dominated)
    target = max(512, min(8192, (2 << 20) // max(C * x.dtype.itemsize, 1)))
    tm = _row_tile(x.shape[0], target)
    x, M0 = _pad_rows(x, tm)
    M = x.shape[0]
    kern = functools.partial(_layernorm_kernel, eps=eps)
    out = pl.pallas_call(
        kern,
        out_shape=jax.ShapeDtypeStruct((M, C), x.dtype),
        grid=(M // tm,),
        in_specs=[
            pl.BlockSpec((tm, C), lambda i: (i, 0)),
            pl.BlockSpec((1, C), lambda i: (0, 0)),
            pl.BlockSpec((1, C), lambda i: (0, 0)),
        ],
        out_specs=pl.BlockSpec((tm, C), lambda i: (i, 0)),
        compiler_params=pltpu.CompilerParams(
            dimension_semantics=("parallel",), vmem_limit_bytes=VMEM_LIMIT),
    )(x, gamma.reshape(1, C), beta.reshape(1, C))
    return out[:M0]


def _ln_linear_kernel(x_ref, g_ref, bl_ref, w_ref, b_ref, o_ref, *, eps, activation):
    x = x_ref[...].astype(jnp.float32)
    mu = jnp.mean(x, axis=-1, keepdims=True)
    var = jnp.mean((x - mu) ** 2, axis=-1, keepdims=True)
    xn = (x - mu) * jax.lax.rsqrt(var + eps)
    xn = xn * g_ref[...].astype(jnp.float32) + bl_ref[...].astype(jnp.float32)
    y = jnp.dot(xn.astype(w_ref.dtype), w_ref[...],
                preferred_element_type=jnp.float32)
    y = y + b_ref[...].astype(jnp.float32)
    if activation == "gelu":
        y = _gelu(y)
    o_ref[...] = y.astype(o_ref.dtype)


def pallas_ln_linear(x, gamma, beta, w, b=None, activation=None, eps=1e-5):
    """y = act(LN(x) @ w + b); the normalized activation never hits HBM."""
    K = x.shape[1]
    N = w.shape[1]
    if b is None:
        b = jnp.zeros((N,), PARAM_DTYPE)
    tm = _row_tile(x.shape[0], 256)
    x, M0 = _pad_rows(x, tm)
    M = x.shape[0]
    tn = _pick_tile(N, 256, 128)
    kern = functools.partial(_ln_linear_kernel, eps=eps, activation=activation)
    out = pl.pallas_call(
        kern,
        out_shape=jax.ShapeDtypeStruct((M, N), x.dtype),
        grid=(M // tm, N // tn),
        in_specs=[
            pl.BlockSpec((tm, K), lambda i, j: (i, 0)),
            pl.BlockSpec((1, K), lambda i, j: (0, 0)),
            pl.BlockSpec((1, K), lambda i, j: (0, 0)),
            pl.BlockSpec((K, tn), lambda i, j: (0, j)),
            pl.BlockSpec((1, tn), lambda i, j: (0, j)),
        ],
        out_specs=pl.BlockSpec((tm, tn), lambda i, j: (i, j)),
        compiler_params=pltpu.CompilerParams(
            dimension_semantics=("parallel", "parallel"),
            vmem_limit_bytes=VMEM_LIMIT),
        cost_estimate=pl.CostEstimate(
            flops=2 * M * N * K, transcendentals=0,
            bytes_accessed=(M * K + K * N + M * N) * x.dtype.itemsize),
    )(x, gamma.reshape(1, K), beta.reshape(1, K), w, b.reshape(1, N))
    return out[:M0]


def _mlp_kernel(x_ref, g_ref, bl_ref, w1_ref, b1_ref, w2_ref, b2_ref,
                o_ref, acc_ref, xn_ref, *, eps):
    h = pl.program_id(1)

    @pl.when(h == 0)
    def _():
        acc_ref[...] = jnp.zeros_like(acc_ref)
        # LN computed once per row tile and cached in VMEM (reused for every
        # hidden tile -> the XLU reductions don't repeat each step).
        x = x_ref[...].astype(jnp.float32)
        mu = jnp.mean(x, axis=-1, keepdims=True)
        var = jnp.mean((x - mu) ** 2, axis=-1, keepdims=True)
        xn = (x - mu) * jax.lax.rsqrt(var + eps)
        xn = xn * g_ref[...].astype(jnp.float32) + bl_ref[...].astype(jnp.float32)
        xn_ref[...] = xn.astype(xn_ref.dtype)

    hid = jnp.dot(xn_ref[...], w1_ref[...], preferred_element_type=jnp.float32)
    hid = _gelu(hid + b1_ref[...].astype(jnp.float32))
    acc_ref[...] += jnp.dot(hid.astype(w2_ref.dtype), w2_ref[...],
                            preferred_element_type=jnp.float32)

    @pl.when(h == pl.num_programs(1) - 1)
    def _():
        # residual add fused into the finalize (x tile is already resident)
        y = x_ref[...].astype(jnp.float32) + acc_ref[...] + b2_ref[...].astype(jnp.float32)
        o_ref[...] = y.astype(o_ref.dtype)


def pallas_mlp(x, gamma, beta, w1, b1, w2, b2, eps=1e-5):
    """Fused  x + fc2(GELU(fc1(LN(x)))) ; hidden and LN stay in VMEM."""
    C = x.shape[1]
    Hh = w1.shape[1]
    tm = _row_tile(x.shape[0], 256)
    x, M0 = _pad_rows(x, tm)
    M = x.shape[0]
    th = _pick_tile(Hh, 256, 128)
    kern = functools.partial(_mlp_kernel, eps=eps)
    flops = 4 * M * Hh * C
    bytes_acc = (2 * M * C + 2 * C * Hh) * x.dtype.itemsize
    out = pl.pallas_call(
        kern,
        out_shape=jax.ShapeDtypeStruct((M, C), x.dtype),
        grid=(M // tm, Hh // th),
        in_specs=[
            pl.BlockSpec((tm, C), lambda i, h: (i, 0)),
            pl.BlockSpec((1, C), lambda i, h: (0, 0)),
            pl.BlockSpec((1, C), lambda i, h: (0, 0)),
            pl.BlockSpec((C, th), lambda i, h: (0, h)),
            pl.BlockSpec((1, th), lambda i, h: (0, h)),
            pl.BlockSpec((th, C), lambda i, h: (h, 0)),
            pl.BlockSpec((1, C), lambda i, h: (0, 0)),
        ],
        out_specs=pl.BlockSpec((tm, C), lambda i, h: (i, 0)),
        scratch_shapes=[pltpu.VMEM((tm, C), jnp.float32),
                        pltpu.VMEM((tm, C), w1.dtype)],
        compiler_params=pltpu.CompilerParams(
            dimension_semantics=("parallel", "arbitrary"),
            vmem_limit_bytes=VMEM_LIMIT),
        cost_estimate=pl.CostEstimate(flops=flops, transcendentals=M * Hh,
                                      bytes_accessed=bytes_acc),
    )(x, gamma.reshape(1, C), beta.reshape(1, C), w1, b1.reshape(1, Hh),
      w2, b2.reshape(1, C))
    return out[:M0]


def _window_attn_kernel(qkv_ref, bias_ref, *rest, num_heads, scale, has_mask):
    if has_mask:
        mask_ref, o_ref = rest
    else:
        (o_ref,) = rest
    Wb, L, C3 = qkv_ref.shape
    C = C3 // 3
    Dh = C // num_heads

    bias = bias_ref[...].astype(jnp.float32)                  # (H, L, L)
    if has_mask:
        m = mask_ref[...].astype(jnp.float32)                 # (Wb, L, L)

    # TODO(synk): per-head loop kept (Mosaic multi-batch dot_general is not
    # reliable); each head's result is stored straight into the output VMEM
    # tile so live ranges stay bounded and no lane-dim concatenate is needed.
    for h in range(num_heads):
        q = qkv_ref[:, :, h * Dh:(h + 1) * Dh]                # (Wb, L, Dh) bf16
        k = qkv_ref[:, :, C + h * Dh:C + (h + 1) * Dh]
        v = qkv_ref[:, :, 2 * C + h * Dh:2 * C + (h + 1) * Dh]
        s = jnp.einsum("wld,wmd->wlm", q, k,
                       preferred_element_type=jnp.float32) * scale
        s = s + bias[h][None, :, :]
        if has_mask:
            s = s + m
        s = s - jnp.max(s, axis=-1, keepdims=True)
        p = jnp.exp(s)
        p = p * pl.reciprocal(jnp.sum(p, axis=-1, keepdims=True), approx=True)
        o = jnp.einsum("wlm,wmd->wld", p.astype(v.dtype), v,
                       preferred_element_type=jnp.float32)    # (Wb, L, Dh)
        o_ref[:, :, h * Dh:(h + 1) * Dh] = o.astype(o_ref.dtype)


def pallas_window_attention(qkv, bias, mask, num_heads, scale):
    """qkv: (BW, L, 3C) packed per-token; bias: (H, L, L); mask: (nW, L, L)|None.
    Returns (BW, L, C) with heads concatenated on the lane axis."""
    BW, L, C3 = qkv.shape
    C = C3 // 3
    itemsize = qkv.dtype.itemsize

    # VMEM budget: double-buffered qkv/out blocks + one head's f32 score/prob
    # intermediates per window + the full (H, L, L) bias block (+ mask block).
    per_win = 2 * (3 * C * L + C * L) * itemsize + 3 * L * L * 4
    if mask is not None:
        per_win += 2 * L * L * mask.dtype.itemsize
    fixed = 2 * num_heads * L * L * bias.dtype.itemsize
    budget = 12 * 1024 * 1024                     # << 16 MiB (v5e scoped default)
    cap = min(128, max(1, (budget - fixed) // max(per_win, 1)))
    # TODO(synk): for very large H*L^2 (e.g. 8x7x7 windows, 48 heads) the bias
    # block alone exceeds the budget; head-tiling the bias is a follow-up.

    if mask is not None:
        nW = mask.shape[0]
        assert BW % nW == 0, "window batch must be a multiple of the mask window count"
        Wb = _largest_divisor(nW, cap)
    else:
        Wb = _largest_divisor(BW, cap)
    # prefer >=2 and even grid steps (v7x has two TensorCores)
    if (BW // Wb) % 2 == 1 and Wb > 1 and Wb % 2 == 0:
        Wb //= 2
    if mask is not None:
        nWb = mask.shape[0] // Wb

    in_specs = [
        pl.BlockSpec((Wb, L, C3), lambda i: (i, 0, 0)),
        pl.BlockSpec((num_heads, L, L), lambda i: (0, 0, 0)),
    ]
    args = [qkv, bias]
    if mask is not None:
        in_specs.append(pl.BlockSpec((Wb, L, L), lambda i: (i % nWb, 0, 0)))
        args.append(mask)

    kern = functools.partial(_window_attn_kernel, num_heads=num_heads,
                             scale=scale, has_mask=(mask is not None))
    flops = 4 * BW * L * L * C
    bytes_acc = BW * L * 4 * C * itemsize + num_heads * L * L * bias.dtype.itemsize
    return pl.pallas_call(
        kern,
        out_shape=jax.ShapeDtypeStruct((BW, L, C), qkv.dtype),
        grid=(BW // Wb,),
        in_specs=in_specs,
        out_specs=pl.BlockSpec((Wb, L, C), lambda i: (i, 0, 0)),
        compiler_params=pltpu.CompilerParams(
            dimension_semantics=("parallel",), vmem_limit_bytes=VMEM_LIMIT),
        cost_estimate=pl.CostEstimate(flops=flops,
                                      transcendentals=BW * num_heads * L * L,
                                      bytes_accessed=bytes_acc),
    )(*args)


# -------------------------------- JAX glue -----------------------------------

def get_window_size(x_size, window_size, shift_size=None):
    use_window = list(window_size)
    use_shift = list(shift_size) if shift_size is not None else None
    for i in range(len(x_size)):
        if x_size[i] <= window_size[i]:
            use_window[i] = x_size[i]
            if shift_size is not None:
                use_shift[i] = 0
    if shift_size is None:
        return tuple(use_window)
    return tuple(use_window), tuple(use_shift)


def window_partition(x, ws):
    B, D, H, W, C = x.shape
    wd, wh, ww = ws
    x = x.reshape(B, D // wd, wd, H // wh, wh, W // ww, ww, C)
    x = x.transpose(0, 1, 3, 5, 2, 4, 6, 7).reshape(-1, wd * wh * ww, C)
    return x


def window_reverse(windows, ws, B, D, H, W):
    wd, wh, ww = ws
    x = windows.reshape(B, D // wd, H // wh, W // ww, wd, wh, ww, -1)
    x = x.transpose(0, 1, 4, 2, 5, 3, 6, 7).reshape(B, D, H, W, -1)
    return x


def compute_mask(Dp, Hp, Wp, window_size, shift_size):
    img_mask = np.zeros((1, Dp, Hp, Wp, 1), np.float32)
    cnt = 0
    for d in (slice(-window_size[0]), slice(-window_size[0], -shift_size[0]),
              slice(-shift_size[0], None)):
        for h in (slice(-window_size[1]), slice(-window_size[1], -shift_size[1]),
                  slice(-shift_size[1], None)):
            for w in (slice(-window_size[2]), slice(-window_size[2], -shift_size[2]),
                      slice(-shift_size[2], None)):
                img_mask[:, d, h, w, :] = cnt
                cnt += 1
    mask_windows = window_partition(jnp.asarray(img_mask), window_size)[..., 0]  # (nW, L)
    attn_mask = mask_windows[:, None, :] - mask_windows[:, :, None]
    attn_mask = jnp.where(attn_mask != 0, -100.0, 0.0).astype(jnp.float32)
    return attn_mask


def compute_rel_pos_index(window_size):
    wd, wh, ww = window_size
    coords = np.stack(np.meshgrid(np.arange(wd), np.arange(wh), np.arange(ww), indexing="ij"))
    coords_flat = coords.reshape(3, -1)
    rel = coords_flat[:, :, None] - coords_flat[:, None, :]
    rel = rel.transpose(1, 2, 0).astype(np.int64)
    rel[:, :, 0] += wd - 1
    rel[:, :, 1] += wh - 1
    rel[:, :, 2] += ww - 1
    rel[:, :, 0] *= (2 * wh - 1) * (2 * ww - 1)
    rel[:, :, 1] *= (2 * ww - 1)
    return jnp.asarray(rel.sum(-1), jnp.int32)  # (L, L)


def patch_embed_3d(x, p, patch_size, embed_dim):
    # Conv3d(in=3, out=E, kernel=stride=patch_size) == patch extraction + matmul
    N, C, D, H, W = x.shape
    pd, ph, pw = patch_size
    if W % pw != 0:
        x = jnp.pad(x, ((0, 0), (0, 0), (0, 0), (0, 0), (0, pw - W % pw)))
    if H % ph != 0:
        x = jnp.pad(x, ((0, 0), (0, 0), (0, 0), (0, ph - H % ph), (0, 0)))
    if D % pd != 0:
        x = jnp.pad(x, ((0, 0), (0, 0), (0, pd - D % pd), (0, 0), (0, 0)))
    N, C, D, H, W = x.shape
    Dp, Hp, Wp = D // pd, H // ph, W // pw
    patches = x.reshape(N, C, Dp, pd, Hp, ph, Wp, pw)
    patches = patches.transpose(0, 2, 4, 6, 1, 3, 5, 7).reshape(
        N * Dp * Hp * Wp, C * pd * ph * pw).astype(COMPUTE_DTYPE)
    y = pallas_linear(patches, p["proj_w"], p["proj_b"])
    y = pallas_layernorm(y, p["norm_g"], p["norm_b"])          # patch_norm=True
    y = y.reshape(N, Dp, Hp, Wp, embed_dim).transpose(0, 4, 1, 2, 3)  # N, E, D, H, W
    return y


def swin_block(x, p, num_heads, window_size, shift_size, mask_matrix, rel_pos_index):
    # x: (B, D, H, W, C); dropout / drop_path are identity (p=0 / eval).
    B, D, H, W, C = x.shape
    ws, ss = get_window_size((D, H, W), window_size, shift_size)
    a = p["attn"]
    L = ws[0] * ws[1] * ws[2]
    scale = (C // num_heads) ** -0.5

    pad_d1 = (ws[0] - D % ws[0]) % ws[0]
    pad_b = (ws[1] - H % ws[1]) % ws[1]
    pad_r = (ws[2] - W % ws[2]) % ws[2]
    no_pad = (pad_d1 == 0 and pad_b == 0 and pad_r == 0)
    do_shift = any(s > 0 for s in ss)

    shortcut = x
    if no_pad:
        Dp, Hp, Wp = D, H, W
        shifted = jnp.roll(x, shift=(-ss[0], -ss[1], -ss[2]), axis=(1, 2, 3)) if do_shift else x
        x_windows = window_partition(shifted, ws)              # (BW, L, C), raw tokens
        BW = x_windows.shape[0]
        # norm1 fused into the qkv projection (LN is per-token, so applying it
        # after windowing is exact when there is no padding).
        qkv = pallas_ln_linear(x_windows.reshape(BW * L, C),
                               p["norm1_g"], p["norm1_b"], a["qkv_w"], a["qkv_b"])
    else:
        # fallback: LN first so window padding stays exactly zero (matches reference)
        xn = pallas_layernorm(x.reshape(-1, C), p["norm1_g"], p["norm1_b"]).reshape(B, D, H, W, C)
        xn = jnp.pad(xn, ((0, 0), (0, pad_d1), (0, pad_b), (0, pad_r), (0, 0)))
        _, Dp, Hp, Wp, _ = xn.shape
        shifted = jnp.roll(xn, shift=(-ss[0], -ss[1], -ss[2]), axis=(1, 2, 3)) if do_shift else xn
        x_windows = window_partition(shifted, ws)
        BW = x_windows.shape[0]
        qkv = pallas_linear(x_windows.reshape(BW * L, C), a["qkv_w"], a["qkv_b"])
    qkv = qkv.reshape(BW, L, 3 * C)                             # packed; split in-kernel

    # relative position bias: gather hoisted out of the attention kernel, bf16
    idx = rel_pos_index[:L, :L].reshape(-1)
    bias = a["rpb_table"][idx].reshape(L, L, num_heads).transpose(2, 0, 1).astype(COMPUTE_DTYPE)

    attn_mask = mask_matrix if do_shift else None
    attn = pallas_window_attention(qkv, bias, attn_mask, num_heads, scale)    # (BW, L, C)
    attn = pallas_linear(attn.reshape(BW * L, C), a["proj_w"], a["proj_b"]).reshape(BW, L, C)

    attn = attn.reshape((-1,) + tuple(ws) + (C,))
    shifted_out = window_reverse(attn, ws, B, Dp, Hp, Wp)
    xo = jnp.roll(shifted_out, shift=tuple(ss), axis=(1, 2, 3)) if do_shift else shifted_out
    xo = xo[:, :D, :H, :W, :]
    x = shortcut + xo

    # Fused LN -> fc1 -> GELU -> fc2 -> (+residual); hidden + LN stay in VMEM
    x = pallas_mlp(x.reshape(-1, C), p["norm2_g"], p["norm2_b"],
                   p["fc1_w"], p["fc1_b"], p["fc2_w"], p["fc2_b"]).reshape(B, D, H, W, C)
    return x


def patch_merging(x, p):
    B, D, H, W, C = x.shape
    if (H % 2 == 1) or (W % 2 == 1):
        x = jnp.pad(x, ((0, 0), (0, 0), (0, H % 2), (0, W % 2), (0, 0)))
    x0 = x[:, :, 0::2, 0::2, :]
    x1 = x[:, :, 1::2, 0::2, :]
    x2 = x[:, :, 0::2, 1::2, :]
    x3 = x[:, :, 1::2, 1::2, :]
    x = jnp.concatenate([x0, x1, x2, x3], axis=-1)
    Bn, Dn, Hn, Wn, C4 = x.shape
    # Fused LayerNorm + Linear(4C, 2C, bias=False)
    y = pallas_ln_linear(x.reshape(-1, C4), p["norm_g"], p["norm_b"], p["red_w"], None)
    return y.reshape(Bn, Dn, Hn, Wn, C4 // 2)


def basic_layer(x, lparams, num_heads, window_size, has_downsample):
    # x: (B, C, D, H, W)
    B, C, D, H, W = x.shape
    shift_full = tuple(i // 2 for i in window_size)
    ws, ss = get_window_size((D, H, W), window_size, shift_full)
    x = jnp.transpose(x, (0, 2, 3, 4, 1))                           # b d h w c
    Dp = int(np.ceil(D / ws[0])) * ws[0]
    Hp = int(np.ceil(H / ws[1])) * ws[1]
    Wp = int(np.ceil(W / ws[2])) * ws[2]
    attn_mask = compute_mask(Dp, Hp, Wp, ws, ss) if any(s > 0 for s in ss) else None
    rel_idx = lparams["rel_pos_index"]
    for i, bp in enumerate(lparams["blocks"]):
        blk_shift = (0, 0, 0) if i % 2 == 0 else shift_full
        x = swin_block(x, bp, num_heads, window_size, blk_shift, attn_mask, rel_idx)
    x = x.reshape(B, D, H, W, -1)
    # TODO(synk): exact definition of the second BasicLayer output (xbfd) is not in the
    # provided source (custom swin_transformer); assumed = pre-downsample features in NCDHW.
    xbfd = jnp.transpose(x, (0, 4, 1, 2, 3))
    if has_downsample:
        x = patch_merging(x, lparams["downsample"])
    x = jnp.transpose(x, (0, 4, 1, 2, 3))                           # b c d h w
    return x, xbfd


def viedoswin_flow_forward(x, params, cfg):
    embed_dim = cfg["embed_dim"]
    x = patch_embed_3d(x, params["patch_embed"], cfg["patch_size"], embed_dim)
    # pos_drop(p=0.0) == identity
    feats = []
    for li in range(4):
        x, xbfd = basic_layer(x, params["layers"][li], cfg["num_heads"][li],
                              cfg["window_size"], has_downsample=(li < 3))
        feats.append(xbfd)
    # norm3 over channels: n c d h w -> n d h w c -> LN -> n c d h w
    N, C, D, H, W = x.shape
    xt = jnp.transpose(x, (0, 2, 3, 4, 1)).reshape(-1, C)
    xt = pallas_layernorm(xt, params["norm3_g"], params["norm3_b"])
    x = xt.reshape(N, D, H, W, C).transpose(0, 4, 1, 2, 3)
    # module-boundary dtype: float32
    return [feats[1].astype(jnp.float32), feats[2].astype(jnp.float32),
            x.astype(jnp.float32)]


# --------------------------- deterministic params ----------------------------

class _KeyGen:
    def __init__(self, key):
        self._key = key

    def __call__(self):
        self._key, sub = jax.random.split(self._key)
        return sub


def init_block_params(kg, dim, num_heads, window_size, mlp_ratio, std=0.02):
    hidden = int(dim * mlp_ratio)
    tbl = (2 * window_size[0] - 1) * (2 * window_size[1] - 1) * (2 * window_size[2] - 1)
    f32 = PARAM_DTYPE
    wd = COMPUTE_DTYPE

    def w(shape):
        return (std * jax.random.normal(kg(), shape, jnp.float32)).astype(wd)

    return {
        "norm1_g": jnp.ones((dim,), f32), "norm1_b": jnp.zeros((dim,), f32),
        "attn": {
            "qkv_w": w((dim, 3 * dim)),
            "qkv_b": jnp.zeros((3 * dim,), f32),
            "proj_w": w((dim, dim)),
            "proj_b": jnp.zeros((dim,), f32),
            "rpb_table": std * jax.random.normal(kg(), (tbl, num_heads), f32),
        },
        "norm2_g": jnp.ones((dim,), f32), "norm2_b": jnp.zeros((dim,), f32),
        "fc1_w": w((dim, hidden)),
        "fc1_b": jnp.zeros((hidden,), f32),
        "fc2_w": w((hidden, dim)),
        "fc2_b": jnp.zeros((dim,), f32),
    }


def init_params(key, cfg, std=0.02):
    kg = _KeyGen(key)
    f32 = PARAM_DTYPE
    wd = COMPUTE_DTYPE
    pd, ph, pw = cfg["patch_size"]
    E = cfg["embed_dim"]
    K = 3 * pd * ph * pw
    params = {
        "patch_embed": {
            "proj_w": (std * jax.random.normal(kg(), (K, E), jnp.float32)).astype(wd),
            "proj_b": jnp.zeros((E,), f32),
            "norm_g": jnp.ones((E,), f32),
            "norm_b": jnp.zeros((E,), f32),
        },
        "layers": [],
    }
    ws = cfg["window_size"]
    for li in range(4):
        dim = E * (2 ** li)
        blocks = [init_block_params(kg, dim, cfg["num_heads"][li], ws, cfg["mlp_ratio"], std)
                  for _ in range(cfg["depths"][li])]
        lp = {"blocks": blocks, "rel_pos_index": compute_rel_pos_index(ws)}
        if li < 3:
            lp["downsample"] = {
                "norm_g": jnp.ones((4 * dim,), f32),
                "norm_b": jnp.zeros((4 * dim,), f32),
                "red_w": (std * jax.random.normal(kg(), (4 * dim, 2 * dim), jnp.float32)).astype(wd),
            }
        params["layers"].append(lp)
    num_features = E * (2 ** 3)
    params["norm3_g"] = jnp.ones((num_features,), f32)
    params["norm3_b"] = jnp.zeros((num_features,), f32)
    return params


# ----------------------------------- main -------------------------------------

if __name__ == "__main__":
    # Small-but-structurally-faithful config (constructor args of viedoswinFlow,
    # scaled down: embed_dim / depths / heads / window shrunk for a quick run).
    cfg = {
        "patch_size": (2, 4, 4),
        "embed_dim": 16,
        "depths": (2, 2, 1, 1),
        "num_heads": (2, 2, 4, 8),
        "window_size": (2, 2, 2),
        "mlp_ratio": 4.0,
    }
    root = jax.random.PRNGKey(0)
    k_in, k_par = jax.random.split(root)
    # input video: (N, C=3, D, H, W)  -- PyTorch NCDHW convention
    x = jax.random.normal(k_in, (2, 3, 4, 16, 16), jnp.float32)
    params = init_params(k_par, cfg)

    fwd = jax.jit(lambda xx, pp: viedoswin_flow_forward(xx, pp, cfg))
    outs = fwd(x, params)
    jax.block_until_ready(outs)
    print("KERNEL_OK")
</pallas_src>

<mosaic_0001>
module attributes {stable_mosaic.version = 11 : i64} {
  func.func @_layernorm_kernel(%arg0: i32, %arg1: memref<64x16xbf16, #tpu.memory_space<vmem>>, %arg2: memref<1x16xf32, #tpu.memory_space<vmem>>, %arg3: memref<1x16xf32, #tpu.memory_space<vmem>>, %arg4: memref<64x16xbf16, #tpu.memory_space<vmem>>) attributes {dimension_semantics = [#tpu.dimension_semantics<parallel>], iteration_bounds = array<i64: 1>, scalar_prefetch = 0 : i64, scratch_operands = 0 : i64, tpu.core_type = #tpu.core_type<tc>, window_params = [{transform_indices = @transform_0, window_bounds = array<i64: 64, 16>}, {pipeline_mode = #tpu.pipeline_mode<synchronous>, transform_indices = @transform_1, window_bounds = array<i64: 1, 16>}, {pipeline_mode = #tpu.pipeline_mode<synchronous>, transform_indices = @transform_2, window_bounds = array<i64: 1, 16>}, {transform_indices = @transform_3, window_bounds = array<i64: 64, 16>}]} {
    %c0 = arith.constant 0 : index
    %c0_0 = arith.constant 0 : index
    %0 = vector.load %arg1[%c0, %c0_0] : memref<64x16xbf16, #tpu.memory_space<vmem>>, vector<64x16xbf16>
    %1 = arith.extf %0 : vector<64x16xbf16> to vector<64x16xf32>
    %cst = arith.constant dense<0.000000e+00> : vector<64xf32>
    %2 = vector.multi_reduction <add>, %1, %cst [1] : vector<64x16xf32> to vector<64xf32>
    %3 = vector.shape_cast %2 : vector<64xf32> to vector<64x1xf32>
    %cst_1 = arith.constant 1.600000e+01 : f32
    %4 = vector.broadcast %cst_1 : f32 to vector<64x1xf32>
    %5 = arith.divf %3, %4 : vector<64x1xf32>
    %6 = vector.broadcast %5 : vector<64x1xf32> to vector<64x16xf32>
    %7 = arith.subf %1, %6 : vector<64x16xf32>
    %8 = arith.mulf %7, %7 : vector<64x16xf32>
    %cst_2 = arith.constant dense<0.000000e+00> : vector<64xf32>
    %9 = vector.multi_reduction <add>, %8, %cst_2 [1] : vector<64x16xf32> to vector<64xf32>
    %10 = vector.shape_cast %9 : vector<64xf32> to vector<64x1xf32>
    %cst_3 = arith.constant 1.600000e+01 : f32
    %11 = vector.broadcast %cst_3 : f32 to vector<64x1xf32>
    %12 = arith.divf %10, %11 : vector<64x1xf32>
    %13 = vector.broadcast %5 : vector<64x1xf32> to vector<64x16xf32>
    %14 = arith.subf %1, %13 : vector<64x16xf32>
    %cst_4 = arith.constant 9.99999974E-6 : f32
    %15 = vector.broadcast %cst_4 : f32 to vector<64x1xf32>
    %16 = arith.addf %12, %15 : vector<64x1xf32>
    %17 = math.rsqrt %16 : vector<64x1xf32>
    %18 = vector.broadcast %17 : vector<64x1xf32> to vector<64x16xf32>
    %19 = arith.mulf %14, %18 : vector<64x16xf32>
    %c0_5 = arith.constant 0 : index
    %c0_6 = arith.constant 0 : index
    %20 = vector.load %arg2[%c0_5, %c0_6] : memref<1x16xf32, #tpu.memory_space<vmem>>, vector<1x16xf32>
    %21 = vector.broadcast %20 : vector<1x16xf32> to vector<64x16xf32>
    %22 = arith.mulf %19, %21 : vector<64x16xf32>
    %c0_7 = arith.constant 0 : index
    %c0_8 = arith.constant 0 : index
    %23 = vector.load %arg3[%c0_7, %c0_8] : memref<1x16xf32, #tpu.memory_space<vmem>>, vector<1x16xf32>
    %24 = vector.broadcast %23 : vector<1x16xf32> to vector<64x16xf32>
    %25 = arith.addf %22, %24 : vector<64x16xf32>
    %26 = arith.truncf %25 : vector<64x16xf32> to vector<64x16xbf16>
    %c0_9 = arith.constant 0 : index
    %c0_10 = arith.constant 0 : index
    %27 = vector.load %arg4[%c0_9, %c0_10] : memref<64x16xbf16, #tpu.memory_space<vmem>>, vector<64x16xbf16>
    tpu.vector_store %arg4[%c0_9, %c0_10], %26 {strides = array<i32>} : memref<64x16xbf16, #tpu.memory_space<vmem>>, vector<64x16xbf16>,
    return
  }
  func.func @transform_0(%arg0: i32) -> (i32, i32) {
    %c0_i32 = arith.constant 0 : i32
    %c0_i32_0 = arith.constant 0 : i32
    return %arg0, %c0_i32 : i32, i32
  }
  func.func @transform_1(%arg0: i32) -> (i32, i32) {
    %c0_i32 = arith.constant 0 : i32
    %c0_i32_0 = arith.constant 0 : i32
    %c0_i32_1 = arith.constant 0 : i32
    return %c0_i32, %c0_i32_0 : i32, i32
  }
  func.func @transform_2(%arg0: i32) -> (i32, i32) {
    %c0_i32 = arith.constant 0 : i32
    %c0_i32_0 = arith.constant 0 : i32
    %c0_i32_1 = arith.constant 0 : i32
    return %c0_i32, %c0_i32_0 : i32, i32
  }
  func.func @transform_3(%arg0: i32) -> (i32, i32) {
    %c0_i32 = arith.constant 0 : i32
    %c0_i32_0 = arith.constant 0 : i32
    return %arg0, %c0_i32 : i32, i32
  }
}

module attributes {stable_mosaic.version = 11 : i64} {
  func.func @_ln_linear_kernel(%arg0: i32, %arg1: i32, %arg2: memref<64x16xbf16, #tpu.memory_space<vmem>>, %arg3: memref<1x16xf32, #tpu.memory_space<vmem>>, %arg4: memref<1x16xf32, #tpu.memory_space<vmem>>, %arg5: memref<16x48xbf16, #tpu.memory_space<vmem>>, %arg6: memref<1x48xf32, #tpu.memory_space<vmem>>, %arg7: memref<64x48xbf16, #tpu.memory_space<vmem>>) attributes {dimension_semantics = [#tpu.dimension_semantics<parallel>, #tpu.dimension_semantics<parallel>], iteration_bounds = array<i64: 1, 1>, scalar_prefetch = 0 : i64, scratch_operands = 0 : i64, tpu.core_type = #tpu.core_type<tc>, window_params = [{transform_indices = @transform_0, window_bounds = array<i64: 64, 16>}, {pipeline_mode = #tpu.pipeline_mode<synchronous>, transform_indices = @transform_1, window_bounds = array<i64: 1, 16>}, {pipeline_mode = #tpu.pipeline_mode<synchronous>, transform_indices = @transform_2, window_bounds = array<i64: 1, 16>}, {transform_indices = @transform_3, window_bounds = array<i64: 16, 48>}, {transform_indices = @transform_4, window_bounds = array<i64: 1, 48>}, {transform_indices = @transform_5, window_bounds = array<i64: 64, 48>}]} {
    %c0 = arith.constant 0 : index
    %c0_0 = arith.constant 0 : index
    %0 = vector.load %arg2[%c0, %c0_0] : memref<64x16xbf16, #tpu.memory_space<vmem>>, vector<64x16xbf16>
    %1 = arith.extf %0 : vector<64x16xbf16> to vector<64x16xf32>
    %cst = arith.constant dense<0.000000e+00> : vector<64xf32>
    %2 = vector.multi_reduction <add>, %1, %cst [1] : vector<64x16xf32> to vector<64xf32>
    %3 = vector.shape_cast %2 : vector<64xf32> to vector<64x1xf32>
    %cst_1 = arith.constant 1.600000e+01 : f32
    %4 = vector.broadcast %cst_1 : f32 to vector<64x1xf32>
    %5 = arith.divf %3, %4 : vector<64x1xf32>
    %6 = vector.broadcast %5 : vector<64x1xf32> to vector<64x16xf32>
    %7 = arith.subf %1, %6 : vector<64x16xf32>
    %8 = arith.mulf %7, %7 : vector<64x16xf32>
    %cst_2 = arith.constant dense<0.000000e+00> : vector<64xf32>
    %9 = vector.multi_reduction <add>, %8, %cst_2 [1] : vector<64x16xf32> to vector<64xf32>
    %10 = vector.shape_cast %9 : vector<64xf32> to vector<64x1xf32>
    %cst_3 = arith.constant 1.600000e+01 : f32
    %11 = vector.broadcast %cst_3 : f32 to vector<64x1xf32>
    %12 = arith.divf %10, %11 : vector<64x1xf32>
    %13 = vector.broadcast %5 : vector<64x1xf32> to vector<64x16xf32>
    %14 = arith.subf %1, %13 : vector<64x16xf32>
    %cst_4 = arith.constant 9.99999974E-6 : f32
    %15 = vector.broadcast %cst_4 : f32 to vector<64x1xf32>
    %16 = arith.addf %12, %15 : vector<64x1xf32>
    %17 = math.rsqrt %16 : vector<64x1xf32>
    %18 = vector.broadcast %17 : vector<64x1xf32> to vector<64x16xf32>
    %19 = arith.mulf %14, %18 : vector<64x16xf32>
    %c0_5 = arith.constant 0 : index
    %c0_6 = arith.constant 0 : index
    %20 = vector.load %arg3[%c0_5, %c0_6] : memref<1x16xf32, #tpu.memory_space<vmem>>, vector<1x16xf32>
    %21 = vector.broadcast %20 : vector<1x16xf32> to vector<64x16xf32>
    %22 = arith.mulf %19, %21 : vector<64x16xf32>
    %c0_7 = arith.constant 0 : index
    %c0_8 = arith.constant 0 : index
    %23 = vector.load %arg4[%c0_7, %c0_8] : memref<1x16xf32, #tpu.memory_space<vmem>>, vector<1x16xf32>
    %24 = vector.broadcast %23 : vector<1x16xf32> to vector<64x16xf32>
    %25 = arith.addf %22, %24 : vector<64x16xf32>
    %26 = arith.truncf %25 : vector<64x16xf32> to vector<64x16xbf16>
    %c0_9 = arith.constant 0 : index
    %c0_10 = arith.constant 0 : index
    %27 = vector.load %arg5[%c0_9, %c0_10] : memref<16x48xbf16, #tpu.memory_space<vmem>>, vector<16x48xbf16>
    %cst_11 = arith.constant dense<0.000000e+00> : vector<64x48xf32>
    %28 = tpu.matmul %26, %27, %cst_11 {dimension_numbers = #tpu.dot_dimension_numbers<[1], [0], [0], [1], [0, 0, 1, 1], [], []>} : vector<64x16xbf16>, vector<16x48xbf16>, vector<64x48xf32> -> vector<64x48xf32>
    %c0_12 = arith.constant 0 : index
    %c0_13 = arith.constant 0 : index
    %29 = vector.load %arg6[%c0_12, %c0_13] : memref<1x48xf32, #tpu.memory_space<vmem>>, vector<1x48xf32>
    %30 = vector.broadcast %29 : vector<1x48xf32> to vector<64x48xf32>
    %31 = arith.addf %28, %30 : vector<64x48xf32>
    %32 = arith.truncf %31 : vector<64x48xf32> to vector<64x48xbf16>
    %c0_14 = arith.constant 0 : index
    %c0_15 = arith.constant 0 : index
    %33 = vector.load %arg7[%c0_14, %c0_15] : memref<64x48xbf16, #tpu.memory_space<vmem>>, vector<64x48xbf16>
    tpu.vector_store %arg7[%c0_14, %c0_15], %32 {strides = array<i32>} : memref<64x48xbf16, #tpu.memory_space<vmem>>, vector<64x48xbf16>,
    return
  }
  func.func @transform_0(%arg0: i32, %arg1: i32) -> (i32, i32) {
    %c0_i32 = arith.constant 0 : i32
    %c0_i32_0 = arith.constant 0 : i32
    return %arg0, %c0_i32 : i32, i32
  }
  func.func @transform_1(%arg0: i32, %arg1: i32) -> (i32, i32) {
    %c0_i32 = arith.constant 0 : i32
    %c0_i32_0 = arith.constant 0 : i32
    %c0_i32_1 = arith.constant 0 : i32
    return %c0_i32, %c0_i32_0 : i32, i32
  }
  func.func @transform_2(%arg0: i32, %arg1: i32) -> (i32, i32) {
    %c0_i32 = arith.constant 0 : i32
    %c0_i32_0 = arith.constant 0 : i32
    %c0_i32_1 = arith.constant 0 : i32
    return %c0_i32, %c0_i32_0 : i32, i32
  }
  func.func @transform_3(%arg0: i32, %arg1: i32) -> (i32, i32) {
    %c0_i32 = arith.constant 0 : i32
    %c0_i32_0 = arith.constant 0 : i32
    return %c0_i32, %arg1 : i32, i32
  }
  func.func @transform_4(%arg0: i32, %arg1: i32) -> (i32, i32) {
    %c0_i32 = arith.constant 0 : i32
    %c0_i32_0 = arith.constant 0 : i32
    return %c0_i32, %arg1 : i32, i32
  }
  func.func @transform_5(%arg0: i32, %arg1: i32) -> (i32, i32) {
    %c0_i32 = arith.constant 0 : i32
    return %arg0, %arg1 : i32, i32
  }
}

module attributes {stable_mosaic.version = 11 : i64} {
  func.func @_matmul_kernel(%arg0: i32, %arg1: i32, %arg2: i32, %arg3: memref<64x96xbf16, #tpu.memory_space<vmem>>, %arg4: memref<96x16xbf16, #tpu.memory_space<vmem>>, %arg5: memref<1x16xf32, #tpu.memory_space<vmem>>, %arg6: memref<64x16xbf16, #tpu.memory_space<vmem>>, %arg7: memref<64x16xf32, #tpu.memory_space<vmem>>) attributes {dimension_semantics = [#tpu.dimension_semantics<parallel>, #tpu.dimension_semantics<parallel>, #tpu.dimension_semantics<arbitrary>], iteration_bounds = array<i64: 1, 1, 1>, scalar_prefetch = 0 : i64, scratch_operands = 1 : i64, tpu.core_type = #tpu.core_type<tc>, window_params = [{transform_indices = @transform_0, window_bounds = array<i64: 64, 96>}, {transform_indices = @transform_1, window_bounds = array<i64: 96, 16>}, {transform_indices = @transform_2, window_bounds = array<i64: 1, 16>}, {transform_indices = @transform_3, window_bounds = array<i64: 64, 16>}]} {
    %c0_i32 = arith.constant 0 : i32
    %0 = arith.cmpi eq, %arg2, %c0_i32 : i32
    %1 = arith.extui %0 : i1 to i32
    %c0_i32_0 = arith.constant 0 : i32
    %2 = arith.cmpi ne, %1, %c0_i32_0 : i32
    scf.if %2 {
      %cst_10 = arith.constant 0.000000e+00 : f32
      %12 = vector.broadcast %cst_10 : f32 to vector<64x16xf32>
      %c0_11 = arith.constant 0 : index
      %c0_12 = arith.constant 0 : index
      %13 = vector.load %arg7[%c0_11, %c0_12] : memref<64x16xf32, #tpu.memory_space<vmem>>, vector<64x16xf32>
      tpu.vector_store %arg7[%c0_11, %c0_12], %12 {strides = array<i32>} : memref<64x16xf32, #tpu.memory_space<vmem>>, vector<64x16xf32>,
    } else {
    }
    %c0 = arith.constant 0 : index
    %c0_1 = arith.constant 0 : index
    %3 = vector.load %arg7[%c0, %c0_1] : memref<64x16xf32, #tpu.memory_space<vmem>>, vector<64x16xf32>
    %c0_2 = arith.constant 0 : index
    %c0_3 = arith.constant 0 : index
    %4 = vector.load %arg3[%c0_2, %c0_3] : memref<64x96xbf16, #tpu.memory_space<vmem>>, vector<64x96xbf16>
    %c0_4 = arith.constant 0 : index
    %c0_5 = arith.constant 0 : index
    %5 = vector.load %arg4[%c0_4, %c0_5] : memref<96x16xbf16, #tpu.memory_space<vmem>>, vector<96x16xbf16>
    %cst = arith.constant dense<0.000000e+00> : vector<64x16xf32>
    %6 = tpu.matmul %4, %5, %cst {dimension_numbers = #tpu.dot_dimension_numbers<[1], [0], [0], [1], [0, 0, 1, 1], [], []>} : vector<64x96xbf16>, vector<96x16xbf16>, vector<64x16xf32> -> vector<64x16xf32>
    %7 = arith.addf %3, %6 : vector<64x16xf32>
    %c0_6 = arith.constant 0 : index
    %c0_7 = arith.constant 0 : index
    %8 = vector.load %arg7[%c0_6, %c0_7] : memref<64x16xf32, #tpu.memory_space<vmem>>, vector<64x16xf32>
    tpu.vector_store %arg7[%c0_6, %c0_7], %7 {strides = array<i32>} : memref<64x16xf32, #tpu.memory_space<vmem>>, vector<64x16xf32>,
    %c0_i32_8 = arith.constant 0 : i32
    %9 = arith.cmpi eq, %arg2, %c0_i32_8 : i32
    %10 = arith.extui %9 : i1 to i32
    %c0_i32_9 = arith.constant 0 : i32
    %11 = arith.cmpi ne, %10, %c0_i32_9 : i32
    scf.if %11 {
      %c0_10 = arith.constant 0 : index
      %c0_11 = arith.constant 0 : index
      %12 = vector.load %arg7[%c0_10, %c0_11] : memref<64x16xf32, #tpu.memory_space<vmem>>, vector<64x16xf32>
      %c0_12 = arith.constant 0 : index
      %c0_13 = arith.constant 0 : index
      %13 = vector.load %arg5[%c0_12, %c0_13] : memref<1x16xf32, #tpu.memory_space<vmem>>, vector<1x16xf32>
      %14 = vector.broadcast %13 : vector<1x16xf32> to vector<64x16xf32>
      %15 = arith.addf %12, %14 : vector<64x16xf32>
      %16 = arith.truncf %15 : vector<64x16xf32> to vector<64x16xbf16>
      %c0_14 = arith.constant 0 : index
      %c0_15 = arith.constant 0 : index
      %17 = vector.load %arg6[%c0_14, %c0_15] : memref<64x16xbf16, #tpu.memory_space<vmem>>, vector<64x16xbf16>
      tpu.vector_store %arg6[%c0_14, %c0_15], %16 {strides = array<i32>} : memref<64x16xbf16, #tpu.memory_space<vmem>>, vector<64x16xbf16>,
    } else {
    }
    return
  }
  func.func @transform_0(%arg0: i32, %arg1: i32, %arg2: i32) -> (i32, i32) {
    %c0_i32 = arith.constant 0 : i32
    return %arg0, %arg2 : i32, i32
  }
  func.func @transform_1(%arg0: i32, %arg1: i32, %arg2: i32) -> (i32, i32) {
    %c0_i32 = arith.constant 0 : i32
    return %arg2, %arg1 : i32, i32
  }
  func.func @transform_2(%arg0: i32, %arg1: i32, %arg2: i32) -> (i32, i32) {
    %c0_i32 = arith.constant 0 : i32
    %c0_i32_0 = arith.constant 0 : i32
    return %c0_i32, %arg1 : i32, i32
  }
  func.func @transform_3(%arg0: i32, %arg1: i32, %arg2: i32) -> (i32, i32) {
    %c0_i32 = arith.constant 0 : i32
    return %arg0, %arg1 : i32, i32
  }
}

module attributes {stable_mosaic.version = 11 : i64} {
  func.func @_matmul_kernel(%arg0: i32, %arg1: i32, %arg2: i32, %arg3: memref<64x16xbf16, #tpu.memory_space<vmem>>, %arg4: memref<16x16xbf16, #tpu.memory_space<vmem>>, %arg5: memref<1x16xf32, #tpu.memory_space<vmem>>, %arg6: memref<64x16xbf16, #tpu.memory_space<vmem>>, %arg7: memref<64x16xf32, #tpu.memory_space<vmem>>) attributes {dimension_semantics = [#tpu.dimension_semantics<parallel>, #tpu.dimension_semantics<parallel>, #tpu.dimension_semantics<arbitrary>], iteration_bounds = array<i64: 1, 1, 1>, scalar_prefetch = 0 : i64, scratch_operands = 1 : i64, tpu.core_type = #tpu.core_type<tc>, window_params = [{transform_indices = @transform_0, window_bounds = array<i64: 64, 16>}, {transform_indices = @transform_1, window_bounds = array<i64: 16, 16>}, {transform_indices = @transform_2, window_bounds = array<i64: 1, 16>}, {transform_indices = @transform_3, window_bounds = array<i64: 64, 16>}]} {
    %c0_i32 = arith.constant 0 : i32
    %0 = arith.cmpi eq, %arg2, %c0_i32 : i32
    %1 = arith.extui %0 : i1 to i32
    %c0_i32_0 = arith.constant 0 : i32
    %2 = arith.cmpi ne, %1, %c0_i32_0 : i32
    scf.if %2 {
      %cst_10 = arith.constant 0.000000e+00 : f32
      %12 = vector.broadcast %cst_10 : f32 to vector<64x16xf32>
      %c0_11 = arith.constant 0 : index
      %c0_12 = arith.constant 0 : index
      %13 = vector.load %arg7[%c0_11, %c0_12] : memref<64x16xf32, #tpu.memory_space<vmem>>, vector<64x16xf32>
      tpu.vector_store %arg7[%c0_11, %c0_12], %12 {strides = array<i32>} : memref<64x16xf32, #tpu.memory_space<vmem>>, vector<64x16xf32>,
    } else {
    }
    %c0 = arith.constant 0 : index
    %c0_1 = arith.constant 0 : index
    %3 = vector.load %arg7[%c0, %c0_1] : memref<64x16xf32, #tpu.memory_space<vmem>>, vector<64x16xf32>
    %c0_2 = arith.constant 0 : index
    %c0_3 = arith.constant 0 : index
    %4 = vector.load %arg3[%c0_2, %c0_3] : memref<64x16xbf16, #tpu.memory_space<vmem>>, vector<64x16xbf16>
    %c0_4 = arith.constant 0 : index
    %c0_5 = arith.constant 0 : index
    %5 = vector.load %arg4[%c0_4, %c0_5] : memref<16x16xbf16, #tpu.memory_space<vmem>>, vector<16x16xbf16>
    %cst = arith.constant dense<0.000000e+00> : vector<64x16xf32>
    %6 = tpu.matmul %4, %5, %cst {dimension_numbers = #tpu.dot_dimension_numbers<[1], [0], [0], [1], [0, 0, 1, 1], [], []>} : vector<64x16xbf16>, vector<16x16xbf16>, vector<64x16xf32> -> vector<64x16xf32>
    %7 = arith.addf %3, %6 : vector<64x16xf32>
    %c0_6 = arith.constant 0 : index
    %c0_7 = arith.constant 0 : index
    %8 = vector.load %arg7[%c0_6, %c0_7] : memref<64x16xf32, #tpu.memory_space<vmem>>, vector<64x16xf32>
    tpu.vector_store %arg7[%c0_6, %c0_7], %7 {strides = array<i32>} : memref<64x16xf32, #tpu.memory_space<vmem>>, vector<64x16xf32>,
    %c0_i32_8 = arith.constant 0 : i32
    %9 = arith.cmpi eq, %arg2, %c0_i32_8 : i32
    %10 = arith.extui %9 : i1 to i32
    %c0_i32_9 = arith.constant 0 : i32
    %11 = arith.cmpi ne, %10, %c0_i32_9 : i32
    scf.if %11 {
      %c0_10 = arith.constant 0 : index
      %c0_11 = arith.constant 0 : index
      %12 = vector.load %arg7[%c0_10, %c0_11] : memref<64x16xf32, #tpu.memory_space<vmem>>, vector<64x16xf32>
      %c0_12 = arith.constant 0 : index
      %c0_13 = arith.constant 0 : index
      %13 = vector.load %arg5[%c0_12, %c0_13] : memref<1x16xf32, #tpu.memory_space<vmem>>, vector<1x16xf32>
      %14 = vector.broadcast %13 : vector<1x16xf32> to vector<64x16xf32>
      %15 = arith.addf %12, %14 : vector<64x16xf32>
      %16 = arith.truncf %15 : vector<64x16xf32> to vector<64x16xbf16>
      %c0_14 = arith.constant 0 : index
      %c0_15 = arith.constant 0 : index
      %17 = vector.load %arg6[%c0_14, %c0_15] : memref<64x16xbf16, #tpu.memory_space<vmem>>, vector<64x16xbf16>
      tpu.vector_store %arg6[%c0_14, %c0_15], %16 {strides = array<i32>} : memref<64x16xbf16, #tpu.memory_space<vmem>>, vector<64x16xbf16>,
    } else {
    }
    return
  }
  func.func @transform_0(%arg0: i32, %arg1: i32, %arg2: i32) -> (i32, i32) {
    %c0_i32 = arith.constant 0 : i32
    return %arg0, %arg2 : i32, i32
  }
  func.func @transform_1(%arg0: i32, %arg1: i32, %arg2: i32) -> (i32, i32) {
    %c0_i32 = arith.constant 0 : i32
    return %arg2, %arg1 : i32, i32
  }
  func.func @transform_2(%arg0: i32, %arg1: i32, %arg2: i32) -> (i32, i32) {
    %c0_i32 = arith.constant 0 : i32
    %c0_i32_0 = arith.constant 0 : i32
    return %c0_i32, %arg1 : i32, i32
  }
  func.func @transform_3(%arg0: i32, %arg1: i32, %arg2: i32) -> (i32, i32) {
    %c0_i32 = arith.constant 0 : i32
    return %arg0, %arg1 : i32, i32
  }
}

module attributes {stable_mosaic.version = 11 : i64} {
  func.func @_mlp_kernel(%arg0: i32, %arg1: i32, %arg2: memref<64x16xbf16, #tpu.memory_space<vmem>>, %arg3: memref<1x16xf32, #tpu.memory_space<vmem>>, %arg4: memref<1x16xf32, #tpu.memory_space<vmem>>, %arg5: memref<16x64xbf16, #tpu.memory_space<vmem>>, %arg6: memref<1x64xf32, #tpu.memory_space<vmem>>, %arg7: memref<64x16xbf16, #tpu.memory_space<vmem>>, %arg8: memref<1x16xf32, #tpu.memory_space<vmem>>, %arg9: memref<64x16xbf16, #tpu.memory_space<vmem>>, %arg10: memref<64x16xf32, #tpu.memory_space<vmem>>, %arg11: memref<64x16xbf16, #tpu.memory_space<vmem>>) attributes {dimension_semantics = [#tpu.dimension_semantics<parallel>, #tpu.dimension_semantics<arbitrary>], iteration_bounds = array<i64: 1, 1>, scalar_prefetch = 0 : i64, scratch_operands = 2 : i64, tpu.core_type = #tpu.core_type<tc>, window_params = [{transform_indices = @transform_0, window_bounds = array<i64: 64, 16>}, {pipeline_mode = #tpu.pipeline_mode<synchronous>, transform_indices = @transform_1, window_bounds = array<i64: 1, 16>}, {pipeline_mode = #tpu.pipeline_mode<synchronous>, transform_indices = @transform_2, window_bounds = array<i64: 1, 16>}, {transform_indices = @transform_3, window_bounds = array<i64: 16, 64>}, {transform_indices = @transform_4, window_bounds = array<i64: 1, 64>}, {transform_indices = @transform_5, window_bounds = array<i64: 64, 16>}, {pipeline_mode = #tpu.pipeline_mode<synchronous>, transform_indices = @transform_6, window_bounds = array<i64: 1, 16>}, {transform_indices = @transform_7, window_bounds = array<i64: 64, 16>}]} {
    %c0_i32 = arith.constant 0 : i32
    %0 = arith.cmpi eq, %arg1, %c0_i32 : i32
    %1 = arith.extui %0 : i1 to i32
    %c0_i32_0 = arith.constant 0 : i32
    %2 = arith.cmpi ne, %1, %c0_i32_0 : i32
    scf.if %2 {
      %cst_19 = arith.constant 0.000000e+00 : f32
      %31 = vector.broadcast %cst_19 : f32 to vector<64x16xf32>
      %c0_20 = arith.constant 0 : index
      %c0_21 = arith.constant 0 : index
      %32 = vector.load %arg10[%c0_20, %c0_21] : memref<64x16xf32, #tpu.memory_space<vmem>>, vector<64x16xf32>
      tpu.vector_store %arg10[%c0_20, %c0_21], %31 {strides = array<i32>} : memref<64x16xf32, #tpu.memory_space<vmem>>, vector<64x16xf32>,
      %c0_22 = arith.constant 0 : index
      %c0_23 = arith.constant 0 : index
      %33 = vector.load %arg2[%c0_22, %c0_23] : memref<64x16xbf16, #tpu.memory_space<vmem>>, vector<64x16xbf16>
      %34 = arith.extf %33 : vector<64x16xbf16> to vector<64x16xf32>
      %cst_24 = arith.constant dense<0.000000e+00> : vector<64xf32>
      %35 = vector.multi_reduction <add>, %34, %cst_24 [1] : vector<64x16xf32> to vector<64xf32>
      %36 = vector.shape_cast %35 : vector<64xf32> to vector<64x1xf32>
      %cst_25 = arith.constant 1.600000e+01 : f32
      %37 = vector.broadcast %cst_25 : f32 to vector<64x1xf32>
      %38 = arith.divf %36, %37 : vector<64x1xf32>
      %39 = vector.broadcast %38 : vector<64x1xf32> to vector<64x16xf32>
      %40 = arith.subf %34, %39 : vector<64x16xf32>
      %41 = arith.mulf %40, %40 : vector<64x16xf32>
      %cst_26 = arith.constant dense<0.000000e+00> : vector<64xf32>
      %42 = vector.multi_reduction <add>, %41, %cst_26 [1] : vector<64x16xf32> to vector<64xf32>
      %43 = vector.shape_cast %42 : vector<64xf32> to vector<64x1xf32>
      %cst_27 = arith.constant 1.600000e+01 : f32
      %44 = vector.broadcast %cst_27 : f32 to vector<64x1xf32>
      %45 = arith.divf %43, %44 : vector<64x1xf32>
      %46 = vector.broadcast %38 : vector<64x1xf32> to vector<64x16xf32>
      %47 = arith.subf %34, %46 : vector<64x16xf32>
      %cst_28 = arith.constant 9.99999974E-6 : f32
      %48 = vector.broadcast %cst_28 : f32 to vector<64x1xf32>
      %49 = arith.addf %45, %48 : vector<64x1xf32>
      %50 = math.rsqrt %49 : vector<64x1xf32>
      %51 = vector.broadcast %50 : vector<64x1xf32> to vector<64x16xf32>
      %52 = arith.mulf %47, %51 : vector<64x16xf32>
      %c0_29 = arith.constant 0 : index
      %c0_30 = arith.constant 0 : index
      %53 = vector.load %arg3[%c0_29, %c0_30] : memref<1x16xf32, #tpu.memory_space<vmem>>, vector<1x16xf32>
      %54 = vector.broadcast %53 : vector<1x16xf32> to vector<64x16xf32>
      %55 = arith.mulf %52, %54 : vector<64x16xf32>
      %c0_31 = arith.constant 0 : index
      %c0_32 = arith.constant 0 : index
      %56 = vector.load %arg4[%c0_31, %c0_32] : memref<1x16xf32, #tpu.memory_space<vmem>>, vector<1x16xf32>
      %57 = vector.broadcast %56 : vector<1x16xf32> to vector<64x16xf32>
      %58 = arith.addf %55, %57 : vector<64x16xf32>
      %59 = arith.truncf %58 : vector<64x16xf32> to vector<64x16xbf16>
      %c0_33 = arith.constant 0 : index
      %c0_34 = arith.constant 0 : index
      %60 = vector.load %arg11[%c0_33, %c0_34] : memref<64x16xbf16, #tpu.memory_space<vmem>>, vector<64x16xbf16>
      tpu.vector_store %arg11[%c0_33, %c0_34], %59 {strides = array<i32>} : memref<64x16xbf16, #tpu.memory_space<vmem>>, vector<64x16xbf16>,
    } else {
    }
    %c0 = arith.constant 0 : index
    %c0_1 = arith.constant 0 : index
    %3 = vector.load %arg11[%c0, %c0_1] : memref<64x16xbf16, #tpu.memory_space<vmem>>, vector<64x16xbf16>
    %c0_2 = arith.constant 0 : index
    %c0_3 = arith.constant 0 : index
    %4 = vector.load %arg5[%c0_2, %c0_3] : memref<16x64xbf16, #tpu.memory_space<vmem>>, vector<16x64xbf16>
    %cst = arith.constant dense<0.000000e+00> : vector<64x64xf32>
    %5 = tpu.matmul %3, %4, %cst {dimension_numbers = #tpu.dot_dimension_numbers<[1], [0], [0], [1], [0, 0, 1, 1], [], []>} : vector<64x16xbf16>, vector<16x64xbf16>, vector<64x64xf32> -> vector<64x64xf32>
    %c0_4 = arith.constant 0 : index
    %c0_5 = arith.constant 0 : index
    %6 = vector.load %arg6[%c0_4, %c0_5] : memref<1x64xf32, #tpu.memory_space<vmem>>, vector<1x64xf32>
    %7 = vector.broadcast %6 : vector<1x64xf32> to vector<64x64xf32>
    %8 = arith.addf %5, %7 : vector<64x64xf32>
    %cst_6 = arith.constant 5.000000e-01 : f32
    %9 = vector.broadcast %cst_6 : f32 to vector<64x64xf32>
    %10 = arith.mulf %9, %8 : vector<64x64xf32>
    %cst_7 = arith.constant 4.471500e-02 : f32
    %11 = vector.broadcast %cst_7 : f32 to vector<64x64xf32>
    %12 = arith.mulf %11, %8 : vector<64x64xf32>
    %13 = arith.mulf %12, %8 : vector<64x64xf32>
    %14 = arith.mulf %13, %8 : vector<64x64xf32>
    %15 = arith.addf %8, %14 : vector<64x64xf32>
    %cst_8 = arith.constant 0.797884583 : f32
    %16 = vector.broadcast %cst_8 : f32 to vector<64x64xf32>
    %17 = arith.mulf %16, %15 : vector<64x64xf32>
    %18 = math.tanh %17 : vector<64x64xf32>
    %cst_9 = arith.constant 1.000000e+00 : f32
    %19 = vector.broadcast %cst_9 : f32 to vector<64x64xf32>
    %20 = arith.addf %19, %18 : vector<64x64xf32>
    %21 = arith.mulf %10, %20 : vector<64x64xf32>
    %c0_10 = arith.constant 0 : index
    %c0_11 = arith.constant 0 : index
    %22 = vector.load %arg10[%c0_10, %c0_11] : memref<64x16xf32, #tpu.memory_space<vmem>>, vector<64x16xf32>
    %23 = arith.truncf %21 : vector<64x64xf32> to vector<64x64xbf16>
    %c0_12 = arith.constant 0 : index
    %c0_13 = arith.constant 0 : index
    %24 = vector.load %arg7[%c0_12, %c0_13] : memref<64x16xbf16, #tpu.memory_space<vmem>>, vector<64x16xbf16>
    %cst_14 = arith.constant dense<0.000000e+00> : vector<64x16xf32>
    %25 = tpu.matmul %23, %24, %cst_14 {dimension_numbers = #tpu.dot_dimension_numbers<[1], [0], [0], [1], [0, 0, 1, 1], [], []>} : vector<64x64xbf16>, vector<64x16xbf16>, vector<64x16xf32> -> vector<64x16xf32>
    %26 = arith.addf %22, %25 : vector<64x16xf32>
    %c0_15 = arith.constant 0 : index
    %c0_16 = arith.constant 0 : index
    %27 = vector.load %arg10[%c0_15, %c0_16] : memref<64x16xf32, #tpu.memory_space<vmem>>, vector<64x16xf32>
    tpu.vector_store %arg10[%c0_15, %c0_16], %26 {strides = array<i32>} : memref<64x16xf32, #tpu.memory_space<vmem>>, vector<64x16xf32>,
    %c0_i32_17 = arith.constant 0 : i32
    %28 = arith.cmpi eq, %arg1, %c0_i32_17 : i32
    %29 = arith.extui %28 : i1 to i32
    %c0_i32_18 = arith.constant 0 : i32
    %30 = arith.cmpi ne, %29, %c0_i32_18 : i32
    scf.if %30 {
      %c0_19 = arith.constant 0 : index
      %c0_20 = arith.constant 0 : index
      %31 = vector.load %arg2[%c0_19, %c0_20] : memref<64x16xbf16, #tpu.memory_space<vmem>>, vector<64x16xbf16>
      %32 = arith.extf %31 : vector<64x16xbf16> to vector<64x16xf32>
      %c0_21 = arith.constant 0 : index
      %c0_22 = arith.constant 0 : index
      %33 = vector.load %arg10[%c0_21, %c0_22] : memref<64x16xf32, #tpu.memory_space<vmem>>, vector<64x16xf32>
      %34 = arith.addf %32, %33 : vector<64x16xf32>
      %c0_23 = arith.constant 0 : index
      %c0_24 = arith.constant 0 : index
      %35 = vector.load %arg8[%c0_23, %c0_24] : memref<1x16xf32, #tpu.memory_space<vmem>>, vector<1x16xf32>
      %36 = vector.broadcast %35 : vector<1x16xf32> to vector<64x16xf32>
      %37 = arith.addf %34, %36 : vector<64x16xf32>
      %38 = arith.truncf %37 : vector<64x16xf32> to vector<64x16xbf16>
      %c0_25 = arith.constant 0 : index
      %c0_26 = arith.constant 0 : index
      %39 = vector.load %arg9[%c0_25, %c0_26] : memref<64x16xbf16, #tpu.memory_space<vmem>>, vector<64x16xbf16>
      tpu.vector_store %arg9[%c0_25, %c0_26], %38 {strides = array<i32>} : memref<64x16xbf16, #tpu.memory_space<vmem>>, vector<64x16xbf16>,
    } else {
    }
    return
  }
  func.func @transform_0(%arg0: i32, %arg1: i32) -> (i32, i32) {
    %c0_i32 = arith.constant 0 : i32
    %c0_i32_0 = arith.constant 0 : i32
    return %arg0, %c0_i32 : i32, i32
  }
  func.func @transform_1(%arg0: i32, %arg1: i32) -> (i32, i32) {
    %c0_i32 = arith.constant 0 : i32
    %c0_i32_0 = arith.constant 0 : i32
    %c0_i32_1 = arith.constant 0 : i32
    return %c0_i32, %c0_i32_0 : i32, i32
  }
  func.func @transform_2(%arg0: i32, %arg1: i32) -> (i32, i32) {
    %c0_i32 = arith.constant 0 : i32
    %c0_i32_0 = arith.constant 0 : i32
    %c0_i32_1 = arith.constant 0 : i32
    return %c0_i32, %c0_i32_0 : i32, i32
  }
  func.func @transform_3(%arg0: i32, %arg1: i32) -> (i32, i32) {
    %c0_i32 = arith.constant 0 : i32
    %c0_i32_0 = arith.constant 0 : i32
    return %c0_i32, %arg1 : i32, i32
  }
  func.func @transform_4(%arg0: i32, %arg1: i32) -> (i32, i32) {
    %c0_i32 = arith.constant 0 : i32
    %c0_i32_0 = arith.constant 0 : i32
    return %c0_i32, %arg1 : i32, i32
  }
  func.func @transform_5(%arg0: i32, %arg1: i32) -> (i32, i32) {
    %c0_i32 = arith.constant 0 : i32
    %c0_i32_0 = arith.constant 0 : i32
    return %arg1, %c0_i32 : i32, i32
  }
  func.func @transform_6(%arg0: i32, %arg1: i32) -> (i32, i32) {
    %c0_i32 = arith.constant 0 : i32
    %c0_i32_0 = arith.constant 0 : i32
    %c0_i32_1 = arith.constant 0 : i32
    return %c0_i32, %c0_i32_0 : i32, i32
  }
  func.func @transform_7(%arg0: i32, %arg1: i32) -> (i32, i32) {
    %c0_i32 = arith.constant 0 : i32
    %c0_i32_0 = arith.constant 0 : i32
    return %arg0, %c0_i32 : i32, i32
  }
}

module attributes {stable_mosaic.version = 11 : i64} {
  func.func @_window_attn_kernel(%arg0: i32, %arg1: memref<4x8x48xbf16, #tpu.memory_space<vmem>>, %arg2: memref<2x8x8xbf16, #tpu.memory_space<vmem>>, %arg3: memref<4x8x16xbf16, #tpu.memory_space<vmem>>) attributes {dimension_semantics = [#tpu.dimension_semantics<parallel>], iteration_bounds = array<i64: 2>, scalar_prefetch = 0 : i64, scratch_operands = 0 : i64, tpu.core_type = #tpu.core_type<tc>, window_params = [{transform_indices = @transform_0, window_bounds = array<i64: 4, 8, 48>}, {pipeline_mode = #tpu.pipeline_mode<synchronous>, transform_indices = @transform_1, window_bounds = array<i64: 2, 8, 8>}, {transform_indices = @transform_2, window_bounds = array<i64: 4, 8, 16>}]} {
    %c0 = arith.constant 0 : index
    %c0_0 = arith.constant 0 : index
    %c0_1 = arith.constant 0 : index
    %0 = vector.load %arg2[%c0, %c0_0, %c0_1] : memref<2x8x8xbf16, #tpu.memory_space<vmem>>, vector<2x8x8xbf16>
    %1 = arith.extf %0 : vector<2x8x8xbf16> to vector<2x8x8xf32>
    %c0_2 = arith.constant 0 : index
    %c0_3 = arith.constant 0 : index
    %c0_4 = arith.constant 0 : index
    %2 = vector.load %arg1[%c0_2, %c0_3, %c0_4] : memref<4x8x48xbf16, #tpu.memory_space<vmem>>, vector<4x8x8xbf16>
    %c0_5 = arith.constant 0 : index
    %c0_6 = arith.constant 0 : index
    %c16 = arith.constant 16 : index
    %3 = vector.load %arg1[%c0_5, %c0_6, %c16] : memref<4x8x48xbf16, #tpu.memory_space<vmem>>, vector<4x8x8xbf16>
    %c0_7 = arith.constant 0 : index
    %c0_8 = arith.constant 0 : index
    %c32 = arith.constant 32 : index
    %4 = vector.load %arg1[%c0_7, %c0_8, %c32] : memref<4x8x48xbf16, #tpu.memory_space<vmem>>, vector<4x8x8xbf16>
    "tpu.trace_start"() <{level = 10 : i32, message = "wld,wmd->wlm"}> : () -> ()
    %cst = arith.constant dense<0.000000e+00> : vector<4x8x8xf32>
    %5 = tpu.matmul %2, %3, %cst {dimension_numbers = #tpu.dot_dimension_numbers<[2], [2], [1], [1], [0, 0, 0, 1, 1, 1], [0], [0]>} : vector<4x8x8xbf16>, vector<4x8x8xbf16>, vector<4x8x8xf32> -> vector<4x8x8xf32>
    "tpu.trace_stop"() : () -> ()
    %cst_9 = arith.constant 0.353553385 : f32
    %6 = vector.broadcast %cst_9 : f32 to vector<4x8x8xf32>
    %7 = arith.mulf %5, %6 : vector<4x8x8xf32>
    %8 = vector.extract_strided_slice %1 {offsets = [0, 0, 0], sizes = [1, 8, 8], strides = [1, 1, 1]} : vector<2x8x8xf32> to vector<1x8x8xf32>
    %9 = vector.shape_cast %8 : vector<1x8x8xf32> to vector<8x8xf32>
    %10 = vector.shape_cast %9 : vector<8x8xf32> to vector<1x8x8xf32>
    %11 = vector.broadcast %10 : vector<1x8x8xf32> to vector<4x8x8xf32>
    %12 = arith.addf %7, %11 : vector<4x8x8xf32>
    %cst_10 = arith.constant dense<0xFF800000> : vector<4x8xf32>
    %13 = vector.multi_reduction <maximumf>, %12, %cst_10 [2] : vector<4x8x8xf32> to vector<4x8xf32>
    %14 = vector.shape_cast %13 : vector<4x8xf32> to vector<4x8x1xf32>
    %15 = vector.broadcast %14 : vector<4x8x1xf32> to vector<4x8x8xf32>
    %16 = arith.subf %12, %15 : vector<4x8x8xf32>
    %17 = math.exp %16 : vector<4x8x8xf32>
    %cst_11 = arith.constant dense<0.000000e+00> : vector<4x8xf32>
    %18 = vector.multi_reduction <add>, %17, %cst_11 [2] : vector<4x8x8xf32> to vector<4x8xf32>
    %19 = vector.shape_cast %18 : vector<4x8xf32> to vector<4x8x1xf32>
    %20 = tpu.reciprocal %19 {approx = true} : vector<4x8x1xf32> -> vector<4x8x1xf32>
    %21 = vector.broadcast %20 : vector<4x8x1xf32> to vector<4x8x8xf32>
    %22 = arith.mulf %17, %21 : vector<4x8x8xf32>
    %23 = arith.truncf %22 : vector<4x8x8xf32> to vector<4x8x8xbf16>
    "tpu.trace_start"() <{level = 10 : i32, message = "wlm,wmd->wld"}> : () -> ()
    %cst_12 = arith.constant dense<0.000000e+00> : vector<4x8x8xf32>
    %24 = tpu.matmul %23, %4, %cst_12 {dimension_numbers = #tpu.dot_dimension_numbers<[2], [1], [1], [2], [0, 0, 0, 1, 1, 2], [0], [0]>} : vector<4x8x8xbf16>, vector<4x8x8xbf16>, vector<4x8x8xf32> -> vector<4x8x8xf32>
    "tpu.trace_stop"() : () -> ()
    %25 = arith.truncf %24 : vector<4x8x8xf32> to vector<4x8x8xbf16>
    %c0_13 = arith.constant 0 : index
    %c0_14 = arith.constant 0 : index
    %c0_15 = arith.constant 0 : index
    %26 = vector.load %arg3[%c0_13, %c0_14, %c0_15] : memref<4x8x16xbf16, #tpu.memory_space<vmem>>, vector<4x8x8xbf16>
    tpu.vector_store %arg3[%c0_13, %c0_14, %c0_15], %25 {strides = array<i32>} : memref<4x8x16xbf16, #tpu.memory_space<vmem>>, vector<4x8x8xbf16>,
    %c0_16 = arith.constant 0 : index
    %c0_17 = arith.constant 0 : index
    %c8 = arith.constant 8 : index
    %27 = vector.load %arg1[%c0_16, %c0_17, %c8] : memref<4x8x48xbf16, #tpu.memory_space<vmem>>, vector<4x8x8xbf16>
    %c0_18 = arith.constant 0 : index
    %c0_19 = arith.constant 0 : index
    %c24 = arith.constant 24 : index
    %28 = vector.load %arg1[%c0_18, %c0_19, %c24] : memref<4x8x48xbf16, #tpu.memory_space<vmem>>, vector<4x8x8xbf16>
    %c0_20 = arith.constant 0 : index
    %c0_21 = arith.constant 0 : index
    %c40 = arith.constant 40 : index
    %29 = vector.load %arg1[%c0_20, %c0_21, %c40] : memref<4x8x48xbf16, #tpu.memory_space<vmem>>, vector<4x8x8xbf16>
    "tpu.trace_start"() <{level = 10 : i32, message = "wld,wmd->wlm"}> : () -> ()
    %cst_22 = arith.constant dense<0.000000e+00> : vector<4x8x8xf32>
    %30 = tpu.matmul %27, %28, %cst_22 {dimension_numbers = #tpu.dot_dimension_numbers<[2], [2], [1], [1], [0, 0, 0, 1, 1, 1], [0], [0]>} : vector<4x8x8xbf16>, vector<4x8x8xbf16>, vector<4x8x8xf32> -> vector<4x8x8xf32>
    "tpu.trace_stop"() : () -> ()
    %cst_23 = arith.constant 0.353553385 : f32
    %31 = vector.broadcast %cst_23 : f32 to vector<4x8x8xf32>
    %32 = arith.mulf %30, %31 : vector<4x8x8xf32>
    %33 = vector.extract_strided_slice %1 {offsets = [1, 0, 0], sizes = [1, 8, 8], strides = [1, 1, 1]} : vector<2x8x8xf32> to vector<1x8x8xf32>
    %34 = vector.shape_cast %33 : vector<1x8x8xf32> to vector<8x8xf32>
    %35 = vector.shape_cast %34 : vector<8x8xf32> to vector<1x8x8xf32>
    %36 = vector.broadcast %35 : vector<1x8x8xf32> to vector<4x8x8xf32>
    %37 = arith.addf %32, %36 : vector<4x8x8xf32>
    %cst_24 = arith.constant dense<0xFF800000> : vector<4x8xf32>
    %38 = vector.multi_reduction <maximumf>, %37, %cst_24 [2] : vector<4x8x8xf32> to vector<4x8xf32>
    %39 = vector.shape_cast %38 : vector<4x8xf32> to vector<4x8x1xf32>
    %40 = vector.broadcast %39 : vector<4x8x1xf32> to vector<4x8x8xf32>
    %41 = arith.subf %37, %40 : vector<4x8x8xf32>
    %42 = math.exp %41 : vector<4x8x8xf32>
    %cst_25 = arith.constant dense<0.000000e+00> : vector<4x8xf32>
    %43 = vector.multi_reduction <add>, %42, %cst_25 [2] : vector<4x8x8xf32> to vector<4x8xf32>
    %44 = vector.shape_cast %43 : vector<4x8xf32> to vector<4x8x1xf32>
    %45 = tpu.reciprocal %44 {approx = true} : vector<4x8x1xf32> -> vector<4x8x1xf32>
    %46 = vector.broadcast %45 : vector<4x8x1xf32> to vector<4x8x8xf32>
    %47 = arith.mulf %42, %46 : vector<4x8x8xf32>
    %48 = arith.truncf %47 : vector<4x8x8xf32> to vector<4x8x8xbf16>
    "tpu.trace_start"() <{level = 10 : i32, message = "wlm,wmd->wld"}> : () -> ()
    %cst_26 = arith.constant dense<0.000000e+00> : vector<4x8x8xf32>
    %49 = tpu.matmul %48, %29, %cst_26 {dimension_numbers = #tpu.dot_dimension_numbers<[2], [1], [1], [2], [0, 0, 0, 1, 1, 2], [0], [0]>} : vector<4x8x8xbf16>, vector<4x8x8xbf16>, vector<4x8x8xf32> -> vector<4x8x8xf32>
    "tpu.trace_stop"() : () -> ()
    %50 = arith.truncf %49 : vector<4x8x8xf32> to vector<4x8x8xbf16>
    %c0_27 = arith.constant 0 : index
    %c0_28 = arith.constant 0 : index
    %c8_29 = arith.constant 8 : index
    %51 = vector.load %arg3[%c0_27, %c0_28, %c8_29] : memref<4x8x16xbf16, #tpu.memory_space<vmem>>, vector<4x8x8xbf16>
    tpu.vector_store %arg3[%c0_27, %c0_28, %c8_29], %50 {strides = array<i32>} : memref<4x8x16xbf16, #tpu.memory_space<vmem>>, vector<4x8x8xbf16>,
    return
  }
  func.func @transform_0(%arg0: i32) -> (i32, i32, i32) {
    %c0_i32 = arith.constant 0 : i32
    %c0_i32_0 = arith.constant 0 : i32
    %c0_i32_1 = arith.constant 0 : i32
    return %arg0, %c0_i32, %c0_i32_0 : i32, i32, i32
  }
  func.func @transform_1(%arg0: i32) -> (i32, i32, i32) {
    %c0_i32 = arith.constant 0 : i32
    %c0_i32_0 = arith.constant 0 : i32
    %c0_i32_1 = arith.constant 0 : i32
    %c0_i32_2 = arith.constant 0 : i32
    return %c0_i32, %c0_i32_0, %c0_i32_1 : i32, i32, i32
  }
  func.func @transform_2(%arg0: i32) -> (i32, i32, i32) {
    %c0_i32 = arith.constant 0 : i32
    %c0_i32_0 = arith.constant 0 : i32
    %c0_i32_1 = arith.constant 0 : i32
    return %arg0, %c0_i32, %c0_i32_0 : i32, i32, i32
  }
}

module attributes {stable_mosaic.version = 11 : i64} {
  func.func @_window_attn_kernel(%arg0: i32, %arg1: memref<4x8x48xbf16, #tpu.memory_space<vmem>>, %arg2: memref<2x8x8xbf16, #tpu.memory_space<vmem>>, %arg3: memref<4x8x8xf32, #tpu.memory_space<vmem>>, %arg4: memref<4x8x16xbf16, #tpu.memory_space<vmem>>) attributes {dimension_semantics = [#tpu.dimension_semantics<parallel>], iteration_bounds = array<i64: 2>, scalar_prefetch = 0 : i64, scratch_operands = 0 : i64, tpu.core_type = #tpu.core_type<tc>, window_params = [{transform_indices = @transform_0, window_bounds = array<i64: 4, 8, 48>}, {pipeline_mode = #tpu.pipeline_mode<synchronous>, transform_indices = @transform_1, window_bounds = array<i64: 2, 8, 8>}, {transform_indices = @transform_2, window_bounds = array<i64: 4, 8, 8>}, {transform_indices = @transform_3, window_bounds = array<i64: 4, 8, 16>}]} {
    %c0 = arith.constant 0 : index
    %c0_0 = arith.constant 0 : index
    %c0_1 = arith.constant 0 : index
    %0 = vector.load %arg2[%c0, %c0_0, %c0_1] : memref<2x8x8xbf16, #tpu.memory_space<vmem>>, vector<2x8x8xbf16>
    %1 = arith.extf %0 : vector<2x8x8xbf16> to vector<2x8x8xf32>
    %c0_2 = arith.constant 0 : index
    %c0_3 = arith.constant 0 : index
    %c0_4 = arith.constant 0 : index
    %2 = vector.load %arg3[%c0_2, %c0_3, %c0_4] : memref<4x8x8xf32, #tpu.memory_space<vmem>>, vector<4x8x8xf32>
    %c0_5 = arith.constant 0 : index
    %c0_6 = arith.constant 0 : index
    %c0_7 = arith.constant 0 : index
    %3 = vector.load %arg1[%c0_5, %c0_6, %c0_7] : memref<4x8x48xbf16, #tpu.memory_space<vmem>>, vector<4x8x8xbf16>
    %c0_8 = arith.constant 0 : index
    %c0_9 = arith.constant 0 : index
    %c16 = arith.constant 16 : index
    %4 = vector.load %arg1[%c0_8, %c0_9, %c16] : memref<4x8x48xbf16, #tpu.memory_space<vmem>>, vector<4x8x8xbf16>
    %c0_10 = arith.constant 0 : index
    %c0_11 = arith.constant 0 : index
    %c32 = arith.constant 32 : index
    %5 = vector.load %arg1[%c0_10, %c0_11, %c32] : memref<4x8x48xbf16, #tpu.memory_space<vmem>>, vector<4x8x8xbf16>
    "tpu.trace_start"() <{level = 10 : i32, message = "wld,wmd->wlm"}> : () -> ()
    %cst = arith.constant dense<0.000000e+00> : vector<4x8x8xf32>
    %6 = tpu.matmul %3, %4, %cst {dimension_numbers = #tpu.dot_dimension_numbers<[2], [2], [1], [1], [0, 0, 0, 1, 1, 1], [0], [0]>} : vector<4x8x8xbf16>, vector<4x8x8xbf16>, vector<4x8x8xf32> -> vector<4x8x8xf32>
    "tpu.trace_stop"() : () -> ()
    %cst_12 = arith.constant 0.353553385 : f32
    %7 = vector.broadcast %cst_12 : f32 to vector<4x8x8xf32>
    %8 = arith.mulf %6, %7 : vector<4x8x8xf32>
    %9 = vector.extract_strided_slice %1 {offsets = [0, 0, 0], sizes = [1, 8, 8], strides = [1, 1, 1]} : vector<2x8x8xf32> to vector<1x8x8xf32>
    %10 = vector.shape_cast %9 : vector<1x8x8xf32> to vector<8x8xf32>
    %11 = vector.shape_cast %10 : vector<8x8xf32> to vector<1x8x8xf32>
    %12 = vector.broadcast %11 : vector<1x8x8xf32> to vector<4x8x8xf32>
    %13 = arith.addf %8, %12 : vector<4x8x8xf32>
    %14 = arith.addf %13, %2 : vector<4x8x8xf32>
    %cst_13 = arith.constant dense<0xFF800000> : vector<4x8xf32>
    %15 = vector.multi_reduction <maximumf>, %14, %cst_13 [2] : vector<4x8x8xf32> to vector<4x8xf32>
    %16 = vector.shape_cast %15 : vector<4x8xf32> to vector<4x8x1xf32>
    %17 = vector.broadcast %16 : vector<4x8x1xf32> to vector<4x8x8xf32>
    %18 = arith.subf %14, %17 : vector<4x8x8xf32>
    %19 = math.exp %18 : vector<4x8x8xf32>
    %cst_14 = arith.constant dense<0.000000e+00> : vector<4x8xf32>
    %20 = vector.multi_reduction <add>, %19, %cst_14 [2] : vector<4x8x8xf32> to vector<4x8xf32>
    %21 = vector.shape_cast %20 : vector<4x8xf32> to vector<4x8x1xf32>
    %22 = tpu.reciprocal %21 {approx = true} : vector<4x8x1xf32> -> vector<4x8x1xf32>
    %23 = vector.broadcast %22 : vector<4x8x1xf32> to vector<4x8x8xf32>
    %24 = arith.mulf %19, %23 : vector<4x8x8xf32>
    %25 = arith.truncf %24 : vector<4x8x8xf32> to vector<4x8x8xbf16>
    "tpu.trace_start"() <{level = 10 : i32, message = "wlm,wmd->wld"}> : () -> ()
    %cst_15 = arith.constant dense<0.000000e+00> : vector<4x8x8xf32>
    %26 = tpu.matmul %25, %5, %cst_15 {dimension_numbers = #tpu.dot_dimension_numbers<[2], [1], [1], [2], [0, 0, 0, 1, 1, 2], [0], [0]>} : vector<4x8x8xbf16>, vector<4x8x8xbf16>, vector<4x8x8xf32> -> vector<4x8x8xf32>
    "tpu.trace_stop"() : () -> ()
    %27 = arith.truncf %26 : vector<4x8x8xf32> to vector<4x8x8xbf16>
    %c0_16 = arith.constant 0 : index
    %c0_17 = arith.constant 0 : index
    %c0_18 = arith.constant 0 : index
    %28 = vector.load %arg4[%c0_16, %c0_17, %c0_18] : memref<4x8x16xbf16, #tpu.memory_space<vmem>>, vector<4x8x8xbf16>
    tpu.vector_store %arg4[%c0_16, %c0_17, %c0_18], %27 {strides = array<i32>} : memref<4x8x16xbf16, #tpu.memory_space<vmem>>, vector<4x8x8xbf16>,
    %c0_19 = arith.constant 0 : index
    %c0_20 = arith.constant 0 : index
    %c8 = arith.constant 8 : index
    %29 = vector.load %arg1[%c0_19, %c0_20, %c8] : memref<4x8x48xbf16, #tpu.memory_space<vmem>>, vector<4x8x8xbf16>
    %c0_21 = arith.constant 0 : index
    %c0_22 = arith.constant 0 : index
    %c24 = arith.constant 24 : index
    %30 = vector.load %arg1[%c0_21, %c0_22, %c24] : memref<4x8x48xbf16, #tpu.memory_space<vmem>>, vector<4x8x8xbf16>
    %c0_23 = arith.constant 0 : index
    %c0_24 = arith.constant 0 : index
    %c40 = arith.constant 40 : index
    %31 = vector.load %arg1[%c0_23, %c0_24, %c40] : memref<4x8x48xbf16, #tpu.memory_space<vmem>>, vector<4x8x8xbf16>
    "tpu.trace_start"() <{level = 10 : i32, message = "wld,wmd->wlm"}> : () -> ()
    %cst_25 = arith.constant dense<0.000000e+00> : vector<4x8x8xf32>
    %32 = tpu.matmul %29, %30, %cst_25 {dimension_numbers = #tpu.dot_dimension_numbers<[2], [2], [1], [1], [0, 0, 0, 1, 1, 1], [0], [0]>} : vector<4x8x8xbf16>, vector<4x8x8xbf16>, vector<4x8x8xf32> -> vector<4x8x8xf32>
    "tpu.trace_stop"() : () -> ()
    %cst_26 = arith.constant 0.353553385 : f32
    %33 = vector.broadcast %cst_26 : f32 to vector<4x8x8xf32>
    %34 = arith.mulf %32, %33 : vector<4x8x8xf32>
    %35 = vector.extract_strided_slice %1 {offsets = [1, 0, 0], sizes = [1, 8, 8], strides = [1, 1, 1]} : vector<2x8x8xf32> to vector<1x8x8xf32>
    %36 = vector.shape_cast %35 : vector<1x8x8xf32> to vector<8x8xf32>
    %37 = vector.shape_cast %36 : vector<8x8xf32> to vector<1x8x8xf32>
    %38 = vector.broadcast %37 : vector<1x8x8xf32> to vector<4x8x8xf32>
    %39 = arith.addf %34, %38 : vector<4x8x8xf32>
    %40 = arith.addf %39, %2 : vector<4x8x8xf32>
    %cst_27 = arith.constant dense<0xFF800000> : vector<4x8xf32>
    %41 = vector.multi_reduction <maximumf>, %40, %cst_27 [2] : vector<4x8x8xf32> to vector<4x8xf32>
    %42 = vector.shape_cast %41 : vector<4x8xf32> to vector<4x8x1xf32>
    %43 = vector.broadcast %42 : vector<4x8x1xf32> to vector<4x8x8xf32>
    %44 = arith.subf %40, %43 : vector<4x8x8xf32>
    %45 = math.exp %44 : vector<4x8x8xf32>
    %cst_28 = arith.constant dense<0.000000e+00> : vector<4x8xf32>
    %46 = vector.multi_reduction <add>, %45, %cst_28 [2] : vector<4x8x8xf32> to vector<4x8xf32>
    %47 = vector.shape_cast %46 : vector<4x8xf32> to vector<4x8x1xf32>
    %48 = tpu.reciprocal %47 {approx = true} : vector<4x8x1xf32> -> vector<4x8x1xf32>
    %49 = vector.broadcast %48 : vector<4x8x1xf32> to vector<4x8x8xf32>
    %50 = arith.mulf %45, %49 : vector<4x8x8xf32>
    %51 = arith.truncf %50 : vector<4x8x8xf32> to vector<4x8x8xbf16>
    "tpu.trace_start"() <{level = 10 : i32, message = "wlm,wmd->wld"}> : () -> ()
    %cst_29 = arith.constant dense<0.000000e+00> : vector<4x8x8xf32>
    %52 = tpu.matmul %51, %31, %cst_29 {dimension_numbers = #tpu.dot_dimension_numbers<[2], [1], [1], [2], [0, 0, 0, 1, 1, 2], [0], [0]>} : vector<4x8x8xbf16>, vector<4x8x8xbf16>, vector<4x8x8xf32> -> vector<4x8x8xf32>
    "tpu.trace_stop"() : () -> ()
    %53 = arith.truncf %52 : vector<4x8x8xf32> to vector<4x8x8xbf16>
    %c0_30 = arith.constant 0 : index
    %c0_31 = arith.constant 0 : index
    %c8_32 = arith.constant 8 : index
    %54 = vector.load %arg4[%c0_30, %c0_31, %c8_32] : memref<4x8x16xbf16, #tpu.memory_space<vmem>>, vector<4x8x8xbf16>
    tpu.vector_store %arg4[%c0_30, %c0_31, %c8_32], %53 {strides = array<i32>} : memref<4x8x16xbf16, #tpu.memory_space<vmem>>, vector<4x8x8xbf16>,
    return
  }
  func.func @transform_0(%arg0: i32) -> (i32, i32, i32) {
    %c0_i32 = arith.constant 0 : i32
    %c0_i32_0 = arith.constant 0 : i32
    %c0_i32_1 = arith.constant 0 : i32
    return %arg0, %c0_i32, %c0_i32_0 : i32, i32, i32
  }
  func.func @transform_1(%arg0: i32) -> (i32, i32, i32) {
    %c0_i32 = arith.constant 0 : i32
    %c0_i32_0 = arith.constant 0 : i32
    %c0_i32_1 = arith.constant 0 : i32
    %c0_i32_2 = arith.constant 0 : i32
    return %c0_i32, %c0_i32_0, %c0_i32_1 : i32, i32, i32
  }
  func.func @transform_2(%arg0: i32) -> (i32, i32, i32) {
    %c1_i32 = arith.constant 1 : i32
    %c0_i32 = arith.constant 0 : i32
    %0 = arith.cmpi eq, %c1_i32, %c0_i32 : i32
    %c1_i32_0 = arith.constant 1 : i32
    %1 = arith.select %0, %c1_i32_0, %c1_i32 : i32
    %2 = arith.remsi %arg0, %1 : i32
    %c0_i32_1 = arith.constant 0 : i32
    %3 = arith.cmpi ne, %2, %c0_i32_1 : i32
    %c0_i32_2 = arith.constant 0 : i32
    %4 = arith.cmpi slt, %2, %c0_i32_2 : i32
    %c0_i32_3 = arith.constant 0 : i32
    %5 = arith.cmpi slt, %1, %c0_i32_3 : i32
    %6 = arith.xori %4, %5 : i1
    %7 = arith.andi %6, %3 : i1
    %8 = arith.addi %2, %1 : i32
    %9 = arith.select %7, %8, %2 : i32
    %c0_i32_4 = arith.constant 0 : i32
    %c0_i32_5 = arith.constant 0 : i32
    %c0_i32_6 = arith.constant 0 : i32
    return %9, %c0_i32_4, %c0_i32_5 : i32, i32, i32
  }
  func.func @transform_3(%arg0: i32) -> (i32, i32, i32) {
    %c0_i32 = arith.constant 0 : i32
    %c0_i32_0 = arith.constant 0 : i32
    %c0_i32_1 = arith.constant 0 : i32
    return %arg0, %c0_i32, %c0_i32_0 : i32, i32, i32
  }
}

module attributes {stable_mosaic.version = 11 : i64} {
  func.func @_ln_linear_kernel(%arg0: i32, %arg1: i32, %arg2: memref<16x64xbf16, #tpu.memory_space<vmem>>, %arg3: memref<1x64xf32, #tpu.memory_space<vmem>>, %arg4: memref<1x64xf32, #tpu.memory_space<vmem>>, %arg5: memref<64x32xbf16, #tpu.memory_space<vmem>>, %arg6: memref<1x32xf32, #tpu.memory_space<vmem>>, %arg7: memref<16x32xbf16, #tpu.memory_space<vmem>>) attributes {dimension_semantics = [#tpu.dimension_semantics<parallel>, #tpu.dimension_semantics<parallel>], iteration_bounds = array<i64: 1, 1>, scalar_prefetch = 0 : i64, scratch_operands = 0 : i64, tpu.core_type = #tpu.core_type<tc>, window_params = [{transform_indices = @transform_0, window_bounds = array<i64: 16, 64>}, {pipeline_mode = #tpu.pipeline_mode<synchronous>, transform_indices = @transform_1, window_bounds = array<i64: 1, 64>}, {pipeline_mode = #tpu.pipeline_mode<synchronous>, transform_indices = @transform_2, window_bounds = array<i64: 1, 64>}, {transform_indices = @transform_3, window_bounds = array<i64: 64, 32>}, {transform_indices = @transform_4, window_bounds = array<i64: 1, 32>}, {transform_indices = @transform_5, window_bounds = array<i64: 16, 32>}]} {
    %c0 = arith.constant 0 : index
    %c0_0 = arith.constant 0 : index
    %0 = vector.load %arg2[%c0, %c0_0] : memref<16x64xbf16, #tpu.memory_space<vmem>>, vector<16x64xbf16>
    %1 = arith.extf %0 : vector<16x64xbf16> to vector<16x64xf32>
    %cst = arith.constant dense<0.000000e+00> : vector<16xf32>
    %2 = vector.multi_reduction <add>, %1, %cst [1] : vector<16x64xf32> to vector<16xf32>
    %3 = vector.shape_cast %2 : vector<16xf32> to vector<16x1xf32>
    %cst_1 = arith.constant 6.400000e+01 : f32
    %4 = vector.broadcast %cst_1 : f32 to vector<16x1xf32>
    %5 = arith.divf %3, %4 : vector<16x1xf32>
    %6 = vector.broadcast %5 : vector<16x1xf32> to vector<16x64xf32>
    %7 = arith.subf %1, %6 : vector<16x64xf32>
    %8 = arith.mulf %7, %7 : vector<16x64xf32>
    %cst_2 = arith.constant dense<0.000000e+00> : vector<16xf32>
    %9 = vector.multi_reduction <add>, %8, %cst_2 [1] : vector<16x64xf32> to vector<16xf32>
    %10 = vector.shape_cast %9 : vector<16xf32> to vector<16x1xf32>
    %cst_3 = arith.constant 6.400000e+01 : f32
    %11 = vector.broadcast %cst_3 : f32 to vector<16x1xf32>
    %12 = arith.divf %10, %11 : vector<16x1xf32>
    %13 = vector.broadcast %5 : vector<16x1xf32> to vector<16x64xf32>
    %14 = arith.subf %1, %13 : vector<16x64xf32>
    %cst_4 = arith.constant 9.99999974E-6 : f32
    %15 = vector.broadcast %cst_4 : f32 to vector<16x1xf32>
    %16 = arith.addf %12, %15 : vector<16x1xf32>
    %17 = math.rsqrt %16 : vector<16x1xf32>
    %18 = vector.broadcast %17 : vector<16x1xf32> to vector<16x64xf32>
    %19 = arith.mulf %14, %18 : vector<16x64xf32>
    %c0_5 = arith.constant 0 : index
    %c0_6 = arith.constant 0 : index
    %20 = vector.load %arg3[%c0_5, %c0_6] : memref<1x64xf32, #tpu.memory_space<vmem>>, vector<1x64xf32>
    %21 = vector.broadcast %20 : vector<1x64xf32> to vector<16x64xf32>
    %22 = arith.mulf %19, %21 : vector<16x64xf32>
    %c0_7 = arith.constant 0 : index
    %c0_8 = arith.constant 0 : index
    %23 = vector.load %arg4[%c0_7, %c0_8] : memref<1x64xf32, #tpu.memory_space<vmem>>, vector<1x64xf32>
    %24 = vector.broadcast %23 : vector<1x64xf32> to vector<16x64xf32>
    %25 = arith.addf %22, %24 : vector<16x64xf32>
    %26 = arith.truncf %25 : vector<16x64xf32> to vector<16x64xbf16>
    %c0_9 = arith.constant 0 : index
    %c0_10 = arith.constant 0 : index
    %27 = vector.load %arg5[%c0_9, %c0_10] : memref<64x32xbf16, #tpu.memory_space<vmem>>, vector<64x32xbf16>
    %cst_11 = arith.constant dense<0.000000e+00> : vector<16x32xf32>
    %28 = tpu.matmul %26, %27, %cst_11 {dimension_numbers = #tpu.dot_dimension_numbers<[1], [0], [0], [1], [0, 0, 1, 1], [], []>} : vector<16x64xbf16>, vector<64x32xbf16>, vector<16x32xf32> -> vector<16x32xf32>
    %c0_12 = arith.constant 0 : index
    %c0_13 = arith.constant 0 : index
    %29 = vector.load %arg6[%c0_12, %c0_13] : memref<1x32xf32, #tpu.memory_space<vmem>>, vector<1x32xf32>
    %30 = vector.broadcast %29 : vector<1x32xf32> to vector<16x32xf32>
    %31 = arith.addf %28, %30 : vector<16x32xf32>
    %32 = arith.truncf %31 : vector<16x32xf32> to vector<16x32xbf16>
    %c0_14 = arith.constant 0 : index
    %c0_15 = arith.constant 0 : index
    %33 = vector.load %arg7[%c0_14, %c0_15] : memref<16x32xbf16, #tpu.memory_space<vmem>>, vector<16x32xbf16>
    tpu.vector_store %arg7[%c0_14, %c0_15], %32 {strides = array<i32>} : memref<16x32xbf16, #tpu.memory_space<vmem>>, vector<16x32xbf16>,
    return
  }
  func.func @transform_0(%arg0: i32, %arg1: i32) -> (i32, i32) {
    %c0_i32 = arith.constant 0 : i32
    %c0_i32_0 = arith.constant 0 : i32
    return %arg0, %c0_i32 : i32, i32
  }
  func.func @transform_1(%arg0: i32, %arg1: i32) -> (i32, i32) {
    %c0_i32 = arith.constant 0 : i32
    %c0_i32_0 = arith.constant 0 : i32
    %c0_i32_1 = arith.constant 0 : i32
    return %c0_i32, %c0_i32_0 : i32, i32
  }
  func.func @transform_2(%arg0: i32, %arg1: i32) -> (i32, i32) {
    %c0_i32 = arith.constant 0 : i32
    %c0_i32_0 = arith.constant 0 : i32
    %c0_i32_1 = arith.constant 0 : i32
    return %c0_i32, %c0_i32_0 : i32, i32
  }
  func.func @transform_3(%arg0: i32, %arg1: i32) -> (i32, i32) {
    %c0_i32 = arith.constant 0 : i32
    %c0_i32_0 = arith.constant 0 : i32
    return %c0_i32, %arg1 : i32, i32
  }
  func.func @transform_4(%arg0: i32, %arg1: i32) -> (i32, i32) {
    %c0_i32 = arith.constant 0 : i32
    %c0_i32_0 = arith.constant 0 : i32
    return %c0_i32, %arg1 : i32, i32
  }
  func.func @transform_5(%arg0: i32, %arg1: i32) -> (i32, i32) {
    %c0_i32 = arith.constant 0 : i32
    return %arg0, %arg1 : i32, i32
  }
}

module attributes {stable_mosaic.version = 11 : i64} {
  func.func @_matmul_kernel(%arg0: i32, %arg1: i32, %arg2: i32, %arg3: memref<16x32xbf16, #tpu.memory_space<vmem>>, %arg4: memref<32x32xbf16, #tpu.memory_space<vmem>>, %arg5: memref<1x32xf32, #tpu.memory_space<vmem>>, %arg6: memref<16x32xbf16, #tpu.memory_space<vmem>>, %arg7: memref<16x32xf32, #tpu.memory_space<vmem>>) attributes {dimension_semantics = [#tpu.dimension_semantics<parallel>, #tpu.dimension_semantics<parallel>, #tpu.dimension_semantics<arbitrary>], iteration_bounds = array<i64: 1, 1, 1>, scalar_prefetch = 0 : i64, scratch_operands = 1 : i64, tpu.core_type = #tpu.core_type<tc>, window_params = [{transform_indices = @transform_0, window_bounds = array<i64: 16, 32>}, {transform_indices = @transform_1, window_bounds = array<i64: 32, 32>}, {transform_indices = @transform_2, window_bounds = array<i64: 1, 32>}, {transform_indices = @transform_3, window_bounds = array<i64: 16, 32>}]} {
    %c0_i32 = arith.constant 0 : i32
    %0 = arith.cmpi eq, %arg2, %c0_i32 : i32
    %1 = arith.extui %0 : i1 to i32
    %c0_i32_0 = arith.constant 0 : i32
    %2 = arith.cmpi ne, %1, %c0_i32_0 : i32
    scf.if %2 {
      %cst_10 = arith.constant 0.000000e+00 : f32
      %12 = vector.broadcast %cst_10 : f32 to vector<16x32xf32>
      %c0_11 = arith.constant 0 : index
      %c0_12 = arith.constant 0 : index
      %13 = vector.load %arg7[%c0_11, %c0_12] : memref<16x32xf32, #tpu.memory_space<vmem>>, vector<16x32xf32>
      tpu.vector_store %arg7[%c0_11, %c0_12], %12 {strides = array<i32>} : memref<16x32xf32, #tpu.memory_space<vmem>>, vector<16x32xf32>,
    } else {
    }
    %c0 = arith.constant 0 : index
    %c0_1 = arith.constant 0 : index
    %3 = vector.load %arg7[%c0, %c0_1] : memref<16x32xf32, #tpu.memory_space<vmem>>, vector<16x32xf32>
    %c0_2 = arith.constant 0 : index
    %c0_3 = arith.constant 0 : index
    %4 = vector.load %arg3[%c0_2, %c0_3] : memref<16x32xbf16, #tpu.memory_space<vmem>>, vector<16x32xbf16>
    %c0_4 = arith.constant 0 : index
    %c0_5 = arith.constant 0 : index
    %5 = vector.load %arg4[%c0_4, %c0_5] : memref<32x32xbf16, #tpu.memory_space<vmem>>, vector<32x32xbf16>
    %cst = arith.constant dense<0.000000e+00> : vector<16x32xf32>
    %6 = tpu.matmul %4, %5, %cst {dimension_numbers = #tpu.dot_dimension_numbers<[1], [0], [0], [1], [0, 0, 1, 1], [], []>} : vector<16x32xbf16>, vector<32x32xbf16>, vector<16x32xf32> -> vector<16x32xf32>
    %7 = arith.addf %3, %6 : vector<16x32xf32>
    %c0_6 = arith.constant 0 : index
    %c0_7 = arith.constant 0 : index
    %8 = vector.load %arg7[%c0_6, %c0_7] : memref<16x32xf32, #tpu.memory_space<vmem>>, vector<16x32xf32>
    tpu.vector_store %arg7[%c0_6, %c0_7], %7 {strides = array<i32>} : memref<16x32xf32, #tpu.memory_space<vmem>>, vector<16x32xf32>,
    %c0_i32_8 = arith.constant 0 : i32
    %9 = arith.cmpi eq, %arg2, %c0_i32_8 : i32
    %10 = arith.extui %9 : i1 to i32
    %c0_i32_9 = arith.constant 0 : i32
    %11 = arith.cmpi ne, %10, %c0_i32_9 : i32
    scf.if %11 {
      %c0_10 = arith.constant 0 : index
      %c0_11 = arith.constant 0 : index
      %12 = vector.load %arg7[%c0_10, %c0_11] : memref<16x32xf32, #tpu.memory_space<vmem>>, vector<16x32xf32>
      %c0_12 = arith.constant 0 : index
      %c0_13 = arith.constant 0 : index
      %13 = vector.load %arg5[%c0_12, %c0_13] : memref<1x32xf32, #tpu.memory_space<vmem>>, vector<1x32xf32>
      %14 = vector.broadcast %13 : vector<1x32xf32> to vector<16x32xf32>
      %15 = arith.addf %12, %14 : vector<16x32xf32>
      %16 = arith.truncf %15 : vector<16x32xf32> to vector<16x32xbf16>
      %c0_14 = arith.constant 0 : index
      %c0_15 = arith.constant 0 : index
      %17 = vector.load %arg6[%c0_14, %c0_15] : memref<16x32xbf16, #tpu.memory_space<vmem>>, vector<16x32xbf16>
      tpu.vector_store %arg6[%c0_14, %c0_15], %16 {strides = array<i32>} : memref<16x32xbf16, #tpu.memory_space<vmem>>, vector<16x32xbf16>,
    } else {
    }
    return
  }
  func.func @transform_0(%arg0: i32, %arg1: i32, %arg2: i32) -> (i32, i32) {
    %c0_i32 = arith.constant 0 : i32
    return %arg0, %arg2 : i32, i32
  }
  func.func @transform_1(%arg0: i32, %arg1: i32, %arg2: i32) -> (i32, i32) {
    %c0_i32 = arith.constant 0 : i32
    return %arg2, %arg1 : i32, i32
  }
  func.func @transform_2(%arg0: i32, %arg1: i32, %arg2: i32) -> (i32, i32) {
    %c0_i32 = arith.constant 0 : i32
    %c0_i32_0 = arith.constant 0 : i32
    return %c0_i32, %arg1 : i32, i32
  }
  func.func @transform_3(%arg0: i32, %arg1: i32, %arg2: i32) -> (i32, i32) {
    %c0_i32 = arith.constant 0 : i32
    return %arg0, %arg1 : i32, i32
  }
}

module attributes {stable_mosaic.version = 11 : i64} {
  func.func @_window_attn_kernel(%arg0: i32, %arg1: memref<1x8x96xbf16, #tpu.memory_space<vmem>>, %arg2: memref<2x8x8xbf16, #tpu.memory_space<vmem>>, %arg3: memref<1x8x32xbf16, #tpu.memory_space<vmem>>) attributes {dimension_semantics = [#tpu.dimension_semantics<parallel>], iteration_bounds = array<i64: 2>, scalar_prefetch = 0 : i64, scratch_operands = 0 : i64, tpu.core_type = #tpu.core_type<tc>, window_params = [{transform_indices = @transform_0, window_bounds = array<i64: 1, 8, 96>}, {pipeline_mode = #tpu.pipeline_mode<synchronous>, transform_indices = @transform_1, window_bounds = array<i64: 2, 8, 8>}, {transform_indices = @transform_2, window_bounds = array<i64: 1, 8, 32>}]} {
    %c0 = arith.constant 0 : index
    %c0_0 = arith.constant 0 : index
    %c0_1 = arith.constant 0 : index
    %0 = vector.load %arg2[%c0, %c0_0, %c0_1] : memref<2x8x8xbf16, #tpu.memory_space<vmem>>, vector<2x8x8xbf16>
    %1 = arith.extf %0 : vector<2x8x8xbf16> to vector<2x8x8xf32>
    %c0_2 = arith.constant 0 : index
    %c0_3 = arith.constant 0 : index
    %c0_4 = arith.constant 0 : index
    %2 = vector.load %arg1[%c0_2, %c0_3, %c0_4] : memref<1x8x96xbf16, #tpu.memory_space<vmem>>, vector<1x8x16xbf16>
    %c0_5 = arith.constant 0 : index
    %c0_6 = arith.constant 0 : index
    %c32 = arith.constant 32 : index
    %3 = vector.load %arg1[%c0_5, %c0_6, %c32] : memref<1x8x96xbf16, #tpu.memory_space<vmem>>, vector<1x8x16xbf16>
    %c0_7 = arith.constant 0 : index
    %c0_8 = arith.constant 0 : index
    %c64 = arith.constant 64 : index
    %4 = vector.load %arg1[%c0_7, %c0_8, %c64] : memref<1x8x96xbf16, #tpu.memory_space<vmem>>, vector<1x8x16xbf16>
    "tpu.trace_start"() <{level = 10 : i32, message = "wld,wmd->wlm"}> : () -> ()
    %cst = arith.constant dense<0.000000e+00> : vector<1x8x8xf32>
    %5 = tpu.matmul %2, %3, %cst {dimension_numbers = #tpu.dot_dimension_numbers<[2], [2], [1], [1], [0, 0, 0, 1, 1, 1], [0], [0]>} : vector<1x8x16xbf16>, vector<1x8x16xbf16>, vector<1x8x8xf32> -> vector<1x8x8xf32>
    "tpu.trace_stop"() : () -> ()
    %cst_9 = arith.constant 2.500000e-01 : f32
    %6 = vector.broadcast %cst_9 : f32 to vector<1x8x8xf32>
    %7 = arith.mulf %5, %6 : vector<1x8x8xf32>
    %8 = vector.extract_strided_slice %1 {offsets = [0, 0, 0], sizes = [1, 8, 8], strides = [1, 1, 1]} : vector<2x8x8xf32> to vector<1x8x8xf32>
    %9 = vector.shape_cast %8 : vector<1x8x8xf32> to vector<8x8xf32>
    %10 = vector.shape_cast %9 : vector<8x8xf32> to vector<1x8x8xf32>
    %11 = arith.addf %7, %10 : vector<1x8x8xf32>
    %cst_10 = arith.constant dense<0xFF800000> : vector<1x8xf32>
    %12 = vector.multi_reduction <maximumf>, %11, %cst_10 [2] : vector<1x8x8xf32> to vector<1x8xf32>
    %13 = vector.shape_cast %12 : vector<1x8xf32> to vector<1x8x1xf32>
    %14 = vector.broadcast %13 : vector<1x8x1xf32> to vector<1x8x8xf32>
    %15 = arith.subf %11, %14 : vector<1x8x8xf32>
    %16 = math.exp %15 : vector<1x8x8xf32>
    %cst_11 = arith.constant dense<0.000000e+00> : vector<1x8xf32>
    %17 = vector.multi_reduction <add>, %16, %cst_11 [2] : vector<1x8x8xf32> to vector<1x8xf32>
    %18 = vector.shape_cast %17 : vector<1x8xf32> to vector<1x8x1xf32>
    %19 = tpu.reciprocal %18 {approx = true} : vector<1x8x1xf32> -> vector<1x8x1xf32>
    %20 = vector.broadcast %19 : vector<1x8x1xf32> to vector<1x8x8xf32>
    %21 = arith.mulf %16, %20 : vector<1x8x8xf32>
    %22 = arith.truncf %21 : vector<1x8x8xf32> to vector<1x8x8xbf16>
    "tpu.trace_start"() <{level = 10 : i32, message = "wlm,wmd->wld"}> : () -> ()
    %cst_12 = arith.constant dense<0.000000e+00> : vector<1x8x16xf32>
    %23 = tpu.matmul %22, %4, %cst_12 {dimension_numbers = #tpu.dot_dimension_numbers<[2], [1], [1], [2], [0, 0, 0, 1, 1, 2], [0], [0]>} : vector<1x8x8xbf16>, vector<1x8x16xbf16>, vector<1x8x16xf32> -> vector<1x8x16xf32>
    "tpu.trace_stop"() : () -> ()
    %24 = arith.truncf %23 : vector<1x8x16xf32> to vector<1x8x16xbf16>
    %c0_13 = arith.constant 0 : index
    %c0_14 = arith.constant 0 : index
    %c0_15 = arith.constant 0 : index
    %25 = vector.load %arg3[%c0_13, %c0_14, %c0_15] : memref<1x8x32xbf16, #tpu.memory_space<vmem>>, vector<1x8x16xbf16>
    tpu.vector_store %arg3[%c0_13, %c0_14, %c0_15], %24 {strides = array<i32>} : memref<1x8x32xbf16, #tpu.memory_space<vmem>>, vector<1x8x16xbf16>,
    %c0_16 = arith.constant 0 : index
    %c0_17 = arith.constant 0 : index
    %c16 = arith.constant 16 : index
    %26 = vector.load %arg1[%c0_16, %c0_17, %c16] : memref<1x8x96xbf16, #tpu.memory_space<vmem>>, vector<1x8x16xbf16>
    %c0_18 = arith.constant 0 : index
    %c0_19 = arith.constant 0 : index
    %c48 = arith.constant 48 : index
    %27 = vector.load %arg1[%c0_18, %c0_19, %c48] : memref<1x8x96xbf16, #tpu.memory_space<vmem>>, vector<1x8x16xbf16>
    %c0_20 = arith.constant 0 : index
    %c0_21 = arith.constant 0 : index
    %c80 = arith.constant 80 : index
    %28 = vector.load %arg1[%c0_20, %c0_21, %c80] : memref<1x8x96xbf16, #tpu.memory_space<vmem>>, vector<1x8x16xbf16>
    "tpu.trace_start"() <{level = 10 : i32, message = "wld,wmd->wlm"}> : () -> ()
    %cst_22 = arith.constant dense<0.000000e+00> : vector<1x8x8xf32>
    %29 = tpu.matmul %26, %27, %cst_22 {dimension_numbers = #tpu.dot_dimension_numbers<[2], [2], [1], [1], [0, 0, 0, 1, 1, 1], [0], [0]>} : vector<1x8x16xbf16>, vector<1x8x16xbf16>, vector<1x8x8xf32> -> vector<1x8x8xf32>
    "tpu.trace_stop"() : () -> ()
    %cst_23 = arith.constant 2.500000e-01 : f32
    %30 = vector.broadcast %cst_23 : f32 to vector<1x8x8xf32>
    %31 = arith.mulf %29, %30 : vector<1x8x8xf32>
    %32 = vector.extract_strided_slice %1 {offsets = [1, 0, 0], sizes = [1, 8, 8], strides = [1, 1, 1]} : vector<2x8x8xf32> to vector<1x8x8xf32>
    %33 = vector.shape_cast %32 : vector<1x8x8xf32> to vector<8x8xf32>
    %34 = vector.shape_cast %33 : vector<8x8xf32> to vector<1x8x8xf32>
    %35 = arith.addf %31, %34 : vector<1x8x8xf32>
    %cst_24 = arith.constant dense<0xFF800000> : vector<1x8xf32>
    %36 = vector.multi_reduction <maximumf>, %35, %cst_24 [2] : vector<1x8x8xf32> to vector<1x8xf32>
    %37 = vector.shape_cast %36 : vector<1x8xf32> to vector<1x8x1xf32>
    %38 = vector.broadcast %37 : vector<1x8x1xf32> to vector<1x8x8xf32>
    %39 = arith.subf %35, %38 : vector<1x8x8xf32>
    %40 = math.exp %39 : vector<1x8x8xf32>
    %cst_25 = arith.constant dense<0.000000e+00> : vector<1x8xf32>
    %41 = vector.multi_reduction <add>, %40, %cst_25 [2] : vector<1x8x8xf32> to vector<1x8xf32>
    %42 = vector.shape_cast %41 : vector<1x8xf32> to vector<1x8x1xf32>
    %43 = tpu.reciprocal %42 {approx = true} : vector<1x8x1xf32> -> vector<1x8x1xf32>
    %44 = vector.broadcast %43 : vector<1x8x1xf32> to vector<1x8x8xf32>
    %45 = arith.mulf %40, %44 : vector<1x8x8xf32>
    %46 = arith.truncf %45 : vector<1x8x8xf32> to vector<1x8x8xbf16>
    "tpu.trace_start"() <{level = 10 : i32, message = "wlm,wmd->wld"}> : () -> ()
    %cst_26 = arith.constant dense<0.000000e+00> : vector<1x8x16xf32>
    %47 = tpu.matmul %46, %28, %cst_26 {dimension_numbers = #tpu.dot_dimension_numbers<[2], [1], [1], [2], [0, 0, 0, 1, 1, 2], [0], [0]>} : vector<1x8x8xbf16>, vector<1x8x16xbf16>, vector<1x8x16xf32> -> vector<1x8x16xf32>
    "tpu.trace_stop"() : () -> ()
    %48 = arith.truncf %47 : vector<1x8x16xf32> to vector<1x8x16xbf16>
    %c0_27 = arith.constant 0 : index
    %c0_28 = arith.constant 0 : index
    %c16_29 = arith.constant 16 : index
    %49 = vector.load %arg3[%c0_27, %c0_28, %c16_29] : memref<1x8x32xbf16, #tpu.memory_space<vmem>>, vector<1x8x16xbf16>
    tpu.vector_store %arg3[%c0_27, %c0_28, %c16_29], %48 {strides = array<i32>} : memref<1x8x32xbf16, #tpu.memory_space<vmem>>, vector<1x8x16xbf16>,
    return
  }
  func.func @transform_0(%arg0: i32) -> (i32, i32, i32) {
    %c0_i32 = arith.constant 0 : i32
    %c0_i32_0 = arith.constant 0 : i32
    %c0_i32_1 = arith.constant 0 : i32
    return %arg0, %c0_i32, %c0_i32_0 : i32, i32, i32
  }
  func.func @transform_1(%arg0: i32) -> (i32, i32, i32) {
    %c0_i32 = arith.constant 0 : i32
    %c0_i32_0 = arith.constant 0 : i32
    %c0_i32_1 = arith.constant 0 : i32
    %c0_i32_2 = arith.constant 0 : i32
    return %c0_i32, %c0_i32_0, %c0_i32_1 : i32, i32, i32
  }
  func.func @transform_2(%arg0: i32) -> (i32, i32, i32) {
    %c0_i32 = arith.constant 0 : i32
    %c0_i32_0 = arith.constant 0 : i32
    %c0_i32_1 = arith.constant 0 : i32
    return %arg0, %c0_i32, %c0_i32_0 : i32, i32, i32
  }
}

module attributes {stable_mosaic.version = 11 : i64} {
  func.func @_ln_linear_kernel(%arg0: i32, %arg1: i32, %arg2: memref<16x32xbf16, #tpu.memory_space<vmem>>, %arg3: memref<1x32xf32, #tpu.memory_space<vmem>>, %arg4: memref<1x32xf32, #tpu.memory_space<vmem>>, %arg5: memref<32x96xbf16, #tpu.memory_space<vmem>>, %arg6: memref<1x96xf32, #tpu.memory_space<vmem>>, %arg7: memref<16x96xbf16, #tpu.memory_space<vmem>>) attributes {dimension_semantics = [#tpu.dimension_semantics<parallel>, #tpu.dimension_semantics<parallel>], iteration_bounds = array<i64: 1, 1>, scalar_prefetch = 0 : i64, scratch_operands = 0 : i64, tpu.core_type = #tpu.core_type<tc>, window_params = [{transform_indices = @transform_0, window_bounds = array<i64: 16, 32>}, {pipeline_mode = #tpu.pipeline_mode<synchronous>, transform_indices = @transform_1, window_bounds = array<i64: 1, 32>}, {pipeline_mode = #tpu.pipeline_mode<synchronous>, transform_indices = @transform_2, window_bounds = array<i64: 1, 32>}, {transform_indices = @transform_3, window_bounds = array<i64: 32, 96>}, {transform_indices = @transform_4, window_bounds = array<i64: 1, 96>}, {transform_indices = @transform_5, window_bounds = array<i64: 16, 96>}]} {
    %c0 = arith.constant 0 : index
    %c0_0 = arith.constant 0 : index
    %0 = vector.load %arg2[%c0, %c0_0] : memref<16x32xbf16, #tpu.memory_space<vmem>>, vector<16x32xbf16>
    %1 = arith.extf %0 : vector<16x32xbf16> to vector<16x32xf32>
    %cst = arith.constant dense<0.000000e+00> : vector<16xf32>
    %2 = vector.multi_reduction <add>, %1, %cst [1] : vector<16x32xf32> to vector<16xf32>
    %3 = vector.shape_cast %2 : vector<16xf32> to vector<16x1xf32>
    %cst_1 = arith.constant 3.200000e+01 : f32
    %4 = vector.broadcast %cst_1 : f32 to vector<16x1xf32>
    %5 = arith.divf %3, %4 : vector<16x1xf32>
    %6 = vector.broadcast %5 : vector<16x1xf32> to vector<16x32xf32>
    %7 = arith.subf %1, %6 : vector<16x32xf32>
    %8 = arith.mulf %7, %7 : vector<16x32xf32>
    %cst_2 = arith.constant dense<0.000000e+00> : vector<16xf32>
    %9 = vector.multi_reduction <add>, %8, %cst_2 [1] : vector<16x32xf32> to vector<16xf32>
    %10 = vector.shape_cast %9 : vector<16xf32> to vector<16x1xf32>
    %cst_3 = arith.constant 3.200000e+01 : f32
    %11 = vector.broadcast %cst_3 : f32 to vector<16x1xf32>
    %12 = arith.divf %10, %11 : vector<16x1xf32>
    %13 = vector.broadcast %5 : vector<16x1xf32> to vector<16x32xf32>
    %14 = arith.subf %1, %13 : vector<16x32xf32>
    %cst_4 = arith.constant 9.99999974E-6 : f32
    %15 = vector.broadcast %cst_4 : f32 to vector<16x1xf32>
    %16 = arith.addf %12, %15 : vector<16x1xf32>
    %17 = math.rsqrt %16 : vector<16x1xf32>
    %18 = vector.broadcast %17 : vector<16x1xf32> to vector<16x32xf32>
    %19 = arith.mulf %14, %18 : vector<16x32xf32>
    %c0_5 = arith.constant 0 : index
    %c0_6 = arith.constant 0 : index
    %20 = vector.load %arg3[%c0_5, %c0_6] : memref<1x32xf32, #tpu.memory_space<vmem>>, vector<1x32xf32>
    %21 = vector.broadcast %20 : vector<1x32xf32> to vector<16x32xf32>
    %22 = arith.mulf %19, %21 : vector<16x32xf32>
    %c0_7 = arith.constant 0 : index
    %c0_8 = arith.constant 0 : index
    %23 = vector.load %arg4[%c0_7, %c0_8] : memref<1x32xf32, #tpu.memory_space<vmem>>, vector<1x32xf32>
    %24 = vector.broadcast %23 : vector<1x32xf32> to vector<16x32xf32>
    %25 = arith.addf %22, %24 : vector<16x32xf32>
    %26 = arith.truncf %25 : vector<16x32xf32> to vector<16x32xbf16>
    %c0_9 = arith.constant 0 : index
    %c0_10 = arith.constant 0 : index
    %27 = vector.load %arg5[%c0_9, %c0_10] : memref<32x96xbf16, #tpu.memory_space<vmem>>, vector<32x96xbf16>
    %cst_11 = arith.constant dense<0.000000e+00> : vector<16x96xf32>
    %28 = tpu.matmul %26, %27, %cst_11 {dimension_numbers = #tpu.dot_dimension_numbers<[1], [0], [0], [1], [0, 0, 1, 1], [], []>} : vector<16x32xbf16>, vector<32x96xbf16>, vector<16x96xf32> -> vector<16x96xf32>
    %c0_12 = arith.constant 0 : index
    %c0_13 = arith.constant 0 : index
    %29 = vector.load %arg6[%c0_12, %c0_13] : memref<1x96xf32, #tpu.memory_space<vmem>>, vector<1x96xf32>
    %30 = vector.broadcast %29 : vector<1x96xf32> to vector<16x96xf32>
    %31 = arith.addf %28, %30 : vector<16x96xf32>
    %32 = arith.truncf %31 : vector<16x96xf32> to vector<16x96xbf16>
    %c0_14 = arith.constant 0 : index
    %c0_15 = arith.constant 0 : index
    %33 = vector.load %arg7[%c0_14, %c0_15] : memref<16x96xbf16, #tpu.memory_space<vmem>>, vector<16x96xbf16>
    tpu.vector_store %arg7[%c0_14, %c0_15], %32 {strides = array<i32>} : memref<16x96xbf16, #tpu.memory_space<vmem>>, vector<16x96xbf16>,
    return
  }
  func.func @transform_0(%arg0: i32, %arg1: i32) -> (i32, i32) {
    %c0_i32 = arith.constant 0 : i32
    %c0_i32_0 = arith.constant 0 : i32
    return %arg0, %c0_i32 : i32, i32
  }
  func.func @transform_1(%arg0: i32, %arg1: i32) -> (i32, i32) {
    %c0_i32 = arith.constant 0 : i32
    %c0_i32_0 = arith.constant 0 : i32
    %c0_i32_1 = arith.constant 0 : i32
    return %c0_i32, %c0_i32_0 : i32, i32
  }
  func.func @transform_2(%arg0: i32, %arg1: i32) -> (i32, i32) {
    %c0_i32 = arith.constant 0 : i32
    %c0_i32_0 = arith.constant 0 : i32
    %c0_i32_1 = arith.constant 0 : i32
    return %c0_i32, %c0_i32_0 : i32, i32
  }
  func.func @transform_3(%arg0: i32, %arg1: i32) -> (i32, i32) {
    %c0_i32 = arith.constant 0 : i32
    %c0_i32_0 = arith.constant 0 : i32
    return %c0_i32, %arg1 : i32, i32
  }
  func.func @transform_4(%arg0: i32, %arg1: i32) -> (i32, i32) {
    %c0_i32 = arith.constant 0 : i32
    %c0_i32_0 = arith.constant 0 : i32
    return %c0_i32, %arg1 : i32, i32
  }
  func.func @transform_5(%arg0: i32, %arg1: i32) -> (i32, i32) {
    %c0_i32 = arith.constant 0 : i32
    return %arg0, %arg1 : i32, i32
  }
}

module attributes {stable_mosaic.version = 11 : i64} {
  func.func @_mlp_kernel(%arg0: i32, %arg1: i32, %arg2: memref<16x32xbf16, #tpu.memory_space<vmem>>, %arg3: memref<1x32xf32, #tpu.memory_space<vmem>>, %arg4: memref<1x32xf32, #tpu.memory_space<vmem>>, %arg5: memref<32x128xbf16, #tpu.memory_space<vmem>>, %arg6: memref<1x128xf32, #tpu.memory_space<vmem>>, %arg7: memref<128x32xbf16, #tpu.memory_space<vmem>>, %arg8: memref<1x32xf32, #tpu.memory_space<vmem>>, %arg9: memref<16x32xbf16, #tpu.memory_space<vmem>>, %arg10: memref<16x32xf32, #tpu.memory_space<vmem>>, %arg11: memref<16x32xbf16, #tpu.memory_space<vmem>>) attributes {dimension_semantics = [#tpu.dimension_semantics<parallel>, #tpu.dimension_semantics<arbitrary>], iteration_bounds = array<i64: 1, 1>, scalar_prefetch = 0 : i64, scratch_operands = 2 : i64, tpu.core_type = #tpu.core_type<tc>, window_params = [{transform_indices = @transform_0, window_bounds = array<i64: 16, 32>}, {pipeline_mode = #tpu.pipeline_mode<synchronous>, transform_indices = @transform_1, window_bounds = array<i64: 1, 32>}, {pipeline_mode = #tpu.pipeline_mode<synchronous>, transform_indices = @transform_2, window_bounds = array<i64: 1, 32>}, {transform_indices = @transform_3, window_bounds = array<i64: 32, 128>}, {transform_indices = @transform_4, window_bounds = array<i64: 1, 128>}, {transform_indices = @transform_5, window_bounds = array<i64: 128, 32>}, {pipeline_mode = #tpu.pipeline_mode<synchronous>, transform_indices = @transform_6, window_bounds = array<i64: 1, 32>}, {transform_indices = @transform_7, window_bounds = array<i64: 16, 32>}]} {
    %c0_i32 = arith.constant 0 : i32
    %0 = arith.cmpi eq, %arg1, %c0_i32 : i32
    %1 = arith.extui %0 : i1 to i32
    %c0_i32_0 = arith.constant 0 : i32
    %2 = arith.cmpi ne, %1, %c0_i32_0 : i32
    scf.if %2 {
      %cst_19 = arith.constant 0.000000e+00 : f32
      %31 = vector.broadcast %cst_19 : f32 to vector<16x32xf32>
      %c0_20 = arith.constant 0 : index
      %c0_21 = arith.constant 0 : index
      %32 = vector.load %arg10[%c0_20, %c0_21] : memref<16x32xf32, #tpu.memory_space<vmem>>, vector<16x32xf32>
      tpu.vector_store %arg10[%c0_20, %c0_21], %31 {strides = array<i32>} : memref<16x32xf32, #tpu.memory_space<vmem>>, vector<16x32xf32>,
      %c0_22 = arith.constant 0 : index
      %c0_23 = arith.constant 0 : index
      %33 = vector.load %arg2[%c0_22, %c0_23] : memref<16x32xbf16, #tpu.memory_space<vmem>>, vector<16x32xbf16>
      %34 = arith.extf %33 : vector<16x32xbf16> to vector<16x32xf32>
      %cst_24 = arith.constant dense<0.000000e+00> : vector<16xf32>
      %35 = vector.multi_reduction <add>, %34, %cst_24 [1] : vector<16x32xf32> to vector<16xf32>
      %36 = vector.shape_cast %35 : vector<16xf32> to vector<16x1xf32>
      %cst_25 = arith.constant 3.200000e+01 : f32
      %37 = vector.broadcast %cst_25 : f32 to vector<16x1xf32>
      %38 = arith.divf %36, %37 : vector<16x1xf32>
      %39 = vector.broadcast %38 : vector<16x1xf32> to vector<16x32xf32>
      %40 = arith.subf %34, %39 : vector<16x32xf32>
      %41 = arith.mulf %40, %40 : vector<16x32xf32>
      %cst_26 = arith.constant dense<0.000000e+00> : vector<16xf32>
      %42 = vector.multi_reduction <add>, %41, %cst_26 [1] : vector<16x32xf32> to vector<16xf32>
      %43 = vector.shape_cast %42 : vector<16xf32> to vector<16x1xf32>
      %cst_27 = arith.constant 3.200000e+01 : f32
      %44 = vector.broadcast %cst_27 : f32 to vector<16x1xf32>
      %45 = arith.divf %43, %44 : vector<16x1xf32>
      %46 = vector.broadcast %38 : vector<16x1xf32> to vector<16x32xf32>
      %47 = arith.subf %34, %46 : vector<16x32xf32>
      %cst_28 = arith.constant 9.99999974E-6 : f32
      %48 = vector.broadcast %cst_28 : f32 to vector<16x1xf32>
      %49 = arith.addf %45, %48 : vector<16x1xf32>
      %50 = math.rsqrt %49 : vector<16x1xf32>
      %51 = vector.broadcast %50 : vector<16x1xf32> to vector<16x32xf32>
      %52 = arith.mulf %47, %51 : vector<16x32xf32>
      %c0_29 = arith.constant 0 : index
      %c0_30 = arith.constant 0 : index
      %53 = vector.load %arg3[%c0_29, %c0_30] : memref<1x32xf32, #tpu.memory_space<vmem>>, vector<1x32xf32>
      %54 = vector.broadcast %53 : vector<1x32xf32> to vector<16x32xf32>
      %55 = arith.mulf %52, %54 : vector<16x32xf32>
      %c0_31 = arith.constant 0 : index
      %c0_32 = arith.constant 0 : index
      %56 = vector.load %arg4[%c0_31, %c0_32] : memref<1x32xf32, #tpu.memory_space<vmem>>, vector<1x32xf32>
      %57 = vector.broadcast %56 : vector<1x32xf32> to vector<16x32xf32>
      %58 = arith.addf %55, %57 : vector<16x32xf32>
      %59 = arith.truncf %58 : vector<16x32xf32> to vector<16x32xbf16>
      %c0_33 = arith.constant 0 : index
      %c0_34 = arith.constant 0 : index
      %60 = vector.load %arg11[%c0_33, %c0_34] : memref<16x32xbf16, #tpu.memory_space<vmem>>, vector<16x32xbf16>
      tpu.vector_store %arg11[%c0_33, %c0_34], %59 {strides = array<i32>} : memref<16x32xbf16, #tpu.memory_space<vmem>>, vector<16x32xbf16>,
    } else {
    }
    %c0 = arith.constant 0 : index
    %c0_1 = arith.constant 0 : index
    %3 = vector.load %arg11[%c0, %c0_1] : memref<16x32xbf16, #tpu.memory_space<vmem>>, vector<16x32xbf16>
    %c0_2 = arith.constant 0 : index
    %c0_3 = arith.constant 0 : index
    %4 = vector.load %arg5[%c0_2, %c0_3] : memref<32x128xbf16, #tpu.memory_space<vmem>>, vector<32x128xbf16>
    %cst = arith.constant dense<0.000000e+00> : vector<16x128xf32>
    %5 = tpu.matmul %3, %4, %cst {dimension_numbers = #tpu.dot_dimension_numbers<[1], [0], [0], [1], [0, 0, 1, 1], [], []>} : vector<16x32xbf16>, vector<32x128xbf16>, vector<16x128xf32> -> vector<16x128xf32>
    %c0_4 = arith.constant 0 : index
    %c0_5 = arith.constant 0 : index
    %6 = vector.load %arg6[%c0_4, %c0_5] : memref<1x128xf32, #tpu.memory_space<vmem>>, vector<1x128xf32>
    %7 = vector.broadcast %6 : vector<1x128xf32> to vector<16x128xf32>
    %8 = arith.addf %5, %7 : vector<16x128xf32>
    %cst_6 = arith.constant 5.000000e-01 : f32
    %9 = vector.broadcast %cst_6 : f32 to vector<16x128xf32>
    %10 = arith.mulf %9, %8 : vector<16x128xf32>
    %cst_7 = arith.constant 4.471500e-02 : f32
    %11 = vector.broadcast %cst_7 : f32 to vector<16x128xf32>
    %12 = arith.mulf %11, %8 : vector<16x128xf32>
    %13 = arith.mulf %12, %8 : vector<16x128xf32>
    %14 = arith.mulf %13, %8 : vector<16x128xf32>
    %15 = arith.addf %8, %14 : vector<16x128xf32>
    %cst_8 = arith.constant 0.797884583 : f32
    %16 = vector.broadcast %cst_8 : f32 to vector<16x128xf32>
    %17 = arith.mulf %16, %15 : vector<16x128xf32>
    %18 = math.tanh %17 : vector<16x128xf32>
    %cst_9 = arith.constant 1.000000e+00 : f32
    %19 = vector.broadcast %cst_9 : f32 to vector<16x128xf32>
    %20 = arith.addf %19, %18 : vector<16x128xf32>
    %21 = arith.mulf %10, %20 : vector<16x128xf32>
    %c0_10 = arith.constant 0 : index
    %c0_11 = arith.constant 0 : index
    %22 = vector.load %arg10[%c0_10, %c0_11] : memref<16x32xf32, #tpu.memory_space<vmem>>, vector<16x32xf32>
    %23 = arith.truncf %21 : vector<16x128xf32> to vector<16x128xbf16>
    %c0_12 = arith.constant 0 : index
    %c0_13 = arith.constant 0 : index
    %24 = vector.load %arg7[%c0_12, %c0_13] : memref<128x32xbf16, #tpu.memory_space<vmem>>, vector<128x32xbf16>
    %cst_14 = arith.constant dense<0.000000e+00> : vector<16x32xf32>
    %25 = tpu.matmul %23, %24, %cst_14 {dimension_numbers = #tpu.dot_dimension_numbers<[1], [0], [0], [1], [0, 0, 1, 1], [], []>} : vector<16x128xbf16>, vector<128x32xbf16>, vector<16x32xf32> -> vector<16x32xf32>
    %26 = arith.addf %22, %25 : vector<16x32xf32>
    %c0_15 = arith.constant 0 : index
    %c0_16 = arith.constant 0 : index
    %27 = vector.load %arg10[%c0_15, %c0_16] : memref<16x32xf32, #tpu.memory_space<vmem>>, vector<16x32xf32>
    tpu.vector_store %arg10[%c0_15, %c0_16], %26 {strides = array<i32>} : memref<16x32xf32, #tpu.memory_space<vmem>>, vector<16x32xf32>,
    %c0_i32_17 = arith.constant 0 : i32
    %28 = arith.cmpi eq, %arg1, %c0_i32_17 : i32
    %29 = arith.extui %28 : i1 to i32
    %c0_i32_18 = arith.constant 0 : i32
    %30 = arith.cmpi ne, %29, %c0_i32_18 : i32
    scf.if %30 {
      %c0_19 = arith.constant 0 : index
      %c0_20 = arith.constant 0 : index
      %31 = vector.load %arg2[%c0_19, %c0_20] : memref<16x32xbf16, #tpu.memory_space<vmem>>, vector<16x32xbf16>
      %32 = arith.extf %31 : vector<16x32xbf16> to vector<16x32xf32>
      %c0_21 = arith.constant 0 : index
      %c0_22 = arith.constant 0 : index
      %33 = vector.load %arg10[%c0_21, %c0_22] : memref<16x32xf32, #tpu.memory_space<vmem>>, vector<16x32xf32>
      %34 = arith.addf %32, %33 : vector<16x32xf32>
      %c0_23 = arith.constant 0 : index
      %c0_24 = arith.constant 0 : index
      %35 = vector.load %arg8[%c0_23, %c0_24] : memref<1x32xf32, #tpu.memory_space<vmem>>, vector<1x32xf32>
      %36 = vector.broadcast %35 : vector<1x32xf32> to vector<16x32xf32>
      %37 = arith.addf %34, %36 : vector<16x32xf32>
      %38 = arith.truncf %37 : vector<16x32xf32> to vector<16x32xbf16>
      %c0_25 = arith.constant 0 : index
      %c0_26 = arith.constant 0 : index
      %39 = vector.load %arg9[%c0_25, %c0_26] : memref<16x32xbf16, #tpu.memory_space<vmem>>, vector<16x32xbf16>
      tpu.vector_store %arg9[%c0_25, %c0_26], %38 {strides = array<i32>} : memref<16x32xbf16, #tpu.memory_space<vmem>>, vector<16x32xbf16>,
    } else {
    }
    return
  }
  func.func @transform_0(%arg0: i32, %arg1: i32) -> (i32, i32) {
    %c0_i32 = arith.constant 0 : i32
    %c0_i32_0 = arith.constant 0 : i32
    return %arg0, %c0_i32 : i32, i32
  }
  func.func @transform_1(%arg0: i32, %arg1: i32) -> (i32, i32) {
    %c0_i32 = arith.constant 0 : i32
    %c0_i32_0 = arith.constant 0 : i32
    %c0_i32_1 = arith.constant 0 : i32
    return %c0_i32, %c0_i32_0 : i32, i32
  }
  func.func @transform_2(%arg0: i32, %arg1: i32) -> (i32, i32) {
    %c0_i32 = arith.constant 0 : i32
    %c0_i32_0 = arith.constant 0 : i32
    %c0_i32_1 = arith.constant 0 : i32
    return %c0_i32, %c0_i32_0 : i32, i32
  }
  func.func @transform_3(%arg0: i32, %arg1: i32) -> (i32, i32) {
    %c0_i32 = arith.constant 0 : i32
    %c0_i32_0 = arith.constant 0 : i32
    return %c0_i32, %arg1 : i32, i32
  }
  func.func @transform_4(%arg0: i32, %arg1: i32) -> (i32, i32) {
    %c0_i32 = arith.constant 0 : i32
    %c0_i32_0 = arith.constant 0 : i32
    return %c0_i32, %arg1 : i32, i32
  }
  func.func @transform_5(%arg0: i32, %arg1: i32) -> (i32, i32) {
    %c0_i32 = arith.constant 0 : i32
    %c0_i32_0 = arith.constant 0 : i32
    return %arg1, %c0_i32 : i32, i32
  }
  func.func @transform_6(%arg0: i32, %arg1: i32) -> (i32, i32) {
    %c0_i32 = arith.constant 0 : i32
    %c0_i32_0 = arith.constant 0 : i32
    %c0_i32_1 = arith.constant 0 : i32
    return %c0_i32, %c0_i32_0 : i32, i32
  }
  func.func @transform_7(%arg0: i32, %arg1: i32) -> (i32, i32) {
    %c0_i32 = arith.constant 0 : i32
    %c0_i32_0 = arith.constant 0 : i32
    return %arg0, %c0_i32 : i32, i32
  }
}

module attributes {stable_mosaic.version = 11 : i64} {
  func.func @_ln_linear_kernel(%arg0: i32, %arg1: i32, %arg2: memref<16x128xbf16, #tpu.memory_space<vmem>>, %arg3: memref<1x128xf32, #tpu.memory_space<vmem>>, %arg4: memref<1x128xf32, #tpu.memory_space<vmem>>, %arg5: memref<128x64xbf16, #tpu.memory_space<vmem>>, %arg6: memref<1x64xf32, #tpu.memory_space<vmem>>, %arg7: memref<16x64xbf16, #tpu.memory_space<vmem>>) attributes {dimension_semantics = [#tpu.dimension_semantics<parallel>, #tpu.dimension_semantics<parallel>], iteration_bounds = array<i64: 1, 1>, scalar_prefetch = 0 : i64, scratch_operands = 0 : i64, tpu.core_type = #tpu.core_type<tc>, window_params = [{transform_indices = @transform_0, window_bounds = array<i64: 16, 128>}, {pipeline_mode = #tpu.pipeline_mode<synchronous>, transform_indices = @transform_1, window_bounds = array<i64: 1, 128>}, {pipeline_mode = #tpu.pipeline_mode<synchronous>, transform_indices = @transform_2, window_bounds = array<i64: 1, 128>}, {transform_indices = @transform_3, window_bounds = array<i64: 128, 64>}, {transform_indices = @transform_4, window_bounds = array<i64: 1, 64>}, {transform_indices = @transform_5, window_bounds = array<i64: 16, 64>}]} {
    %c0 = arith.constant 0 : index
    %c0_0 = arith.constant 0 : index
    %0 = vector.load %arg2[%c0, %c0_0] : memref<16x128xbf16, #tpu.memory_space<vmem>>, vector<16x128xbf16>
    %1 = arith.extf %0 : vector<16x128xbf16> to vector<16x128xf32>
    %cst = arith.constant dense<0.000000e+00> : vector<16xf32>
    %2 = vector.multi_reduction <add>, %1, %cst [1] : vector<16x128xf32> to vector<16xf32>
    %3 = vector.shape_cast %2 : vector<16xf32> to vector<16x1xf32>
    %cst_1 = arith.constant 1.280000e+02 : f32
    %4 = vector.broadcast %cst_1 : f32 to vector<16x1xf32>
    %5 = arith.divf %3, %4 : vector<16x1xf32>
    %6 = vector.broadcast %5 : vector<16x1xf32> to vector<16x128xf32>
    %7 = arith.subf %1, %6 : vector<16x128xf32>
    %8 = arith.mulf %7, %7 : vector<16x128xf32>
    %cst_2 = arith.constant dense<0.000000e+00> : vector<16xf32>
    %9 = vector.multi_reduction <add>, %8, %cst_2 [1] : vector<16x128xf32> to vector<16xf32>
    %10 = vector.shape_cast %9 : vector<16xf32> to vector<16x1xf32>
    %cst_3 = arith.constant 1.280000e+02 : f32
    %11 = vector.broadcast %cst_3 : f32 to vector<16x1xf32>
    %12 = arith.divf %10, %11 : vector<16x1xf32>
    %13 = vector.broadcast %5 : vector<16x1xf32> to vector<16x128xf32>
    %14 = arith.subf %1, %13 : vector<16x128xf32>
    %cst_4 = arith.constant 9.99999974E-6 : f32
    %15 = vector.broadcast %cst_4 : f32 to vector<16x1xf32>
    %16 = arith.addf %12, %15 : vector<16x1xf32>
    %17 = math.rsqrt %16 : vector<16x1xf32>
    %18 = vector.broadcast %17 : vector<16x1xf32> to vector<16x128xf32>
    %19 = arith.mulf %14, %18 : vector<16x128xf32>
    %c0_5 = arith.constant 0 : index
    %c0_6 = arith.constant 0 : index
    %20 = vector.load %arg3[%c0_5, %c0_6] : memref<1x128xf32, #tpu.memory_space<vmem>>, vector<1x128xf32>
    %21 = vector.broadcast %20 : vector<1x128xf32> to vector<16x128xf32>
    %22 = arith.mulf %19, %21 : vector<16x128xf32>
    %c0_7 = arith.constant 0 : index
    %c0_8 = arith.constant 0 : index
    %23 = vector.load %arg4[%c0_7, %c0_8] : memref<1x128xf32, #tpu.memory_space<vmem>>, vector<1x128xf32>
    %24 = vector.broadcast %23 : vector<1x128xf32> to vector<16x128xf32>
    %25 = arith.addf %22, %24 : vector<16x128xf32>
    %26 = arith.truncf %25 : vector<16x128xf32> to vector<16x128xbf16>
    %c0_9 = arith.constant 0 : index
    %c0_10 = arith.constant 0 : index
    %27 = vector.load %arg5[%c0_9, %c0_10] : memref<128x64xbf16, #tpu.memory_space<vmem>>, vector<128x64xbf16>
    %cst_11 = arith.constant dense<0.000000e+00> : vector<16x64xf32>
    %28 = tpu.matmul %26, %27, %cst_11 {dimension_numbers = #tpu.dot_dimension_numbers<[1], [0], [0], [1], [0, 0, 1, 1], [], []>} : vector<16x128xbf16>, vector<128x64xbf16>, vector<16x64xf32> -> vector<16x64xf32>
    %c0_12 = arith.constant 0 : index
    %c0_13 = arith.constant 0 : index
    %29 = vector.load %arg6[%c0_12, %c0_13] : memref<1x64xf32, #tpu.memory_space<vmem>>, vector<1x64xf32>
    %30 = vector.broadcast %29 : vector<1x64xf32> to vector<16x64xf32>
    %31 = arith.addf %28, %30 : vector<16x64xf32>
    %32 = arith.truncf %31 : vector<16x64xf32> to vector<16x64xbf16>
    %c0_14 = arith.constant 0 : index
    %c0_15 = arith.constant 0 : index
    %33 = vector.load %arg7[%c0_14, %c0_15] : memref<16x64xbf16, #tpu.memory_space<vmem>>, vector<16x64xbf16>
    tpu.vector_store %arg7[%c0_14, %c0_15], %32 {strides = array<i32>} : memref<16x64xbf16, #tpu.memory_space<vmem>>, vector<16x64xbf16>,
    return
  }
  func.func @transform_0(%arg0: i32, %arg1: i32) -> (i32, i32) {
    %c0_i32 = arith.constant 0 : i32
    %c0_i32_0 = arith.constant 0 : i32
    return %arg0, %c0_i32 : i32, i32
  }
  func.func @transform_1(%arg0: i32, %arg1: i32) -> (i32, i32) {
    %c0_i32 = arith.constant 0 : i32
    %c0_i32_0 = arith.constant 0 : i32
    %c0_i32_1 = arith.constant 0 : i32
    return %c0_i32, %c0_i32_0 : i32, i32
  }
  func.func @transform_2(%arg0: i32, %arg1: i32) -> (i32, i32) {
    %c0_i32 = arith.constant 0 : i32
    %c0_i32_0 = arith.constant 0 : i32
    %c0_i32_1 = arith.constant 0 : i32
    return %c0_i32, %c0_i32_0 : i32, i32
  }
  func.func @transform_3(%arg0: i32, %arg1: i32) -> (i32, i32) {
    %c0_i32 = arith.constant 0 : i32
    %c0_i32_0 = arith.constant 0 : i32
    return %c0_i32, %arg1 : i32, i32
  }
  func.func @transform_4(%arg0: i32, %arg1: i32) -> (i32, i32) {
    %c0_i32 = arith.constant 0 : i32
    %c0_i32_0 = arith.constant 0 : i32
    return %c0_i32, %arg1 : i32, i32
  }
  func.func @transform_5(%arg0: i32, %arg1: i32) -> (i32, i32) {
    %c0_i32 = arith.constant 0 : i32
    return %arg0, %arg1 : i32, i32
  }
}

module attributes {stable_mosaic.version = 11 : i64} {
  func.func @_window_attn_kernel(%arg0: i32, %arg1: memref<1x2x192xbf16, #tpu.memory_space<vmem>>, %arg2: memref<4x2x2xbf16, #tpu.memory_space<vmem>>, %arg3: memref<1x2x64xbf16, #tpu.memory_space<vmem>>) attributes {dimension_semantics = [#tpu.dimension_semantics<parallel>], iteration_bounds = array<i64: 2>, scalar_prefetch = 0 : i64, scratch_operands = 0 : i64, tpu.core_type = #tpu.core_type<tc>, window_params = [{transform_indices = @transform_0, window_bounds = array<i64: 1, 2, 192>}, {pipeline_mode = #tpu.pipeline_mode<synchronous>, transform_indices = @transform_1, window_bounds = array<i64: 4, 2, 2>}, {transform_indices = @transform_2, window_bounds = array<i64: 1, 2, 64>}]} {
    %c0 = arith.constant 0 : index
    %c0_0 = arith.constant 0 : index
    %c0_1 = arith.constant 0 : index
    %0 = vector.load %arg2[%c0, %c0_0, %c0_1] : memref<4x2x2xbf16, #tpu.memory_space<vmem>>, vector<4x2x2xbf16>
    %1 = arith.extf %0 : vector<4x2x2xbf16> to vector<4x2x2xf32>
    %c0_2 = arith.constant 0 : index
    %c0_3 = arith.constant 0 : index
    %c0_4 = arith.constant 0 : index
    %2 = vector.load %arg1[%c0_2, %c0_3, %c0_4] : memref<1x2x192xbf16, #tpu.memory_space<vmem>>, vector<1x2x16xbf16>
    %c0_5 = arith.constant 0 : index
    %c0_6 = arith.constant 0 : index
    %c64 = arith.constant 64 : index
    %3 = vector.load %arg1[%c0_5, %c0_6, %c64] : memref<1x2x192xbf16, #tpu.memory_space<vmem>>, vector<1x2x16xbf16>
    %c0_7 = arith.constant 0 : index
    %c0_8 = arith.constant 0 : index
    %c128 = arith.constant 128 : index
    %4 = vector.load %arg1[%c0_7, %c0_8, %c128] : memref<1x2x192xbf16, #tpu.memory_space<vmem>>, vector<1x2x16xbf16>
    "tpu.trace_start"() <{level = 10 : i32, message = "wld,wmd->wlm"}> : () -> ()
    %cst = arith.constant dense<0.000000e+00> : vector<1x2x2xf32>
    %5 = tpu.matmul %2, %3, %cst {dimension_numbers = #tpu.dot_dimension_numbers<[2], [2], [1], [1], [0, 0, 0, 1, 1, 1], [0], [0]>} : vector<1x2x16xbf16>, vector<1x2x16xbf16>, vector<1x2x2xf32> -> vector<1x2x2xf32>
    "tpu.trace_stop"() : () -> ()
    %cst_9 = arith.constant 2.500000e-01 : f32
    %6 = vector.broadcast %cst_9 : f32 to vector<1x2x2xf32>
    %7 = arith.mulf %5, %6 : vector<1x2x2xf32>
    %8 = vector.extract_strided_slice %1 {offsets = [0, 0, 0], sizes = [1, 2, 2], strides = [1, 1, 1]} : vector<4x2x2xf32> to vector<1x2x2xf32>
    %9 = vector.shape_cast %8 : vector<1x2x2xf32> to vector<2x2xf32>
    %10 = vector.shape_cast %9 : vector<2x2xf32> to vector<1x2x2xf32>
    %11 = arith.addf %7, %10 : vector<1x2x2xf32>
    %cst_10 = arith.constant dense<0xFF800000> : vector<1x2xf32>
    %12 = vector.multi_reduction <maximumf>, %11, %cst_10 [2] : vector<1x2x2xf32> to vector<1x2xf32>
    %13 = vector.shape_cast %12 : vector<1x2xf32> to vector<1x2x1xf32>
    %14 = vector.broadcast %13 : vector<1x2x1xf32> to vector<1x2x2xf32>
    %15 = arith.subf %11, %14 : vector<1x2x2xf32>
    %16 = math.exp %15 : vector<1x2x2xf32>
    %cst_11 = arith.constant dense<0.000000e+00> : vector<1x2xf32>
    %17 = vector.multi_reduction <add>, %16, %cst_11 [2] : vector<1x2x2xf32> to vector<1x2xf32>
    %18 = vector.shape_cast %17 : vector<1x2xf32> to vector<1x2x1xf32>
    %19 = tpu.reciprocal %18 {approx = true} : vector<1x2x1xf32> -> vector<1x2x1xf32>
    %20 = vector.broadcast %19 : vector<1x2x1xf32> to vector<1x2x2xf32>
    %21 = arith.mulf %16, %20 : vector<1x2x2xf32>
    %22 = arith.truncf %21 : vector<1x2x2xf32> to vector<1x2x2xbf16>
    "tpu.trace_start"() <{level = 10 : i32, message = "wlm,wmd->wld"}> : () -> ()
    %cst_12 = arith.constant dense<0.000000e+00> : vector<1x2x16xf32>
    %23 = tpu.matmul %22, %4, %cst_12 {dimension_numbers = #tpu.dot_dimension_numbers<[2], [1], [1], [2], [0, 0, 0, 1, 1, 2], [0], [0]>} : vector<1x2x2xbf16>, vector<1x2x16xbf16>, vector<1x2x16xf32> -> vector<1x2x16xf32>
    "tpu.trace_stop"() : () -> ()
    %24 = arith.truncf %23 : vector<1x2x16xf32> to vector<1x2x16xbf16>
    %c0_13 = arith.constant 0 : index
    %c0_14 = arith.constant 0 : index
    %c0_15 = arith.constant 0 : index
    %25 = vector.load %arg3[%c0_13, %c0_14, %c0_15] : memref<1x2x64xbf16, #tpu.memory_space<vmem>>, vector<1x2x16xbf16>
    tpu.vector_store %arg3[%c0_13, %c0_14, %c0_15], %24 {strides = array<i32>} : memref<1x2x64xbf16, #tpu.memory_space<vmem>>, vector<1x2x16xbf16>,
    %c0_16 = arith.constant 0 : index
    %c0_17 = arith.constant 0 : index
    %c16 = arith.constant 16 : index
    %26 = vector.load %arg1[%c0_16, %c0_17, %c16] : memref<1x2x192xbf16, #tpu.memory_space<vmem>>, vector<1x2x16xbf16>
    %c0_18 = arith.constant 0 : index
    %c0_19 = arith.constant 0 : index
    %c80 = arith.constant 80 : index
    %27 = vector.load %arg1[%c0_18, %c0_19, %c80] : memref<1x2x192xbf16, #tpu.memory_space<vmem>>, vector<1x2x16xbf16>
    %c0_20 = arith.constant 0 : index
    %c0_21 = arith.constant 0 : index
    %c144 = arith.constant 144 : index
    %28 = vector.load %arg1[%c0_20, %c0_21, %c144] : memref<1x2x192xbf16, #tpu.memory_space<vmem>>, vector<1x2x16xbf16>
    "tpu.trace_start"() <{level = 10 : i32, message = "wld,wmd->wlm"}> : () -> ()
    %cst_22 = arith.constant dense<0.000000e+00> : vector<1x2x2xf32>
    %29 = tpu.matmul %26, %27, %cst_22 {dimension_numbers = #tpu.dot_dimension_numbers<[2], [2], [1], [1], [0, 0, 0, 1, 1, 1], [0], [0]>} : vector<1x2x16xbf16>, vector<1x2x16xbf16>, vector<1x2x2xf32> -> vector<1x2x2xf32>
    "tpu.trace_stop"() : () -> ()
    %cst_23 = arith.constant 2.500000e-01 : f32
    %30 = vector.broadcast %cst_23 : f32 to vector<1x2x2xf32>
    %31 = arith.mulf %29, %30 : vector<1x2x2xf32>
    %32 = vector.extract_strided_slice %1 {offsets = [1, 0, 0], sizes = [1, 2, 2], strides = [1, 1, 1]} : vector<4x2x2xf32> to vector<1x2x2xf32>
    %33 = vector.shape_cast %32 : vector<1x2x2xf32> to vector<2x2xf32>
    %34 = vector.shape_cast %33 : vector<2x2xf32> to vector<1x2x2xf32>
    %35 = arith.addf %31, %34 : vector<1x2x2xf32>
    %cst_24 = arith.constant dense<0xFF800000> : vector<1x2xf32>
    %36 = vector.multi_reduction <maximumf>, %35, %cst_24 [2] : vector<1x2x2xf32> to vector<1x2xf32>
    %37 = vector.shape_cast %36 : vector<1x2xf32> to vector<1x2x1xf32>
    %38 = vector.broadcast %37 : vector<1x2x1xf32> to vector<1x2x2xf32>
    %39 = arith.subf %35, %38 : vector<1x2x2xf32>
    %40 = math.exp %39 : vector<1x2x2xf32>
    %cst_25 = arith.constant dense<0.000000e+00> : vector<1x2xf32>
    %41 = vector.multi_reduction <add>, %40, %cst_25 [2] : vector<1x2x2xf32> to vector<1x2xf32>
    %42 = vector.shape_cast %41 : vector<1x2xf32> to vector<1x2x1xf32>
    %43 = tpu.reciprocal %42 {approx = true} : vector<1x2x1xf32> -> vector<1x2x1xf32>
    %44 = vector.broadcast %43 : vector<1x2x1xf32> to vector<1x2x2xf32>
    %45 = arith.mulf %40, %44 : vector<1x2x2xf32>
    %46 = arith.truncf %45 : vector<1x2x2xf32> to vector<1x2x2xbf16>
    "tpu.trace_start"() <{level = 10 : i32, message = "wlm,wmd->wld"}> : () -> ()
    %cst_26 = arith.constant dense<0.000000e+00> : vector<1x2x16xf32>
    %47 = tpu.matmul %46, %28, %cst_26 {dimension_numbers = #tpu.dot_dimension_numbers<[2], [1], [1], [2], [0, 0, 0, 1, 1, 2], [0], [0]>} : vector<1x2x2xbf16>, vector<1x2x16xbf16>, vector<1x2x16xf32> -> vector<1x2x16xf32>
    "tpu.trace_stop"() : () -> ()
    %48 = arith.truncf %47 : vector<1x2x16xf32> to vector<1x2x16xbf16>
    %c0_27 = arith.constant 0 : index
    %c0_28 = arith.constant 0 : index
    %c16_29 = arith.constant 16 : index
    %49 = vector.load %arg3[%c0_27, %c0_28, %c16_29] : memref<1x2x64xbf16, #tpu.memory_space<vmem>>, vector<1x2x16xbf16>
    tpu.vector_store %arg3[%c0_27, %c0_28, %c16_29], %48 {strides = array<i32>} : memref<1x2x64xbf16, #tpu.memory_space<vmem>>, vector<1x2x16xbf16>,
    %c0_30 = arith.constant 0 : index
    %c0_31 = arith.constant 0 : index
    %c32 = arith.constant 32 : index
    %50 = vector.load %arg1[%c0_30, %c0_31, %c32] : memref<1x2x192xbf16, #tpu.memory_space<vmem>>, vector<1x2x16xbf16>
    %c0_32 = arith.constant 0 : index
    %c0_33 = arith.constant 0 : index
    %c96 = arith.constant 96 : index
    %51 = vector.load %arg1[%c0_32, %c0_33, %c96] : memref<1x2x192xbf16, #tpu.memory_space<vmem>>, vector<1x2x16xbf16>
    %c0_34 = arith.constant 0 : index
    %c0_35 = arith.constant 0 : index
    %c160 = arith.constant 160 : index
    %52 = vector.load %arg1[%c0_34, %c0_35, %c160] : memref<1x2x192xbf16, #tpu.memory_space<vmem>>, vector<1x2x16xbf16>
    "tpu.trace_start"() <{level = 10 : i32, message = "wld,wmd->wlm"}> : () -> ()
    %cst_36 = arith.constant dense<0.000000e+00> : vector<1x2x2xf32>
    %53 = tpu.matmul %50, %51, %cst_36 {dimension_numbers = #tpu.dot_dimension_numbers<[2], [2], [1], [1], [0, 0, 0, 1, 1, 1], [0], [0]>} : vector<1x2x16xbf16>, vector<1x2x16xbf16>, vector<1x2x2xf32> -> vector<1x2x2xf32>
    "tpu.trace_stop"() : () -> ()
    %cst_37 = arith.constant 2.500000e-01 : f32
    %54 = vector.broadcast %cst_37 : f32 to vector<1x2x2xf32>
    %55 = arith.mulf %53, %54 : vector<1x2x2xf32>
    %56 = vector.extract_strided_slice %1 {offsets = [2, 0, 0], sizes = [1, 2, 2], strides = [1, 1, 1]} : vector<4x2x2xf32> to vector<1x2x2xf32>
    %57 = vector.shape_cast %56 : vector<1x2x2xf32> to vector<2x2xf32>
    %58 = vector.shape_cast %57 : vector<2x2xf32> to vector<1x2x2xf32>
    %59 = arith.addf %55, %58 : vector<1x2x2xf32>
    %cst_38 = arith.constant dense<0xFF800000> : vector<1x2xf32>
    %60 = vector.multi_reduction <maximumf>, %59, %cst_38 [2] : vector<1x2x2xf32> to vector<1x2xf32>
    %61 = vector.shape_cast %60 : vector<1x2xf32> to vector<1x2x1xf32>
    %62 = vector.broadcast %61 : vector<1x2x1xf32> to vector<1x2x2xf32>
    %63 = arith.subf %59, %62 : vector<1x2x2xf32>
    %64 = math.exp %63 : vector<1x2x2xf32>
    %cst_39 = arith.constant dense<0.000000e+00> : vector<1x2xf32>
    %65 = vector.multi_reduction <add>, %64, %cst_39 [2] : vector<1x2x2xf32> to vector<1x2xf32>
    %66 = vector.shape_cast %65 : vector<1x2xf32> to vector<1x2x1xf32>
    %67 = tpu.reciprocal %66 {approx = true} : vector<1x2x1xf32> -> vector<1x2x1xf32>
    %68 = vector.broadcast %67 : vector<1x2x1xf32> to vector<1x2x2xf32>
    %69 = arith.mulf %64, %68 : vector<1x2x2xf32>
    %70 = arith.truncf %69 : vector<1x2x2xf32> to vector<1x2x2xbf16>
    "tpu.trace_start"() <{level = 10 : i32, message = "wlm,wmd->wld"}> : () -> ()
    %cst_40 = arith.constant dense<0.000000e+00> : vector<1x2x16xf32>
    %71 = tpu.matmul %70, %52, %cst_40 {dimension_numbers = #tpu.dot_dimension_numbers<[2], [1], [1], [2], [0, 0, 0, 1, 1, 2], [0], [0]>} : vector<1x2x2xbf16>, vector<1x2x16xbf16>, vector<1x2x16xf32> -> vector<1x2x16xf32>
    "tpu.trace_stop"() : () -> ()
    %72 = arith.truncf %71 : vector<1x2x16xf32> to vector<1x2x16xbf16>
    %c0_41 = arith.constant 0 : index
    %c0_42 = arith.constant 0 : index
    %c32_43 = arith.constant 32 : index
    %73 = vector.load %arg3[%c0_41, %c0_42, %c32_43] : memref<1x2x64xbf16, #tpu.memory_space<vmem>>, vector<1x2x16xbf16>
    tpu.vector_store %arg3[%c0_41, %c0_42, %c32_43], %72 {strides = array<i32>} : memref<1x2x64xbf16, #tpu.memory_space<vmem>>, vector<1x2x16xbf16>,
    %c0_44 = arith.constant 0 : index
    %c0_45 = arith.constant 0 : index
    %c48 = arith.constant 48 : index
    %74 = vector.load %arg1[%c0_44, %c0_45, %c48] : memref<1x2x192xbf16, #tpu.memory_space<vmem>>, vector<1x2x16xbf16>
    %c0_46 = arith.constant 0 : index
    %c0_47 = arith.constant 0 : index
    %c112 = arith.constant 112 : index
    %75 = vector.load %arg1[%c0_46, %c0_47, %c112] : memref<1x2x192xbf16, #tpu.memory_space<vmem>>, vector<1x2x16xbf16>
    %c0_48 = arith.constant 0 : index
    %c0_49 = arith.constant 0 : index
    %c176 = arith.constant 176 : index
    %76 = vector.load %arg1[%c0_48, %c0_49, %c176] : memref<1x2x192xbf16, #tpu.memory_space<vmem>>, vector<1x2x16xbf16>
    "tpu.trace_start"() <{level = 10 : i32, message = "wld,wmd->wlm"}> : () -> ()
    %cst_50 = arith.constant dense<0.000000e+00> : vector<1x2x2xf32>
    %77 = tpu.matmul %74, %75, %cst_50 {dimension_numbers = #tpu.dot_dimension_numbers<[2], [2], [1], [1], [0, 0, 0, 1, 1, 1], [0], [0]>} : vector<1x2x16xbf16>, vector<1x2x16xbf16>, vector<1x2x2xf32> -> vector<1x2x2xf32>
    "tpu.trace_stop"() : () -> ()
    %cst_51 = arith.constant 2.500000e-01 : f32
    %78 = vector.broadcast %cst_51 : f32 to vector<1x2x2xf32>
    %79 = arith.mulf %77, %78 : vector<1x2x2xf32>
    %80 = vector.extract_strided_slice %1 {offsets = [3, 0, 0], sizes = [1, 2, 2], strides = [1, 1, 1]} : vector<4x2x2xf32> to vector<1x2x2xf32>
    %81 = vector.shape_cast %80 : vector<1x2x2xf32> to vector<2x2xf32>
    %82 = vector.shape_cast %81 : vector<2x2xf32> to vector<1x2x2xf32>
    %83 = arith.addf %79, %82 : vector<1x2x2xf32>
    %cst_52 = arith.constant dense<0xFF800000> : vector<1x2xf32>
    %84 = vector.multi_reduction <maximumf>, %83, %cst_52 [2] : vector<1x2x2xf32> to vector<1x2xf32>
    %85 = vector.shape_cast %84 : vector<1x2xf32> to vector<1x2x1xf32>
    %86 = vector.broadcast %85 : vector<1x2x1xf32> to vector<1x2x2xf32>
    %87 = arith.subf %83, %86 : vector<1x2x2xf32>
    %88 = math.exp %87 : vector<1x2x2xf32>
    %cst_53 = arith.constant dense<0.000000e+00> : vector<1x2xf32>
    %89 = vector.multi_reduction <add>, %88, %cst_53 [2] : vector<1x2x2xf32> to vector<1x2xf32>
    %90 = vector.shape_cast %89 : vector<1x2xf32> to vector<1x2x1xf32>
    %91 = tpu.reciprocal %90 {approx = true} : vector<1x2x1xf32> -> vector<1x2x1xf32>
    %92 = vector.broadcast %91 : vector<1x2x1xf32> to vector<1x2x2xf32>
    %93 = arith.mulf %88, %92 : vector<1x2x2xf32>
    %94 = arith.truncf %93 : vector<1x2x2xf32> to vector<1x2x2xbf16>
    "tpu.trace_start"() <{level = 10 : i32, message = "wlm,wmd->wld"}> : () -> ()
    %cst_54 = arith.constant dense<0.000000e+00> : vector<1x2x16xf32>
    %95 = tpu.matmul %94, %76, %cst_54 {dimension_numbers = #tpu.dot_dimension_numbers<[2], [1], [1], [2], [0, 0, 0, 1, 1, 2], [0], [0]>} : vector<1x2x2xbf16>, vector<1x2x16xbf16>, vector<1x2x16xf32> -> vector<1x2x16xf32>
    "tpu.trace_stop"() : () -> ()
    %96 = arith.truncf %95 : vector<1x2x16xf32> to vector<1x2x16xbf16>
    %c0_55 = arith.constant 0 : index
    %c0_56 = arith.constant 0 : index
    %c48_57 = arith.constant 48 : index
    %97 = vector.load %arg3[%c0_55, %c0_56, %c48_57] : memref<1x2x64xbf16, #tpu.memory_space<vmem>>, vector<1x2x16xbf16>
    tpu.vector_store %arg3[%c0_55, %c0_56, %c48_57], %96 {strides = array<i32>} : memref<1x2x64xbf16, #tpu.memory_space<vmem>>, vector<1x2x16xbf16>,
    return
  }
  func.func @transform_0(%arg0: i32) -> (i32, i32, i32) {
    %c0_i32 = arith.constant 0 : i32
    %c0_i32_0 = arith.constant 0 : i32
    %c0_i32_1 = arith.constant 0 : i32
    return %arg0, %c0_i32, %c0_i32_0 : i32, i32, i32
  }
  func.func @transform_1(%arg0: i32) -> (i32, i32, i32) {
    %c0_i32 = arith.constant 0 : i32
    %c0_i32_0 = arith.constant 0 : i32
    %c0_i32_1 = arith.constant 0 : i32
    %c0_i32_2 = arith.constant 0 : i32
    return %c0_i32, %c0_i32_0, %c0_i32_1 : i32, i32, i32
  }
  func.func @transform_2(%arg0: i32) -> (i32, i32, i32) {
    %c0_i32 = arith.constant 0 : i32
    %c0_i32_0 = arith.constant 0 : i32
    %c0_i32_1 = arith.constant 0 : i32
    return %arg0, %c0_i32, %c0_i32_0 : i32, i32, i32
  }
}

module attributes {stable_mosaic.version = 11 : i64} {
  func.func @_ln_linear_kernel(%arg0: i32, %arg1: i32, %arg2: memref<16x64xbf16, #tpu.memory_space<vmem>>, %arg3: memref<1x64xf32, #tpu.memory_space<vmem>>, %arg4: memref<1x64xf32, #tpu.memory_space<vmem>>, %arg5: memref<64x192xbf16, #tpu.memory_space<vmem>>, %arg6: memref<1x192xf32, #tpu.memory_space<vmem>>, %arg7: memref<16x192xbf16, #tpu.memory_space<vmem>>) attributes {dimension_semantics = [#tpu.dimension_semantics<parallel>, #tpu.dimension_semantics<parallel>], iteration_bounds = array<i64: 1, 1>, scalar_prefetch = 0 : i64, scratch_operands = 0 : i64, tpu.core_type = #tpu.core_type<tc>, window_params = [{transform_indices = @transform_0, window_bounds = array<i64: 16, 64>}, {pipeline_mode = #tpu.pipeline_mode<synchronous>, transform_indices = @transform_1, window_bounds = array<i64: 1, 64>}, {pipeline_mode = #tpu.pipeline_mode<synchronous>, transform_indices = @transform_2, window_bounds = array<i64: 1, 64>}, {transform_indices = @transform_3, window_bounds = array<i64: 64, 192>}, {transform_indices = @transform_4, window_bounds = array<i64: 1, 192>}, {transform_indices = @transform_5, window_bounds = array<i64: 16, 192>}]} {
    %c0 = arith.constant 0 : index
    %c0_0 = arith.constant 0 : index
    %0 = vector.load %arg2[%c0, %c0_0] : memref<16x64xbf16, #tpu.memory_space<vmem>>, vector<16x64xbf16>
    %1 = arith.extf %0 : vector<16x64xbf16> to vector<16x64xf32>
    %cst = arith.constant dense<0.000000e+00> : vector<16xf32>
    %2 = vector.multi_reduction <add>, %1, %cst [1] : vector<16x64xf32> to vector<16xf32>
    %3 = vector.shape_cast %2 : vector<16xf32> to vector<16x1xf32>
    %cst_1 = arith.constant 6.400000e+01 : f32
    %4 = vector.broadcast %cst_1 : f32 to vector<16x1xf32>
    %5 = arith.divf %3, %4 : vector<16x1xf32>
    %6 = vector.broadcast %5 : vector<16x1xf32> to vector<16x64xf32>
    %7 = arith.subf %1, %6 : vector<16x64xf32>
    %8 = arith.mulf %7, %7 : vector<16x64xf32>
    %cst_2 = arith.constant dense<0.000000e+00> : vector<16xf32>
    %9 = vector.multi_reduction <add>, %8, %cst_2 [1] : vector<16x64xf32> to vector<16xf32>
    %10 = vector.shape_cast %9 : vector<16xf32> to vector<16x1xf32>
    %cst_3 = arith.constant 6.400000e+01 : f32
    %11 = vector.broadcast %cst_3 : f32 to vector<16x1xf32>
    %12 = arith.divf %10, %11 : vector<16x1xf32>
    %13 = vector.broadcast %5 : vector<16x1xf32> to vector<16x64xf32>
    %14 = arith.subf %1, %13 : vector<16x64xf32>
    %cst_4 = arith.constant 9.99999974E-6 : f32
    %15 = vector.broadcast %cst_4 : f32 to vector<16x1xf32>
    %16 = arith.addf %12, %15 : vector<16x1xf32>
    %17 = math.rsqrt %16 : vector<16x1xf32>
    %18 = vector.broadcast %17 : vector<16x1xf32> to vector<16x64xf32>
    %19 = arith.mulf %14, %18 : vector<16x64xf32>
    %c0_5 = arith.constant 0 : index
    %c0_6 = arith.constant 0 : index
    %20 = vector.load %arg3[%c0_5, %c0_6] : memref<1x64xf32, #tpu.memory_space<vmem>>, vector<1x64xf32>
    %21 = vector.broadcast %20 : vector<1x64xf32> to vector<16x64xf32>
    %22 = arith.mulf %19, %21 : vector<16x64xf32>
    %c0_7 = arith.constant 0 : index
    %c0_8 = arith.constant 0 : index
    %23 = vector.load %arg4[%c0_7, %c0_8] : memref<1x64xf32, #tpu.memory_space<vmem>>, vector<1x64xf32>
    %24 = vector.broadcast %23 : vector<1x64xf32> to vector<16x64xf32>
    %25 = arith.addf %22, %24 : vector<16x64xf32>
    %26 = arith.truncf %25 : vector<16x64xf32> to vector<16x64xbf16>
    %c0_9 = arith.constant 0 : index
    %c0_10 = arith.constant 0 : index
    %27 = vector.load %arg5[%c0_9, %c0_10] : memref<64x192xbf16, #tpu.memory_space<vmem>>, vector<64x192xbf16>
    %cst_11 = arith.constant dense<0.000000e+00> : vector<16x192xf32>
    %28 = tpu.matmul %26, %27, %cst_11 {dimension_numbers = #tpu.dot_dimension_numbers<[1], [0], [0], [1], [0, 0, 1, 1], [], []>} : vector<16x64xbf16>, vector<64x192xbf16>, vector<16x192xf32> -> vector<16x192xf32>
    %c0_12 = arith.constant 0 : index
    %c0_13 = arith.constant 0 : index
    %29 = vector.load %arg6[%c0_12, %c0_13] : memref<1x192xf32, #tpu.memory_space<vmem>>, vector<1x192xf32>
    %30 = vector.broadcast %29 : vector<1x192xf32> to vector<16x192xf32>
    %31 = arith.addf %28, %30 : vector<16x192xf32>
    %32 = arith.truncf %31 : vector<16x192xf32> to vector<16x192xbf16>
    %c0_14 = arith.constant 0 : index
    %c0_15 = arith.constant 0 : index
    %33 = vector.load %arg7[%c0_14, %c0_15] : memref<16x192xbf16, #tpu.memory_space<vmem>>, vector<16x192xbf16>
    tpu.vector_store %arg7[%c0_14, %c0_15], %32 {strides = array<i32>} : memref<16x192xbf16, #tpu.memory_space<vmem>>, vector<16x192xbf16>,
    return
  }
  func.func @transform_0(%arg0: i32, %arg1: i32) -> (i32, i32) {
    %c0_i32 = arith.constant 0 : i32
    %c0_i32_0 = arith.constant 0 : i32
    return %arg0, %c0_i32 : i32, i32
  }
  func.func @transform_1(%arg0: i32, %arg1: i32) -> (i32, i32) {
    %c0_i32 = arith.constant 0 : i32
    %c0_i32_0 = arith.constant 0 : i32
    %c0_i32_1 = arith.constant 0 : i32
    return %c0_i32, %c0_i32_0 : i32, i32
  }
  func.func @transform_2(%arg0: i32, %arg1: i32) -> (i32, i32) {
    %c0_i32 = arith.constant 0 : i32
    %c0_i32_0 = arith.constant 0 : i32
    %c0_i32_1 = arith.constant 0 : i32
    return %c0_i32, %c0_i32_0 : i32, i32
  }
  func.func @transform_3(%arg0: i32, %arg1: i32) -> (i32, i32) {
    %c0_i32 = arith.constant 0 : i32
    %c0_i32_0 = arith.constant 0 : i32
    return %c0_i32, %arg1 : i32, i32
  }
  func.func @transform_4(%arg0: i32, %arg1: i32) -> (i32, i32) {
    %c0_i32 = arith.constant 0 : i32
    %c0_i32_0 = arith.constant 0 : i32
    return %c0_i32, %arg1 : i32, i32
  }
  func.func @transform_5(%arg0: i32, %arg1: i32) -> (i32, i32) {
    %c0_i32 = arith.constant 0 : i32
    return %arg0, %arg1 : i32, i32
  }
}

module attributes {stable_mosaic.version = 11 : i64} {
  func.func @_matmul_kernel(%arg0: i32, %arg1: i32, %arg2: i32, %arg3: memref<16x64xbf16, #tpu.memory_space<vmem>>, %arg4: memref<64x64xbf16, #tpu.memory_space<vmem>>, %arg5: memref<1x64xf32, #tpu.memory_space<vmem>>, %arg6: memref<16x64xbf16, #tpu.memory_space<vmem>>, %arg7: memref<16x64xf32, #tpu.memory_space<vmem>>) attributes {dimension_semantics = [#tpu.dimension_semantics<parallel>, #tpu.dimension_semantics<parallel>, #tpu.dimension_semantics<arbitrary>], iteration_bounds = array<i64: 1, 1, 1>, scalar_prefetch = 0 : i64, scratch_operands = 1 : i64, tpu.core_type = #tpu.core_type<tc>, window_params = [{transform_indices = @transform_0, window_bounds = array<i64: 16, 64>}, {transform_indices = @transform_1, window_bounds = array<i64: 64, 64>}, {transform_indices = @transform_2, window_bounds = array<i64: 1, 64>}, {transform_indices = @transform_3, window_bounds = array<i64: 16, 64>}]} {
    %c0_i32 = arith.constant 0 : i32
    %0 = arith.cmpi eq, %arg2, %c0_i32 : i32
    %1 = arith.extui %0 : i1 to i32
    %c0_i32_0 = arith.constant 0 : i32
    %2 = arith.cmpi ne, %1, %c0_i32_0 : i32
    scf.if %2 {
      %cst_10 = arith.constant 0.000000e+00 : f32
      %12 = vector.broadcast %cst_10 : f32 to vector<16x64xf32>
      %c0_11 = arith.constant 0 : index
      %c0_12 = arith.constant 0 : index
      %13 = vector.load %arg7[%c0_11, %c0_12] : memref<16x64xf32, #tpu.memory_space<vmem>>, vector<16x64xf32>
      tpu.vector_store %arg7[%c0_11, %c0_12], %12 {strides = array<i32>} : memref<16x64xf32, #tpu.memory_space<vmem>>, vector<16x64xf32>,
    } else {
    }
    %c0 = arith.constant 0 : index
    %c0_1 = arith.constant 0 : index
    %3 = vector.load %arg7[%c0, %c0_1] : memref<16x64xf32, #tpu.memory_space<vmem>>, vector<16x64xf32>
    %c0_2 = arith.constant 0 : index
    %c0_3 = arith.constant 0 : index
    %4 = vector.load %arg3[%c0_2, %c0_3] : memref<16x64xbf16, #tpu.memory_space<vmem>>, vector<16x64xbf16>
    %c0_4 = arith.constant 0 : index
    %c0_5 = arith.constant 0 : index
    %5 = vector.load %arg4[%c0_4, %c0_5] : memref<64x64xbf16, #tpu.memory_space<vmem>>, vector<64x64xbf16>
    %cst = arith.constant dense<0.000000e+00> : vector<16x64xf32>
    %6 = tpu.matmul %4, %5, %cst {dimension_numbers = #tpu.dot_dimension_numbers<[1], [0], [0], [1], [0, 0, 1, 1], [], []>} : vector<16x64xbf16>, vector<64x64xbf16>, vector<16x64xf32> -> vector<16x64xf32>
    %7 = arith.addf %3, %6 : vector<16x64xf32>
    %c0_6 = arith.constant 0 : index
    %c0_7 = arith.constant 0 : index
    %8 = vector.load %arg7[%c0_6, %c0_7] : memref<16x64xf32, #tpu.memory_space<vmem>>, vector<16x64xf32>
    tpu.vector_store %arg7[%c0_6, %c0_7], %7 {strides = array<i32>} : memref<16x64xf32, #tpu.memory_space<vmem>>, vector<16x64xf32>,
    %c0_i32_8 = arith.constant 0 : i32
    %9 = arith.cmpi eq, %arg2, %c0_i32_8 : i32
    %10 = arith.extui %9 : i1 to i32
    %c0_i32_9 = arith.constant 0 : i32
    %11 = arith.cmpi ne, %10, %c0_i32_9 : i32
    scf.if %11 {
      %c0_10 = arith.constant 0 : index
      %c0_11 = arith.constant 0 : index
      %12 = vector.load %arg7[%c0_10, %c0_11] : memref<16x64xf32, #tpu.memory_space<vmem>>, vector<16x64xf32>
      %c0_12 = arith.constant 0 : index
      %c0_13 = arith.constant 0 : index
      %13 = vector.load %arg5[%c0_12, %c0_13] : memref<1x64xf32, #tpu.memory_space<vmem>>, vector<1x64xf32>
      %14 = vector.broadcast %13 : vector<1x64xf32> to vector<16x64xf32>
      %15 = arith.addf %12, %14 : vector<16x64xf32>
      %16 = arith.truncf %15 : vector<16x64xf32> to vector<16x64xbf16>
      %c0_14 = arith.constant 0 : index
      %c0_15 = arith.constant 0 : index
      %17 = vector.load %arg6[%c0_14, %c0_15] : memref<16x64xbf16, #tpu.memory_space<vmem>>, vector<16x64xbf16>
      tpu.vector_store %arg6[%c0_14, %c0_15], %16 {strides = array<i32>} : memref<16x64xbf16, #tpu.memory_space<vmem>>, vector<16x64xbf16>,
    } else {
    }
    return
  }
  func.func @transform_0(%arg0: i32, %arg1: i32, %arg2: i32) -> (i32, i32) {
    %c0_i32 = arith.constant 0 : i32
    return %arg0, %arg2 : i32, i32
  }
  func.func @transform_1(%arg0: i32, %arg1: i32, %arg2: i32) -> (i32, i32) {
    %c0_i32 = arith.constant 0 : i32
    return %arg2, %arg1 : i32, i32
  }
  func.func @transform_2(%arg0: i32, %arg1: i32, %arg2: i32) -> (i32, i32) {
    %c0_i32 = arith.constant 0 : i32
    %c0_i32_0 = arith.constant 0 : i32
    return %c0_i32, %arg1 : i32, i32
  }
  func.func @transform_3(%arg0: i32, %arg1: i32, %arg2: i32) -> (i32, i32) {
    %c0_i32 = arith.constant 0 : i32
    return %arg0, %arg1 : i32, i32
  }
}

module attributes {stable_mosaic.version = 11 : i64} {
  func.func @_mlp_kernel(%arg0: i32, %arg1: i32, %arg2: memref<16x64xbf16, #tpu.memory_space<vmem>>, %arg3: memref<1x64xf32, #tpu.memory_space<vmem>>, %arg4: memref<1x64xf32, #tpu.memory_space<vmem>>, %arg5: memref<64x256xbf16, #tpu.memory_space<vmem>>, %arg6: memref<1x256xf32, #tpu.memory_space<vmem>>, %arg7: memref<256x64xbf16, #tpu.memory_space<vmem>>, %arg8: memref<1x64xf32, #tpu.memory_space<vmem>>, %arg9: memref<16x64xbf16, #tpu.memory_space<vmem>>, %arg10: memref<16x64xf32, #tpu.memory_space<vmem>>, %arg11: memref<16x64xbf16, #tpu.memory_space<vmem>>) attributes {dimension_semantics = [#tpu.dimension_semantics<parallel>, #tpu.dimension_semantics<arbitrary>], iteration_bounds = array<i64: 1, 1>, scalar_prefetch = 0 : i64, scratch_operands = 2 : i64, tpu.core_type = #tpu.core_type<tc>, window_params = [{transform_indices = @transform_0, window_bounds = array<i64: 16, 64>}, {pipeline_mode = #tpu.pipeline_mode<synchronous>, transform_indices = @transform_1, window_bounds = array<i64: 1, 64>}, {pipeline_mode = #tpu.pipeline_mode<synchronous>, transform_indices = @transform_2, window_bounds = array<i64: 1, 64>}, {transform_indices = @transform_3, window_bounds = array<i64: 64, 256>}, {transform_indices = @transform_4, window_bounds = array<i64: 1, 256>}, {transform_indices = @transform_5, window_bounds = array<i64: 256, 64>}, {pipeline_mode = #tpu.pipeline_mode<synchronous>, transform_indices = @transform_6, window_bounds = array<i64: 1, 64>}, {transform_indices = @transform_7, window_bounds = array<i64: 16, 64>}]} {
    %c0_i32 = arith.constant 0 : i32
    %0 = arith.cmpi eq, %arg1, %c0_i32 : i32
    %1 = arith.extui %0 : i1 to i32
    %c0_i32_0 = arith.constant 0 : i32
    %2 = arith.cmpi ne, %1, %c0_i32_0 : i32
    scf.if %2 {
      %cst_19 = arith.constant 0.000000e+00 : f32
      %31 = vector.broadcast %cst_19 : f32 to vector<16x64xf32>
      %c0_20 = arith.constant 0 : index
      %c0_21 = arith.constant 0 : index
      %32 = vector.load %arg10[%c0_20, %c0_21] : memref<16x64xf32, #tpu.memory_space<vmem>>, vector<16x64xf32>
      tpu.vector_store %arg10[%c0_20, %c0_21], %31 {strides = array<i32>} : memref<16x64xf32, #tpu.memory_space<vmem>>, vector<16x64xf32>,
      %c0_22 = arith.constant 0 : index
      %c0_23 = arith.constant 0 : index
      %33 = vector.load %arg2[%c0_22, %c0_23] : memref<16x64xbf16, #tpu.memory_space<vmem>>, vector<16x64xbf16>
      %34 = arith.extf %33 : vector<16x64xbf16> to vector<16x64xf32>
      %cst_24 = arith.constant dense<0.000000e+00> : vector<16xf32>
      %35 = vector.multi_reduction <add>, %34, %cst_24 [1] : vector<16x64xf32> to vector<16xf32>
      %36 = vector.shape_cast %35 : vector<16xf32> to vector<16x1xf32>
      %cst_25 = arith.constant 6.400000e+01 : f32
      %37 = vector.broadcast %cst_25 : f32 to vector<16x1xf32>
      %38 = arith.divf %36, %37 : vector<16x1xf32>
      %39 = vector.broadcast %38 : vector<16x1xf32> to vector<16x64xf32>
      %40 = arith.subf %34, %39 : vector<16x64xf32>
      %41 = arith.mulf %40, %40 : vector<16x64xf32>
      %cst_26 = arith.constant dense<0.000000e+00> : vector<16xf32>
      %42 = vector.multi_reduction <add>, %41, %cst_26 [1] : vector<16x64xf32> to vector<16xf32>
      %43 = vector.shape_cast %42 : vector<16xf32> to vector<16x1xf32>
      %cst_27 = arith.constant 6.400000e+01 : f32
      %44 = vector.broadcast %cst_27 : f32 to vector<16x1xf32>
      %45 = arith.divf %43, %44 : vector<16x1xf32>
      %46 = vector.broadcast %38 : vector<16x1xf32> to vector<16x64xf32>
      %47 = arith.subf %34, %46 : vector<16x64xf32>
      %cst_28 = arith.constant 9.99999974E-6 : f32
      %48 = vector.broadcast %cst_28 : f32 to vector<16x1xf32>
      %49 = arith.addf %45, %48 : vector<16x1xf32>
      %50 = math.rsqrt %49 : vector<16x1xf32>
      %51 = vector.broadcast %50 : vector<16x1xf32> to vector<16x64xf32>
      %52 = arith.mulf %47, %51 : vector<16x64xf32>
      %c0_29 = arith.constant 0 : index
      %c0_30 = arith.constant 0 : index
      %53 = vector.load %arg3[%c0_29, %c0_30] : memref<1x64xf32, #tpu.memory_space<vmem>>, vector<1x64xf32>
      %54 = vector.broadcast %53 : vector<1x64xf32> to vector<16x64xf32>
      %55 = arith.mulf %52, %54 : vector<16x64xf32>
      %c0_31 = arith.constant 0 : index
      %c0_32 = arith.constant 0 : index
      %56 = vector.load %arg4[%c0_31, %c0_32] : memref<1x64xf32, #tpu.memory_space<vmem>>, vector<1x64xf32>
      %57 = vector.broadcast %56 : vector<1x64xf32> to vector<16x64xf32>
      %58 = arith.addf %55, %57 : vector<16x64xf32>
      %59 = arith.truncf %58 : vector<16x64xf32> to vector<16x64xbf16>
      %c0_33 = arith.constant 0 : index
      %c0_34 = arith.constant 0 : index
      %60 = vector.load %arg11[%c0_33, %c0_34] : memref<16x64xbf16, #tpu.memory_space<vmem>>, vector<16x64xbf16>
      tpu.vector_store %arg11[%c0_33, %c0_34], %59 {strides = array<i32>} : memref<16x64xbf16, #tpu.memory_space<vmem>>, vector<16x64xbf16>,
    } else {
    }
    %c0 = arith.constant 0 : index
    %c0_1 = arith.constant 0 : index
    %3 = vector.load %arg11[%c0, %c0_1] : memref<16x64xbf16, #tpu.memory_space<vmem>>, vector<16x64xbf16>
    %c0_2 = arith.constant 0 : index
    %c0_3 = arith.constant 0 : index
    %4 = vector.load %arg5[%c0_2, %c0_3] : memref<64x256xbf16, #tpu.memory_space<vmem>>, vector<64x256xbf16>
    %cst = arith.constant dense<0.000000e+00> : vector<16x256xf32>
    %5 = tpu.matmul %3, %4, %cst {dimension_numbers = #tpu.dot_dimension_numbers<[1], [0], [0], [1], [0, 0, 1, 1], [], []>} : vector<16x64xbf16>, vector<64x256xbf16>, vector<16x256xf32> -> vector<16x256xf32>
    %c0_4 = arith.constant 0 : index
    %c0_5 = arith.constant 0 : index
    %6 = vector.load %arg6[%c0_4, %c0_5] : memref<1x256xf32, #tpu.memory_space<vmem>>, vector<1x256xf32>
    %7 = vector.broadcast %6 : vector<1x256xf32> to vector<16x256xf32>
    %8 = arith.addf %5, %7 : vector<16x256xf32>
    %cst_6 = arith.constant 5.000000e-01 : f32
    %9 = vector.broadcast %cst_6 : f32 to vector<16x256xf32>
    %10 = arith.mulf %9, %8 : vector<16x256xf32>
    %cst_7 = arith.constant 4.471500e-02 : f32
    %11 = vector.broadcast %cst_7 : f32 to vector<16x256xf32>
    %12 = arith.mulf %11, %8 : vector<16x256xf32>
    %13 = arith.mulf %12, %8 : vector<16x256xf32>
    %14 = arith.mulf %13, %8 : vector<16x256xf32>
    %15 = arith.addf %8, %14 : vector<16x256xf32>
    %cst_8 = arith.constant 0.797884583 : f32
    %16 = vector.broadcast %cst_8 : f32 to vector<16x256xf32>
    %17 = arith.mulf %16, %15 : vector<16x256xf32>
    %18 = math.tanh %17 : vector<16x256xf32>
    %cst_9 = arith.constant 1.000000e+00 : f32
    %19 = vector.broadcast %cst_9 : f32 to vector<16x256xf32>
    %20 = arith.addf %19, %18 : vector<16x256xf32>
    %21 = arith.mulf %10, %20 : vector<16x256xf32>
    %c0_10 = arith.constant 0 : index
    %c0_11 = arith.constant 0 : index
    %22 = vector.load %arg10[%c0_10, %c0_11] : memref<16x64xf32, #tpu.memory_space<vmem>>, vector<16x64xf32>
    %23 = arith.truncf %21 : vector<16x256xf32> to vector<16x256xbf16>
    %c0_12 = arith.constant 0 : index
    %c0_13 = arith.constant 0 : index
    %24 = vector.load %arg7[%c0_12, %c0_13] : memref<256x64xbf16, #tpu.memory_space<vmem>>, vector<256x64xbf16>
    %cst_14 = arith.constant dense<0.000000e+00> : vector<16x64xf32>
    %25 = tpu.matmul %23, %24, %cst_14 {dimension_numbers = #tpu.dot_dimension_numbers<[1], [0], [0], [1], [0, 0, 1, 1], [], []>} : vector<16x256xbf16>, vector<256x64xbf16>, vector<16x64xf32> -> vector<16x64xf32>
    %26 = arith.addf %22, %25 : vector<16x64xf32>
    %c0_15 = arith.constant 0 : index
    %c0_16 = arith.constant 0 : index
    %27 = vector.load %arg10[%c0_15, %c0_16] : memref<16x64xf32, #tpu.memory_space<vmem>>, vector<16x64xf32>
    tpu.vector_store %arg10[%c0_15, %c0_16], %26 {strides = array<i32>} : memref<16x64xf32, #tpu.memory_space<vmem>>, vector<16x64xf32>,
    %c0_i32_17 = arith.constant 0 : i32
    %28 = arith.cmpi eq, %arg1, %c0_i32_17 : i32
    %29 = arith.extui %28 : i1 to i32
    %c0_i32_18 = arith.constant 0 : i32
    %30 = arith.cmpi ne, %29, %c0_i32_18 : i32
    scf.if %30 {
      %c0_19 = arith.constant 0 : index
      %c0_20 = arith.constant 0 : index
      %31 = vector.load %arg2[%c0_19, %c0_20] : memref<16x64xbf16, #tpu.memory_space<vmem>>, vector<16x64xbf16>
      %32 = arith.extf %31 : vector<16x64xbf16> to vector<16x64xf32>
      %c0_21 = arith.constant 0 : index
      %c0_22 = arith.constant 0 : index
      %33 = vector.load %arg10[%c0_21, %c0_22] : memref<16x64xf32, #tpu.memory_space<vmem>>, vector<16x64xf32>
      %34 = arith.addf %32, %33 : vector<16x64xf32>
      %c0_23 = arith.constant 0 : index
      %c0_24 = arith.constant 0 : index
      %35 = vector.load %arg8[%c0_23, %c0_24] : memref<1x64xf32, #tpu.memory_space<vmem>>, vector<1x64xf32>
      %36 = vector.broadcast %35 : vector<1x64xf32> to vector<16x64xf32>
      %37 = arith.addf %34, %36 : vector<16x64xf32>
      %38 = arith.truncf %37 : vector<16x64xf32> to vector<16x64xbf16>
      %c0_25 = arith.constant 0 : index
      %c0_26 = arith.constant 0 : index
      %39 = vector.load %arg9[%c0_25, %c0_26] : memref<16x64xbf16, #tpu.memory_space<vmem>>, vector<16x64xbf16>
      tpu.vector_store %arg9[%c0_25, %c0_26], %38 {strides = array<i32>} : memref<16x64xbf16, #tpu.memory_space<vmem>>, vector<16x64xbf16>,
    } else {
    }
    return
  }
  func.func @transform_0(%arg0: i32, %arg1: i32) -> (i32, i32) {
    %c0_i32 = arith.constant 0 : i32
    %c0_i32_0 = arith.constant 0 : i32
    return %arg0, %c0_i32 : i32, i32
  }
  func.func @transform_1(%arg0: i32, %arg1: i32) -> (i32, i32) {
    %c0_i32 = arith.constant 0 : i32
    %c0_i32_0 = arith.constant 0 : i32
    %c0_i32_1 = arith.constant 0 : i32
    return %c0_i32, %c0_i32_0 : i32, i32
  }
  func.func @transform_2(%arg0: i32, %arg1: i32) -> (i32, i32) {
    %c0_i32 = arith.constant 0 : i32
    %c0_i32_0 = arith.constant 0 : i32
    %c0_i32_1 = arith.constant 0 : i32
    return %c0_i32, %c0_i32_0 : i32, i32
  }
  func.func @transform_3(%arg0: i32, %arg1: i32) -> (i32, i32) {
    %c0_i32 = arith.constant 0 : i32
    %c0_i32_0 = arith.constant 0 : i32
    return %c0_i32, %arg1 : i32, i32
  }
  func.func @transform_4(%arg0: i32, %arg1: i32) -> (i32, i32) {
    %c0_i32 = arith.constant 0 : i32
    %c0_i32_0 = arith.constant 0 : i32
    return %c0_i32, %arg1 : i32, i32
  }
  func.func @transform_5(%arg0: i32, %arg1: i32) -> (i32, i32) {
    %c0_i32 = arith.constant 0 : i32
    %c0_i32_0 = arith.constant 0 : i32
    return %arg1, %c0_i32 : i32, i32
  }
  func.func @transform_6(%arg0: i32, %arg1: i32) -> (i32, i32) {
    %c0_i32 = arith.constant 0 : i32
    %c0_i32_0 = arith.constant 0 : i32
    %c0_i32_1 = arith.constant 0 : i32
    return %c0_i32, %c0_i32_0 : i32, i32
  }
  func.func @transform_7(%arg0: i32, %arg1: i32) -> (i32, i32) {
    %c0_i32 = arith.constant 0 : i32
    %c0_i32_0 = arith.constant 0 : i32
    return %arg0, %c0_i32 : i32, i32
  }
}

module attributes {stable_mosaic.version = 11 : i64} {
  func.func @_ln_linear_kernel(%arg0: i32, %arg1: i32, %arg2: memref<16x256xbf16, #tpu.memory_space<vmem>>, %arg3: memref<1x256xf32, #tpu.memory_space<vmem>>, %arg4: memref<1x256xf32, #tpu.memory_space<vmem>>, %arg5: memref<256x128xbf16, #tpu.memory_space<vmem>>, %arg6: memref<1x128xf32, #tpu.memory_space<vmem>>, %arg7: memref<16x128xbf16, #tpu.memory_space<vmem>>) attributes {dimension_semantics = [#tpu.dimension_semantics<parallel>, #tpu.dimension_semantics<parallel>], iteration_bounds = array<i64: 1, 1>, scalar_prefetch = 0 : i64, scratch_operands = 0 : i64, tpu.core_type = #tpu.core_type<tc>, window_params = [{transform_indices = @transform_0, window_bounds = array<i64: 16, 256>}, {pipeline_mode = #tpu.pipeline_mode<synchronous>, transform_indices = @transform_1, window_bounds = array<i64: 1, 256>}, {pipeline_mode = #tpu.pipeline_mode<synchronous>, transform_indices = @transform_2, window_bounds = array<i64: 1, 256>}, {transform_indices = @transform_3, window_bounds = array<i64: 256, 128>}, {transform_indices = @transform_4, window_bounds = array<i64: 1, 128>}, {transform_indices = @transform_5, window_bounds = array<i64: 16, 128>}]} {
    %c0 = arith.constant 0 : index
    %c0_0 = arith.constant 0 : index
    %0 = vector.load %arg2[%c0, %c0_0] : memref<16x256xbf16, #tpu.memory_space<vmem>>, vector<16x256xbf16>
    %1 = arith.extf %0 : vector<16x256xbf16> to vector<16x256xf32>
    %cst = arith.constant dense<0.000000e+00> : vector<16xf32>
    %2 = vector.multi_reduction <add>, %1, %cst [1] : vector<16x256xf32> to vector<16xf32>
    %3 = vector.shape_cast %2 : vector<16xf32> to vector<16x1xf32>
    %cst_1 = arith.constant 2.560000e+02 : f32
    %4 = vector.broadcast %cst_1 : f32 to vector<16x1xf32>
    %5 = arith.divf %3, %4 : vector<16x1xf32>
    %6 = vector.broadcast %5 : vector<16x1xf32> to vector<16x256xf32>
    %7 = arith.subf %1, %6 : vector<16x256xf32>
    %8 = arith.mulf %7, %7 : vector<16x256xf32>
    %cst_2 = arith.constant dense<0.000000e+00> : vector<16xf32>
    %9 = vector.multi_reduction <add>, %8, %cst_2 [1] : vector<16x256xf32> to vector<16xf32>
    %10 = vector.shape_cast %9 : vector<16xf32> to vector<16x1xf32>
    %cst_3 = arith.constant 2.560000e+02 : f32
    %11 = vector.broadcast %cst_3 : f32 to vector<16x1xf32>
    %12 = arith.divf %10, %11 : vector<16x1xf32>
    %13 = vector.broadcast %5 : vector<16x1xf32> to vector<16x256xf32>
    %14 = arith.subf %1, %13 : vector<16x256xf32>
    %cst_4 = arith.constant 9.99999974E-6 : f32
    %15 = vector.broadcast %cst_4 : f32 to vector<16x1xf32>
    %16 = arith.addf %12, %15 : vector<16x1xf32>
    %17 = math.rsqrt %16 : vector<16x1xf32>
    %18 = vector.broadcast %17 : vector<16x1xf32> to vector<16x256xf32>
    %19 = arith.mulf %14, %18 : vector<16x256xf32>
    %c0_5 = arith.constant 0 : index
    %c0_6 = arith.constant 0 : index
    %20 = vector.load %arg3[%c0_5, %c0_6] : memref<1x256xf32, #tpu.memory_space<vmem>>, vector<1x256xf32>
    %21 = vector.broadcast %20 : vector<1x256xf32> to vector<16x256xf32>
    %22 = arith.mulf %19, %21 : vector<16x256xf32>
    %c0_7 = arith.constant 0 : index
    %c0_8 = arith.constant 0 : index
    %23 = vector.load %arg4[%c0_7, %c0_8] : memref<1x256xf32, #tpu.memory_space<vmem>>, vector<1x256xf32>
    %24 = vector.broadcast %23 : vector<1x256xf32> to vector<16x256xf32>
    %25 = arith.addf %22, %24 : vector<16x256xf32>
    %26 = arith.truncf %25 : vector<16x256xf32> to vector<16x256xbf16>
    %c0_9 = arith.constant 0 : index
    %c0_10 = arith.constant 0 : index
    %27 = vector.load %arg5[%c0_9, %c0_10] : memref<256x128xbf16, #tpu.memory_space<vmem>>, vector<256x128xbf16>
    %cst_11 = arith.constant dense<0.000000e+00> : vector<16x128xf32>
    %28 = tpu.matmul %26, %27, %cst_11 {dimension_numbers = #tpu.dot_dimension_numbers<[1], [0], [0], [1], [0, 0, 1, 1], [], []>} : vector<16x256xbf16>, vector<256x128xbf16>, vector<16x128xf32> -> vector<16x128xf32>
    %c0_12 = arith.constant 0 : index
    %c0_13 = arith.constant 0 : index
    %29 = vector.load %arg6[%c0_12, %c0_13] : memref<1x128xf32, #tpu.memory_space<vmem>>, vector<1x128xf32>
    %30 = vector.broadcast %29 : vector<1x128xf32> to vector<16x128xf32>
    %31 = arith.addf %28, %30 : vector<16x128xf32>
    %32 = arith.truncf %31 : vector<16x128xf32> to vector<16x128xbf16>
    %c0_14 = arith.constant 0 : index
    %c0_15 = arith.constant 0 : index
    %33 = vector.load %arg7[%c0_14, %c0_15] : memref<16x128xbf16, #tpu.memory_space<vmem>>, vector<16x128xbf16>
    tpu.vector_store %arg7[%c0_14, %c0_15], %32 {strides = array<i32>} : memref<16x128xbf16, #tpu.memory_space<vmem>>, vector<16x128xbf16>,
    return
  }
  func.func @transform_0(%arg0: i32, %arg1: i32) -> (i32, i32) {
    %c0_i32 = arith.constant 0 : i32
    %c0_i32_0 = arith.constant 0 : i32
    return %arg0, %c0_i32 : i32, i32
  }
  func.func @transform_1(%arg0: i32, %arg1: i32) -> (i32, i32) {
    %c0_i32 = arith.constant 0 : i32
    %c0_i32_0 = arith.constant 0 : i32
    %c0_i32_1 = arith.constant 0 : i32
    return %c0_i32, %c0_i32_0 : i32, i32
  }
  func.func @transform_2(%arg0: i32, %arg1: i32) -> (i32, i32) {
    %c0_i32 = arith.constant 0 : i32
    %c0_i32_0 = arith.constant 0 : i32
    %c0_i32_1 = arith.constant 0 : i32
    return %c0_i32, %c0_i32_0 : i32, i32
  }
  func.func @transform_3(%arg0: i32, %arg1: i32) -> (i32, i32) {
    %c0_i32 = arith.constant 0 : i32
    %c0_i32_0 = arith.constant 0 : i32
    return %c0_i32, %arg1 : i32, i32
  }
  func.func @transform_4(%arg0: i32, %arg1: i32) -> (i32, i32) {
    %c0_i32 = arith.constant 0 : i32
    %c0_i32_0 = arith.constant 0 : i32
    return %c0_i32, %arg1 : i32, i32
  }
  func.func @transform_5(%arg0: i32, %arg1: i32) -> (i32, i32) {
    %c0_i32 = arith.constant 0 : i32
    return %arg0, %arg1 : i32, i32
  }
}

module attributes {stable_mosaic.version = 11 : i64} {
  func.func @_ln_linear_kernel(%arg0: i32, %arg1: i32, %arg2: memref<16x128xbf16, #tpu.memory_space<vmem>>, %arg3: memref<1x128xf32, #tpu.memory_space<vmem>>, %arg4: memref<1x128xf32, #tpu.memory_space<vmem>>, %arg5: memref<128x128xbf16, #tpu.memory_space<vmem>>, %arg6: memref<1x128xf32, #tpu.memory_space<vmem>>, %arg7: memref<16x128xbf16, #tpu.memory_space<vmem>>) attributes {dimension_semantics = [#tpu.dimension_semantics<parallel>, #tpu.dimension_semantics<parallel>], iteration_bounds = array<i64: 1, 3>, scalar_prefetch = 0 : i64, scratch_operands = 0 : i64, tpu.core_type = #tpu.core_type<tc>, window_params = [{transform_indices = @transform_0, window_bounds = array<i64: 16, 128>}, {pipeline_mode = #tpu.pipeline_mode<synchronous>, transform_indices = @transform_1, window_bounds = array<i64: 1, 128>}, {pipeline_mode = #tpu.pipeline_mode<synchronous>, transform_indices = @transform_2, window_bounds = array<i64: 1, 128>}, {transform_indices = @transform_3, window_bounds = array<i64: 128, 128>}, {transform_indices = @transform_4, window_bounds = array<i64: 1, 128>}, {transform_indices = @transform_5, window_bounds = array<i64: 16, 128>}]} {
    %c0 = arith.constant 0 : index
    %c0_0 = arith.constant 0 : index
    %0 = vector.load %arg2[%c0, %c0_0] : memref<16x128xbf16, #tpu.memory_space<vmem>>, vector<16x128xbf16>
    %1 = arith.extf %0 : vector<16x128xbf16> to vector<16x128xf32>
    %cst = arith.constant dense<0.000000e+00> : vector<16xf32>
    %2 = vector.multi_reduction <add>, %1, %cst [1] : vector<16x128xf32> to vector<16xf32>
    %3 = vector.shape_cast %2 : vector<16xf32> to vector<16x1xf32>
    %cst_1 = arith.constant 1.280000e+02 : f32
    %4 = vector.broadcast %cst_1 : f32 to vector<16x1xf32>
    %5 = arith.divf %3, %4 : vector<16x1xf32>
    %6 = vector.broadcast %5 : vector<16x1xf32> to vector<16x128xf32>
    %7 = arith.subf %1, %6 : vector<16x128xf32>
    %8 = arith.mulf %7, %7 : vector<16x128xf32>
    %cst_2 = arith.constant dense<0.000000e+00> : vector<16xf32>
    %9 = vector.multi_reduction <add>, %8, %cst_2 [1] : vector<16x128xf32> to vector<16xf32>
    %10 = vector.shape_cast %9 : vector<16xf32> to vector<16x1xf32>
    %cst_3 = arith.constant 1.280000e+02 : f32
    %11 = vector.broadcast %cst_3 : f32 to vector<16x1xf32>
    %12 = arith.divf %10, %11 : vector<16x1xf32>
    %13 = vector.broadcast %5 : vector<16x1xf32> to vector<16x128xf32>
    %14 = arith.subf %1, %13 : vector<16x128xf32>
    %cst_4 = arith.constant 9.99999974E-6 : f32
    %15 = vector.broadcast %cst_4 : f32 to vector<16x1xf32>
    %16 = arith.addf %12, %15 : vector<16x1xf32>
    %17 = math.rsqrt %16 : vector<16x1xf32>
    %18 = vector.broadcast %17 : vector<16x1xf32> to vector<16x128xf32>
    %19 = arith.mulf %14, %18 : vector<16x128xf32>
    %c0_5 = arith.constant 0 : index
    %c0_6 = arith.constant 0 : index
    %20 = vector.load %arg3[%c0_5, %c0_6] : memref<1x128xf32, #tpu.memory_space<vmem>>, vector<1x128xf32>
    %21 = vector.broadcast %20 : vector<1x128xf32> to vector<16x128xf32>
    %22 = arith.mulf %19, %21 : vector<16x128xf32>
    %c0_7 = arith.constant 0 : index
    %c0_8 = arith.constant 0 : index
    %23 = vector.load %arg4[%c0_7, %c0_8] : memref<1x128xf32, #tpu.memory_space<vmem>>, vector<1x128xf32>
    %24 = vector.broadcast %23 : vector<1x128xf32> to vector<16x128xf32>
    %25 = arith.addf %22, %24 : vector<16x128xf32>
    %26 = arith.truncf %25 : vector<16x128xf32> to vector<16x128xbf16>
    %c0_9 = arith.constant 0 : index
    %c0_10 = arith.constant 0 : index
    %27 = vector.load %arg5[%c0_9, %c0_10] : memref<128x128xbf16, #tpu.memory_space<vmem>>, vector<128x128xbf16>
    %cst_11 = arith.constant dense<0.000000e+00> : vector<16x128xf32>
    %28 = tpu.matmul %26, %27, %cst_11 {dimension_numbers = #tpu.dot_dimension_numbers<[1], [0], [0], [1], [0, 0, 1, 1], [], []>} : vector<16x128xbf16>, vector<128x128xbf16>, vector<16x128xf32> -> vector<16x128xf32>
    %c0_12 = arith.constant 0 : index
    %c0_13 = arith.constant 0 : index
    %29 = vector.load %arg6[%c0_12, %c0_13] : memref<1x128xf32, #tpu.memory_space<vmem>>, vector<1x128xf32>
    %30 = vector.broadcast %29 : vector<1x128xf32> to vector<16x128xf32>
    %31 = arith.addf %28, %30 : vector<16x128xf32>
    %32 = arith.truncf %31 : vector<16x128xf32> to vector<16x128xbf16>
    %c0_14 = arith.constant 0 : index
    %c0_15 = arith.constant 0 : index
    %33 = vector.load %arg7[%c0_14, %c0_15] : memref<16x128xbf16, #tpu.memory_space<vmem>>, vector<16x128xbf16>
    tpu.vector_store %arg7[%c0_14, %c0_15], %32 {strides = array<i32>} : memref<16x128xbf16, #tpu.memory_space<vmem>>, vector<16x128xbf16>,
    return
  }
  func.func @transform_0(%arg0: i32, %arg1: i32) -> (i32, i32) {
    %c0_i32 = arith.constant 0 : i32
    %c0_i32_0 = arith.constant 0 : i32
    return %arg0, %c0_i32 : i32, i32
  }
  func.func @transform_1(%arg0: i32, %arg1: i32) -> (i32, i32) {
    %c0_i32 = arith.constant 0 : i32
    %c0_i32_0 = arith.constant 0 : i32
    %c0_i32_1 = arith.constant 0 : i32
    return %c0_i32, %c0_i32_0 : i32, i32
  }
  func.func @transform_2(%arg0: i32, %arg1: i32) -> (i32, i32) {
    %c0_i32 = arith.constant 0 : i32
    %c0_i32_0 = arith.constant 0 : i32
    %c0_i32_1 = arith.constant 0 : i32
    return %c0_i32, %c0_i32_0 : i32, i32
  }
  func.func @transform_3(%arg0: i32, %arg1: i32) -> (i32, i32) {
    %c0_i32 = arith.constant 0 : i32
    %c0_i32_0 = arith.constant 0 : i32
    return %c0_i32, %arg1 : i32, i32
  }
  func.func @transform_4(%arg0: i32, %arg1: i32) -> (i32, i32) {
    %c0_i32 = arith.constant 0 : i32
    %c0_i32_0 = arith.constant 0 : i32
    return %c0_i32, %arg1 : i32, i32
  }
  func.func @transform_5(%arg0: i32, %arg1: i32) -> (i32, i32) {
    %c0_i32 = arith.constant 0 : i32
    return %arg0, %arg1 : i32, i32
  }
}

module attributes {stable_mosaic.version = 11 : i64} {
  func.func @_window_attn_kernel(%arg0: i32, %arg1: memref<1x2x384xbf16, #tpu.memory_space<vmem>>, %arg2: memref<8x2x2xbf16, #tpu.memory_space<vmem>>, %arg3: memref<1x2x128xbf16, #tpu.memory_space<vmem>>) attributes {dimension_semantics = [#tpu.dimension_semantics<parallel>], iteration_bounds = array<i64: 2>, scalar_prefetch = 0 : i64, scratch_operands = 0 : i64, tpu.core_type = #tpu.core_type<tc>, window_params = [{transform_indices = @transform_0, window_bounds = array<i64: 1, 2, 384>}, {pipeline_mode = #tpu.pipeline_mode<synchronous>, transform_indices = @transform_1, window_bounds = array<i64: 8, 2, 2>}, {transform_indices = @transform_2, window_bounds = array<i64: 1, 2, 128>}]} {
    %c0 = arith.constant 0 : index
    %c0_0 = arith.constant 0 : index
    %c0_1 = arith.constant 0 : index
    %0 = vector.load %arg2[%c0, %c0_0, %c0_1] : memref<8x2x2xbf16, #tpu.memory_space<vmem>>, vector<8x2x2xbf16>
    %1 = arith.extf %0 : vector<8x2x2xbf16> to vector<8x2x2xf32>
    %c0_2 = arith.constant 0 : index
    %c0_3 = arith.constant 0 : index
    %c0_4 = arith.constant 0 : index
    %2 = vector.load %arg1[%c0_2, %c0_3, %c0_4] : memref<1x2x384xbf16, #tpu.memory_space<vmem>>, vector<1x2x16xbf16>
    %c0_5 = arith.constant 0 : index
    %c0_6 = arith.constant 0 : index
    %c128 = arith.constant 128 : index
    %3 = vector.load %arg1[%c0_5, %c0_6, %c128] : memref<1x2x384xbf16, #tpu.memory_space<vmem>>, vector<1x2x16xbf16>
    %c0_7 = arith.constant 0 : index
    %c0_8 = arith.constant 0 : index
    %c256 = arith.constant 256 : index
    %4 = vector.load %arg1[%c0_7, %c0_8, %c256] : memref<1x2x384xbf16, #tpu.memory_space<vmem>>, vector<1x2x16xbf16>
    "tpu.trace_start"() <{level = 10 : i32, message = "wld,wmd->wlm"}> : () -> ()
    %cst = arith.constant dense<0.000000e+00> : vector<1x2x2xf32>
    %5 = tpu.matmul %2, %3, %cst {dimension_numbers = #tpu.dot_dimension_numbers<[2], [2], [1], [1], [0, 0, 0, 1, 1, 1], [0], [0]>} : vector<1x2x16xbf16>, vector<1x2x16xbf16>, vector<1x2x2xf32> -> vector<1x2x2xf32>
    "tpu.trace_stop"() : () -> ()
    %cst_9 = arith.constant 2.500000e-01 : f32
    %6 = vector.broadcast %cst_9 : f32 to vector<1x2x2xf32>
    %7 = arith.mulf %5, %6 : vector<1x2x2xf32>
    %8 = vector.extract_strided_slice %1 {offsets = [0, 0, 0], sizes = [1, 2, 2], strides = [1, 1, 1]} : vector<8x2x2xf32> to vector<1x2x2xf32>
    %9 = vector.shape_cast %8 : vector<1x2x2xf32> to vector<2x2xf32>
    %10 = vector.shape_cast %9 : vector<2x2xf32> to vector<1x2x2xf32>
    %11 = arith.addf %7, %10 : vector<1x2x2xf32>
    %cst_10 = arith.constant dense<0xFF800000> : vector<1x2xf32>
    %12 = vector.multi_reduction <maximumf>, %11, %cst_10 [2] : vector<1x2x2xf32> to vector<1x2xf32>
    %13 = vector.shape_cast %12 : vector<1x2xf32> to vector<1x2x1xf32>
    %14 = vector.broadcast %13 : vector<1x2x1xf32> to vector<1x2x2xf32>
    %15 = arith.subf %11, %14 : vector<1x2x2xf32>
    %16 = math.exp %15 : vector<1x2x2xf32>
    %cst_11 = arith.constant dense<0.000000e+00> : vector<1x2xf32>
    %17 = vector.multi_reduction <add>, %16, %cst_11 [2] : vector<1x2x2xf32> to vector<1x2xf32>
    %18 = vector.shape_cast %17 : vector<1x2xf32> to vector<1x2x1xf32>
    %19 = tpu.reciprocal %18 {approx = true} : vector<1x2x1xf32> -> vector<1x2x1xf32>
    %20 = vector.broadcast %19 : vector<1x2x1xf32> to vector<1x2x2xf32>
    %21 = arith.mulf %16, %20 : vector<1x2x2xf32>
    %22 = arith.truncf %21 : vector<1x2x2xf32> to vector<1x2x2xbf16>
    "tpu.trace_start"() <{level = 10 : i32, message = "wlm,wmd->wld"}> : () -> ()
    %cst_12 = arith.constant dense<0.000000e+00> : vector<1x2x16xf32>
    %23 = tpu.matmul %22, %4, %cst_12 {dimension_numbers = #tpu.dot_dimension_numbers<[2], [1], [1], [2], [0, 0, 0, 1, 1, 2], [0], [0]>} : vector<1x2x2xbf16>, vector<1x2x16xbf16>, vector<1x2x16xf32> -> vector<1x2x16xf32>
    "tpu.trace_stop"() : () -> ()
    %24 = arith.truncf %23 : vector<1x2x16xf32> to vector<1x2x16xbf16>
    %c0_13 = arith.constant 0 : index
    %c0_14 = arith.constant 0 : index
    %c0_15 = arith.constant 0 : index
    %25 = vector.load %arg3[%c0_13, %c0_14, %c0_15] : memref<1x2x128xbf16, #tpu.memory_space<vmem>>, vector<1x2x16xbf16>
    tpu.vector_store %arg3[%c0_13, %c0_14, %c0_15], %24 {strides = array<i32>} : memref<1x2x128xbf16, #tpu.memory_space<vmem>>, vector<1x2x16xbf16>,
    %c0_16 = arith.constant 0 : index
    %c0_17 = arith.constant 0 : index
    %c16 = arith.constant 16 : index
    %26 = vector.load %arg1[%c0_16, %c0_17, %c16] : memref<1x2x384xbf16, #tpu.memory_space<vmem>>, vector<1x2x16xbf16>
    %c0_18 = arith.constant 0 : index
    %c0_19 = arith.constant 0 : index
    %c144 = arith.constant 144 : index
    %27 = vector.load %arg1[%c0_18, %c0_19, %c144] : memref<1x2x384xbf16, #tpu.memory_space<vmem>>, vector<1x2x16xbf16>
    %c0_20 = arith.constant 0 : index
    %c0_21 = arith.constant 0 : index
    %c272 = arith.constant 272 : index
    %28 = vector.load %arg1[%c0_20, %c0_21, %c272] : memref<1x2x384xbf16, #tpu.memory_space<vmem>>, vector<1x2x16xbf16>
    "tpu.trace_start"() <{level = 10 : i32, message = "wld,wmd->wlm"}> : () -> ()
    %cst_22 = arith.constant dense<0.000000e+00> : vector<1x2x2xf32>
    %29 = tpu.matmul %26, %27, %cst_22 {dimension_numbers = #tpu.dot_dimension_numbers<[2], [2], [1], [1], [0, 0, 0, 1, 1, 1], [0], [0]>} : vector<1x2x16xbf16>, vector<1x2x16xbf16>, vector<1x2x2xf32> -> vector<1x2x2xf32>
    "tpu.trace_stop"() : () -> ()
    %cst_23 = arith.constant 2.500000e-01 : f32
    %30 = vector.broadcast %cst_23 : f32 to vector<1x2x2xf32>
    %31 = arith.mulf %29, %30 : vector<1x2x2xf32>
    %32 = vector.extract_strided_slice %1 {offsets = [1, 0, 0], sizes = [1, 2, 2], strides = [1, 1, 1]} : vector<8x2x2xf32> to vector<1x2x2xf32>
    %33 = vector.shape_cast %32 : vector<1x2x2xf32> to vector<2x2xf32>
    %34 = vector.shape_cast %33 : vector<2x2xf32> to vector<1x2x2xf32>
    %35 = arith.addf %31, %34 : vector<1x2x2xf32>
    %cst_24 = arith.constant dense<0xFF800000> : vector<1x2xf32>
    %36 = vector.multi_reduction <maximumf>, %35, %cst_24 [2] : vector<1x2x2xf32> to vector<1x2xf32>
    %37 = vector.shape_cast %36 : vector<1x2xf32> to vector<1x2x1xf32>
    %38 = vector.broadcast %37 : vector<1x2x1xf32> to vector<1x2x2xf32>
    %39 = arith.subf %35, %38 : vector<1x2x2xf32>
    %40 = math.exp %39 : vector<1x2x2xf32>
    %cst_25 = arith.constant dense<0.000000e+00> : vector<1x2xf32>
    %41 = vector.multi_reduction <add>, %40, %cst_25 [2] : vector<1x2x2xf32> to vector<1x2xf32>
    %42 = vector.shape_cast %41 : vector<1x2xf32> to vector<1x2x1xf32>
    %43 = tpu.reciprocal %42 {approx = true} : vector<1x2x1xf32> -> vector<1x2x1xf32>
    %44 = vector.broadcast %43 : vector<1x2x1xf32> to vector<1x2x2xf32>
    %45 = arith.mulf %40, %44 : vector<1x2x2xf32>
    %46 = arith.truncf %45 : vector<1x2x2xf32> to vector<1x2x2xbf16>
    "tpu.trace_start"() <{level = 10 : i32, message = "wlm,wmd->wld"}> : () -> ()
    %cst_26 = arith.constant dense<0.000000e+00> : vector<1x2x16xf32>
    %47 = tpu.matmul %46, %28, %cst_26 {dimension_numbers = #tpu.dot_dimension_numbers<[2], [1], [1], [2], [0, 0, 0, 1, 1, 2], [0], [0]>} : vector<1x2x2xbf16>, vector<1x2x16xbf16>, vector<1x2x16xf32> -> vector<1x2x16xf32>
    "tpu.trace_stop"() : () -> ()
    %48 = arith.truncf %47 : vector<1x2x16xf32> to vector<1x2x16xbf16>
    %c0_27 = arith.constant 0 : index
    %c0_28 = arith.constant 0 : index
    %c16_29 = arith.constant 16 : index
    %49 = vector.load %arg3[%c0_27, %c0_28, %c16_29] : memref<1x2x128xbf16, #tpu.memory_space<vmem>>, vector<1x2x16xbf16>
    tpu.vector_store %arg3[%c0_27, %c0_28, %c16_29], %48 {strides = array<i32>} : memref<1x2x128xbf16, #tpu.memory_space<vmem>>, vector<1x2x16xbf16>,
    %c0_30 = arith.constant 0 : index
    %c0_31 = arith.constant 0 : index
    %c32 = arith.constant 32 : index
    %50 = vector.load %arg1[%c0_30, %c0_31, %c32] : memref<1x2x384xbf16, #tpu.memory_space<vmem>>, vector<1x2x16xbf16>
    %c0_32 = arith.constant 0 : index
    %c0_33 = arith.constant 0 : index
    %c160 = arith.constant 160 : index
    %51 = vector.load %arg1[%c0_32, %c0_33, %c160] : memref<1x2x384xbf16, #tpu.memory_space<vmem>>, vector<1x2x16xbf16>
    %c0_34 = arith.constant 0 : index
    %c0_35 = arith.constant 0 : index
    %c288 = arith.constant 288 : index
    %52 = vector.load %arg1[%c0_34, %c0_35, %c288] : memref<1x2x384xbf16, #tpu.memory_space<vmem>>, vector<1x2x16xbf16>
    "tpu.trace_start"() <{level = 10 : i32, message = "wld,wmd->wlm"}> : () -> ()
    %cst_36 = arith.constant dense<0.000000e+00> : vector<1x2x2xf32>
    %53 = tpu.matmul %50, %51, %cst_36 {dimension_numbers = #tpu.dot_dimension_numbers<[2], [2], [1], [1], [0, 0, 0, 1, 1, 1], [0], [0]>} : vector<1x2x16xbf16>, vector<1x2x16xbf16>, vector<1x2x2xf32> -> vector<1x2x2xf32>
    "tpu.trace_stop"() : () -> ()
    %cst_37 = arith.constant 2.500000e-01 : f32
    %54 = vector.broadcast %cst_37 : f32 to vector<1x2x2xf32>
    %55 = arith.mulf %53, %54 : vector<1x2x2xf32>
    %56 = vector.extract_strided_slice %1 {offsets = [2, 0, 0], sizes = [1, 2, 2], strides = [1, 1, 1]} : vector<8x2x2xf32> to vector<1x2x2xf32>
    %57 = vector.shape_cast %56 : vector<1x2x2xf32> to vector<2x2xf32>
    %58 = vector.shape_cast %57 : vector<2x2xf32> to vector<1x2x2xf32>
    %59 = arith.addf %55, %58 : vector<1x2x2xf32>
    %cst_38 = arith.constant dense<0xFF800000> : vector<1x2xf32>
    %60 = vector.multi_reduction <maximumf>, %59, %cst_38 [2] : vector<1x2x2xf32> to vector<1x2xf32>
    %61 = vector.shape_cast %60 : vector<1x2xf32> to vector<1x2x1xf32>
    %62 = vector.broadcast %61 : vector<1x2x1xf32> to vector<1x2x2xf32>
    %63 = arith.subf %59, %62 : vector<1x2x2xf32>
    %64 = math.exp %63 : vector<1x2x2xf32>
    %cst_39 = arith.constant dense<0.000000e+00> : vector<1x2xf32>
    %65 = vector.multi_reduction <add>, %64, %cst_39 [2] : vector<1x2x2xf32> to vector<1x2xf32>
    %66 = vector.shape_cast %65 : vector<1x2xf32> to vector<1x2x1xf32>
    %67 = tpu.reciprocal %66 {approx = true} : vector<1x2x1xf32> -> vector<1x2x1xf32>
    %68 = vector.broadcast %67 : vector<1x2x1xf32> to vector<1x2x2xf32>
    %69 = arith.mulf %64, %68 : vector<1x2x2xf32>
    %70 = arith.truncf %69 : vector<1x2x2xf32> to vector<1x2x2xbf16>
    "tpu.trace_start"() <{level = 10 : i32, message = "wlm,wmd->wld"}> : () -> ()
    %cst_40 = arith.constant dense<0.000000e+00> : vector<1x2x16xf32>
    %71 = tpu.matmul %70, %52, %cst_40 {dimension_numbers = #tpu.dot_dimension_numbers<[2], [1], [1], [2], [0, 0, 0, 1, 1, 2], [0], [0]>} : vector<1x2x2xbf16>, vector<1x2x16xbf16>, vector<1x2x16xf32> -> vector<1x2x16xf32>
    "tpu.trace_stop"() : () -> ()
    %72 = arith.truncf %71 : vector<1x2x16xf32> to vector<1x2x16xbf16>
    %c0_41 = arith.constant 0 : index
    %c0_42 = arith.constant 0 : index
    %c32_43 = arith.constant 32 : index
    %73 = vector.load %arg3[%c0_41, %c0_42, %c32_43] : memref<1x2x128xbf16, #tpu.memory_space<vmem>>, vector<1x2x16xbf16>
    tpu.vector_store %arg3[%c0_41, %c0_42, %c32_43], %72 {strides = array<i32>} : memref<1x2x128xbf16, #tpu.memory_space<vmem>>, vector<1x2x16xbf16>,
    %c0_44 = arith.constant 0 : index
    %c0_45 = arith.constant 0 : index
    %c48 = arith.constant 48 : index
    %74 = vector.load %arg1[%c0_44, %c0_45, %c48] : memref<1x2x384xbf16, #tpu.memory_space<vmem>>, vector<1x2x16xbf16>
    %c0_46 = arith.constant 0 : index
    %c0_47 = arith.constant 0 : index
    %c176 = arith.constant 176 : index
    %75 = vector.load %arg1[%c0_46, %c0_47, %c176] : memref<1x2x384xbf16, #tpu.memory_space<vmem>>, vector<1x2x16xbf16>
    %c0_48 = arith.constant 0 : index
    %c0_49 = arith.constant 0 : index
    %c304 = arith.constant 304 : index
    %76 = vector.load %arg1[%c0_48, %c0_49, %c304] : memref<1x2x384xbf16, #tpu.memory_space<vmem>>, vector<1x2x16xbf16>
    "tpu.trace_start"() <{level = 10 : i32, message = "wld,wmd->wlm"}> : () -> ()
    %cst_50 = arith.constant dense<0.000000e+00> : vector<1x2x2xf32>
    %77 = tpu.matmul %74, %75, %cst_50 {dimension_numbers = #tpu.dot_dimension_numbers<[2], [2], [1], [1], [0, 0, 0, 1, 1, 1], [0], [0]>} : vector<1x2x16xbf16>, vector<1x2x16xbf16>, vector<1x2x2xf32> -> vector<1x2x2xf32>
    "tpu.trace_stop"() : () -> ()
    %cst_51 = arith.constant 2.500000e-01 : f32
    %78 = vector.broadcast %cst_51 : f32 to vector<1x2x2xf32>
    %79 = arith.mulf %77, %78 : vector<1x2x2xf32>
    %80 = vector.extract_strided_slice %1 {offsets = [3, 0, 0], sizes = [1, 2, 2], strides = [1, 1, 1]} : vector<8x2x2xf32> to vector<1x2x2xf32>
    %81 = vector.shape_cast %80 : vector<1x2x2xf32> to vector<2x2xf32>
    %82 = vector.shape_cast %81 : vector<2x2xf32> to vector<1x2x2xf32>
    %83 = arith.addf %79, %82 : vector<1x2x2xf32>
    %cst_52 = arith.constant dense<0xFF800000> : vector<1x2xf32>
    %84 = vector.multi_reduction <maximumf>, %83, %cst_52 [2] : vector<1x2x2xf32> to vector<1x2xf32>
    %85 = vector.shape_cast %84 : vector<1x2xf32> to vector<1x2x1xf32>
    %86 = vector.broadcast %85 : vector<1x2x1xf32> to vector<1x2x2xf32>
    %87 = arith.subf %83, %86 : vector<1x2x2xf32>
    %88 = math.exp %87 : vector<1x2x2xf32>
    %cst_53 = arith.constant dense<0.000000e+00> : vector<1x2xf32>
    %89 = vector.multi_reduction <add>, %88, %cst_53 [2] : vector<1x2x2xf32> to vector<1x2xf32>
    %90 = vector.shape_cast %89 : vector<1x2xf32> to vector<1x2x1xf32>
    %91 = tpu.reciprocal %90 {approx = true} : vector<1x2x1xf32> -> vector<1x2x1xf32>
    %92 = vector.broadcast %91 : vector<1x2x1xf32> to vector<1x2x2xf32>
    %93 = arith.mulf %88, %92 : vector<1x2x2xf32>
    %94 = arith.truncf %93 : vector<1x2x2xf32> to vector<1x2x2xbf16>
    "tpu.trace_start"() <{level = 10 : i32, message = "wlm,wmd->wld"}> : () -> ()
    %cst_54 = arith.constant dense<0.000000e+00> : vector<1x2x16xf32>
    %95 = tpu.matmul %94, %76, %cst_54 {dimension_numbers = #tpu.dot_dimension_numbers<[2], [1], [1], [2], [0, 0, 0, 1, 1, 2], [0], [0]>} : vector<1x2x2xbf16>, vector<1x2x16xbf16>, vector<1x2x16xf32> -> vector<1x2x16xf32>
    "tpu.trace_stop"() : () -> ()
    %96 = arith.truncf %95 : vector<1x2x16xf32> to vector<1x2x16xbf16>
    %c0_55 = arith.constant 0 : index
    %c0_56 = arith.constant 0 : index
    %c48_57 = arith.constant 48 : index
    %97 = vector.load %arg3[%c0_55, %c0_56, %c48_57] : memref<1x2x128xbf16, #tpu.memory_space<vmem>>, vector<1x2x16xbf16>
    tpu.vector_store %arg3[%c0_55, %c0_56, %c48_57], %96 {strides = array<i32>} : memref<1x2x128xbf16, #tpu.memory_space<vmem>>, vector<1x2x16xbf16>,
    %c0_58 = arith.constant 0 : index
    %c0_59 = arith.constant 0 : index
    %c64 = arith.constant 64 : index
    %98 = vector.load %arg1[%c0_58, %c0_59, %c64] : memref<1x2x384xbf16, #tpu.memory_space<vmem>>, vector<1x2x16xbf16>
    %c0_60 = arith.constant 0 : index
    %c0_61 = arith.constant 0 : index
    %c192 = arith.constant 192 : index
    %99 = vector.load %arg1[%c0_60, %c0_61, %c192] : memref<1x2x384xbf16, #tpu.memory_space<vmem>>, vector<1x2x16xbf16>
    %c0_62 = arith.constant 0 : index
    %c0_63 = arith.constant 0 : index
    %c320 = arith.constant 320 : index
    %100 = vector.load %arg1[%c0_62, %c0_63, %c320] : memref<1x2x384xbf16, #tpu.memory_space<vmem>>, vector<1x2x16xbf16>
    "tpu.trace_start"() <{level = 10 : i32, message = "wld,wmd->wlm"}> : () -> ()
    %cst_64 = arith.constant dense<0.000000e+00> : vector<1x2x2xf32>
    %101 = tpu.matmul %98, %99, %cst_64 {dimension_numbers = #tpu.dot_dimension_numbers<[2], [2], [1], [1], [0, 0, 0, 1, 1, 1], [0], [0]>} : vector<1x2x16xbf16>, vector<1x2x16xbf16>, vector<1x2x2xf32> -> vector<1x2x2xf32>
    "tpu.trace_stop"() : () -> ()
    %cst_65 = arith.constant 2.500000e-01 : f32
    %102 = vector.broadcast %cst_65 : f32 to vector<1x2x2xf32>
    %103 = arith.mulf %101, %102 : vector<1x2x2xf32>
    %104 = vector.extract_strided_slice %1 {offsets = [4, 0, 0], sizes = [1, 2, 2], strides = [1, 1, 1]} : vector<8x2x2xf32> to vector<1x2x2xf32>
    %105 = vector.shape_cast %104 : vector<1x2x2xf32> to vector<2x2xf32>
    %106 = vector.shape_cast %105 : vector<2x2xf32> to vector<1x2x2xf32>
    %107 = arith.addf %103, %106 : vector<1x2x2xf32>
    %cst_66 = arith.constant dense<0xFF800000> : vector<1x2xf32>
    %108 = vector.multi_reduction <maximumf>, %107, %cst_66 [2] : vector<1x2x2xf32> to vector<1x2xf32>
    %109 = vector.shape_cast %108 : vector<1x2xf32> to vector<1x2x1xf32>
    %110 = vector.broadcast %109 : vector<1x2x1xf32> to vector<1x2x2xf32>
    %111 = arith.subf %107, %110 : vector<1x2x2xf32>
    %112 = math.exp %111 : vector<1x2x2xf32>
    %cst_67 = arith.constant dense<0.000000e+00> : vector<1x2xf32>
    %113 = vector.multi_reduction <add>, %112, %cst_67 [2] : vector<1x2x2xf32> to vector<1x2xf32>
    %114 = vector.shape_cast %113 : vector<1x2xf32> to vector<1x2x1xf32>
    %115 = tpu.reciprocal %114 {approx = true} : vector<1x2x1xf32> -> vector<1x2x1xf32>
    %116 = vector.broadcast %115 : vector<1x2x1xf32> to vector<1x2x2xf32>
    %117 = arith.mulf %112, %116 : vector<1x2x2xf32>
    %118 = arith.truncf %117 : vector<1x2x2xf32> to vector<1x2x2xbf16>
    "tpu.trace_start"() <{level = 10 : i32, message = "wlm,wmd->wld"}> : () -> ()
    %cst_68 = arith.constant dense<0.000000e+00> : vector<1x2x16xf32>
    %119 = tpu.matmul %118, %100, %cst_68 {dimension_numbers = #tpu.dot_dimension_numbers<[2], [1], [1], [2], [0, 0, 0, 1, 1, 2], [0], [0]>} : vector<1x2x2xbf16>, vector<1x2x16xbf16>, vector<1x2x16xf32> -> vector<1x2x16xf32>
    "tpu.trace_stop"() : () -> ()
    %120 = arith.truncf %119 : vector<1x2x16xf32> to vector<1x2x16xbf16>
    %c0_69 = arith.constant 0 : index
    %c0_70 = arith.constant 0 : index
    %c64_71 = arith.constant 64 : index
    %121 = vector.load %arg3[%c0_69, %c0_70, %c64_71] : memref<1x2x128xbf16, #tpu.memory_space<vmem>>, vector<1x2x16xbf16>
    tpu.vector_store %arg3[%c0_69, %c0_70, %c64_71], %120 {strides = array<i32>} : memref<1x2x128xbf16, #tpu.memory_space<vmem>>, vector<1x2x16xbf16>,
    %c0_72 = arith.constant 0 : index
    %c0_73 = arith.constant 0 : index
    %c80 = arith.constant 80 : index
    %122 = vector.load %arg1[%c0_72, %c0_73, %c80] : memref<1x2x384xbf16, #tpu.memory_space<vmem>>, vector<1x2x16xbf16>
    %c0_74 = arith.constant 0 : index
    %c0_75 = arith.constant 0 : index
    %c208 = arith.constant 208 : index
    %123 = vector.load %arg1[%c0_74, %c0_75, %c208] : memref<1x2x384xbf16, #tpu.memory_space<vmem>>, vector<1x2x16xbf16>
    %c0_76 = arith.constant 0 : index
    %c0_77 = arith.constant 0 : index
    %c336 = arith.constant 336 : index
    %124 = vector.load %arg1[%c0_76, %c0_77, %c336] : memref<1x2x384xbf16, #tpu.memory_space<vmem>>, vector<1x2x16xbf16>
    "tpu.trace_start"() <{level = 10 : i32, message = "wld,wmd->wlm"}> : () -> ()
    %cst_78 = arith.constant dense<0.000000e+00> : vector<1x2x2xf32>
    %125 = tpu.matmul %122, %123, %cst_78 {dimension_numbers = #tpu.dot_dimension_numbers<[2], [2], [1], [1], [0, 0, 0, 1, 1, 1], [0], [0]>} : vector<1x2x16xbf16>, vector<1x2x16xbf16>, vector<1x2x2xf32> -> vector<1x2x2xf32>
    "tpu.trace_stop"() : () -> ()
    %cst_79 = arith.constant 2.500000e-01 : f32
    %126 = vector.broadcast %cst_79 : f32 to vector<1x2x2xf32>
    %127 = arith.mulf %125, %126 : vector<1x2x2xf32>
    %128 = vector.extract_strided_slice %1 {offsets = [5, 0, 0], sizes = [1, 2, 2], strides = [1, 1, 1]} : vector<8x2x2xf32> to vector<1x2x2xf32>
    %129 = vector.shape_cast %128 : vector<1x2x2xf32> to vector<2x2xf32>
    %130 = vector.shape_cast %129 : vector<2x2xf32> to vector<1x2x2xf32>
    %131 = arith.addf %127, %130 : vector<1x2x2xf32>
    %cst_80 = arith.constant dense<0xFF800000> : vector<1x2xf32>
    %132 = vector.multi_reduction <maximumf>, %131, %cst_80 [2] : vector<1x2x2xf32> to vector<1x2xf32>
    %133 = vector.shape_cast %132 : vector<1x2xf32> to vector<1x2x1xf32>
    %134 = vector.broadcast %133 : vector<1x2x1xf32> to vector<1x2x2xf32>
    %135 = arith.subf %131, %134 : vector<1x2x2xf32>
    %136 = math.exp %135 : vector<1x2x2xf32>
    %cst_81 = arith.constant dense<0.000000e+00> : vector<1x2xf32>
    %137 = vector.multi_reduction <add>, %136, %cst_81 [2] : vector<1x2x2xf32> to vector<1x2xf32>
    %138 = vector.shape_cast %137 : vector<1x2xf32> to vector<1x2x1xf32>
    %139 = tpu.reciprocal %138 {approx = true} : vector<1x2x1xf32> -> vector<1x2x1xf32>
    %140 = vector.broadcast %139 : vector<1x2x1xf32> to vector<1x2x2xf32>
    %141 = arith.mulf %136, %140 : vector<1x2x2xf32>
    %142 = arith.truncf %141 : vector<1x2x2xf32> to vector<1x2x2xbf16>
    "tpu.trace_start"() <{level = 10 : i32, message = "wlm,wmd->wld"}> : () -> ()
    %cst_82 = arith.constant dense<0.000000e+00> : vector<1x2x16xf32>
    %143 = tpu.matmul %142, %124, %cst_82 {dimension_numbers = #tpu.dot_dimension_numbers<[2], [1], [1], [2], [0, 0, 0, 1, 1, 2], [0], [0]>} : vector<1x2x2xbf16>, vector<1x2x16xbf16>, vector<1x2x16xf32> -> vector<1x2x16xf32>
    "tpu.trace_stop"() : () -> ()
    %144 = arith.truncf %143 : vector<1x2x16xf32> to vector<1x2x16xbf16>
    %c0_83 = arith.constant 0 : index
    %c0_84 = arith.constant 0 : index
    %c80_85 = arith.constant 80 : index
    %145 = vector.load %arg3[%c0_83, %c0_84, %c80_85] : memref<1x2x128xbf16, #tpu.memory_space<vmem>>, vector<1x2x16xbf16>
    tpu.vector_store %arg3[%c0_83, %c0_84, %c80_85], %144 {strides = array<i32>} : memref<1x2x128xbf16, #tpu.memory_space<vmem>>, vector<1x2x16xbf16>,
    %c0_86 = arith.constant 0 : index
    %c0_87 = arith.constant 0 : index
    %c96 = arith.constant 96 : index
    %146 = vector.load %arg1[%c0_86, %c0_87, %c96] : memref<1x2x384xbf16, #tpu.memory_space<vmem>>, vector<1x2x16xbf16>
    %c0_88 = arith.constant 0 : index
    %c0_89 = arith.constant 0 : index
    %c224 = arith.constant 224 : index
    %147 = vector.load %arg1[%c0_88, %c0_89, %c224] : memref<1x2x384xbf16, #tpu.memory_space<vmem>>, vector<1x2x16xbf16>
    %c0_90 = arith.constant 0 : index
    %c0_91 = arith.constant 0 : index
    %c352 = arith.constant 352 : index
    %148 = vector.load %arg1[%c0_90, %c0_91, %c352] : memref<1x2x384xbf16, #tpu.memory_space<vmem>>, vector<1x2x16xbf16>
    "tpu.trace_start"() <{level = 10 : i32, message = "wld,wmd->wlm"}> : () -> ()
    %cst_92 = arith.constant dense<0.000000e+00> : vector<1x2x2xf32>
    %149 = tpu.matmul %146, %147, %cst_92 {dimension_numbers = #tpu.dot_dimension_numbers<[2], [2], [1], [1], [0, 0, 0, 1, 1, 1], [0], [0]>} : vector<1x2x16xbf16>, vector<1x2x16xbf16>, vector<1x2x2xf32> -> vector<1x2x2xf32>
    "tpu.trace_stop"() : () -> ()
    %cst_93 = arith.constant 2.500000e-01 : f32
    %150 = vector.broadcast %cst_93 : f32 to vector<1x2x2xf32>
    %151 = arith.mulf %149, %150 : vector<1x2x2xf32>
    %152 = vector.extract_strided_slice %1 {offsets = [6, 0, 0], sizes = [1, 2, 2], strides = [1, 1, 1]} : vector<8x2x2xf32> to vector<1x2x2xf32>
    %153 = vector.shape_cast %152 : vector<1x2x2xf32> to vector<2x2xf32>
    %154 = vector.shape_cast %153 : vector<2x2xf32> to vector<1x2x2xf32>
    %155 = arith.addf %151, %154 : vector<1x2x2xf32>
    %cst_94 = arith.constant dense<0xFF800000> : vector<1x2xf32>
    %156 = vector.multi_reduction <maximumf>, %155, %cst_94 [2] : vector<1x2x2xf32> to vector<1x2xf32>
    %157 = vector.shape_cast %156 : vector<1x2xf32> to vector<1x2x1xf32>
    %158 = vector.broadcast %157 : vector<1x2x1xf32> to vector<1x2x2xf32>
    %159 = arith.subf %155, %158 : vector<1x2x2xf32>
    %160 = math.exp %159 : vector<1x2x2xf32>
    %cst_95 = arith.constant dense<0.000000e+00> : vector<1x2xf32>
    %161 = vector.multi_reduction <add>, %160, %cst_95 [2] : vector<1x2x2xf32> to vector<1x2xf32>
    %162 = vector.shape_cast %161 : vector<1x2xf32> to vector<1x2x1xf32>
    %163 = tpu.reciprocal %162 {approx = true} : vector<1x2x1xf32> -> vector<1x2x1xf32>
    %164 = vector.broadcast %163 : vector<1x2x1xf32> to vector<1x2x2xf32>
    %165 = arith.mulf %160, %164 : vector<1x2x2xf32>
    %166 = arith.truncf %165 : vector<1x2x2xf32> to vector<1x2x2xbf16>
    "tpu.trace_start"() <{level = 10 : i32, message = "wlm,wmd->wld"}> : () -> ()
    %cst_96 = arith.constant dense<0.000000e+00> : vector<1x2x16xf32>
    %167 = tpu.matmul %166, %148, %cst_96 {dimension_numbers = #tpu.dot_dimension_numbers<[2], [1], [1], [2], [0, 0, 0, 1, 1, 2], [0], [0]>} : vector<1x2x2xbf16>, vector<1x2x16xbf16>, vector<1x2x16xf32> -> vector<1x2x16xf32>
    "tpu.trace_stop"() : () -> ()
    %168 = arith.truncf %167 : vector<1x2x16xf32> to vector<1x2x16xbf16>
    %c0_97 = arith.constant 0 : index
    %c0_98 = arith.constant 0 : index
    %c96_99 = arith.constant 96 : index
    %169 = vector.load %arg3[%c0_97, %c0_98, %c96_99] : memref<1x2x128xbf16, #tpu.memory_space<vmem>>, vector<1x2x16xbf16>
    tpu.vector_store %arg3[%c0_97, %c0_98, %c96_99], %168 {strides = array<i32>} : memref<1x2x128xbf16, #tpu.memory_space<vmem>>, vector<1x2x16xbf16>,
    %c0_100 = arith.constant 0 : index
    %c0_101 = arith.constant 0 : index
    %c112 = arith.constant 112 : index
    %170 = vector.load %arg1[%c0_100, %c0_101, %c112] : memref<1x2x384xbf16, #tpu.memory_space<vmem>>, vector<1x2x16xbf16>
    %c0_102 = arith.constant 0 : index
    %c0_103 = arith.constant 0 : index
    %c240 = arith.constant 240 : index
    %171 = vector.load %arg1[%c0_102, %c0_103, %c240] : memref<1x2x384xbf16, #tpu.memory_space<vmem>>, vector<1x2x16xbf16>
    %c0_104 = arith.constant 0 : index
    %c0_105 = arith.constant 0 : index
    %c368 = arith.constant 368 : index
    %172 = vector.load %arg1[%c0_104, %c0_105, %c368] : memref<1x2x384xbf16, #tpu.memory_space<vmem>>, vector<1x2x16xbf16>
    "tpu.trace_start"() <{level = 10 : i32, message = "wld,wmd->wlm"}> : () -> ()
    %cst_106 = arith.constant dense<0.000000e+00> : vector<1x2x2xf32>
    %173 = tpu.matmul %170, %171, %cst_106 {dimension_numbers = #tpu.dot_dimension_numbers<[2], [2], [1], [1], [0, 0, 0, 1, 1, 1], [0], [0]>} : vector<1x2x16xbf16>, vector<1x2x16xbf16>, vector<1x2x2xf32> -> vector<1x2x2xf32>
    "tpu.trace_stop"() : () -> ()
    %cst_107 = arith.constant 2.500000e-01 : f32
    %174 = vector.broadcast %cst_107 : f32 to vector<1x2x2xf32>
    %175 = arith.mulf %173, %174 : vector<1x2x2xf32>
    %176 = vector.extract_strided_slice %1 {offsets = [7, 0, 0], sizes = [1, 2, 2], strides = [1, 1, 1]} : vector<8x2x2xf32> to vector<1x2x2xf32>
    %177 = vector.shape_cast %176 : vector<1x2x2xf32> to vector<2x2xf32>
    %178 = vector.shape_cast %177 : vector<2x2xf32> to vector<1x2x2xf32>
    %179 = arith.addf %175, %178 : vector<1x2x2xf32>
    %cst_108 = arith.constant dense<0xFF800000> : vector<1x2xf32>
    %180 = vector.multi_reduction <maximumf>, %179, %cst_108 [2] : vector<1x2x2xf32> to vector<1x2xf32>
    %181 = vector.shape_cast %180 : vector<1x2xf32> to vector<1x2x1xf32>
    %182 = vector.broadcast %181 : vector<1x2x1xf32> to vector<1x2x2xf32>
    %183 = arith.subf %179, %182 : vector<1x2x2xf32>
    %184 = math.exp %183 : vector<1x2x2xf32>
    %cst_109 = arith.constant dense<0.000000e+00> : vector<1x2xf32>
    %185 = vector.multi_reduction <add>, %184, %cst_109 [2] : vector<1x2x2xf32> to vector<1x2xf32>
    %186 = vector.shape_cast %185 : vector<1x2xf32> to vector<1x2x1xf32>
    %187 = tpu.reciprocal %186 {approx = true} : vector<1x2x1xf32> -> vector<1x2x1xf32>
    %188 = vector.broadcast %187 : vector<1x2x1xf32> to vector<1x2x2xf32>
    %189 = arith.mulf %184, %188 : vector<1x2x2xf32>
    %190 = arith.truncf %189 : vector<1x2x2xf32> to vector<1x2x2xbf16>
    "tpu.trace_start"() <{level = 10 : i32, message = "wlm,wmd->wld"}> : () -> ()
    %cst_110 = arith.constant dense<0.000000e+00> : vector<1x2x16xf32>
    %191 = tpu.matmul %190, %172, %cst_110 {dimension_numbers = #tpu.dot_dimension_numbers<[2], [1], [1], [2], [0, 0, 0, 1, 1, 2], [0], [0]>} : vector<1x2x2xbf16>, vector<1x2x16xbf16>, vector<1x2x16xf32> -> vector<1x2x16xf32>
    "tpu.trace_stop"() : () -> ()
    %192 = arith.truncf %191 : vector<1x2x16xf32> to vector<1x2x16xbf16>
    %c0_111 = arith.constant 0 : index
    %c0_112 = arith.constant 0 : index
    %c112_113 = arith.constant 112 : index
    %193 = vector.load %arg3[%c0_111, %c0_112, %c112_113] : memref<1x2x128xbf16, #tpu.memory_space<vmem>>, vector<1x2x16xbf16>
    tpu.vector_store %arg3[%c0_111, %c0_112, %c112_113], %192 {strides = array<i32>} : memref<1x2x128xbf16, #tpu.memory_space<vmem>>, vector<1x2x16xbf16>,
    return
  }
  func.func @transform_0(%arg0: i32) -> (i32, i32, i32) {
    %c0_i32 = arith.constant 0 : i32
    %c0_i32_0 = arith.constant 0 : i32
    %c0_i32_1 = arith.constant 0 : i32
    return %arg0, %c0_i32, %c0_i32_0 : i32, i32, i32
  }
  func.func @transform_1(%arg0: i32) -> (i32, i32, i32) {
    %c0_i32 = arith.constant 0 : i32
    %c0_i32_0 = arith.constant 0 : i32
    %c0_i32_1 = arith.constant 0 : i32
    %c0_i32_2 = arith.constant 0 : i32
    return %c0_i32, %c0_i32_0, %c0_i32_1 : i32, i32, i32
  }
  func.func @transform_2(%arg0: i32) -> (i32, i32, i32) {
    %c0_i32 = arith.constant 0 : i32
    %c0_i32_0 = arith.constant 0 : i32
    %c0_i32_1 = arith.constant 0 : i32
    return %arg0, %c0_i32, %c0_i32_0 : i32, i32, i32
  }
}

module attributes {stable_mosaic.version = 11 : i64} {
  func.func @_matmul_kernel(%arg0: i32, %arg1: i32, %arg2: i32, %arg3: memref<16x128xbf16, #tpu.memory_space<vmem>>, %arg4: memref<128x128xbf16, #tpu.memory_space<vmem>>, %arg5: memref<1x128xf32, #tpu.memory_space<vmem>>, %arg6: memref<16x128xbf16, #tpu.memory_space<vmem>>, %arg7: memref<16x128xf32, #tpu.memory_space<vmem>>) attributes {dimension_semantics = [#tpu.dimension_semantics<parallel>, #tpu.dimension_semantics<parallel>, #tpu.dimension_semantics<arbitrary>], iteration_bounds = array<i64: 1, 1, 1>, scalar_prefetch = 0 : i64, scratch_operands = 1 : i64, tpu.core_type = #tpu.core_type<tc>, window_params = [{transform_indices = @transform_0, window_bounds = array<i64: 16, 128>}, {transform_indices = @transform_1, window_bounds = array<i64: 128, 128>}, {transform_indices = @transform_2, window_bounds = array<i64: 1, 128>}, {transform_indices = @transform_3, window_bounds = array<i64: 16, 128>}]} {
    %c0_i32 = arith.constant 0 : i32
    %0 = arith.cmpi eq, %arg2, %c0_i32 : i32
    %1 = arith.extui %0 : i1 to i32
    %c0_i32_0 = arith.constant 0 : i32
    %2 = arith.cmpi ne, %1, %c0_i32_0 : i32
    scf.if %2 {
      %cst_10 = arith.constant 0.000000e+00 : f32
      %12 = vector.broadcast %cst_10 : f32 to vector<16x128xf32>
      %c0_11 = arith.constant 0 : index
      %c0_12 = arith.constant 0 : index
      %13 = vector.load %arg7[%c0_11, %c0_12] : memref<16x128xf32, #tpu.memory_space<vmem>>, vector<16x128xf32>
      tpu.vector_store %arg7[%c0_11, %c0_12], %12 {strides = array<i32>} : memref<16x128xf32, #tpu.memory_space<vmem>>, vector<16x128xf32>,
    } else {
    }
    %c0 = arith.constant 0 : index
    %c0_1 = arith.constant 0 : index
    %3 = vector.load %arg7[%c0, %c0_1] : memref<16x128xf32, #tpu.memory_space<vmem>>, vector<16x128xf32>
    %c0_2 = arith.constant 0 : index
    %c0_3 = arith.constant 0 : index
    %4 = vector.load %arg3[%c0_2, %c0_3] : memref<16x128xbf16, #tpu.memory_space<vmem>>, vector<16x128xbf16>
    %c0_4 = arith.constant 0 : index
    %c0_5 = arith.constant 0 : index
    %5 = vector.load %arg4[%c0_4, %c0_5] : memref<128x128xbf16, #tpu.memory_space<vmem>>, vector<128x128xbf16>
    %cst = arith.constant dense<0.000000e+00> : vector<16x128xf32>
    %6 = tpu.matmul %4, %5, %cst {dimension_numbers = #tpu.dot_dimension_numbers<[1], [0], [0], [1], [0, 0, 1, 1], [], []>} : vector<16x128xbf16>, vector<128x128xbf16>, vector<16x128xf32> -> vector<16x128xf32>
    %7 = arith.addf %3, %6 : vector<16x128xf32>
    %c0_6 = arith.constant 0 : index
    %c0_7 = arith.constant 0 : index
    %8 = vector.load %arg7[%c0_6, %c0_7] : memref<16x128xf32, #tpu.memory_space<vmem>>, vector<16x128xf32>
    tpu.vector_store %arg7[%c0_6, %c0_7], %7 {strides = array<i32>} : memref<16x128xf32, #tpu.memory_space<vmem>>, vector<16x128xf32>,
    %c0_i32_8 = arith.constant 0 : i32
    %9 = arith.cmpi eq, %arg2, %c0_i32_8 : i32
    %10 = arith.extui %9 : i1 to i32
    %c0_i32_9 = arith.constant 0 : i32
    %11 = arith.cmpi ne, %10, %c0_i32_9 : i32
    scf.if %11 {
      %c0_10 = arith.constant 0 : index
      %c0_11 = arith.constant 0 : index
      %12 = vector.load %arg7[%c0_10, %c0_11] : memref<16x128xf32, #tpu.memory_space<vmem>>, vector<16x128xf32>
      %c0_12 = arith.constant 0 : index
      %c0_13 = arith.constant 0 : index
      %13 = vector.load %arg5[%c0_12, %c0_13] : memref<1x128xf32, #tpu.memory_space<vmem>>, vector<1x128xf32>
      %14 = vector.broadcast %13 : vector<1x128xf32> to vector<16x128xf32>
      %15 = arith.addf %12, %14 : vector<16x128xf32>
      %16 = arith.truncf %15 : vector<16x128xf32> to vector<16x128xbf16>
      %c0_14 = arith.constant 0 : index
      %c0_15 = arith.constant 0 : index
      %17 = vector.load %arg6[%c0_14, %c0_15] : memref<16x128xbf16, #tpu.memory_space<vmem>>, vector<16x128xbf16>
      tpu.vector_store %arg6[%c0_14, %c0_15], %16 {strides = array<i32>} : memref<16x128xbf16, #tpu.memory_space<vmem>>, vector<16x128xbf16>,
    } else {
    }
    return
  }
  func.func @transform_0(%arg0: i32, %arg1: i32, %arg2: i32) -> (i32, i32) {
    %c0_i32 = arith.constant 0 : i32
    return %arg0, %arg2 : i32, i32
  }
  func.func @transform_1(%arg0: i32, %arg1: i32, %arg2: i32) -> (i32, i32) {
    %c0_i32 = arith.constant 0 : i32
    return %arg2, %arg1 : i32, i32
  }
  func.func @transform_2(%arg0: i32, %arg1: i32, %arg2: i32) -> (i32, i32) {
    %c0_i32 = arith.constant 0 : i32
    %c0_i32_0 = arith.constant 0 : i32
    return %c0_i32, %arg1 : i32, i32
  }
  func.func @transform_3(%arg0: i32, %arg1: i32, %arg2: i32) -> (i32, i32) {
    %c0_i32 = arith.constant 0 : i32
    return %arg0, %arg1 : i32, i32
  }
}

module attributes {stable_mosaic.version = 11 : i64} {
  func.func @_mlp_kernel(%arg0: i32, %arg1: i32, %arg2: memref<16x128xbf16, #tpu.memory_space<vmem>>, %arg3: memref<1x128xf32, #tpu.memory_space<vmem>>, %arg4: memref<1x128xf32, #tpu.memory_space<vmem>>, %arg5: memref<128x256xbf16, #tpu.memory_space<vmem>>, %arg6: memref<1x256xf32, #tpu.memory_space<vmem>>, %arg7: memref<256x128xbf16, #tpu.memory_space<vmem>>, %arg8: memref<1x128xf32, #tpu.memory_space<vmem>>, %arg9: memref<16x128xbf16, #tpu.memory_space<vmem>>, %arg10: memref<16x128xf32, #tpu.memory_space<vmem>>, %arg11: memref<16x128xbf16, #tpu.memory_space<vmem>>) attributes {dimension_semantics = [#tpu.dimension_semantics<parallel>, #tpu.dimension_semantics<arbitrary>], iteration_bounds = array<i64: 1, 2>, scalar_prefetch = 0 : i64, scratch_operands = 2 : i64, tpu.core_type = #tpu.core_type<tc>, window_params = [{transform_indices = @transform_0, window_bounds = array<i64: 16, 128>}, {pipeline_mode = #tpu.pipeline_mode<synchronous>, transform_indices = @transform_1, window_bounds = array<i64: 1, 128>}, {pipeline_mode = #tpu.pipeline_mode<synchronous>, transform_indices = @transform_2, window_bounds = array<i64: 1, 128>}, {transform_indices = @transform_3, window_bounds = array<i64: 128, 256>}, {transform_indices = @transform_4, window_bounds = array<i64: 1, 256>}, {transform_indices = @transform_5, window_bounds = array<i64: 256, 128>}, {pipeline_mode = #tpu.pipeline_mode<synchronous>, transform_indices = @transform_6, window_bounds = array<i64: 1, 128>}, {transform_indices = @transform_7, window_bounds = array<i64: 16, 128>}]} {
    %c0_i32 = arith.constant 0 : i32
    %0 = arith.cmpi eq, %arg1, %c0_i32 : i32
    %1 = arith.extui %0 : i1 to i32
    %c0_i32_0 = arith.constant 0 : i32
    %2 = arith.cmpi ne, %1, %c0_i32_0 : i32
    scf.if %2 {
      %cst_18 = arith.constant 0.000000e+00 : f32
      %31 = vector.broadcast %cst_18 : f32 to vector<16x128xf32>
      %c0_19 = arith.constant 0 : index
      %c0_20 = arith.constant 0 : index
      %32 = vector.load %arg10[%c0_19, %c0_20] : memref<16x128xf32, #tpu.memory_space<vmem>>, vector<16x128xf32>
      tpu.vector_store %arg10[%c0_19, %c0_20], %31 {strides = array<i32>} : memref<16x128xf32, #tpu.memory_space<vmem>>, vector<16x128xf32>,
      %c0_21 = arith.constant 0 : index
      %c0_22 = arith.constant 0 : index
      %33 = vector.load %arg2[%c0_21, %c0_22] : memref<16x128xbf16, #tpu.memory_space<vmem>>, vector<16x128xbf16>
      %34 = arith.extf %33 : vector<16x128xbf16> to vector<16x128xf32>
      %cst_23 = arith.constant dense<0.000000e+00> : vector<16xf32>
      %35 = vector.multi_reduction <add>, %34, %cst_23 [1] : vector<16x128xf32> to vector<16xf32>
      %36 = vector.shape_cast %35 : vector<16xf32> to vector<16x1xf32>
      %cst_24 = arith.constant 1.280000e+02 : f32
      %37 = vector.broadcast %cst_24 : f32 to vector<16x1xf32>
      %38 = arith.divf %36, %37 : vector<16x1xf32>
      %39 = vector.broadcast %38 : vector<16x1xf32> to vector<16x128xf32>
      %40 = arith.subf %34, %39 : vector<16x128xf32>
      %41 = arith.mulf %40, %40 : vector<16x128xf32>
      %cst_25 = arith.constant dense<0.000000e+00> : vector<16xf32>
      %42 = vector.multi_reduction <add>, %41, %cst_25 [1] : vector<16x128xf32> to vector<16xf32>
      %43 = vector.shape_cast %42 : vector<16xf32> to vector<16x1xf32>
      %cst_26 = arith.constant 1.280000e+02 : f32
      %44 = vector.broadcast %cst_26 : f32 to vector<16x1xf32>
      %45 = arith.divf %43, %44 : vector<16x1xf32>
      %46 = vector.broadcast %38 : vector<16x1xf32> to vector<16x128xf32>
      %47 = arith.subf %34, %46 : vector<16x128xf32>
      %cst_27 = arith.constant 9.99999974E-6 : f32
      %48 = vector.broadcast %cst_27 : f32 to vector<16x1xf32>
      %49 = arith.addf %45, %48 : vector<16x1xf32>
      %50 = math.rsqrt %49 : vector<16x1xf32>
      %51 = vector.broadcast %50 : vector<16x1xf32> to vector<16x128xf32>
      %52 = arith.mulf %47, %51 : vector<16x128xf32>
      %c0_28 = arith.constant 0 : index
      %c0_29 = arith.constant 0 : index
      %53 = vector.load %arg3[%c0_28, %c0_29] : memref<1x128xf32, #tpu.memory_space<vmem>>, vector<1x128xf32>
      %54 = vector.broadcast %53 : vector<1x128xf32> to vector<16x128xf32>
      %55 = arith.mulf %52, %54 : vector<16x128xf32>
      %c0_30 = arith.constant 0 : index
      %c0_31 = arith.constant 0 : index
      %56 = vector.load %arg4[%c0_30, %c0_31] : memref<1x128xf32, #tpu.memory_space<vmem>>, vector<1x128xf32>
      %57 = vector.broadcast %56 : vector<1x128xf32> to vector<16x128xf32>
      %58 = arith.addf %55, %57 : vector<16x128xf32>
      %59 = arith.truncf %58 : vector<16x128xf32> to vector<16x128xbf16>
      %c0_32 = arith.constant 0 : index
      %c0_33 = arith.constant 0 : index
      %60 = vector.load %arg11[%c0_32, %c0_33] : memref<16x128xbf16, #tpu.memory_space<vmem>>, vector<16x128xbf16>
      tpu.vector_store %arg11[%c0_32, %c0_33], %59 {strides = array<i32>} : memref<16x128xbf16, #tpu.memory_space<vmem>>, vector<16x128xbf16>,
    } else {
    }
    %c0 = arith.constant 0 : index
    %c0_1 = arith.constant 0 : index
    %3 = vector.load %arg11[%c0, %c0_1] : memref<16x128xbf16, #tpu.memory_space<vmem>>, vector<16x128xbf16>
    %c0_2 = arith.constant 0 : index
    %c0_3 = arith.constant 0 : index
    %4 = vector.load %arg5[%c0_2, %c0_3] : memref<128x256xbf16, #tpu.memory_space<vmem>>, vector<128x256xbf16>
    %cst = arith.constant dense<0.000000e+00> : vector<16x256xf32>
    %5 = tpu.matmul %3, %4, %cst {dimension_numbers = #tpu.dot_dimension_numbers<[1], [0], [0], [1], [0, 0, 1, 1], [], []>} : vector<16x128xbf16>, vector<128x256xbf16>, vector<16x256xf32> -> vector<16x256xf32>
    %c0_4 = arith.constant 0 : index
    %c0_5 = arith.constant 0 : index
    %6 = vector.load %arg6[%c0_4, %c0_5] : memref<1x256xf32, #tpu.memory_space<vmem>>, vector<1x256xf32>
    %7 = vector.broadcast %6 : vector<1x256xf32> to vector<16x256xf32>
    %8 = arith.addf %5, %7 : vector<16x256xf32>
    %cst_6 = arith.constant 5.000000e-01 : f32
    %9 = vector.broadcast %cst_6 : f32 to vector<16x256xf32>
    %10 = arith.mulf %9, %8 : vector<16x256xf32>
    %cst_7 = arith.constant 4.471500e-02 : f32
    %11 = vector.broadcast %cst_7 : f32 to vector<16x256xf32>
    %12 = arith.mulf %11, %8 : vector<16x256xf32>
    %13 = arith.mulf %12, %8 : vector<16x256xf32>
    %14 = arith.mulf %13, %8 : vector<16x256xf32>
    %15 = arith.addf %8, %14 : vector<16x256xf32>
    %cst_8 = arith.constant 0.797884583 : f32
    %16 = vector.broadcast %cst_8 : f32 to vector<16x256xf32>
    %17 = arith.mulf %16, %15 : vector<16x256xf32>
    %18 = math.tanh %17 : vector<16x256xf32>
    %cst_9 = arith.constant 1.000000e+00 : f32
    %19 = vector.broadcast %cst_9 : f32 to vector<16x256xf32>
    %20 = arith.addf %19, %18 : vector<16x256xf32>
    %21 = arith.mulf %10, %20 : vector<16x256xf32>
    %c0_10 = arith.constant 0 : index
    %c0_11 = arith.constant 0 : index
    %22 = vector.load %arg10[%c0_10, %c0_11] : memref<16x128xf32, #tpu.memory_space<vmem>>, vector<16x128xf32>
    %23 = arith.truncf %21 : vector<16x256xf32> to vector<16x256xbf16>
    %c0_12 = arith.constant 0 : index
    %c0_13 = arith.constant 0 : index
    %24 = vector.load %arg7[%c0_12, %c0_13] : memref<256x128xbf16, #tpu.memory_space<vmem>>, vector<256x128xbf16>
    %cst_14 = arith.constant dense<0.000000e+00> : vector<16x128xf32>
    %25 = tpu.matmul %23, %24, %cst_14 {dimension_numbers = #tpu.dot_dimension_numbers<[1], [0], [0], [1], [0, 0, 1, 1], [], []>} : vector<16x256xbf16>, vector<256x128xbf16>, vector<16x128xf32> -> vector<16x128xf32>
    %26 = arith.addf %22, %25 : vector<16x128xf32>
    %c0_15 = arith.constant 0 : index
    %c0_16 = arith.constant 0 : index
    %27 = vector.load %arg10[%c0_15, %c0_16] : memref<16x128xf32, #tpu.memory_space<vmem>>, vector<16x128xf32>
    tpu.vector_store %arg10[%c0_15, %c0_16], %26 {strides = array<i32>} : memref<16x128xf32, #tpu.memory_space<vmem>>, vector<16x128xf32>,
    %c1_i32 = arith.constant 1 : i32
    %28 = arith.cmpi eq, %arg1, %c1_i32 : i32
    %29 = arith.extui %28 : i1 to i32
    %c0_i32_17 = arith.constant 0 : i32
    %30 = arith.cmpi ne, %29, %c0_i32_17 : i32
    scf.if %30 {
      %c0_18 = arith.constant 0 : index
      %c0_19 = arith.constant 0 : index
      %31 = vector.load %arg2[%c0_18, %c0_19] : memref<16x128xbf16, #tpu.memory_space<vmem>>, vector<16x128xbf16>
      %32 = arith.extf %31 : vector<16x128xbf16> to vector<16x128xf32>
      %c0_20 = arith.constant 0 : index
      %c0_21 = arith.constant 0 : index
      %33 = vector.load %arg10[%c0_20, %c0_21] : memref<16x128xf32, #tpu.memory_space<vmem>>, vector<16x128xf32>
      %34 = arith.addf %32, %33 : vector<16x128xf32>
      %c0_22 = arith.constant 0 : index
      %c0_23 = arith.constant 0 : index
      %35 = vector.load %arg8[%c0_22, %c0_23] : memref<1x128xf32, #tpu.memory_space<vmem>>, vector<1x128xf32>
      %36 = vector.broadcast %35 : vector<1x128xf32> to vector<16x128xf32>
      %37 = arith.addf %34, %36 : vector<16x128xf32>
      %38 = arith.truncf %37 : vector<16x128xf32> to vector<16x128xbf16>
      %c0_24 = arith.constant 0 : index
      %c0_25 = arith.constant 0 : index
      %39 = vector.load %arg9[%c0_24, %c0_25] : memref<16x128xbf16, #tpu.memory_space<vmem>>, vector<16x128xbf16>
      tpu.vector_store %arg9[%c0_24, %c0_25], %38 {strides = array<i32>} : memref<16x128xbf16, #tpu.memory_space<vmem>>, vector<16x128xbf16>,
    } else {
    }
    return
  }
  func.func @transform_0(%arg0: i32, %arg1: i32) -> (i32, i32) {
    %c0_i32 = arith.constant 0 : i32
    %c0_i32_0 = arith.constant 0 : i32
    return %arg0, %c0_i32 : i32, i32
  }
  func.func @transform_1(%arg0: i32, %arg1: i32) -> (i32, i32) {
    %c0_i32 = arith.constant 0 : i32
    %c0_i32_0 = arith.constant 0 : i32
    %c0_i32_1 = arith.constant 0 : i32
    return %c0_i32, %c0_i32_0 : i32, i32
  }
  func.func @transform_2(%arg0: i32, %arg1: i32) -> (i32, i32) {
    %c0_i32 = arith.constant 0 : i32
    %c0_i32_0 = arith.constant 0 : i32
    %c0_i32_1 = arith.constant 0 : i32
    return %c0_i32, %c0_i32_0 : i32, i32
  }
  func.func @transform_3(%arg0: i32, %arg1: i32) -> (i32, i32) {
    %c0_i32 = arith.constant 0 : i32
    %c0_i32_0 = arith.constant 0 : i32
    return %c0_i32, %arg1 : i32, i32
  }
  func.func @transform_4(%arg0: i32, %arg1: i32) -> (i32, i32) {
    %c0_i32 = arith.constant 0 : i32
    %c0_i32_0 = arith.constant 0 : i32
    return %c0_i32, %arg1 : i32, i32
  }
  func.func @transform_5(%arg0: i32, %arg1: i32) -> (i32, i32) {
    %c0_i32 = arith.constant 0 : i32
    %c0_i32_0 = arith.constant 0 : i32
    return %arg1, %c0_i32 : i32, i32
  }
  func.func @transform_6(%arg0: i32, %arg1: i32) -> (i32, i32) {
    %c0_i32 = arith.constant 0 : i32
    %c0_i32_0 = arith.constant 0 : i32
    %c0_i32_1 = arith.constant 0 : i32
    return %c0_i32, %c0_i32_0 : i32, i32
  }
  func.func @transform_7(%arg0: i32, %arg1: i32) -> (i32, i32) {
    %c0_i32 = arith.constant 0 : i32
    %c0_i32_0 = arith.constant 0 : i32
    return %arg0, %c0_i32 : i32, i32
  }
}

module attributes {stable_mosaic.version = 11 : i64} {
  func.func @_layernorm_kernel(%arg0: i32, %arg1: memref<16x128xbf16, #tpu.memory_space<vmem>>, %arg2: memref<1x128xf32, #tpu.memory_space<vmem>>, %arg3: memref<1x128xf32, #tpu.memory_space<vmem>>, %arg4: memref<16x128xbf16, #tpu.memory_space<vmem>>) attributes {dimension_semantics = [#tpu.dimension_semantics<parallel>], iteration_bounds = array<i64: 1>, scalar_prefetch = 0 : i64, scratch_operands = 0 : i64, tpu.core_type = #tpu.core_type<tc>, window_params = [{transform_indices = @transform_0, window_bounds = array<i64: 16, 128>}, {pipeline_mode = #tpu.pipeline_mode<synchronous>, transform_indices = @transform_1, window_bounds = array<i64: 1, 128>}, {pipeline_mode = #tpu.pipeline_mode<synchronous>, transform_indices = @transform_2, window_bounds = array<i64: 1, 128>}, {transform_indices = @transform_3, window_bounds = array<i64: 16, 128>}]} {
    %c0 = arith.constant 0 : index
    %c0_0 = arith.constant 0 : index
    %0 = vector.load %arg1[%c0, %c0_0] : memref<16x128xbf16, #tpu.memory_space<vmem>>, vector<16x128xbf16>
    %1 = arith.extf %0 : vector<16x128xbf16> to vector<16x128xf32>
    %cst = arith.constant dense<0.000000e+00> : vector<16xf32>
    %2 = vector.multi_reduction <add>, %1, %cst [1] : vector<16x128xf32> to vector<16xf32>
    %3 = vector.shape_cast %2 : vector<16xf32> to vector<16x1xf32>
    %cst_1 = arith.constant 1.280000e+02 : f32
    %4 = vector.broadcast %cst_1 : f32 to vector<16x1xf32>
    %5 = arith.divf %3, %4 : vector<16x1xf32>
    %6 = vector.broadcast %5 : vector<16x1xf32> to vector<16x128xf32>
    %7 = arith.subf %1, %6 : vector<16x128xf32>
    %8 = arith.mulf %7, %7 : vector<16x128xf32>
    %cst_2 = arith.constant dense<0.000000e+00> : vector<16xf32>
    %9 = vector.multi_reduction <add>, %8, %cst_2 [1] : vector<16x128xf32> to vector<16xf32>
    %10 = vector.shape_cast %9 : vector<16xf32> to vector<16x1xf32>
    %cst_3 = arith.constant 1.280000e+02 : f32
    %11 = vector.broadcast %cst_3 : f32 to vector<16x1xf32>
    %12 = arith.divf %10, %11 : vector<16x1xf32>
    %13 = vector.broadcast %5 : vector<16x1xf32> to vector<16x128xf32>
    %14 = arith.subf %1, %13 : vector<16x128xf32>
    %cst_4 = arith.constant 9.99999974E-6 : f32
    %15 = vector.broadcast %cst_4 : f32 to vector<16x1xf32>
    %16 = arith.addf %12, %15 : vector<16x1xf32>
    %17 = math.rsqrt %16 : vector<16x1xf32>
    %18 = vector.broadcast %17 : vector<16x1xf32> to vector<16x128xf32>
    %19 = arith.mulf %14, %18 : vector<16x128xf32>
    %c0_5 = arith.constant 0 : index
    %c0_6 = arith.constant 0 : index
    %20 = vector.load %arg2[%c0_5, %c0_6] : memref<1x128xf32, #tpu.memory_space<vmem>>, vector<1x128xf32>
    %21 = vector.broadcast %20 : vector<1x128xf32> to vector<16x128xf32>
    %22 = arith.mulf %19, %21 : vector<16x128xf32>
    %c0_7 = arith.constant 0 : index
    %c0_8 = arith.constant 0 : index
    %23 = vector.load %arg3[%c0_7, %c0_8] : memref<1x128xf32, #tpu.memory_space<vmem>>, vector<1x128xf32>
    %24 = vector.broadcast %23 : vector<1x128xf32> to vector<16x128xf32>
    %25 = arith.addf %22, %24 : vector<16x128xf32>
    %26 = arith.truncf %25 : vector<16x128xf32> to vector<16x128xbf16>
    %c0_9 = arith.constant 0 : index
    %c0_10 = arith.constant 0 : index
    %27 = vector.load %arg4[%c0_9, %c0_10] : memref<16x128xbf16, #tpu.memory_space<vmem>>, vector<16x128xbf16>
    tpu.vector_store %arg4[%c0_9, %c0_10], %26 {strides = array<i32>} : memref<16x128xbf16, #tpu.memory_space<vmem>>, vector<16x128xbf16>,
    return
  }
  func.func @transform_0(%arg0: i32) -> (i32, i32) {
    %c0_i32 = arith.constant 0 : i32
    %c0_i32_0 = arith.constant 0 : i32
    return %arg0, %c0_i32 : i32, i32
  }
  func.func @transform_1(%arg0: i32) -> (i32, i32) {
    %c0_i32 = arith.constant 0 : i32
    %c0_i32_0 = arith.constant 0 : i32
    %c0_i32_1 = arith.constant 0 : i32
    return %c0_i32, %c0_i32_0 : i32, i32
  }
  func.func @transform_2(%arg0: i32) -> (i32, i32) {
    %c0_i32 = arith.constant 0 : i32
    %c0_i32_0 = arith.constant 0 : i32
    %c0_i32_1 = arith.constant 0 : i32
    return %c0_i32, %c0_i32_0 : i32, i32
  }
  func.func @transform_3(%arg0: i32) -> (i32, i32) {
    %c0_i32 = arith.constant 0 : i32
    %c0_i32_0 = arith.constant 0 : i32
    return %arg0, %c0_i32 : i32, i32
  }
}

</mosaic_0001>

<bundles_post_ra>
// kernel: _lambda_.30
= control target key start
LH: loop header
LB: loop body
LE: loop exit
PB: predicated region body
PF: predicated region fallthrough
CT: control target
= control target key end

     0   :  { %vm19_vm0 = vcmask 130048   ;;  %v289_v1 = vmov 0.0   ;;  %vm112_vm1 = vcmask 785408   ;;  %vm202_vm2 = vcmask 125952   ;;  %s391_s1 = inlined_call_operand.vmem [shape: bf16[96,16], index: 1, kind: input, shape index: {}]   ;;  %s392_s2 = inlined_call_operand.vmem [shape: f32[1,16], index: 2, kind: input, shape index: {}]   ;;  %s393_s0 = inlined_call_operand.vmem [shape: bf16[64,96], index: 0, kind: input, shape index: {}]   ;;  %s394_s3 = inlined_call_operand.vmem [shape: bf16[64,16], index: 3, kind: output, shape index: {}]  }
   0x1   :  { %v268_v0 = vld [vmem:[%s391_s1 + $0x28] sm:$0xff]  ;;  %20 = vst.msk [vmem:[#allocation2] sm:$0xff] %vm19_vm0, %v289_v1  ;;  %v267_v2 = vld [vmem:[%s391_s1 + $0x20] sm:$0xff]  ;;  %v266_v3 = vld [vmem:[%s391_s1 + $0x18] sm:$0xff] }
   0x2   :  { %21 = vst.msk [vmem:[#allocation2 + $0x8] sm:$0xff] %vm19_vm0, %v289_v1  ;;  %127 = vmatpush.bf16.msra.mxu0 %v268_v0  ;;  %269 = vmatpush.bf16.msra.mxu1 %v268_v0  ;;  %v265_v4 = vld [vmem:[%s391_s1 + $0x10] sm:$0xff]  ;;  %v264_v5 = vld [vmem:[%s391_s1 + $0x8] sm:$0xff]  ;;  %v263_v6 = vld [vmem:[%s391_s1] sm:$0xff] }
   0x3   :  { %22 = vst.msk [vmem:[#allocation2 + $0x10] sm:$0xff] %vm19_vm0, %v289_v1  ;;  %270 = vmatpush.bf16.msra.mxu2 %v268_v0  ;;  %271 = vmatpush.bf16.msra.mxu3 %v268_v0  ;;  %v259_v7 = vld [vmem:[%s393_s0] sm:$0xff]  ;;  %v260_v8 = vld [vmem:[%s393_s0 + $0x8] sm:$0xff]  ;;  %v261_v9 = vld [vmem:[%s393_s0 + $0x10] sm:$0xff] }
   0x4   :  { %23 = vst.msk [vmem:[#allocation2 + $0x18] sm:$0xff] %vm19_vm0, %v289_v1  ;;  %v262_v10 = vld [vmem:[%s393_s0 + $0x18] sm:$0xff]  ;;  %v288_v21 = vld [vmem:[%s392_s2] ss:$0 sm:$0xff] }
   0x5   :  { %24 = vst.msk [vmem:[#allocation2 + $0x20] sm:$0xff] %vm19_vm0, %v289_v1 }
   0x6   :  { %25 = vst.msk [vmem:[#allocation2 + $0x28] sm:$0xff] %vm19_vm0, %v289_v1  ;;  %128 = vmatpush.bf16.msra.mxu0 %v267_v2  ;;  %272 = vmatpush.bf16.msra.mxu1 %v267_v2 }
   0x7   :  { %26 = vst.msk [vmem:[#allocation2 + $0x30] sm:$0xff] %vm19_vm0, %v289_v1  ;;  %273 = vmatpush.bf16.msra.mxu2 %v267_v2  ;;  %274 = vmatpush.bf16.msra.mxu3 %v267_v2 }
   0x8   :  { %27 = vst.msk [vmem:[#allocation2 + $0x38] sm:$0xff] %vm19_vm0, %v289_v1  ;;  %v28_v11 = vld [vmem:[#allocation2] sm:$0xff] }
   0x9   :  { %v29_v19 = vld [vmem:[#allocation2 + $0x8] sm:$0xff] }
   0xa   :  { %129 = vmatpush.bf16.msra.mxu0 %v266_v3  ;;  %275 = vmatpush.bf16.msra.mxu1 %v266_v3  ;;  %v30_v12 = vld [vmem:[#allocation2 + $0x10] sm:$0xff] }
   0xb   :  { %276 = vmatpush.bf16.msra.mxu2 %v266_v3  ;;  %277 = vmatpush.bf16.msra.mxu3 %v266_v3  ;;  %v31_v20 = vld [vmem:[#allocation2 + $0x18] sm:$0xff] }
   0xc   :  { %v32_v17 = vld [vmem:[#allocation2 + $0x20] sm:$0xff] }
   0xd   :  { %v33_v35 = vld [vmem:[#allocation2 + $0x28] sm:$0xff] }
   0xe   :  { %130 = vmatpush.bf16.msra.mxu0 %v265_v4  ;;  %278 = vmatpush.bf16.msra.mxu1 %v265_v4  ;;  %v34_v18 = vld [vmem:[#allocation2 + $0x30] sm:$0xff] }
   0xf   :  { %279 = vmatpush.bf16.msra.mxu2 %v265_v4  ;;  %280 = vmatpush.bf16.msra.mxu3 %v265_v4  ;;  %v35_v36 = vld [vmem:[#allocation2 + $0x38] sm:$0xff] }
  0x12   :  { %131 = vmatpush.bf16.msra.mxu0 %v264_v5  ;;  %281 = vmatpush.bf16.msra.mxu1 %v264_v5 }
  0x13   :  { %282 = vmatpush.bf16.msra.mxu2 %v264_v5  ;;  %283 = vmatpush.bf16.msra.mxu3 %v264_v5 }
  0x16   :  { %132 = vmatpush.bf16.msra.mxu0 %v263_v6  ;;  %284 = vmatpush.bf16.msra.mxu1 %v263_v6 }
  0x17   :  { %285 = vmatpush.bf16.msra.mxu2 %v263_v6  ;;  %286 = vmatpush.bf16.msra.mxu3 %v263_v6 }
  0x19   :  { %255 = vmatmul.msk.bf16.vlgmr.msra.gmra.mxu0 %vm112_vm1, %v259_v7  ;;  %256 = vmatmul.msk.bf16.vlgmr.msra.gmra.mxu1 %vm112_vm1, %v260_v8 }
  0x1a   :  { %257 = vmatmul.msk.bf16.vlgmr.msra.gmra.mxu2 %vm112_vm1, %v261_v9  ;;  %258 = vmatmul.msk.bf16.vlgmr.msra.gmra.mxu3 %vm112_vm1, %v262_v10 }
  0x96   :  { %v134_v13 = vpop.f32.mrf.mxu0  ;;  %v139_v14 = vpop.f32.mrf.mxu1 }
  0x97   :  { %v154_v15 = vadd.f32 %v134_v13, %v28_v11  ;;  %v156_v16 = vadd.f32 %v139_v14, %v30_v12 }
  0x99   :  { %163 = vst.msk [vmem:[#allocation2] sm:$0xff] %vm19_vm0, %v154_v15 }
  0x9a   :  { %165 = vst.msk [vmem:[#allocation2 + $0x10] sm:$0xff] %vm19_vm0, %v156_v16 }
  0x9d   :  { %v144_v22 = vpop.f32.mrf.mxu2  ;;  %v149_v23 = vpop.f32.mrf.mxu3 }
  0x9e   :  { %v158_v24 = vadd.f32 %v144_v22, %v32_v17  ;;  %v160_v25 = vadd.f32 %v149_v23, %v34_v18  ;;  %v136_v26 = vpop.f32.mrf.mxu0  ;;  %v141_v27 = vpop.f32.mrf.mxu1 }
  0x9f   :  { %v155_v28 = vadd.f32 %v136_v26, %v29_v19  ;;  %v157_v29 = vadd.f32 %v141_v27, %v31_v20 }
  0xa0   :  { %v174_v30 = vld [vmem:[#allocation2] sm:$0xff]  ;;  %167 = vst.msk [vmem:[#allocation2 + $0x20] sm:$0xff] %vm19_vm0, %v158_v24 }
  0xa1   :  { %v186_v31 = vadd.f32 %v288_v21, %v174_v30  ;;  %v176_v32 = vld [vmem:[#allocation2 + $0x10] sm:$0xff]  ;;  %169 = vst.msk [vmem:[#allocation2 + $0x30] sm:$0xff] %vm19_vm0, %v160_v25 }
  0xa2   :  { %v188_v33 = vadd.f32 %v288_v21, %v176_v32  ;;  %164 = vst.msk [vmem:[#allocation2 + $0x8] sm:$0xff] %vm19_vm0, %v155_v28 }
  0xa3   :  { %v194_v34 = vpack.c.bf16 %v186_v31, %v186_v31  ;;  %166 = vst.msk [vmem:[#allocation2 + $0x18] sm:$0xff] %vm19_vm0, %v157_v29 }
  0xa4   :  { %v196_v37 = vpack.c.bf16 %v188_v33, %v188_v33 }
  0xa5   :  { %203 = vst.msk [vmem:[%s394_s3] sm:$0xf] %vm202_vm2, %v194_v34  ;;  %v146_v38 = vpop.f32.mrf.mxu2  ;;  %v151_v39 = vpop.f32.mrf.mxu3 }
  0xa6   :  { %205 = vst.msk [vmem:[%s394_s3 + $0x8] sm:$0xf] %vm202_vm2, %v196_v37  ;;  %v159_v40 = vadd.f32 %v146_v38, %v33_v35  ;;  %v161_v41 = vadd.f32 %v151_v39, %v35_v36 }
  0xa7   :  { %v178_v42 = vld [vmem:[#allocation2 + $0x20] sm:$0xff] }
  0xa8   :  { %v190_v43 = vadd.f32 %v288_v21, %v178_v42  ;;  %v180_v44 = vld [vmem:[#allocation2 + $0x30] sm:$0xff]  ;;  %168 = vst.msk [vmem:[#allocation2 + $0x28] sm:$0xff] %vm19_vm0, %v159_v40 }
  0xa9   :  { %v192_v45 = vadd.f32 %v288_v21, %v180_v44  ;;  %v175_v46 = vld [vmem:[#allocation2 + $0x8] sm:$0xff]  ;;  %170 = vst.msk [vmem:[#allocation2 + $0x38] sm:$0xff] %vm19_vm0, %v161_v41 }
  0xaa   :  { %v198_v47 = vpack.c.bf16 %v190_v43, %v190_v43  ;;  %v187_v48 = vadd.f32 %v288_v21, %v175_v46  ;;  %v177_v49 = vld [vmem:[#allocation2 + $0x18] sm:$0xff] }
  0xab   :  { %v200_v50 = vpack.c.bf16 %v192_v45, %v192_v45  ;;  %v189_v51 = vadd.f32 %v288_v21, %v177_v49 }
  0xac   :  { %207 = vst.msk [vmem:[%s394_s3 + $0x10] sm:$0xf] %vm202_vm2, %v198_v47  ;;  %v195_v52 = vpack.c.bf16 %v187_v48, %v187_v48 }
  0xad   :  { %209 = vst.msk [vmem:[%s394_s3 + $0x18] sm:$0xf] %vm202_vm2, %v200_v50  ;;  %v197_v53 = vpack.c.bf16 %v189_v51, %v189_v51 }
  0xae   :  { %204 = vst.msk [vmem:[%s394_s3 + $0x4] sm:$0xf] %vm202_vm2, %v195_v52 }
  0xaf   :  { %206 = vst.msk [vmem:[%s394_s3 + $0xc] sm:$0xf] %vm202_vm2, %v197_v53  ;;  %v179_v54 = vld [vmem:[#allocation2 + $0x28] sm:$0xff] }
  0xb0   :  { %v191_v55 = vadd.f32 %v288_v21, %v179_v54  ;;  %v181_v56 = vld [vmem:[#allocation2 + $0x38] sm:$0xff] }
  0xb1   :  { %v193_v57 = vadd.f32 %v288_v21, %v181_v56 }
  0xb2   :  { %v199_v58 = vpack.c.bf16 %v191_v55, %v191_v55 }
  0xb3   :  { %v201_v59 = vpack.c.bf16 %v193_v57, %v193_v57 }
  0xb4   :  { %208 = vst.msk [vmem:[%s394_s3 + $0x14] sm:$0xf] %vm202_vm2, %v199_v58 }
  0xb5   :  { %210 = vst.msk [vmem:[%s394_s3 + $0x1c] sm:$0xf] %vm202_vm2, %v201_v59 }

// kernel: _lambda_.32
= control target key start
LH: loop header
LB: loop body
LE: loop exit
PB: predicated region body
PF: predicated region fallthrough
CT: control target
= control target key end

     0   :  { %vm37_vm0 = vcmask 130048   ;;  %v376_v20 = vmov 16.0   ;;  %s601_s0 = inlined_call_operand.vmem [shape: bf16[64,16], index: 0, kind: input, shape index: {}]   ;;  %s602_s1 = inlined_call_operand.vmem [shape: f32[1,16], index: 1, kind: input, shape index: {}]   ;;  %s603_s2 = inlined_call_operand.vmem [shape: f32[1,16], index: 2, kind: input, shape index: {}]   ;;  %s604_s4 = inlined_call_operand.vmem [shape: f32[1,48], index: 4, kind: input, shape index: {}]   ;;  %s605_s3 = inlined_call_operand.vmem [shape: bf16[16,48], index: 3, kind: input, shape index: {}]   ;;  %s606_s5 = inlined_call_operand.vmem [shape: bf16[64,48], index: 5, kind: output, shape index: {}]  }
   0x1   :  { %v350_v0 = vld [vmem:[%s601_s0 + $0x18] sm:$0xff]   ;;  %v349_v1 = vld [vmem:[%s601_s0 + $0x10] sm:$0xff]   ;;  %v333_v2 = vld [vmem:[%s601_s0] sm:$0xff]   ;;  %358 = vrcp.f32 %v376_v20 }
   0x2   :  { %v346_v3 = vunpack.c.l.bf16 %v350_v0  ;;  %v342_v4 = vunpack.c.l.bf16 %v349_v1  ;;  %v334_v5 = vunpack.c.l.bf16 %v333_v2  ;;  %v347_v9 = vunpack.c.h.bf16 %v350_v0  ;;  %v348_v15 = vld [vmem:[%s601_s0 + $0x8] sm:$0xff]  }
   0x3   :  { %v343_v10 = vunpack.c.h.bf16 %v349_v1  ;;  %v335_v11 = vunpack.c.h.bf16 %v333_v2  ;;  %v338_v16 = vunpack.c.l.bf16 %v348_v15  ;;  %v339_v17 = vunpack.c.h.bf16 %v348_v15 }
   0x4   :  { %v56_v6 = vsel %vm37_vm0, %v346_v3, 0.0  ;;  %v50_v7 = vsel %vm37_vm0, %v342_v4, 0.0  ;;  %v38_v8 = vsel %vm37_vm0, %v334_v5, 0.0  ;;  %v59_v12 = vsel %vm37_vm0, %v347_v9, 0.0 }
   0x5   :  { %57 = vadd.xlane.f32.xlu1 %v56_v6  ;;  %51 = vadd.xlane.f32.xlu0 %v50_v7  ;;  %v53_v13 = vsel %vm37_vm0, %v343_v10, 0.0  ;;  %v41_v14 = vsel %vm37_vm0, %v335_v11, 0.0  ;;  %v44_v18 = vsel %vm37_vm0, %v338_v16, 0.0  ;;  %v47_v19 = vsel %vm37_vm0, %v339_v17, 0.0 }
   0x6   :  { %39 = vadd.xlane.f32.xlu2 %v38_v8 }
   0x7   :  { %v359_v21 = vpop.eup %358 }
   0x8   :  { %v63_v22 = vmul.f32 16.0, %v359_v21  ;;  %vm67_vm1 = vweird.f32 %v359_v21 }
   0xa   :  { %v64_v23 = vsub.f32 1.0, %v63_v22 }
   0xc   :  { %v65_v24 = vmul.f32 %v359_v21, %v64_v23 }
   0xd   :  { %60 = vadd.xlane.f32.xlu1 %v59_v12  ;;  %54 = vadd.xlane.f32.xlu0 %v53_v13 }
   0xe   :  { %42 = vadd.xlane.f32.xlu2 %v41_v14  ;;  %v66_v25 = vadd.f32 %v359_v21, %v65_v24 }
  0x10   :  { %v427_v26 = vsel %vm67_vm1, %v359_v21, %v66_v25 }
  0x15   :  { %45 = vadd.xlane.f32.xlu0 %v44_v18  ;;  %48 = vadd.xlane.f32.xlu1 %v47_v19 }
  0x78   :  { %v58_v27 = vpop.xlane.xlu1 %57  ;;  %v52_v28 = vpop.xlane.xlu0 %51 }
  0x79   :  { %v75_v29 = vmul.f32 %v427_v26, %v58_v27  ;;  %v73_v30 = vmul.f32 %v427_v26, %v52_v28  ;;  %v40_v31 = vpop.xlane.xlu2 %39 }
  0x7a   :  { %v69_v40 = vmul.f32 %v427_v26, %v40_v31 }
  0x7b   :  { %v431_v32 = vsub.f32 %v346_v3, %v75_v29  ;;  %v433_v33 = vsub.f32 %v342_v4, %v73_v30 }
  0x7c   :  { %v451_v48 = vsub.f32 %v334_v5, %v69_v40 }
  0x7d   :  { %v91_v34 = vmul.f32 %v431_v32, %v431_v32  ;;  %v89_v35 = vmul.f32 %v433_v33, %v433_v33 }
  0x7e   :  { %v85_v59 = vmul.f32 %v451_v48, %v451_v48 }
  0x7f   :  { %v111_v36 = vsel %vm37_vm0, %v91_v34, 0.0  ;;  %v105_v37 = vsel %vm37_vm0, %v89_v35, 0.0 }
  0x80   :  { %v61_v38 = vpop.xlane.xlu1 %60  ;;  %v55_v39 = vpop.xlane.xlu0 %54  ;;  %112 = vadd.xlane.f32.xlu1 %v111_v36  ;;  %106 = vadd.xlane.f32.xlu2 %v105_v37  ;;  %v93_v63 = vsel %vm37_vm0, %v85_v59, 0.0 }
  0x81   :  { %v76_v41 = vmul.f32 %v427_v26, %v61_v38  ;;  %v74_v42 = vmul.f32 %v427_v26, %v55_v39  ;;  %v43_v43 = vpop.xlane.xlu2 %42 }
  0x82   :  { %v70_v44 = vmul.f32 %v427_v26, %v43_v43 }
  0x83   :  { %v445_v45 = vsub.f32 %v347_v9, %v76_v41  ;;  %v447_v46 = vsub.f32 %v343_v10, %v74_v42  ;;  %v331_v9 = vld [vmem:[%s605_s3] sm:$0xff] }
  0x84   :  { %v449_v47 = vsub.f32 %v335_v11, %v70_v44  ;;  %352 = vmatpush.bf16.msra.mxu2 %v331_v9  ;;  %353 = vmatpush.bf16.msra.mxu3 %v331_v9 }
  0x85   :  { %v90_v49 = vmul.f32 %v447_v46, %v447_v46  ;;  %v92_v50 = vmul.f32 %v445_v45, %v445_v45  ;;  %280 = vmatpush.bf16.msra.mxu0 %v331_v9  ;;  %351 = vmatpush.bf16.msra.mxu1 %v331_v9 }
  0x86   :  { %v86_v51 = vmul.f32 %v449_v47, %v449_v47 }
  0x87   :  { %v108_v52 = vsel %vm37_vm0, %v90_v49, 0.0  ;;  %v114_v53 = vsel %vm37_vm0, %v92_v50, 0.0 }
  0x88   :  { %109 = vadd.xlane.f32.xlu0 %v108_v52  ;;  %v46_v54 = vpop.xlane.xlu0 %45  ;;  %115 = vadd.xlane.f32.xlu2 %v114_v53  ;;  %v96_v55 = vsel %vm37_vm0, %v86_v51, 0.0  ;;  %v49_v56 = vpop.xlane.xlu1 %48 }
  0x89   :  { %v71_v57 = vmul.f32 %v427_v26, %v46_v54  ;;  %97 = vadd.xlane.f32.xlu1 %v96_v55  ;;  %v72_v58 = vmul.f32 %v427_v26, %v49_v56 }
  0x8b   :  { %v466_v60 = vsub.f32 %v338_v16, %v71_v57  ;;  %v468_v61 = vsub.f32 %v339_v17, %v72_v58 }
  0x8d   :  { %v87_v62 = vmul.f32 %v466_v60, %v466_v60  ;;  %v88_v1 = vmul.f32 %v468_v61, %v468_v61 }
  0x8f   :  { %v99_v0 = vsel %vm37_vm0, %v87_v62, 0.0  ;;  %v102_v2 = vsel %vm37_vm0, %v88_v1, 0.0 }
  0x90   :  { %100 = vadd.xlane.f32.xlu2 %v99_v0  ;;  %94 = vadd.xlane.f32.xlu0 %v93_v63 }
  0x98   :  { %103 = vadd.xlane.f32.xlu0 %v102_v2  ;;  %v521_v2 = vld [vmem:[%s602_s1] ss:$0 sm:$0xff] }
  0xf3   :  { %v113_v3 = vpop.xlane.xlu1 %112  ;;  %v107_v4 = vpop.xlane.xlu2 %106 }
  0xf4   :  { %v123_v5 = vmul.f32 %v113_v3, %v427_v26  ;;  %v121_v6 = vmul.f32 %v107_v4, %v427_v26 }
  0xf6   :  { %v131_v7 = vadd.f32 1e-05, %v123_v5  ;;  %v129_v8 = vadd.f32 1e-05, %v121_v6 }
  0xf8   :  { %360 = vrsqrt.f32 %v131_v7  ;;  %vm199_vm2 = vweird.f32 %v131_v7  ;;  %vm179_vm5 = vweird.f32 %v129_v8 }
  0xf9   :  { %362 = vrsqrt.f32 %v129_v8 }
  0xfb   :  { %v110_v10 = vpop.xlane.xlu0 %109  ;;  %v116_v11 = vpop.xlane.xlu2 %115 }
  0xfc   :  { %v122_v12 = vmul.f32 %v110_v10, %v427_v26  ;;  %v98_v13 = vpop.xlane.xlu1 %97  ;;  %v124_v14 = vmul.f32 %v116_v11, %v427_v26 }
  0xfd   :  { %v118_v15 = vmul.f32 %v98_v13, %v427_v26 }
  0xfe   :  { %v361_v16 = vpop.eup %360  ;;  %v130_v17 = vadd.f32 1e-05, %v122_v12  ;;  %v485_v18 = vadd.f32 1e-05, %v124_v14  ;;  %v356_v14 = vld [vmem:[%s603_s2] ss:$0 sm:$0xff] }
  0xff   :  { %v363_v19 = vpop.eup %362  ;;  %v194_v20 = vmul.f32 %v361_v16, %v131_v7  ;;  %v126_v21 = vadd.f32 1e-05, %v118_v15  ;;  %vm200_vm4 = vweird.f32 %v361_v16 }
 0x100   :  { %v174_v22 = vmul.f32 %v363_v19, %v129_v8  ;;  %364 = vrsqrt.f32 %v130_v17  ;;  %vm180_vm3 = vweird.f32 %v363_v19  ;;  %vm189_vm7 = vweird.f32 %v130_v17  ;;  %vm508_vm8 = vmor %vm199_vm2, %vm200_vm4 }
 0x101   :  { %v195_v23 = vmul.f32 %v361_v16, %v194_v20  ;;  %366 = vrsqrt.f32 %v126_v21  ;;  %vm498_vm6 = vmor %vm179_vm5, %vm180_vm3  ;;  %vm149_vm9 = vweird.f32 %v126_v21  ;;  %vm209_vm12 = vweird.f32 %v485_v18 }
 0x102   :  { %v175_v24 = vmul.f32 %v363_v19, %v174_v22  ;;  %368 = vrsqrt.f32 %v485_v18 }
 0x103   :  { %v196_v25 = vmul.f32 0.5, %v195_v23  ;;  %v95_v27 = vpop.xlane.xlu0 %94  ;;  %v101_v28 = vpop.xlane.xlu2 %100 }
 0x104   :  { %v176_v29 = vmul.f32 0.5, %v175_v24  ;;  %v117_v30 = vmul.f32 %v95_v27, %v427_v26  ;;  %v119_v31 = vmul.f32 %v101_v28, %v427_v26 }
 0x105   :  { %v197_v34 = vsub.f32 1.5, %v196_v25 }
 0x106   :  { %v365_v35 = vpop.eup %364  ;;  %v177_v36 = vsub.f32 1.5, %v176_v29  ;;  %v490_v37 = vadd.f32 1e-05, %v117_v30  ;;  %v494_v40 = vadd.f32 1e-05, %v119_v31 }
 0x107   :  { %v492_v38 = vpop.eup %366  ;;  %v184_v39 = vmul.f32 %v365_v35, %v130_v17  ;;  %v198_v42 = vmul.f32 %v361_v16, %v197_v34  ;;  %vm190_vm10 = vweird.f32 %v365_v35 }
 0x108   :  { %v369_v41 = vpop.eup %368  ;;  %v178_v43 = vmul.f32 %v363_v19, %v177_v36  ;;  %v144_v44 = vmul.f32 %v492_v38, %v126_v21  ;;  %370 = vrsqrt.f32 %v490_v37  ;;  %vm150_vm11 = vweird.f32 %v492_v38  ;;  %vm191_vm14 = vmor %vm189_vm7, %vm190_vm10 }
 0x109   :  { %v185_v50 = vmul.f32 %v365_v35, %v184_v39  ;;  %v204_v51 = vmul.f32 %v369_v41, %v485_v18  ;;  %372 = vrsqrt.f32 %v494_v40  ;;  %v202_v58 = vsel %vm508_vm8, %v361_v16, %v198_v42  ;;  %vm530_vm15 = vmor %vm149_vm9, %vm150_vm11 }
 0x10a   :  { %v182_v52 = vsel %vm498_vm6, %v363_v19, %v178_v43  ;;  %v145_v53 = vmul.f32 %v492_v38, %v144_v44  ;;  %vm210_vm13 = vweird.f32 %v369_v41  ;;  %v219_v6 = vmul.f32 %v202_v58, %v431_v32 }
 0x10b   :  { %v186_v55 = vmul.f32 0.5, %v185_v50  ;;  %v205_v56 = vmul.f32 %v369_v41, %v204_v51  ;;  %v104_v57 = vpop.xlane.xlu0 %103  ;;  %v217_v63 = vmul.f32 %v182_v52, %v433_v33  ;;  %vm211_vm1 = vmor %vm209_vm12, %vm210_vm13  ;;  %vm139_vm2 = vweird.f32 %v490_v37 }
 0x10c   :  { %v146_v59 = vmul.f32 0.5, %v145_v53  ;;  %v120_v62 = vmul.f32 %v104_v57, %v427_v26  ;;  %v231_v21 = vmul.f32 %v521_v2, %v219_v6  ;;  %vm159_vm4 = vweird.f32 %v494_v40 }
 0x10d   :  { %v187_v0 = vsub.f32 1.5, %v186_v55  ;;  %v206_v1 = vmul.f32 0.5, %v205_v56  ;;  %v229_v32 = vmul.f32 %v521_v2, %v217_v63  ;;  %vm310_vm11 = vcmask 388096  }
 0x10e   :  { %v371_v3 = vpop.eup %370  ;;  %v147_v4 = vsub.f32 1.5, %v146_v59  ;;  %v128_v5 = vadd.f32 1e-05, %v120_v62 }
 0x10f   :  { %v188_v26 = vmul.f32 %v365_v35, %v187_v0  ;;  %v207_v33 = vsub.f32 1.5, %v206_v1  ;;  %v134_v7 = vmul.f32 %v371_v3, %v490_v37  ;;  %v373_v10 = vpop.eup %372  ;;  %vm140_vm3 = vweird.f32 %v371_v3 }
 0x110   :  { %v148_v8 = vmul.f32 %v492_v38, %v147_v4  ;;  %374 = vrsqrt.f32 %v128_v5  ;;  %v154_v16 = vmul.f32 %v373_v10, %v494_v40  ;;  %v241_v18 = vadd.f32 %v356_v14, %v229_v32  ;;  %vm141_vm5 = vmor %vm139_vm2, %vm140_vm3 }
 0x111   :  { %v192_v11 = vsel %vm191_vm14, %v365_v35, %v188_v26  ;;  %v208_v12 = vmul.f32 %v369_v41, %v207_v33  ;;  %v135_v13 = vmul.f32 %v371_v3, %v134_v7  ;;  %vm160_vm6 = vweird.f32 %v373_v10 }
 0x112   :  { %v218_v15 = vmul.f32 %v192_v11, %v447_v46  ;;  %v152_v17 = vsel %vm530_vm15, %v492_v38, %v148_v8  ;;  %v155_v23 = vmul.f32 %v373_v10, %v154_v16  ;;  %vm161_vm7 = vmor %vm159_vm4, %vm160_vm6  ;;  %vm169_vm9 = vweird.f32 %v128_v5 }
 0x113   :  { %v212_v19 = vsel %vm211_vm1, %v369_v41, %v208_v12  ;;  %v136_v20 = vmul.f32 0.5, %v135_v13  ;;  %v214_v27 = vmul.f32 %v152_v17, %v449_v47 }
 0x114   :  { %v220_v22 = vmul.f32 %v212_v19, %v445_v45  ;;  %v230_v24 = vmul.f32 %v521_v2, %v218_v15  ;;  %v156_v28 = vmul.f32 0.5, %v155_v23  ;;  %v243_v45 = vadd.f32 %v356_v14, %v231_v21 }
 0x115   :  { %v137_v46 = vsub.f32 1.5, %v136_v20  ;;  %v226_v43 = vmul.f32 %v521_v2, %v214_v27 }
 0x116   :  { %v375_v25 = vpop.eup %374  ;;  %v242_v29 = vadd.f32 %v356_v14, %v230_v24  ;;  %v232_v30 = vmul.f32 %v521_v2, %v220_v22  ;;  %v157_v35 = vsub.f32 1.5, %v156_v28 }
 0x117   :  { %v138_v31 = vmul.f32 %v371_v3, %v137_v46  ;;  %v164_v34 = vmul.f32 %v375_v25, %v128_v5  ;;  %vm170_vm8 = vweird.f32 %v375_v25  ;;  %v238_v53 = vadd.f32 %v356_v14, %v226_v43 }
 0x118   :  { %v247_v36 = vpack.c.bf16 %v242_v29, %v241_v18  ;;  %v244_v38 = vadd.f32 %v356_v14, %v232_v30  ;;  %v158_v42 = vmul.f32 %v373_v10, %v157_v35  ;;  %vm171_vm10 = vmor %vm169_vm9, %vm170_vm8 }
 0x119   :  { %v142_v37 = vsel %vm141_vm5, %v371_v3, %v138_v31  ;;  %v165_v39 = vmul.f32 %v375_v25, %v164_v34 }
 0x11a   :  { %v213_v41 = vmul.f32 %v142_v37, %v451_v48  ;;  %329 = vmatmul.msk.bf16.vlgmr.msra.gmra.mxu2 %vm37_vm0, %v247_v36  ;;  %v248_v47 = vpack.c.bf16 %v244_v38, %v243_v45  ;;  %v162_v49 = vsel %vm161_vm7, %v373_v10, %v158_v42 }
 0x11b   :  { %v166_v44 = vmul.f32 0.5, %v165_v39  ;;  %v215_v52 = vmul.f32 %v162_v49, %v466_v60  ;;  %v357_v60 = vld [vmem:[%s604_s4] ss:$0 sm:$0xff] }
 0x11c   :  { %330 = vmatmul.msk.bf16.vlgmr.msra.gmra.mxu3 %vm37_vm0, %v248_v47  ;;  %v225_v50 = vmul.f32 %v521_v2, %v213_v41 }
 0x11d   :  { %v167_v51 = vsub.f32 1.5, %v166_v44  ;;  %v227_v57 = vmul.f32 %v521_v2, %v215_v52 }
 0x11e   :  { %v237_v48 = vadd.f32 %v356_v14, %v225_v50 }
 0x11f   :  { %v168_v54 = vmul.f32 %v375_v25, %v167_v51  ;;  %v239_v59 = vadd.f32 %v356_v14, %v227_v57 }
 0x120   :  { %v245_v55 = vpack.c.bf16 %v238_v53, %v237_v48 }
 0x121   :  { %v172_v56 = vsel %vm171_vm10, %v375_v25, %v168_v54 }
 0x122   :  { %v216_v40 = vmul.f32 %v172_v56, %v468_v61  ;;  %327 = vmatmul.msk.bf16.vlgmr.msra.gmra.mxu0 %vm37_vm0, %v245_v55 }
 0x124   :  { %v228_v58 = vmul.f32 %v521_v2, %v216_v40 }
 0x126   :  { %v240_v62 = vadd.f32 %v356_v14, %v228_v58 }
 0x128   :  { %v246_v63 = vpack.c.bf16 %v240_v62, %v239_v59 }
 0x12a   :  { %328 = vmatmul.msk.bf16.vlgmr.msra.gmra.mxu1 %vm37_vm0, %v246_v63 }
 0x19d   :  { %v292_v0 = vpop.f32.mrf.mxu2 }
 0x19e   :  { %v293_v1 = vadd.f32 %v357_v60, %v292_v0 }
 0x19f   :  { %v297_v3 = vpop.f32.mrf.mxu3  ;;  %v282_v61 = vpop.f32.mrf.mxu0 }
 0x1a0   :  { %v306_v4 = vpack.c.bf16 %v293_v1, %v293_v1  ;;  %v298_v5 = vadd.f32 %v357_v60, %v297_v3  ;;  %v283_v6 = vadd.f32 %v357_v60, %v282_v61 }
 0x1a2   :  { %315 = vst.msk [vmem:[%s606_s5 + $0x10] sm:$0xf] %vm310_vm11, %v306_v4  ;;  %v308_v2 = vpack.c.bf16 %v298_v5, %v298_v5  ;;  %v302_v26 = vpack.c.bf16 %v283_v6, %v283_v6 }
 0x1a4   :  { %317 = vst.msk [vmem:[%s606_s5 + $0x18] sm:$0xf] %vm310_vm11, %v308_v2 }
 0x1a5   :  { %311 = vst.msk [vmem:[%s606_s5] sm:$0xf] %vm310_vm11, %v302_v26  ;;  %v294_v33 = vpop.f32.mrf.mxu2 }
 0x1a6   :  { %v295_v7 = vadd.f32 %v357_v60, %v294_v33 }
 0x1a7   :  { %v299_v8 = vpop.f32.mrf.mxu3  ;;  %v284_v9 = vpop.f32.mrf.mxu0 }
 0x1a8   :  { %v307_v10 = vpack.c.bf16 %v295_v7, %v295_v7  ;;  %v300_v11 = vadd.f32 %v357_v60, %v299_v8  ;;  %v285_v12 = vadd.f32 %v357_v60, %v284_v9  ;;  %v287_v13 = vpop.f32.mrf.mxu1 }
 0x1a9   :  { %v288_v32 = vadd.f32 %v357_v60, %v287_v13 }
 0x1aa   :  { %316 = vst.msk [vmem:[%s606_s5 + $0x14] sm:$0xf] %vm310_vm11, %v307_v10  ;;  %v309_v14 = vpack.c.bf16 %v300_v11, %v300_v11  ;;  %v303_v15 = vpack.c.bf16 %v285_v12, %v285_v12 }
 0x1ab   :  { %v304_v16 = vpack.c.bf16 %v288_v32, %v288_v32 }
 0x1ac   :  { %318 = vst.msk [vmem:[%s606_s5 + $0x1c] sm:$0xf] %vm310_vm11, %v309_v14 }
 0x1ad   :  { %312 = vst.msk [vmem:[%s606_s5 + $0x4] sm:$0xf] %vm310_vm11, %v303_v15 }
 0x1ae   :  { %313 = vst.msk [vmem:[%s606_s5 + $0x8] sm:$0xf] %vm310_vm11, %v304_v16 }
 0x1b0   :  { %v289_v17 = vpop.f32.mrf.mxu1 }
 0x1b1   :  { %v290_v19 = vadd.f32 %v357_v60, %v289_v17 }
 0x1b3   :  { %v305_v20 = vpack.c.bf16 %v290_v19, %v290_v19 }
 0x1b5   :  { %314 = vst.msk [vmem:[%s606_s5 + $0xc] sm:$0xf] %vm310_vm11, %v305_v20 }

// kernel: _lambda_.31
= control target key start
LH: loop header
LB: loop body
LE: loop exit
PB: predicated region body
PF: predicated region fallthrough
CT: control target
= control target key end

     0   :  { %vm30_vm0 = vcmask 130048   ;;  %v299_v20 = vmov 16.0   ;;  %vm246_vm5 = vcmask 125952   ;;  %s507_s0 = inlined_call_operand.vmem [shape: bf16[64,16], index: 0, kind: input, shape index: {}]   ;;  %s508_s1 = inlined_call_operand.vmem [shape: f32[1,16], index: 1, kind: input, shape index: {}]   ;;  %s509_s2 = inlined_call_operand.vmem [shape: f32[1,16], index: 2, kind: input, shape index: {}]   ;;  %s510_s3 = inlined_call_operand.vmem [shape: bf16[64,16], index: 3, kind: output, shape index: {}]  }
   0x1   :  { %v323_v0 = vld [vmem:[%s507_s0 + $0x10] sm:$0xff]   ;;  %v275_v1 = vld [vmem:[%s507_s0 + $0x8] sm:$0xff]   ;;  %v260_v2 = vld [vmem:[%s507_s0] sm:$0xff]   ;;  %281 = vrcp.f32 %v299_v20 }
   0x2   :  { %v269_v3 = vunpack.c.l.bf16 %v323_v0  ;;  %v265_v4 = vunpack.c.l.bf16 %v275_v1  ;;  %v261_v5 = vunpack.c.l.bf16 %v260_v2  ;;  %v270_v9 = vunpack.c.h.bf16 %v323_v0  ;;  %v277_v15 = vld [vmem:[%s507_s0 + $0x18] sm:$0xff]  }
   0x3   :  { %v266_v10 = vunpack.c.h.bf16 %v275_v1  ;;  %v262_v11 = vunpack.c.h.bf16 %v260_v2  ;;  %v274_v16 = vunpack.c.h.bf16 %v277_v15  ;;  %v273_v17 = vunpack.c.l.bf16 %v277_v15 }
   0x4   :  { %v43_v6 = vsel %vm30_vm0, %v269_v3, 0.0  ;;  %v37_v7 = vsel %vm30_vm0, %v265_v4, 0.0  ;;  %v31_v8 = vsel %vm30_vm0, %v261_v5, 0.0  ;;  %v46_v12 = vsel %vm30_vm0, %v270_v9, 0.0 }
   0x5   :  { %44 = vadd.xlane.f32.xlu2 %v43_v6  ;;  %38 = vadd.xlane.f32.xlu1 %v37_v7  ;;  %v40_v13 = vsel %vm30_vm0, %v266_v10, 0.0  ;;  %v34_v14 = vsel %vm30_vm0, %v262_v11, 0.0  ;;  %v52_v18 = vsel %vm30_vm0, %v274_v16, 0.0  ;;  %v49_v19 = vsel %vm30_vm0, %v273_v17, 0.0 }
   0x6   :  { %32 = vadd.xlane.f32.xlu0 %v31_v8 }
   0x7   :  { %v282_v21 = vpop.eup %281 }
   0x8   :  { %v56_v22 = vmul.f32 16.0, %v282_v21  ;;  %vm60_vm1 = vweird.f32 %v282_v21 }
   0xa   :  { %v57_v23 = vsub.f32 1.0, %v56_v22 }
   0xc   :  { %v58_v24 = vmul.f32 %v282_v21, %v57_v23 }
   0xd   :  { %47 = vadd.xlane.f32.xlu2 %v46_v12  ;;  %41 = vadd.xlane.f32.xlu1 %v40_v13 }
   0xe   :  { %35 = vadd.xlane.f32.xlu0 %v34_v14  ;;  %v59_v25 = vadd.f32 %v282_v21, %v58_v24 }
  0x10   :  { %v344_v26 = vsel %vm60_vm1, %v282_v21, %v59_v25 }
  0x15   :  { %53 = vadd.xlane.f32.xlu1 %v52_v18 }
  0x16   :  { %50 = vadd.xlane.f32.xlu0 %v49_v19 }
  0x78   :  { %v45_v27 = vpop.xlane.xlu2 %44  ;;  %v39_v28 = vpop.xlane.xlu1 %38 }
  0x79   :  { %v64_v29 = vmul.f32 %v344_v26, %v39_v28  ;;  %v33_v30 = vpop.xlane.xlu0 %32  ;;  %v66_v43 = vmul.f32 %v344_v26, %v45_v27 }
  0x7a   :  { %v62_v31 = vmul.f32 %v344_v26, %v33_v30 }
  0x7b   :  { %v348_v32 = vsub.f32 %v265_v4, %v64_v29  ;;  %v372_v50 = vsub.f32 %v269_v3, %v66_v43 }
  0x7c   :  { %v350_v33 = vsub.f32 %v261_v5, %v62_v31 }
  0x7d   :  { %v80_v34 = vmul.f32 %v348_v32, %v348_v32  ;;  %v82_v59 = vmul.f32 %v372_v50, %v372_v50 }
  0x7e   :  { %v78_v35 = vmul.f32 %v350_v33, %v350_v33 }
  0x7f   :  { %v92_v36 = vsel %vm30_vm0, %v80_v34, 0.0  ;;  %v98_v62 = vsel %vm30_vm0, %v82_v59, 0.0 }
  0x80   :  { %v48_v37 = vpop.xlane.xlu2 %47  ;;  %93 = vadd.xlane.f32.xlu1 %v92_v36  ;;  %v42_v38 = vpop.xlane.xlu1 %41  ;;  %v86_v39 = vsel %vm30_vm0, %v78_v35, 0.0 }
  0x81   :  { %v67_v40 = vmul.f32 %v344_v26, %v48_v37  ;;  %v65_v41 = vmul.f32 %v344_v26, %v42_v38  ;;  %87 = vadd.xlane.f32.xlu2 %v86_v39  ;;  %v36_v42 = vpop.xlane.xlu0 %35 }
  0x82   :  { %v63_v44 = vmul.f32 %v344_v26, %v36_v42 }
  0x83   :  { %v362_v45 = vsub.f32 %v270_v9, %v67_v40  ;;  %v364_v46 = vsub.f32 %v266_v10, %v65_v41  ;;  %v412_v41 = vld [vmem:[%s508_s1] ss:$0 sm:$0xff] }
  0x84   :  { %v366_v47 = vsub.f32 %v262_v11, %v63_v44 }
  0x85   :  { %v83_v48 = vmul.f32 %v362_v45, %v362_v45  ;;  %v81_v49 = vmul.f32 %v364_v46, %v364_v46 }
  0x86   :  { %v79_v51 = vmul.f32 %v366_v47, %v366_v47 }
  0x87   :  { %v101_v52 = vsel %vm30_vm0, %v83_v48, 0.0  ;;  %v95_v53 = vsel %vm30_vm0, %v81_v49, 0.0 }
  0x88   :  { %102 = vadd.xlane.f32.xlu1 %v101_v52  ;;  %v89_v54 = vsel %vm30_vm0, %v79_v51, 0.0  ;;  %v54_v55 = vpop.xlane.xlu1 %53  ;;  %v422_v52 = vld [vmem:[%s509_s2] ss:$0 sm:$0xff] }
  0x89   :  { %96 = vadd.xlane.f32.xlu2 %v95_v53  ;;  %90 = vadd.xlane.f32.xlu0 %v89_v54  ;;  %v51_v56 = vpop.xlane.xlu0 %50  ;;  %v69_v58 = vmul.f32 %v344_v26, %v54_v55 }
  0x8a   :  { %v68_v57 = vmul.f32 %v344_v26, %v51_v56 }
  0x8b   :  { %v385_v61 = vsub.f32 %v274_v16, %v69_v58 }
  0x8c   :  { %v383_v60 = vsub.f32 %v273_v17, %v68_v57 }
  0x8d   :  { %v85_v1 = vmul.f32 %v385_v61, %v385_v61 }
  0x8e   :  { %v84_v63 = vmul.f32 %v383_v60, %v383_v60 }
  0x8f   :  { %v107_v2 = vsel %vm30_vm0, %v85_v1, 0.0 }
  0x90   :  { %v104_v0 = vsel %vm30_vm0, %v84_v63, 0.0 }
  0x91   :  { %99 = vadd.xlane.f32.xlu0 %v98_v62  ;;  %105 = vadd.xlane.f32.xlu2 %v104_v0 }
  0x99   :  { %108 = vadd.xlane.f32.xlu0 %v107_v2 }
  0xf3   :  { %v94_v3 = vpop.xlane.xlu1 %93 }
  0xf4   :  { %v112_v4 = vmul.f32 %v94_v3, %v344_v26  ;;  %v88_v5 = vpop.xlane.xlu2 %87 }
  0xf5   :  { %v110_v6 = vmul.f32 %v88_v5, %v344_v26 }
  0xf6   :  { %v120_v7 = vadd.f32 1e-05, %v112_v4 }
  0xf7   :  { %v118_v8 = vadd.f32 1e-05, %v110_v6 }
  0xf8   :  { %283 = vrsqrt.f32 %v120_v7  ;;  %vm152_vm2 = vweird.f32 %v120_v7 }
  0xf9   :  { %285 = vrsqrt.f32 %v118_v8  ;;  %vm132_vm7 = vweird.f32 %v118_v8 }
  0xfb   :  { %v103_v9 = vpop.xlane.xlu1 %102 }
  0xfc   :  { %v115_v10 = vmul.f32 %v103_v9, %v344_v26  ;;  %v97_v11 = vpop.xlane.xlu2 %96  ;;  %v91_v12 = vpop.xlane.xlu0 %90 }
  0xfd   :  { %v113_v13 = vmul.f32 %v97_v11, %v344_v26  ;;  %v111_v14 = vmul.f32 %v91_v12, %v344_v26 }
  0xfe   :  { %v284_v15 = vpop.eup %283  ;;  %v123_v16 = vadd.f32 1e-05, %v115_v10 }
  0xff   :  { %v286_v17 = vpop.eup %285  ;;  %v147_v18 = vmul.f32 %v284_v15, %v120_v7  ;;  %v399_v19 = vadd.f32 1e-05, %v113_v13  ;;  %v401_v20 = vadd.f32 1e-05, %v111_v14  ;;  %vm153_vm3 = vweird.f32 %v284_v15 }
 0x100   :  { %v127_v21 = vmul.f32 %v286_v17, %v118_v8  ;;  %287 = vrsqrt.f32 %v123_v16  ;;  %vm133_vm4 = vweird.f32 %v286_v17  ;;  %vm154_vm6 = vmor %vm152_vm2, %vm153_vm3  ;;  %vm182_vm9 = vweird.f32 %v123_v16 }
 0x101   :  { %v148_v22 = vmul.f32 %v284_v15, %v147_v18  ;;  %289 = vrsqrt.f32 %v399_v19  ;;  %vm134_vm8 = vmor %vm132_vm7, %vm133_vm4  ;;  %vm162_vm11 = vweird.f32 %v399_v19  ;;  %vm142_vm15 = vweird.f32 %v401_v20 }
 0x102   :  { %v128_v23 = vmul.f32 %v286_v17, %v127_v21  ;;  %291 = vrsqrt.f32 %v401_v20 }
 0x103   :  { %v149_v24 = vmul.f32 0.5, %v148_v22 }
 0x104   :  { %v129_v25 = vmul.f32 0.5, %v128_v23  ;;  %v106_v27 = vpop.xlane.xlu2 %105  ;;  %v100_v28 = vpop.xlane.xlu0 %99 }
 0x105   :  { %v150_v29 = vsub.f32 1.5, %v149_v24  ;;  %v116_v30 = vmul.f32 %v106_v27, %v344_v26  ;;  %v114_v31 = vmul.f32 %v100_v28, %v344_v26 }
 0x106   :  { %v288_v34 = vpop.eup %287  ;;  %v130_v35 = vsub.f32 1.5, %v129_v25 }
 0x107   :  { %v290_v36 = vpop.eup %289  ;;  %v151_v37 = vmul.f32 %v284_v15, %v150_v29  ;;  %v177_v38 = vmul.f32 %v288_v34, %v123_v16  ;;  %v407_v39 = vadd.f32 1e-05, %v116_v30  ;;  %v416_v44 = vadd.f32 1e-05, %v114_v31 }
 0x108   :  { %v292_v40 = vpop.eup %291  ;;  %v131_v42 = vmul.f32 %v286_v17, %v130_v35  ;;  %v157_v43 = vmul.f32 %v290_v36, %v399_v19  ;;  %vm183_vm10 = vweird.f32 %v288_v34  ;;  %vm163_vm13 = vweird.f32 %v290_v36 }
 0x109   :  { %v155_v48 = vsel %vm154_vm6, %v284_v15, %v151_v37  ;;  %v178_v49 = vmul.f32 %v288_v34, %v177_v38  ;;  %v137_v51 = vmul.f32 %v292_v40, %v401_v20  ;;  %293 = vrsqrt.f32 %v407_v39  ;;  %vm434_vm12 = vmor %vm182_vm9, %vm183_vm10 }
 0x10a   :  { %v208_v53 = vmul.f32 %v155_v48, %v348_v32  ;;  %v135_v54 = vsel %vm134_vm8, %v286_v17, %v131_v42  ;;  %v158_v55 = vmul.f32 %v290_v36, %v157_v43  ;;  %295 = vrsqrt.f32 %v416_v44  ;;  %vm164_vm0 = vmor %vm162_vm11, %vm163_vm13 }
 0x10b   :  { %v206_v56 = vmul.f32 %v135_v54, %v350_v33  ;;  %v179_v57 = vmul.f32 0.5, %v178_v49  ;;  %v138_v58 = vmul.f32 %v292_v40, %v137_v51  ;;  %vm143_vm14 = vweird.f32 %v292_v40 }
 0x10c   :  { %v220_v59 = vmul.f32 %v412_v41, %v208_v53  ;;  %v159_v62 = vmul.f32 0.5, %v158_v55  ;;  %v109_v63 = vpop.xlane.xlu0 %108  ;;  %vm144_vm1 = vmor %vm142_vm15, %vm143_vm14  ;;  %vm192_vm2 = vweird.f32 %v407_v39  ;;  %vm172_vm7 = vweird.f32 %v416_v44 }
 0x10d   :  { %v218_v0 = vmul.f32 %v412_v41, %v206_v56  ;;  %v180_v32 = vsub.f32 1.5, %v179_v57  ;;  %v139_v1 = vmul.f32 0.5, %v138_v58  ;;  %v117_v2 = vmul.f32 %v109_v63, %v344_v26 }
 0x10e   :  { %v232_v3 = vadd.f32 %v422_v52, %v220_v59  ;;  %v160_v4 = vsub.f32 1.5, %v159_v62 }
 0x10f   :  { %v230_v5 = vadd.f32 %v422_v52, %v218_v0  ;;  %v181_v6 = vmul.f32 %v288_v34, %v180_v32  ;;  %v140_v7 = vsub.f32 1.5, %v139_v1  ;;  %v439_v8 = vadd.f32 1e-05, %v117_v2  ;;  %v294_v9 = vpop.eup %293 }
 0x110   :  { %v240_v10 = vpack.c.bf16 %v232_v3, %v232_v3  ;;  %v161_v11 = vmul.f32 %v290_v36, %v160_v4  ;;  %v187_v14 = vmul.f32 %v294_v9, %v407_v39  ;;  %v296_v15 = vpop.eup %295  ;;  %vm193_vm3 = vweird.f32 %v294_v9 }
 0x111   :  { %v238_v26 = vpack.c.bf16 %v230_v5, %v230_v5  ;;  %v185_v12 = vsel %vm434_vm12, %v288_v34, %v181_v6  ;;  %v141_v13 = vmul.f32 %v292_v40, %v140_v7  ;;  %297 = vrsqrt.f32 %v439_v8  ;;  %vm194_vm6 = vmor %vm192_vm2, %vm193_vm3 }
 0x112   :  { %249 = vst.msk [vmem:[%s510_s3 + $0x8] sm:$0xf] %vm246_vm5, %v240_v10  ;;  %v211_v16 = vmul.f32 %v185_v12, %v362_v45  ;;  %v165_v17 = vsel %vm164_vm0, %v290_v36, %v161_v11  ;;  %v188_v20 = vmul.f32 %v294_v9, %v187_v14  ;;  %v167_v21 = vmul.f32 %v296_v15, %v416_v44 }
 0x113   :  { %247 = vst.msk [vmem:[%s510_s3] sm:$0xf] %vm246_vm5, %v238_v26  ;;  %v209_v18 = vmul.f32 %v165_v17, %v364_v46  ;;  %v145_v19 = vsel %vm144_vm1, %v292_v40, %v141_v13  ;;  %vm173_vm4 = vweird.f32 %v296_v15  ;;  %vm202_vm10 = vweird.f32 %v439_v8 }
 0x114   :  { %v223_v22 = vmul.f32 %v412_v41, %v211_v16  ;;  %v207_v45 = vmul.f32 %v145_v19, %v366_v47  ;;  %v189_v24 = vmul.f32 0.5, %v188_v20  ;;  %v168_v25 = vmul.f32 %v296_v15, %v167_v21  ;;  %vm174_vm8 = vmor %vm172_vm7, %vm173_vm4 }
 0x115   :  { %v221_v23 = vmul.f32 %v412_v41, %v209_v18 }
 0x116   :  { %v235_v27 = vadd.f32 %v422_v52, %v223_v22  ;;  %v219_v28 = vmul.f32 %v412_v41, %v207_v45  ;;  %v190_v29 = vsub.f32 1.5, %v189_v24  ;;  %v169_v30 = vmul.f32 0.5, %v168_v25 }
 0x117   :  { %v233_v46 = vadd.f32 %v422_v52, %v221_v23  ;;  %v298_v31 = vpop.eup %297 }
 0x118   :  { %v243_v34 = vpack.c.bf16 %v235_v27, %v235_v27  ;;  %v231_v35 = vadd.f32 %v422_v52, %v219_v28  ;;  %v191_v36 = vmul.f32 %v294_v9, %v190_v29  ;;  %v170_v37 = vsub.f32 1.5, %v169_v30 }
 0x119   :  { %v241_v47 = vpack.c.bf16 %v233_v46, %v233_v46  ;;  %v197_v38 = vmul.f32 %v298_v31, %v439_v8  ;;  %vm203_vm9 = vweird.f32 %v298_v31 }
 0x11a   :  { %252 = vst.msk [vmem:[%s510_s3 + $0x14] sm:$0xf] %vm246_vm5, %v243_v34  ;;  %v239_v40 = vpack.c.bf16 %v231_v35, %v231_v35  ;;  %v195_v42 = vsel %vm194_vm6, %v294_v9, %v191_v36  ;;  %v171_v43 = vmul.f32 %v296_v15, %v170_v37  ;;  %vm204_vm11 = vmor %vm202_vm10, %vm203_vm9 }
 0x11b   :  { %250 = vst.msk [vmem:[%s510_s3 + $0xc] sm:$0xf] %vm246_vm5, %v241_v47  ;;  %v198_v48 = vmul.f32 %v298_v31, %v197_v38  ;;  %v212_v49 = vmul.f32 %v195_v42, %v383_v60 }
 0x11c   :  { %248 = vst.msk [vmem:[%s510_s3 + $0x4] sm:$0xf] %vm246_vm5, %v239_v40  ;;  %v175_v39 = vsel %vm174_vm8, %v296_v15, %v171_v43 }
 0x11d   :  { %v199_v51 = vmul.f32 0.5, %v198_v48  ;;  %v224_v53 = vmul.f32 %v412_v41, %v212_v49  ;;  %v210_v54 = vmul.f32 %v175_v39, %v372_v50 }
 0x11f   :  { %v200_v55 = vsub.f32 1.5, %v199_v51  ;;  %v236_v44 = vadd.f32 %v422_v52, %v224_v53  ;;  %v222_v56 = vmul.f32 %v412_v41, %v210_v54 }
 0x121   :  { %v201_v57 = vmul.f32 %v298_v31, %v200_v55  ;;  %v244_v58 = vpack.c.bf16 %v236_v44, %v236_v44  ;;  %v234_v60 = vadd.f32 %v422_v52, %v222_v56 }
 0x123   :  { %v205_v59 = vsel %vm204_vm11, %v298_v31, %v201_v57  ;;  %253 = vst.msk [vmem:[%s510_s3 + $0x18] sm:$0xf] %vm246_vm5, %v244_v58  ;;  %v242_v50 = vpack.c.bf16 %v234_v60, %v234_v60 }
 0x124   :  { %v213_v62 = vmul.f32 %v205_v59, %v385_v61 }
 0x125   :  { %251 = vst.msk [vmem:[%s510_s3 + $0x10] sm:$0xf] %vm246_vm5, %v242_v50 }
 0x126   :  { %v225_v63 = vmul.f32 %v412_v41, %v213_v62 }
 0x128   :  { %v237_v0 = vadd.f32 %v422_v52, %v225_v63 }
 0x12a   :  { %v245_v32 = vpack.c.bf16 %v237_v0, %v237_v0 }
 0x12c   :  { %254 = vst.msk [vmem:[%s510_s3 + $0x1c] sm:$0xf] %vm246_vm5, %v245_v32 }

// kernel: _lambda_.34
= control target key start
LH: loop header
LB: loop body
LE: loop exit
PB: predicated region body
PF: predicated region fallthrough
CT: control target
= control target key end

     0   :  { %vm19_vm0 = vcmask 130048   ;;  %v208_v1 = vmov 0.0   ;;  %vm161_vm1 = vcmask 125952   ;;  %s299_s1 = inlined_call_operand.vmem [shape: bf16[16,16], index: 1, kind: input, shape index: {}]   ;;  %s300_s0 = inlined_call_operand.vmem [shape: bf16[64,16], index: 0, kind: input, shape index: {}]   ;;  %s301_s2 = inlined_call_operand.vmem [shape: f32[1,16], index: 2, kind: input, shape index: {}]   ;;  %s302_s3 = inlined_call_operand.vmem [shape: bf16[64,16], index: 3, kind: output, shape index: {}]  }
   0x1   :  { %v202_v0 = vld [vmem:[%s299_s1] sm:$0xff]  ;;  %20 = vst.msk [vmem:[#allocation2] sm:$0xff] %vm19_vm0, %v208_v1  ;;  %v199_v3 = vld [vmem:[%s300_s0 + $0x8] sm:$0xff]  ;;  %v200_v4 = vld [vmem:[%s300_s0 + $0x10] sm:$0xff] }
   0x2   :  { %v198_v2 = vld [vmem:[%s300_s0] sm:$0xff]  ;;  %21 = vst.msk [vmem:[#allocation2 + $0x8] sm:$0xff] %vm19_vm0, %v208_v1  ;;  %92 = vmatpush.bf16.msra.mxu0 %v202_v0  ;;  %203 = vmatpush.bf16.msra.mxu1 %v202_v0  ;;  %v201_v5 = vld [vmem:[%s300_s0 + $0x18] sm:$0xff] }
   0x3   :  { %22 = vst.msk [vmem:[#allocation2 + $0x10] sm:$0xff] %vm19_vm0, %v208_v1  ;;  %204 = vmatpush.bf16.msra.mxu2 %v202_v0  ;;  %205 = vmatpush.bf16.msra.mxu3 %v202_v0  ;;  %v207_v16 = vld [vmem:[%s301_s2] ss:$0 sm:$0xff] }
   0x4   :  { %23 = vst.msk [vmem:[#allocation2 + $0x18] sm:$0xff] %vm19_vm0, %v208_v1 }
   0x5   :  { %24 = vst.msk [vmem:[#allocation2 + $0x20] sm:$0xff] %vm19_vm0, %v208_v1  ;;  %194 = vmatmul.msk.bf16.vlgmr.msra.gmra.mxu0 %vm19_vm0, %v198_v2  ;;  %195 = vmatmul.msk.bf16.vlgmr.msra.gmra.mxu1 %vm19_vm0, %v199_v3 }
   0x6   :  { %25 = vst.msk [vmem:[#allocation2 + $0x28] sm:$0xff] %vm19_vm0, %v208_v1  ;;  %196 = vmatmul.msk.bf16.vlgmr.msra.gmra.mxu2 %vm19_vm0, %v200_v4  ;;  %197 = vmatmul.msk.bf16.vlgmr.msra.gmra.mxu3 %vm19_vm0, %v201_v5 }
   0x7   :  { %26 = vst.msk [vmem:[#allocation2 + $0x30] sm:$0xff] %vm19_vm0, %v208_v1 }
   0x8   :  { %27 = vst.msk [vmem:[#allocation2 + $0x38] sm:$0xff] %vm19_vm0, %v208_v1  ;;  %v28_v6 = vld [vmem:[#allocation2] sm:$0xff] }
   0x9   :  { %v29_v14 = vld [vmem:[#allocation2 + $0x8] sm:$0xff] }
   0xa   :  { %v30_v7 = vld [vmem:[#allocation2 + $0x10] sm:$0xff] }
   0xb   :  { %v31_v15 = vld [vmem:[#allocation2 + $0x18] sm:$0xff] }
   0xc   :  { %v32_v12 = vld [vmem:[#allocation2 + $0x20] sm:$0xff] }
   0xd   :  { %v33_v30 = vld [vmem:[#allocation2 + $0x28] sm:$0xff] }
   0xe   :  { %v34_v13 = vld [vmem:[#allocation2 + $0x30] sm:$0xff] }
   0xf   :  { %v35_v31 = vld [vmem:[#allocation2 + $0x38] sm:$0xff] }
  0x82   :  { %v94_v8 = vpop.f32.mrf.mxu0  ;;  %v99_v9 = vpop.f32.mrf.mxu1 }
  0x83   :  { %v114_v10 = vadd.f32 %v94_v8, %v28_v6  ;;  %v116_v11 = vadd.f32 %v99_v9, %v30_v7 }
  0x85   :  { %122 = vst.msk [vmem:[#allocation2] sm:$0xff] %vm19_vm0, %v114_v10 }
  0x86   :  { %124 = vst.msk [vmem:[#allocation2 + $0x10] sm:$0xff] %vm19_vm0, %v116_v11 }
  0x89   :  { %v104_v17 = vpop.f32.mrf.mxu2  ;;  %v109_v18 = vpop.f32.mrf.mxu3 }
  0x8a   :  { %v118_v19 = vadd.f32 %v104_v17, %v32_v12  ;;  %v120_v20 = vadd.f32 %v109_v18, %v34_v13  ;;  %v96_v21 = vpop.f32.mrf.mxu0  ;;  %v101_v22 = vpop.f32.mrf.mxu1 }
  0x8b   :  { %v115_v23 = vadd.f32 %v96_v21, %v29_v14  ;;  %v117_v24 = vadd.f32 %v101_v22, %v31_v15 }
  0x8c   :  { %v133_v25 = vld [vmem:[#allocation2] sm:$0xff]  ;;  %126 = vst.msk [vmem:[#allocation2 + $0x20] sm:$0xff] %vm19_vm0, %v118_v19 }
  0x8d   :  { %v145_v26 = vadd.f32 %v207_v16, %v133_v25  ;;  %v135_v27 = vld [vmem:[#allocation2 + $0x10] sm:$0xff]  ;;  %128 = vst.msk [vmem:[#allocation2 + $0x30] sm:$0xff] %vm19_vm0, %v120_v20 }
  0x8e   :  { %v147_v28 = vadd.f32 %v207_v16, %v135_v27  ;;  %123 = vst.msk [vmem:[#allocation2 + $0x8] sm:$0xff] %vm19_vm0, %v115_v23 }
  0x8f   :  { %v153_v29 = vpack.c.bf16 %v145_v26, %v145_v26  ;;  %125 = vst.msk [vmem:[#allocation2 + $0x18] sm:$0xff] %vm19_vm0, %v117_v24 }
  0x90   :  { %v155_v32 = vpack.c.bf16 %v147_v28, %v147_v28 }
  0x91   :  { %162 = vst.msk [vmem:[%s302_s3] sm:$0xf] %vm161_vm1, %v153_v29  ;;  %v106_v33 = vpop.f32.mrf.mxu2  ;;  %v111_v34 = vpop.f32.mrf.mxu3 }
  0x92   :  { %164 = vst.msk [vmem:[%s302_s3 + $0x8] sm:$0xf] %vm161_vm1, %v155_v32  ;;  %v119_v35 = vadd.f32 %v106_v33, %v33_v30  ;;  %v121_v36 = vadd.f32 %v111_v34, %v35_v31 }
  0x93   :  { %v137_v37 = vld [vmem:[#allocation2 + $0x20] sm:$0xff] }
  0x94   :  { %v149_v38 = vadd.f32 %v207_v16, %v137_v37  ;;  %v139_v39 = vld [vmem:[#allocation2 + $0x30] sm:$0xff]  ;;  %127 = vst.msk [vmem:[#allocation2 + $0x28] sm:$0xff] %vm19_vm0, %v119_v35 }
  0x95   :  { %v151_v40 = vadd.f32 %v207_v16, %v139_v39  ;;  %v134_v41 = vld [vmem:[#allocation2 + $0x8] sm:$0xff]  ;;  %129 = vst.msk [vmem:[#allocation2 + $0x38] sm:$0xff] %vm19_vm0, %v121_v36 }
  0x96   :  { %v157_v42 = vpack.c.bf16 %v149_v38, %v149_v38  ;;  %v146_v43 = vadd.f32 %v207_v16, %v134_v41  ;;  %v136_v44 = vld [vmem:[#allocation2 + $0x18] sm:$0xff] }
  0x97   :  { %v159_v45 = vpack.c.bf16 %v151_v40, %v151_v40  ;;  %v148_v46 = vadd.f32 %v207_v16, %v136_v44 }
  0x98   :  { %166 = vst.msk [vmem:[%s302_s3 + $0x10] sm:$0xf] %vm161_vm1, %v157_v42  ;;  %v154_v47 = vpack.c.bf16 %v146_v43, %v146_v43 }
  0x99   :  { %168 = vst.msk [vmem:[%s302_s3 + $0x18] sm:$0xf] %vm161_vm1, %v159_v45  ;;  %v156_v48 = vpack.c.bf16 %v148_v46, %v148_v46 }
  0x9a   :  { %163 = vst.msk [vmem:[%s302_s3 + $0x4] sm:$0xf] %vm161_vm1, %v154_v47 }
  0x9b   :  { %165 = vst.msk [vmem:[%s302_s3 + $0xc] sm:$0xf] %vm161_vm1, %v156_v48  ;;  %v138_v49 = vld [vmem:[#allocation2 + $0x28] sm:$0xff] }
  0x9c   :  { %v150_v50 = vadd.f32 %v207_v16, %v138_v49  ;;  %v140_v51 = vld [vmem:[#allocation2 + $0x38] sm:$0xff] }
  0x9d   :  { %v152_v52 = vadd.f32 %v207_v16, %v140_v51 }
  0x9e   :  { %v158_v53 = vpack.c.bf16 %v150_v50, %v150_v50 }
  0x9f   :  { %v160_v54 = vpack.c.bf16 %v152_v52, %v152_v52 }
  0xa0   :  { %167 = vst.msk [vmem:[%s302_s3 + $0x14] sm:$0xf] %vm161_vm1, %v158_v53 }
  0xa1   :  { %169 = vst.msk [vmem:[%s302_s3 + $0x1c] sm:$0xf] %vm161_vm1, %v160_v54 }

// kernel: _lambda_.35
= control target key start
LH: loop header
LB: loop body
LE: loop exit
PB: predicated region body
PF: predicated region fallthrough
CT: control target
= control target key end

     0   :  { %vm31_vm0 = vcmask 130048   ;;  %v740_v20 = vmov 16.0   ;;  %vm271_vm14 = vcmask 125952   ;;  %s1121_s0 = inlined_call_operand.vmem [shape: bf16[64,16], index: 0, kind: input, shape index: {}]   ;;  %s1122_s1 = inlined_call_operand.vmem [shape: f32[1,16], index: 1, kind: input, shape index: {}]   ;;  %s1123_s2 = inlined_call_operand.vmem [shape: f32[1,16], index: 2, kind: input, shape index: {}]   ;;  %s1124_s4 = inlined_call_operand.vmem [shape: f32[1,64], index: 4, kind: input, shape index: {}]   ;;  %s1125_s3 = inlined_call_operand.vmem [shape: bf16[16,64], index: 3, kind: input, shape index: {}]   ;;  %s1126_s6 = inlined_call_operand.vmem [shape: f32[1,16], index: 6, kind: input, shape index: {}]   ;;  %s1127_s5 = inlined_call_operand.vmem [shape: bf16[64,16], index: 5, kind: input, shape index: {}]   ;;  %s1128_s7 = inlined_call_operand.vmem [shape: bf16[64,16], index: 7, kind: output, shape index: {}]  }
   0x1   :  { %v690_v0 = vld [vmem:[%s1121_s0 + $0x10] sm:$0xff]   ;;  %v674_v1 = vld [vmem:[%s1121_s0] sm:$0xff]   ;;  %v692_v2 = vld [vmem:[%s1121_s0 + $0x8] sm:$0xff]   ;;  %706 = vrcp.f32 %v740_v20 }
   0x2   :  { %v791_v3 = vunpack.c.l.bf16 %v690_v0  ;;  %v793_v4 = vunpack.c.l.bf16 %v674_v1  ;;  %v795_v5 = vunpack.c.l.bf16 %v692_v2  ;;  %v803_v9 = vunpack.c.h.bf16 %v692_v2  ;;  %v694_v14 = vld [vmem:[%s1121_s0 + $0x18] sm:$0xff]  }
   0x3   :  { %v805_v10 = vunpack.c.h.bf16 %v690_v0  ;;  %v807_v11 = vunpack.c.h.bf16 %v674_v1  ;;  %v818_v16 = vunpack.c.l.bf16 %v694_v14  ;;  %v820_v17 = vunpack.c.h.bf16 %v694_v14 }
   0x4   :  { %v68_v6 = vsel %vm31_vm0, %v791_v3, 0.0  ;;  %v62_v7 = vsel %vm31_vm0, %v795_v5, 0.0  ;;  %v56_v8 = vsel %vm31_vm0, %v793_v4, 0.0  ;;  %v65_v13 = vsel %vm31_vm0, %v803_v9, 0.0 }
   0x5   :  { %69 = vadd.xlane.f32.xlu1 %v68_v6  ;;  %63 = vadd.xlane.f32.xlu0 %v62_v7  ;;  %v71_v12 = vsel %vm31_vm0, %v805_v10, 0.0  ;;  %v59_v15 = vsel %vm31_vm0, %v807_v11, 0.0  ;;  %v74_v18 = vsel %vm31_vm0, %v818_v16, 0.0  ;;  %v77_v19 = vsel %vm31_vm0, %v820_v17, 0.0 }
   0x6   :  { %57 = vadd.xlane.f32.xlu2 %v56_v8 }
   0x7   :  { %v707_v21 = vpop.eup %706 }
   0x8   :  { %v81_v22 = vmul.f32 16.0, %v707_v21  ;;  %vm85_vm1 = vweird.f32 %v707_v21 }
   0xa   :  { %v82_v23 = vsub.f32 1.0, %v81_v22 }
   0xc   :  { %v83_v24 = vmul.f32 %v707_v21, %v82_v23 }
   0xd   :  { %72 = vadd.xlane.f32.xlu1 %v71_v12  ;;  %66 = vadd.xlane.f32.xlu0 %v65_v13 }
   0xe   :  { %60 = vadd.xlane.f32.xlu2 %v59_v15  ;;  %v84_v25 = vadd.f32 %v707_v21, %v83_v24 }
  0x10   :  { %v826_v26 = vsel %vm85_vm1, %v707_v21, %v84_v25 }
  0x15   :  { %75 = vadd.xlane.f32.xlu0 %v74_v18  ;;  %78 = vadd.xlane.f32.xlu1 %v77_v19 }
  0x78   :  { %v70_v27 = vpop.xlane.xlu1 %69  ;;  %v64_v28 = vpop.xlane.xlu0 %63 }
  0x79   :  { %v91_v29 = vmul.f32 %v826_v26, %v70_v27  ;;  %v89_v30 = vmul.f32 %v826_v26, %v64_v28  ;;  %v58_v31 = vpop.xlane.xlu2 %57 }
  0x7a   :  { %v87_v40 = vmul.f32 %v826_v26, %v58_v31 }
  0x7b   :  { %v831_v32 = vsub.f32 %v791_v3, %v91_v29  ;;  %v834_v33 = vsub.f32 %v795_v5, %v89_v30 }
  0x7c   :  { %v856_v48 = vsub.f32 %v793_v4, %v87_v40 }
  0x7d   :  { %v107_v34 = vmul.f32 %v831_v32, %v831_v32  ;;  %v105_v35 = vmul.f32 %v834_v33, %v834_v33 }
  0x7e   :  { %v103_v59 = vmul.f32 %v856_v48, %v856_v48 }
  0x7f   :  { %v123_v36 = vsel %vm31_vm0, %v107_v34, 0.0  ;;  %v117_v37 = vsel %vm31_vm0, %v105_v35, 0.0  ;;  %v652_v34 = vld [vmem:[%s1125_s3] sm:$0xff] }
  0x80   :  { %124 = vadd.xlane.f32.xlu1 %v123_v36  ;;  %v73_v38 = vpop.xlane.xlu1 %72  ;;  %v67_v39 = vpop.xlane.xlu0 %66  ;;  %118 = vadd.xlane.f32.xlu2 %v117_v37  ;;  %v111_v63 = vsel %vm31_vm0, %v103_v59, 0.0 }
  0x81   :  { %v92_v41 = vmul.f32 %v826_v26, %v73_v38  ;;  %v90_v42 = vmul.f32 %v826_v26, %v67_v39  ;;  %v61_v43 = vpop.xlane.xlu2 %60  ;;  %695 = vmatpush.bf16.msra.mxu3 %v652_v34  ;;  %340 = vmatpush.bf16.msra.mxu0 %v652_v34 }
  0x82   :  { %v88_v44 = vmul.f32 %v826_v26, %v61_v43 }
  0x83   :  { %v847_v45 = vsub.f32 %v805_v10, %v92_v41  ;;  %v850_v46 = vsub.f32 %v803_v9, %v90_v42 }
  0x84   :  { %v853_v47 = vsub.f32 %v807_v11, %v88_v44 }
  0x85   :  { %v106_v49 = vmul.f32 %v850_v46, %v850_v46  ;;  %v108_v50 = vmul.f32 %v847_v45, %v847_v45 }
  0x86   :  { %v104_v51 = vmul.f32 %v853_v47, %v853_v47 }
  0x87   :  { %v120_v52 = vsel %vm31_vm0, %v106_v49, 0.0  ;;  %v126_v53 = vsel %vm31_vm0, %v108_v50, 0.0 }
  0x88   :  { %121 = vadd.xlane.f32.xlu0 %v120_v52  ;;  %v76_v54 = vpop.xlane.xlu0 %75  ;;  %127 = vadd.xlane.f32.xlu2 %v126_v53  ;;  %v114_v55 = vsel %vm31_vm0, %v104_v51, 0.0  ;;  %v79_v56 = vpop.xlane.xlu1 %78 }
  0x89   :  { %v93_v57 = vmul.f32 %v826_v26, %v76_v54  ;;  %115 = vadd.xlane.f32.xlu1 %v114_v55  ;;  %v94_v58 = vmul.f32 %v826_v26, %v79_v56  ;;  %v916_v56 = vld [vmem:[%s1122_s1] ss:$0 sm:$0xff] }
  0x8b   :  { %v872_v60 = vsub.f32 %v818_v16, %v93_v57  ;;  %v875_v61 = vsub.f32 %v820_v17, %v94_v58 }
  0x8d   :  { %v109_v62 = vmul.f32 %v872_v60, %v872_v60  ;;  %v110_v1 = vmul.f32 %v875_v61, %v875_v61 }
  0x8f   :  { %v129_v0 = vsel %vm31_vm0, %v109_v62, 0.0  ;;  %v132_v2 = vsel %vm31_vm0, %v110_v1, 0.0 }
  0x90   :  { %130 = vadd.xlane.f32.xlu2 %v129_v0  ;;  %112 = vadd.xlane.f32.xlu0 %v111_v63  ;;  %v929_v0 = vld [vmem:[%s1123_s2] ss:$0 sm:$0xff] }
  0x98   :  { %133 = vadd.xlane.f32.xlu0 %v132_v2 }
  0xf3   :  { %v125_v6 = vpop.xlane.xlu1 %124  ;;  %v119_v7 = vpop.xlane.xlu2 %118 }
  0xf4   :  { %v139_v8 = vmul.f32 %v125_v6, %v826_v26  ;;  %v137_v12 = vmul.f32 %v119_v7, %v826_v26 }
  0xf6   :  { %v147_v13 = vadd.f32 1e-05, %v139_v8  ;;  %v145_v14 = vadd.f32 1e-05, %v137_v12 }
  0xf8   :  { %708 = vrsqrt.f32 %v147_v13  ;;  %vm197_vm2 = vweird.f32 %v147_v13  ;;  %vm177_vm5 = vweird.f32 %v145_v14 }
  0xf9   :  { %710 = vrsqrt.f32 %v145_v14 }
  0xfb   :  { %v122_v15 = vpop.xlane.xlu0 %121  ;;  %v128_v18 = vpop.xlane.xlu2 %127 }
  0xfc   :  { %v138_v19 = vmul.f32 %v122_v15, %v826_v26  ;;  %v116_v20 = vpop.xlane.xlu1 %115  ;;  %v140_v21 = vmul.f32 %v128_v18, %v826_v26 }
  0xfd   :  { %v136_v22 = vmul.f32 %v116_v20, %v826_v26 }
  0xfe   :  { %v709_v23 = vpop.eup %708  ;;  %v889_v24 = vadd.f32 1e-05, %v138_v19  ;;  %v891_v25 = vadd.f32 1e-05, %v140_v21 }
  0xff   :  { %v711_v27 = vpop.eup %710  ;;  %v192_v28 = vmul.f32 %v709_v23, %v147_v13  ;;  %v893_v29 = vadd.f32 1e-05, %v136_v22  ;;  %vm198_vm3 = vweird.f32 %v709_v23 }
 0x100   :  { %v172_v30 = vmul.f32 %v711_v27, %v145_v14  ;;  %712 = vrsqrt.f32 %v889_v24  ;;  %vm903_vm4 = vmor %vm197_vm2, %vm198_vm3  ;;  %vm178_vm6 = vweird.f32 %v711_v27  ;;  %vm187_vm7 = vweird.f32 %v889_v24 }
 0x101   :  { %v193_v31 = vmul.f32 %v709_v23, %v192_v28  ;;  %714 = vrsqrt.f32 %v893_v29  ;;  %vm167_vm8 = vweird.f32 %v893_v29  ;;  %vm179_vm9 = vmor %vm177_vm5, %vm178_vm6  ;;  %vm207_vm10 = vweird.f32 %v891_v25 }
 0x102   :  { %v173_v35 = vmul.f32 %v711_v27, %v172_v30  ;;  %716 = vrsqrt.f32 %v891_v25 }
 0x103   :  { %v194_v36 = vmul.f32 0.5, %v193_v31  ;;  %v113_v37 = vpop.xlane.xlu0 %112  ;;  %v131_v38 = vpop.xlane.xlu2 %130 }
 0x104   :  { %v174_v39 = vmul.f32 0.5, %v173_v35  ;;  %v135_v40 = vmul.f32 %v113_v37, %v826_v26  ;;  %v141_v41 = vmul.f32 %v131_v38, %v826_v26 }
 0x105   :  { %v195_v42 = vsub.f32 1.5, %v194_v36 }
 0x106   :  { %v713_v43 = vpop.eup %712  ;;  %v175_v49 = vsub.f32 1.5, %v174_v39  ;;  %v907_v50 = vadd.f32 1e-05, %v135_v40  ;;  %v911_v54 = vadd.f32 1e-05, %v141_v41 }
 0x107   :  { %v715_v51 = vpop.eup %714  ;;  %v196_v52 = vmul.f32 %v709_v23, %v195_v42  ;;  %v182_v53 = vmul.f32 %v713_v43, %v889_v24  ;;  %vm188_vm11 = vweird.f32 %v713_v43 }
 0x108   :  { %v717_v55 = vpop.eup %716  ;;  %v176_v57 = vmul.f32 %v711_v27, %v175_v49  ;;  %v162_v58 = vmul.f32 %v715_v51, %v893_v29  ;;  %718 = vrsqrt.f32 %v907_v50  ;;  %vm168_vm12 = vweird.f32 %v715_v51  ;;  %vm941_vm15 = vmor %vm187_vm7, %vm188_vm11 }
 0x109   :  { %v200_v59 = vsel %vm903_vm4, %v709_v23, %v196_v52  ;;  %v183_v62 = vmul.f32 %v713_v43, %v182_v53  ;;  %v202_v63 = vmul.f32 %v717_v55, %v891_v25  ;;  %720 = vrsqrt.f32 %v911_v54  ;;  %vm948_vm1 = vmor %vm167_vm8, %vm168_vm12 }
 0x10a   :  { %v235_v1 = vmul.f32 %v200_v59, %v831_v32  ;;  %v180_v2 = vsel %vm179_vm9, %v711_v27, %v176_v57  ;;  %v163_v6 = vmul.f32 %v715_v51, %v162_v58  ;;  %vm208_vm13 = vweird.f32 %v717_v55 }
 0x10b   :  { %v233_v7 = vmul.f32 %v180_v2, %v834_v33  ;;  %v184_v8 = vmul.f32 0.5, %v183_v62  ;;  %v203_v12 = vmul.f32 %v717_v55, %v202_v63  ;;  %v134_v13 = vpop.xlane.xlu0 %133  ;;  %vm955_vm2 = vmor %vm207_vm10, %vm208_vm13  ;;  %vm157_vm3 = vweird.f32 %v907_v50 }
 0x10c   :  { %v247_v14 = vmul.f32 %v916_v56, %v235_v1  ;;  %v164_v15 = vmul.f32 0.5, %v163_v6  ;;  %v142_v18 = vmul.f32 %v134_v13, %v826_v26  ;;  %vm217_vm5 = vweird.f32 %v911_v54 }
 0x10d   :  { %v245_v19 = vmul.f32 %v916_v56, %v233_v7  ;;  %v185_v20 = vsub.f32 1.5, %v184_v8  ;;  %v204_v32 = vmul.f32 0.5, %v203_v12  ;;  %vm478_vm12 = vcmask 523264  }
 0x10e   :  { %v719_v21 = vpop.eup %718  ;;  %v259_v33 = vadd.f32 %v929_v0, %v247_v14  ;;  %v165_v23 = vsub.f32 1.5, %v164_v15  ;;  %v150_v27 = vadd.f32 1e-05, %v142_v18 }
 0x10f   :  { %v257_v26 = vadd.f32 %v929_v0, %v245_v19  ;;  %v186_v28 = vmul.f32 %v713_v43, %v185_v20  ;;  %v205_v31 = vsub.f32 1.5, %v204_v32  ;;  %v152_v34 = vmul.f32 %v719_v21, %v907_v50  ;;  %v721_v37 = vpop.eup %720 }
 0x110   :  { %v267_v35 = vpack.c.bf16 %v259_v33, %v259_v33  ;;  %v166_v24 = vmul.f32 %v715_v51, %v165_v23  ;;  %722 = vrsqrt.f32 %v150_v27  ;;  %v212_v25 = vmul.f32 %v721_v37, %v911_v54 }
 0x111   :  { %v265_v38 = vpack.c.bf16 %v257_v26, %v257_v26  ;;  %v190_v29 = vsel %vm941_vm15, %v713_v43, %v186_v28  ;;  %v206_v39 = vmul.f32 %v717_v55, %v205_v31  ;;  %v153_v40 = vmul.f32 %v719_v21, %v152_v34 }
 0x112   :  { %276 = vst.msk [vmem:[#allocation3 + $0x10] sm:$0xf] %vm271_vm14, %v267_v35  ;;  %v234_v41 = vmul.f32 %v190_v29, %v850_v46  ;;  %v170_v42 = vsel %vm948_vm1, %v715_v51, %v166_v24  ;;  %v213_v46 = vmul.f32 %v721_v37, %v212_v25  ;;  %vm158_vm4 = vweird.f32 %v719_v21  ;;  %v653_v29 = vld [vmem:[%s1127_s5] sm:$0xff] }
 0x113   :  { %274 = vst.msk [vmem:[#allocation3 + $0x8] sm:$0xf] %vm271_vm14, %v265_v38  ;;  %v232_v44 = vmul.f32 %v170_v42, %v853_v47  ;;  %v210_v49 = vsel %vm955_vm2, %v717_v55, %v206_v39  ;;  %v154_v52 = vmul.f32 0.5, %v153_v40  ;;  %vm218_vm6 = vweird.f32 %v721_v37  ;;  %vm159_vm7 = vmor %vm157_vm3, %vm158_vm4 }
 0x114   :  { %v246_v43 = vmul.f32 %v916_v56, %v234_v41  ;;  %v236_v53 = vmul.f32 %v210_v49, %v847_v45  ;;  %v214_v55 = vmul.f32 0.5, %v213_v46  ;;  %vm219_vm8 = vmor %vm217_vm5, %vm218_vm6  ;;  %vm227_vm9 = vweird.f32 %v150_v27 }
 0x115   :  { %v244_v57 = vmul.f32 %v916_v56, %v232_v44  ;;  %v155_v51 = vsub.f32 1.5, %v154_v52 }
 0x116   :  { %v723_v58 = vpop.eup %722  ;;  %v258_v47 = vadd.f32 %v929_v0, %v246_v43  ;;  %v248_v59 = vmul.f32 %v916_v56, %v236_v53  ;;  %v215_v6 = vsub.f32 1.5, %v214_v55 }
 0x117   :  { %v256_v62 = vadd.f32 %v929_v0, %v244_v57  ;;  %v156_v63 = vmul.f32 %v719_v21, %v155_v51  ;;  %v222_v45 = vmul.f32 %v723_v58, %v150_v27  ;;  %vm228_vm10 = vweird.f32 %v723_v58 }
 0x118   :  { %v266_v1 = vpack.c.bf16 %v258_v47, %v258_v47  ;;  %v260_v2 = vadd.f32 %v929_v0, %v248_v59  ;;  %v216_v15 = vmul.f32 %v721_v37, %v215_v6  ;;  %vm229_vm11 = vmor %vm227_vm9, %vm228_vm10 }
 0x119   :  { %v264_v7 = vpack.c.bf16 %v256_v62, %v256_v62  ;;  %v160_v8 = vsel %vm159_vm7, %v719_v21, %v156_v63  ;;  %v223_v12 = vmul.f32 %v723_v58, %v222_v45 }
 0x11a   :  { %275 = vst.msk [vmem:[#allocation3 + $0xc] sm:$0xf] %vm271_vm14, %v266_v1  ;;  %v268_v13 = vpack.c.bf16 %v260_v2, %v260_v2  ;;  %v231_v14 = vmul.f32 %v160_v8, %v856_v48  ;;  %v220_v19 = vsel %vm219_vm8, %v721_v37, %v216_v15  ;;  %v1014_v37 = vld [vmem:[%s1124_s4] ss:$0 sm:$0xff] }
 0x11b   :  { %273 = vst.msk [vmem:[#allocation3 + $0x4] sm:$0xf] %vm271_vm14, %v264_v7  ;;  %v224_v18 = vmul.f32 0.5, %v223_v12  ;;  %v237_v54 = vmul.f32 %v220_v19, %v872_v60 }
 0x11c   :  { %277 = vst.msk [vmem:[#allocation3 + $0x14] sm:$0xf] %vm271_vm14, %v268_v13  ;;  %v243_v50 = vmul.f32 %v916_v56, %v231_v14 }
 0x11d   :  { %v225_v20 = vsub.f32 1.5, %v224_v18  ;;  %v249_v21 = vmul.f32 %v916_v56, %v237_v54 }
 0x11e   :  { %v255_v32 = vadd.f32 %v929_v0, %v243_v50 }
 0x11f   :  { %v226_v48 = vmul.f32 %v723_v58, %v225_v20  ;;  %v261_v22 = vadd.f32 %v929_v0, %v249_v21 }
 0x120   :  { %v263_v33 = vpack.c.bf16 %v255_v32, %v255_v32 }
 0x121   :  { %v230_v23 = vsel %vm229_vm11, %v723_v58, %v226_v48  ;;  %v649_v27 = vld [vmem:[#allocation3 + $0x8] sm:$0xff]  ;;  %v269_v28 = vpack.c.bf16 %v261_v22, %v261_v22 }
 0x122   :  { %272 = vst.msk [vmem:[#allocation3] sm:$0xf] %vm271_vm14, %v263_v33  ;;  %v238_v26 = vmul.f32 %v230_v23, %v875_v61  ;;  %625 = vmatmul.msk.bf16.vlgmr.msra.gmra.mxu3 %vm31_vm0, %v649_v27  ;;  %v656_v61 = vld [vmem:[%s1127_s5 + $0x18] sm:$0xff] }
 0x123   :  { %278 = vst.msk [vmem:[#allocation3 + $0x18] sm:$0xf] %vm271_vm14, %v269_v28  ;;  %v650_v35 = vld [vmem:[#allocation3 + $0x10] sm:$0xff]  ;;  %495 = vmatpush.bf16.msra.mxu1 %v656_v61  ;;  %696 = vmatpush.bf16.msra.mxu2 %v656_v61 }
 0x124   :  { %v250_v60 = vmul.f32 %v916_v56, %v238_v26  ;;  %v655_v56 = vld [vmem:[%s1127_s5 + $0x10] sm:$0xff] }
 0x126   :  { %v262_v30 = vadd.f32 %v929_v0, %v250_v60  ;;  %v654_v0 = vld [vmem:[%s1127_s5 + $0x8] sm:$0xff] }
 0x127   :  { %496 = vmatpush.bf16.msra.mxu1 %v655_v56  ;;  %697 = vmatpush.bf16.msra.mxu2 %v655_v56 }
 0x128   :  { %v270_v31 = vpack.c.bf16 %v262_v30, %v262_v30 }
 0x129   :  { %v648_v34 = vld [vmem:[#allocation3] sm:$0xff] }
 0x12a   :  { %279 = vst.msk [vmem:[#allocation3 + $0x1c] sm:$0xf] %vm271_vm14, %v270_v31  ;;  %624 = vmatmul.msk.bf16.vlgmr.msra.gmra.mxu0 %vm31_vm0, %v648_v34 }
 0x12b   :  { %497 = vmatpush.bf16.msra.mxu1 %v654_v0  ;;  %698 = vmatpush.bf16.msra.mxu2 %v654_v0 }
 0x12f   :  { %498 = vmatpush.bf16.msra.mxu1 %v653_v29  ;;  %699 = vmatpush.bf16.msra.mxu2 %v653_v29 }
 0x131   :  { %v651_v24 = vld [vmem:[#allocation3 + $0x18] sm:$0xff] }
 0x132   :  { %626 = vmatmul.msk.bf16.gmra.mxu3 %vm31_vm0, %v650_v35 }
 0x142   :  { %627 = vmatmul.msk.bf16.gmra.mxu3 %vm31_vm0, %v651_v24 }
 0x1a5   :  { %v347_v36 = vpop.f32.mrf.mxu3 }
 0x1a6   :  { %v1024_v52 = vadd.f32 %v1014_v37, %v347_v36  ;;  %v741_v36 = vmov 0.0  }
 0x1a7   :  { %v342_v38 = vpop.f32.mrf.mxu0  ;;  %32 = vst.msk [vmem:[#allocation2] sm:$0xff] %vm31_vm0, %v741_v36 }
 0x1a8   :  { %v343_v39 = vadd.f32 %v1014_v37, %v342_v38  ;;  %v372_v51 = vmul.f32 0.044715, %v1024_v52  ;;  %33 = vst.msk [vmem:[#allocation2 + $0x8] sm:$0xff] %vm31_vm0, %v741_v36 }
 0x1a9   :  { %34 = vst.msk [vmem:[#allocation2 + $0x10] sm:$0xff] %vm31_vm0, %v741_v36 }
 0x1aa   :  { %v370_v40 = vmul.f32 0.044715, %v343_v39  ;;  %v380_v45 = vmul.f32 %v372_v51, %v1024_v52  ;;  %v362_v23 = vmul.f32 0.5, %v343_v39  ;;  %35 = vst.msk [vmem:[#allocation2 + $0x18] sm:$0xff] %vm31_vm0, %v741_v36 }
 0x1ab   :  { %36 = vst.msk [vmem:[#allocation2 + $0x20] sm:$0xff] %vm31_vm0, %v741_v36 }
 0x1ac   :  { %v378_v41 = vmul.f32 %v370_v40, %v343_v39  ;;  %v388_v13 = vmul.f32 %v380_v45, %v1024_v52  ;;  %37 = vst.msk [vmem:[#allocation2 + $0x28] sm:$0xff] %vm31_vm0, %v741_v36 }
 0x1ad   :  { %v349_v42 = vpop.f32.mrf.mxu3  ;;  %38 = vst.msk [vmem:[#allocation2 + $0x30] sm:$0xff] %vm31_vm0, %v741_v36 }
 0x1ae   :  { %v1021_v25 = vadd.f32 %v1014_v37, %v349_v42  ;;  %v386_v44 = vmul.f32 %v378_v41, %v343_v39  ;;  %v396_v20 = vadd.f32 %v388_v13, %v1024_v52  ;;  %39 = vst.msk [vmem:[#allocation2 + $0x38] sm:$0xff] %vm31_vm0, %v741_v36 }
 0x1af   :  { %v344_v49 = vpop.f32.mrf.mxu0 }
 0x1b0   :  { %v345_v43 = vadd.f32 %v1014_v37, %v344_v49  ;;  %v394_v53 = vadd.f32 %v386_v44, %v343_v39  ;;  %v373_v46 = vmul.f32 0.044715, %v1021_v25  ;;  %v404_v60 = vmul.f32 0.7978846, %v396_v20 }
 0x1b1   :  { %v365_v51 = vmul.f32 0.5, %v1021_v25 }
 0x1b2   :  { %v371_v57 = vmul.f32 0.044715, %v345_v43  ;;  %v402_v47 = vmul.f32 0.7978846, %v394_v53  ;;  %v381_v59 = vmul.f32 %v373_v46, %v1021_v25  ;;  %v363_v27 = vmul.f32 0.5, %v345_v43 }
 0x1b4   :  { %v379_v58 = vmul.f32 %v371_v57, %v345_v43  ;;  %724 = vtanh.f32 %v402_v47  ;;  %v389_v6 = vmul.f32 %v381_v59, %v1021_v25 }
 0x1b5   :  { %v352_v55 = vpop.f32.mrf.mxu3 }
 0x1b6   :  { %v1031_v62 = vadd.f32 %v1014_v37, %v352_v55  ;;  %v387_v63 = vmul.f32 %v379_v58, %v345_v43  ;;  %v397_v15 = vadd.f32 %v389_v6, %v1021_v25 }
 0x1b8   :  { %v374_v1 = vmul.f32 0.044715, %v1031_v62  ;;  %v395_v2 = vadd.f32 %v387_v63, %v345_v43  ;;  %v405_v21 = vmul.f32 0.7978846, %v397_v15  ;;  %v366_v58 = vmul.f32 0.5, %v1031_v62 }
 0x1ba   :  { %v382_v7 = vmul.f32 %v374_v1, %v1031_v62  ;;  %v403_v8 = vmul.f32 0.7978846, %v395_v2  ;;  %v725_v18 = vpop.eup %724  ;;  %v364_v2 = vmul.f32 0.5, %v1024_v52 }
 0x1bb   :  { %v418_v32 = vadd.f32 1.0, %v725_v18 }
 0x1bc   :  { %726 = vtanh.f32 %v403_v8  ;;  %v390_v12 = vmul.f32 %v382_v7, %v1031_v62 }
 0x1bd   :  { %v354_v14 = vpop.f32.mrf.mxu3  ;;  %v426_v31 = vmul.f32 %v418_v32, %v362_v23  ;;  %728 = vtanh.f32 %v405_v21  ;;  %v434_v21 = vld [vmem:[#allocation2] sm:$0xff] }
 0x1be   :  { %v355_v50 = vadd.f32 %v1014_v37, %v354_v14  ;;  %v398_v19 = vadd.f32 %v390_v12, %v1031_v62 }
 0x1c0   :  { %v375_v54 = vmul.f32 0.044715, %v355_v50  ;;  %v406_v22 = vmul.f32 0.7978846, %v398_v19  ;;  %v367_v47 = vmul.f32 0.5, %v355_v50 }
 0x1c2   :  { %v727_v48 = vpop.eup %726  ;;  %v383_v33 = vmul.f32 %v375_v54, %v355_v50  ;;  %730 = vtanh.f32 %v406_v22  ;;  %v435_v22 = vld [vmem:[#allocation2 + $0x8] sm:$0xff] }
 0x1c3   :  { %v419_v26 = vadd.f32 1.0, %v727_v48  ;;  %732 = vtanh.f32 %v404_v60  ;;  %v729_v29 = vpop.eup %728 }
 0x1c4   :  { %v391_v28 = vmul.f32 %v383_v33, %v355_v50  ;;  %v421_v53 = vadd.f32 1.0, %v729_v29  ;;  %v437_v29 = vld [vmem:[#allocation2 + $0x18] sm:$0xff] }
 0x1c5   :  { %v357_v30 = vpop.f32.mrf.mxu3  ;;  %v427_v34 = vmul.f32 %v419_v26, %v363_v27  ;;  %v1064_v27 = vld [vmem:[%s1126_s6] ss:$0 sm:$0xff] }
 0x1c6   :  { %v358_v35 = vadd.f32 %v1014_v37, %v357_v30  ;;  %v399_v24 = vadd.f32 %v391_v28, %v355_v50  ;;  %v429_v6 = vmul.f32 %v421_v53, %v365_v51 }
 0x1c7   :  { %v442_v61 = vpack.c.bf16 %v427_v34, %v426_v31  ;;  %v436_v31 = vld [vmem:[#allocation2 + $0x10] sm:$0xff] }
 0x1c8   :  { %v376_v56 = vmul.f32 0.044715, %v358_v35  ;;  %v407_v0 = vmul.f32 0.7978846, %v399_v24  ;;  %v731_v39 = vpop.eup %730  ;;  %v368_v50 = vmul.f32 0.5, %v358_v35 }
 0x1c9   :  { %644 = vmatmul.msk.bf16.vlgmr.msra.gmra.mxu1 %vm478_vm12, %v442_v61  ;;  %v733_v42 = vpop.eup %732  ;;  %v422_v43 = vadd.f32 1.0, %v731_v39 }
 0x1ca   :  { %v384_v38 = vmul.f32 %v376_v56, %v358_v35  ;;  %734 = vtanh.f32 %v407_v0  ;;  %v420_v55 = vadd.f32 1.0, %v733_v42  ;;  %v438_v56 = vld [vmem:[#allocation2 + $0x20] sm:$0xff] }
 0x1cb   :  { %v430_v1 = vmul.f32 %v422_v43, %v366_v58 }
 0x1cc   :  { %v392_v40 = vmul.f32 %v384_v38, %v358_v35  ;;  %v428_v12 = vmul.f32 %v420_v55, %v364_v2 }
 0x1cd   :  { %v359_v41 = vpop.f32.mrf.mxu3 }
 0x1ce   :  { %v360_v44 = vadd.f32 %v1014_v37, %v359_v41  ;;  %v400_v49 = vadd.f32 %v392_v40, %v358_v35  ;;  %v443_v25 = vpack.c.bf16 %v429_v6, %v428_v12  ;;  %v441_v6 = vld [vmem:[#allocation2 + $0x38] sm:$0xff] }
 0x1d0   :  { %v735_v46 = vpop.eup %734  ;;  %v377_v57 = vmul.f32 0.044715, %v360_v44  ;;  %v408_v45 = vmul.f32 0.7978846, %v400_v49  ;;  %v369_v19 = vmul.f32 0.5, %v360_v44 }
 0x1d1   :  { %v423_v59 = vadd.f32 1.0, %v735_v46 }
 0x1d2   :  { %v385_v63 = vmul.f32 %v377_v57, %v360_v44  ;;  %736 = vtanh.f32 %v408_v45 }
 0x1d3   :  { %v431_v37 = vmul.f32 %v423_v59, %v367_v47  ;;  %v440_v47 = vld [vmem:[#allocation2 + $0x30] sm:$0xff] }
 0x1d4   :  { %v393_v7 = vmul.f32 %v385_v63, %v360_v44 }
 0x1d5   :  { %v444_v8 = vpack.c.bf16 %v431_v37, %v430_v1 }
 0x1d6   :  { %v401_v13 = vadd.f32 %v393_v7, %v360_v44  ;;  %v439_v44 = vld [vmem:[#allocation2 + $0x28] sm:$0xff] }
 0x1d7   :  { %646 = vmatmul.msk.bf16.vlgmr.msra.gmra.mxu2 %vm478_vm12, %v444_v8 }
 0x1d8   :  { %v409_v14 = vmul.f32 0.7978846, %v401_v13  ;;  %v737_v62 = vpop.eup %736 }
 0x1d9   :  { %645 = vmatmul.msk.bf16.gmra.mxu1 %vm478_vm12, %v443_v25  ;;  %v424_v15 = vadd.f32 1.0, %v737_v62 }
 0x1da   :  { %738 = vtanh.f32 %v409_v14 }
 0x1db   :  { %v432_v52 = vmul.f32 %v424_v15, %v368_v50 }
 0x1e0   :  { %v739_v18 = vpop.eup %738 }
 0x1e1   :  { %v425_v54 = vadd.f32 1.0, %v739_v18 }
 0x1e3   :  { %v433_v20 = vmul.f32 %v425_v54, %v369_v19 }
 0x1e5   :  { %v445_v32 = vpack.c.bf16 %v433_v20, %v432_v52 }
 0x1e7   :  { %647 = vmatmul.msk.bf16.gmra.mxu2 %vm478_vm12, %v445_v32 }
 0x246   :  { %v500_v48 = vpop.f32.mrf.mxu1 }
 0x247   :  { %v520_v33 = vadd.f32 %v500_v48, %v434_v21 }
 0x249   :  { %528 = vst.msk [vmem:[#allocation2] sm:$0xff] %vm31_vm0, %v520_v33 }
 0x24e   :  { %v502_v23 = vpop.f32.mrf.mxu1 }
 0x24f   :  { %v521_v26 = vadd.f32 %v502_v23, %v435_v22 }
 0x250   :  { %v555_v28 = vld [vmem:[#allocation2] sm:$0xff] }
 0x251   :  { %v563_v60 = vadd.f32 %v793_v4, %v555_v28  ;;  %529 = vst.msk [vmem:[#allocation2 + $0x8] sm:$0xff] %vm31_vm0, %v521_v26 }
 0x253   :  { %v575_v30 = vadd.f32 %v1064_v27, %v563_v60 }
 0x255   :  { %v583_v34 = vpack.c.bf16 %v575_v30, %v575_v30 }
 0x256   :  { %v505_v35 = vpop.f32.mrf.mxu1 }
 0x257   :  { %592 = vst.msk [vmem:[%s1128_s7] sm:$0xf] %vm271_vm14, %v583_v34  ;;  %v522_v24 = vadd.f32 %v505_v35, %v436_v31 }
 0x258   :  { %v556_v61 = vld [vmem:[#allocation2 + $0x8] sm:$0xff] }
 0x259   :  { %v564_v0 = vadd.f32 %v807_v11, %v556_v61  ;;  %530 = vst.msk [vmem:[#allocation2 + $0x10] sm:$0xff] %vm31_vm0, %v522_v24 }
 0x25a   :  { %v510_v4 = vpop.f32.mrf.mxu2 }
 0x25b   :  { %v576_v36 = vadd.f32 %v1064_v27, %v564_v0  ;;  %v524_v38 = vadd.f32 %v510_v4, %v438_v56 }
 0x25d   :  { %v584_v39 = vpack.c.bf16 %v576_v36, %v576_v36  ;;  %532 = vst.msk [vmem:[#allocation2 + $0x20] sm:$0xff] %vm31_vm0, %v524_v38 }
 0x25e   :  { %v507_v40 = vpop.f32.mrf.mxu1 }
 0x25f   :  { %593 = vst.msk [vmem:[%s1128_s7 + $0x4] sm:$0xf] %vm271_vm14, %v584_v39  ;;  %v523_v41 = vadd.f32 %v507_v40, %v437_v29 }
 0x260   :  { %v557_v42 = vld [vmem:[#allocation2 + $0x10] sm:$0xff] }
 0x261   :  { %v565_v11 = vadd.f32 %v795_v5, %v557_v42  ;;  %531 = vst.msk [vmem:[#allocation2 + $0x18] sm:$0xff] %vm31_vm0, %v523_v41 }
 0x262   :  { %v512_v49 = vpop.f32.mrf.mxu2 }
 0x263   :  { %v577_v43 = vadd.f32 %v1064_v27, %v565_v11  ;;  %v525_v53 = vadd.f32 %v512_v49, %v439_v44 }
 0x264   :  { %v559_v46 = vld [vmem:[#allocation2 + $0x20] sm:$0xff] }
 0x265   :  { %v585_v57 = vpack.c.bf16 %v577_v43, %v577_v43  ;;  %v567_v51 = vadd.f32 %v791_v3, %v559_v46  ;;  %533 = vst.msk [vmem:[#allocation2 + $0x28] sm:$0xff] %vm31_vm0, %v525_v53 }
 0x267   :  { %594 = vst.msk [vmem:[%s1128_s7 + $0x8] sm:$0xf] %vm271_vm14, %v585_v57  ;;  %v579_v58 = vadd.f32 %v1064_v27, %v567_v51 }
 0x268   :  { %v558_v5 = vld [vmem:[#allocation2 + $0x18] sm:$0xff] }
 0x269   :  { %v587_v59 = vpack.c.bf16 %v579_v58, %v579_v58  ;;  %v566_v55 = vadd.f32 %v803_v9, %v558_v5 }
 0x26a   :  { %v515_v63 = vpop.f32.mrf.mxu2 }
 0x26b   :  { %596 = vst.msk [vmem:[%s1128_s7 + $0x10] sm:$0xf] %vm271_vm14, %v587_v59  ;;  %v578_v3 = vadd.f32 %v1064_v27, %v566_v55  ;;  %v526_v45 = vadd.f32 %v515_v63, %v440_v47 }
 0x26c   :  { %v560_v1 = vld [vmem:[#allocation2 + $0x28] sm:$0xff] }
 0x26d   :  { %v586_v37 = vpack.c.bf16 %v578_v3, %v578_v3  ;;  %v568_v2 = vadd.f32 %v805_v10, %v560_v1  ;;  %534 = vst.msk [vmem:[#allocation2 + $0x30] sm:$0xff] %vm31_vm0, %v526_v45 }
 0x26f   :  { %595 = vst.msk [vmem:[%s1128_s7 + $0xc] sm:$0xf] %vm271_vm14, %v586_v37  ;;  %v580_v9 = vadd.f32 %v1064_v27, %v568_v2 }
 0x271   :  { %v588_v7 = vpack.c.bf16 %v580_v9, %v580_v9 }
 0x272   :  { %v517_v8 = vpop.f32.mrf.mxu2 }
 0x273   :  { %597 = vst.msk [vmem:[%s1128_s7 + $0x14] sm:$0xf] %vm271_vm14, %v588_v7  ;;  %v527_v12 = vadd.f32 %v517_v8, %v441_v6 }
 0x274   :  { %v561_v13 = vld [vmem:[#allocation2 + $0x30] sm:$0xff] }
 0x275   :  { %v569_v10 = vadd.f32 %v818_v16, %v561_v13  ;;  %535 = vst.msk [vmem:[#allocation2 + $0x38] sm:$0xff] %vm31_vm0, %v527_v12 }
 0x277   :  { %v581_v25 = vadd.f32 %v1064_v27, %v569_v10 }
 0x279   :  { %v589_v14 = vpack.c.bf16 %v581_v25, %v581_v25 }
 0x27b   :  { %598 = vst.msk [vmem:[%s1128_s7 + $0x18] sm:$0xf] %vm271_vm14, %v589_v14 }
 0x27c   :  { %v562_v62 = vld [vmem:[#allocation2 + $0x38] sm:$0xff] }
 0x27d   :  { %v570_v15 = vadd.f32 %v820_v17, %v562_v62 }
 0x27f   :  { %v582_v18 = vadd.f32 %v1064_v27, %v570_v15 }
 0x281   :  { %v590_v50 = vpack.c.bf16 %v582_v18, %v582_v18 }
 0x283   :  { %599 = vst.msk [vmem:[%s1128_s7 + $0x1c] sm:$0xf] %vm271_vm14, %v590_v50 }

// kernel: _lambda_.33
= control target key start
LH: loop header
LB: loop body
LE: loop exit
PB: predicated region body
PF: predicated region fallthrough
CT: control target
= control target key end

     0   :  { %s847_s9 = smov 0   ;;  %s983_s0 = inlined_call_operand.vmem [shape: bf16[8,8,48], index: 0, kind: input, shape index: {}]   ;;  %s984_s1 = inlined_call_operand.vmem [shape: bf16[2,8,8], index: 1, kind: input, shape index: {}]   ;;  %s985_s2 = inlined_call_operand.vmem [shape: bf16[8,8,16], index: 2, kind: output, shape index: {}]  }
   0x1 LB: > { %s732_s10 = sadd.s32 4294967295, %s824_s9   ;;  %p736_p0 = scmp.ge.s32.totalorder %s824_s9, 1  ;;  %s824_s9 = sphi %s847_s9, %s12_s9  }
   0x2   : > { %p113_p1 = scmp.lt.s32.totalorder %s824_s9, 3 }
   0x4   : > { %p114_p2 = pnand %p736_p0, %p113_p1 }
   0x5   : > { %s737_s11 = sshll.u32 (!%p114_p2), %s732_s10, 2  ;;  %s826_s16 = smov (!%p114_p2), 112  }
   0x6   : > { %117 = sbr.rel (%p114_p2) target bundleno = 1223 (0x4c7), region = 28  ;;  %p136_p3 = scmp.lt.s32.totalorder (!%p114_p2), %s737_s11, 7 }
   0x7   : > { %s827_s17 = smov (!%p114_p2), 96   ;;  %s828_s18 = smov (!%p114_p2), 104  }
   0x8   : > { %s829_s19 = smov (!%p114_p2), 120   ;;  %s830_s25 = smov (!%p114_p2), 88  }
   0x9   : > { %s831_s26 = smov (!%p114_p2), 8  }
   0xb   : > { %s987_s11 = smov (!%p136_p3, %s737_s11), 7  ;;  %vm161_vm0 = vcmask 64512   ;;  %vm314_vm1 = vcmask 1043456   ;;  %v890_v27 = vld [vmem:[%s984_s1] sm:$0xff]   ;;  %vm398_vm2 = vcmask 60416   ;;  %vm671_vm3 = vcmask 126016  }
   0xc   : > { %s738_s12 = sshll.u32 %s987_s11, 2  ;;  %v761_v30 = vunpack.c.l.bf16 %v890_v27 }
   0xd   : > { %s863_s15 = scalar_lea.vmem %s983_s0, %s738_s12  ;;  %s941_s24 = scalar_lea.vmem %s985_s2, %s738_s12 }
   0xe   : > { %v154_v0 = vld [vmem:[%s863_s15 + $0x8] sm:$0xf]  ;;  %v152_v1 = vld [vmem:[%s863_s15] sm:$0xf]  ;;  %v155_v4 = vld [vmem:[%s863_s15 + $0xc] sm:$0xf] }
   0xf   : > { %v206_v2 = vunpack.c.l.b16 %v154_v0  ;;  %v157_v3 = vunpack.c.l.b16 %v152_v1  ;;  %v153_v5 = vld [vmem:[%s863_s15 + $0x4] sm:$0xf]  ;;  %v230_v8 = vunpack.c.l.b16 %v155_v4  ;;  %v771_v12 = vld [vmem:[%s863_s15 + $0x8] sm:$0xff]  }
  0x10   : > { %v182_v9 = vunpack.c.l.b16 %v153_v5  ;;  %v770_v13 = vunpack.c.h.b16 %v771_v12  ;;  %v769_v15 = vunpack.c.l.b16 %v771_v12  ;;  %v764_v57 = vld [vmem:[%s863_s15] sm:$0xff]  }
  0x11   : > { %v207_v6 = vpack.c.b16 %v206_v2, %v206_v2  ;;  %v158_v7 = vpack.c.b16 %v157_v3, %v157_v3  ;;  %v231_v10 = vpack.c.b16 %v230_v8, %v230_v8  ;;  %v765_v58 = vunpack.c.l.b16 %v764_v57 }
  0x12   : > { %v183_v11 = vpack.c.b16 %v182_v9, %v182_v9  ;;  %v870_v14 = vpack.c.b16 %v770_v13, %v770_v13  ;;  %v874_v16 = vpack.c.b16 %v769_v15, %v769_v15 }
  0x13   : > { %208 = vrot.lane.b32.xlu0 %v207_v6, %s826_s16  ;;  %159 = vrot.lane.b32.xlu1 %v158_v7, %s826_s16  ;;  %v906_v59 = vpack.c.b16 %v765_v58, %v765_v58 }
  0x14   : > { %352 = vrot.lane.b32.xlu2 %v207_v6, %s827_s17 }
  0x1b   : > { %232 = vrot.lane.b32.xlu0 %v231_v10, %s826_s16  ;;  %184 = vrot.lane.b32.xlu1 %v183_v11, %s826_s16 }
  0x1c   : > { %373 = vrot.lane.b32.xlu2 %v231_v10, %s827_s17 }
  0x23   : > { %331 = vrot.lane.b32.xlu0 %v183_v11, %s827_s17 }
  0x24   : > { %309 = vrot.lane.b32.xlu2 %v158_v7, %s827_s17 }
  0x2c   : > { %490 = vrot.lane.b32.xlu2 %v870_v14, %s828_s18 }
  0x34   : > { %462 = vrot.lane.b32.xlu2 %v874_v16, %s829_s19 }
  0x6e   : > { %v353_v25 = vpop.permute.xlu2 %352 }
  0x6f   : > { %v358_v26 = vsel %vm314_vm1, %v353_v25, 0 }
  0x76   : > { %v374_v28 = vpop.permute.xlu2 %373 }
  0x77   : > { %v379_v29 = vsel %vm314_vm1, %v374_v28, 0 }
  0x7e   : > { %v310_v34 = vpop.permute.xlu2 %309 }
  0x7f   : > { %v316_v36 = vsel %vm314_vm1, %v310_v34, 0 }
  0x85   : > { %v209_v17 = vpop.permute.xlu0 %208  ;;  %v160_v18 = vpop.permute.xlu1 %159 }
  0x86   : > { %v166_v19 = vsel %vm161_vm0, %v160_v18, 0  ;;  %v214_v20 = vsel %vm161_vm0, %v209_v17, 0  ;;  %v491_v45 = vpop.permute.xlu2 %490 }
  0x87   : > { %175 = vmatpush.bf16.xpose.msra.mxu0 %v166_v19  ;;  %223 = vmatpush.bf16.xpose.msra.mxu2 %v214_v20  ;;  %v496_v48 = vsel %vm161_vm0, %v491_v45, 0 }
  0x8d   : > { %v233_v21 = vpop.permute.xlu0 %232  ;;  %v185_v22 = vpop.permute.xlu1 %184 }
  0x8e   : > { %741 = vmatmul.msk.bf16.vlgmr.msra.gmra.mxu0 %vm161_vm0, %v152_v1  ;;  %743 = vmatmul.msk.bf16.vlgmr.msra.gmra.mxu2 %vm161_vm0, %v154_v0  ;;  %v190_v23 = vsel %vm161_vm0, %v185_v22, 0  ;;  %v238_v24 = vsel %vm161_vm0, %v233_v21, 0  ;;  %v910_v60 = vpop.permute.xlu2 %462 }
  0x8f   : > { %199 = vmatpush.bf16.xpose.msra.mxu1 %v190_v23  ;;  %247 = vmatpush.bf16.xpose.msra.mxu3 %v238_v24  ;;  %v766_v23 = vunpack.c.h.b16 %v764_v57 }
  0x90   : > { %367 = vmatpush.bf16.msrb.mxu2 %v358_v26  ;;  %325 = vmatpush.bf16.msrb.mxu0 %v316_v36 }
  0x91   : > { %v920_v24 = vpack.c.b16 %v766_v23, %v766_v23 }
  0x95   : > { %v332_v46 = vpop.permute.xlu0 %331 }
  0x96   : > { %742 = vmatmul.msk.bf16.vlgmr.msra.gmra.mxu1 %vm161_vm0, %v153_v5  ;;  %744 = vmatmul.msk.bf16.vlgmr.msra.gmra.mxu3 %vm161_vm0, %v155_v4  ;;  %v337_v49 = vsel %vm314_vm1, %v332_v46, 0 }
  0x97   : > { %388 = vmatpush.bf16.msrb.mxu3 %v379_v29  ;;  %346 = vmatpush.bf16.msrb.mxu1 %v337_v49 }
  0x9b   : > { %505 = vmatpush.bf16.xpose.msra.mxu3 %v496_v48 }
 0x10b   : > { %v177_v31 = vpop.f32.mrf.mxu0 }
 0x10c   : > { %v253_v32 = vmul.f32 0.35355338, %v177_v31 }
 0x10e   : > { %v257_v33 = vadd.f32 %v761_v30, %v253_v32 }
 0x110   : > { %v261_v35 = vsel %vm161_vm0, %v257_v33, -inf }
 0x111   : > { %v225_v37 = vpop.f32.mrf.mxu2  ;;  %262 = vmax.xlane.f32.xlu0 %v261_v35 }
 0x112   : > { %v255_v38 = vmul.f32 0.35355338, %v225_v37 }
 0x113   : > { %v201_v39 = vpop.f32.mrf.mxu1  ;;  %v179_v40 = vpop.f32.mrf.mxu0 }
 0x114   : > { %v254_v41 = vmul.f32 0.35355338, %v201_v39  ;;  %v259_v42 = vadd.f32 %v761_v30, %v255_v38 }
 0x116   : > { %v267_v43 = vsel %vm161_vm0, %v259_v42, -inf  ;;  %v258_v44 = vadd.f32 %v761_v30, %v254_v41 }
 0x117   : > { %268 = vmax.xlane.f32.xlu2 %v267_v43 }
 0x118   : > { %v264_v47 = vsel %vm161_vm0, %v258_v44, -inf }
 0x119   : > { %v227_v50 = vpop.f32.mrf.mxu2  ;;  %v249_v51 = vpop.f32.mrf.mxu3  ;;  %265 = vmax.xlane.f32.xlu1 %v264_v47 }
 0x11a   : > { %v256_v52 = vmul.f32 0.35355338, %v249_v51 }
 0x11b   : > { %v203_v53 = vpop.f32.mrf.mxu1 }
 0x11c   : > { %v260_v54 = vadd.f32 %v761_v30, %v256_v52 }
 0x11e   : > { %v270_v55 = vsel %vm161_vm0, %v260_v54, -inf }
 0x11f   : > { %271 = vmax.xlane.f32.xlu2 %v270_v55 }
 0x121   : > { %v251_v56 = vpop.f32.mrf.mxu3 }
 0x125   : > { %488 = vrot.lane.b32.xlu0 %v870_v14, %s829_s19 }
 0x132   : > { %464 = vrot.lane.b32.xlu1 %v874_v16, %s828_s18 }
 0x137   : > { %412 = vrot.lane.b32.xlu2 %v906_v59, %s828_s18 }
 0x184   : > { %v263_v61 = vpop.xlane.xlu0 %262 }
 0x185   : > { %v273_v62 = vsub.f32 %v257_v33, %v263_v61 }
 0x187   : > { %v277_v63 = vmul.f32 1.442695, %v273_v62 }
 0x189   : > { %786 = vpow2.f32 %v277_v63 }
 0x18a   : > { %v269_v0 = vpop.xlane.xlu2 %268 }
 0x18b   : > { %v275_v1 = vsub.f32 %v259_v42, %v269_v0 }
 0x18c   : > { %v266_v2 = vpop.xlane.xlu1 %265 }
 0x18d   : > { %v281_v3 = vmul.f32 1.442695, %v275_v1  ;;  %v274_v4 = vsub.f32 %v258_v44, %v266_v2 }
 0x18f   : > { %v787_v5 = vpop.eup %786  ;;  %788 = vpow2.f32 %v281_v3  ;;  %v279_v6 = vmul.f32 1.442695, %v274_v4 }
 0x190   : > { %v285_v7 = vsel %vm161_vm0, %v787_v5, 0.0 }
 0x191   : > { %790 = vpow2.f32 %v279_v6  ;;  %286 = vadd.xlane.f32.xlu0 %v285_v7 }
 0x192   : > { %v272_v8 = vpop.xlane.xlu2 %271 }
 0x193   : > { %v276_v9 = vsub.f32 %v260_v54, %v272_v8  ;;  %v762_v54 = vunpack.c.h.bf16 %v890_v27 }
 0x195   : > { %v789_v10 = vpop.eup %788  ;;  %v283_v11 = vmul.f32 1.442695, %v276_v9 }
 0x196   : > { %v291_v12 = vsel %vm161_vm0, %v789_v10, 0.0 }
 0x197   : > { %v791_v13 = vpop.eup %790  ;;  %792 = vpow2.f32 %v283_v11  ;;  %292 = vadd.xlane.f32.xlu2 %v291_v12  ;;  %v489_v25 = vpop.permute.xlu0 %488 }
 0x198   : > { %v288_v15 = vsel %vm161_vm0, %v791_v13, 0.0 }
 0x199   : > { %289 = vadd.xlane.f32.xlu1 %v288_v15 }
 0x19a   : > { %v413_v17 = vpop.permute.xlu2 %412 }
 0x19b   : > { %v418_v18 = vsel %vm161_vm0, %v413_v17, 0 }
 0x19c   : > { %427 = vmatpush.bf16.xpose.msra.mxu0 %v418_v18 }
 0x19d   : > { %v793_v19 = vpop.eup %792 }
 0x19e   : > { %v294_v20 = vsel %vm161_vm0, %v793_v19, 0.0 }
 0x19f   : > { %295 = vadd.xlane.f32.xlu2 %v294_v20 }
 0x1a4   : > { %v465_v21 = vpop.permute.xlu1 %464 }
 0x1a5   : > { %410 = vrot.lane.b32.xlu0 %v906_v59, %s829_s19  ;;  %v470_v22 = vsel %vm161_vm0, %v465_v21, 0 }
 0x1a6   : > { %479 = vmatpush.bf16.xpose.msra.mxu2 %v470_v22 }
 0x1b2   : > { %438 = vrot.lane.b32.xlu1 %v920_v24, %s828_s18 }
 0x1b7   : > { %436 = vrot.lane.b32.xlu2 %v920_v24, %s829_s19 }
 0x204   : > { %v287_v26 = vpop.xlane.xlu0 %286 }
 0x205   : > { %794 = vrcp.f32 %v287_v26 }
 0x20a   : > { %v293_v28 = vpop.xlane.xlu2 %292 }
 0x20b   : > { %v795_v29 = vpop.eup %794  ;;  %796 = vrcp.f32 %v293_v28 }
 0x20c   : > { %v301_v30 = vmul.f32 %v795_v29, %v787_v5  ;;  %v290_v31 = vpop.xlane.xlu1 %289 }
 0x20d   : > { %798 = vrcp.f32 %v290_v31 }
 0x20e   : > { %v305_v32 = vpack.c.bf16 %v301_v30, %v301_v30 }
 0x210   : > { %745 = vmatmul.msk.bf16.vlgmr.msrb.gmra.mxu0 %vm161_vm0, %v305_v32 }
 0x211   : > { %v797_v33 = vpop.eup %796 }
 0x212   : > { %v303_v34 = vmul.f32 %v797_v33, %v789_v10  ;;  %v296_v35 = vpop.xlane.xlu2 %295 }
 0x213   : > { %v799_v36 = vpop.eup %798  ;;  %800 = vrcp.f32 %v296_v35 }
 0x214   : > { %v302_v37 = vmul.f32 %v799_v36, %v791_v13  ;;  %v307_v38 = vpack.c.bf16 %v303_v34, %v303_v34 }
 0x216   : > { %747 = vmatmul.msk.bf16.vlgmr.msrb.gmra.mxu2 %vm161_vm0, %v307_v38  ;;  %v306_v39 = vpack.c.bf16 %v302_v37, %v302_v37 }
 0x217   : > { %v411_v43 = vpop.permute.xlu0 %410 }
 0x218   : > { %746 = vmatmul.msk.bf16.vlgmr.msrb.gmra.mxu1 %vm161_vm0, %v306_v39 }
 0x219   : > { %v801_v40 = vpop.eup %800 }
 0x21a   : > { %v304_v41 = vmul.f32 %v801_v40, %v793_v19  ;;  %v437_v46 = vpop.permute.xlu2 %436 }
 0x21c   : > { %v308_v42 = vpack.c.bf16 %v304_v41, %v304_v41 }
 0x21e   : > { %748 = vmatmul.msk.bf16.vlgmr.msrb.gmra.mxu3 %vm161_vm0, %v308_v42 }
 0x220   : > { %749 = vmatmul.msk.bf16.vlgmr.msra.gmra.mxu0 %vm161_vm0, %v411_v43 }
 0x224   : > { %v439_v44 = vpop.permute.xlu1 %438 }
 0x225   : > { %v444_v45 = vsel %vm161_vm0, %v439_v44, 0 }
 0x226   : > { %453 = vmatpush.bf16.xpose.msra.mxu1 %v444_v45  ;;  %751 = vmatmul.msk.bf16.vlgmr.msra.gmra.mxu2 %vm161_vm0, %v910_v60 }
 0x22d   : > { %750 = vmatmul.msk.bf16.vlgmr.msra.gmra.mxu1 %vm161_vm0, %v437_v46 }
 0x22e   : > { %752 = vmatmul.msk.bf16.vlgmr.msra.gmra.mxu3 %vm161_vm0, %v489_v25 }
 0x28d   : > { %v327_v47 = vpop.f32.mrf.mxu0 }
 0x28e   : > { %v394_v48 = vpack.c.bf16 %v327_v47, %v327_v47 }
 0x290   : > { %399 = vst.msk [vmem:[%s941_s24] sm:$0xf] %vm398_vm2, %v394_v48 }
 0x295   : > { %v329_v49 = vpop.f32.mrf.mxu0  ;;  %v348_v50 = vpop.f32.mrf.mxu1 }
 0x296   : > { %v395_v51 = vpack.c.bf16 %v348_v50, %v348_v50 }
 0x298   : > { %400 = vst.msk [vmem:[%s941_s24 + $0x4] sm:$0xf] %vm398_vm2, %v395_v51 }
 0x299   : > { %v369_v52 = vpop.f32.mrf.mxu2 }
 0x29a   : > { %v396_v53 = vpack.c.bf16 %v369_v52, %v369_v52 }
 0x29c   : > { %401 = vst.msk [vmem:[%s941_s24 + $0x8] sm:$0xf] %vm398_vm2, %v396_v53 }
 0x29d   : > { %v350_v55 = vpop.f32.mrf.mxu1  ;;  %v429_v56 = vpop.f32.mrf.mxu0 }
 0x29e   : > { %v511_v57 = vmul.f32 0.35355338, %v429_v56 }
 0x2a0   : > { %v515_v58 = vadd.f32 %v762_v54, %v511_v57 }
 0x2a1   : > { %v371_v60 = vpop.f32.mrf.mxu2  ;;  %v390_v61 = vpop.f32.mrf.mxu3 }
 0x2a2   : > { %v397_v62 = vpack.c.bf16 %v390_v61, %v390_v61  ;;  %v519_v63 = vsel %vm161_vm0, %v515_v58, -inf }
 0x2a3   : > { %520 = vmax.xlane.f32.xlu2 %v519_v63 }
 0x2a4   : > { %402 = vst.msk [vmem:[%s941_s24 + $0xc] sm:$0xf] %vm398_vm2, %v397_v62 }
 0x2a5   : > { %v431_v0 = vpop.f32.mrf.mxu0 }
 0x2a9   : > { %v392_v1 = vpop.f32.mrf.mxu3  ;;  %v481_v2 = vpop.f32.mrf.mxu2 }
 0x2aa   : > { %v513_v3 = vmul.f32 0.35355338, %v481_v2  ;;  %v455_v4 = vpop.f32.mrf.mxu1 }
 0x2ab   : > { %v512_v5 = vmul.f32 0.35355338, %v455_v4 }
 0x2ac   : > { %v517_v6 = vadd.f32 %v762_v54, %v513_v3 }
 0x2ad   : > { %v516_v7 = vadd.f32 %v762_v54, %v512_v5 }
 0x2ae   : > { %v525_v27 = vsel %vm161_vm0, %v517_v6, -inf }
 0x2af   : > { %526 = vmax.xlane.f32.xlu1 %v525_v27  ;;  %v522_v13 = vsel %vm161_vm0, %v516_v7, -inf }
 0x2b1   : > { %v483_v8 = vpop.f32.mrf.mxu2  ;;  %v507_v9 = vpop.f32.mrf.mxu3 }
 0x2b2   : > { %v514_v10 = vmul.f32 0.35355338, %v507_v9  ;;  %v457_v11 = vpop.f32.mrf.mxu1 }
 0x2b4   : > { %v518_v12 = vadd.f32 %v762_v54, %v514_v10 }
 0x2b6   : > { %v528_v15 = vsel %vm161_vm0, %v518_v12, -inf }
 0x2b7   : > { %529 = vmax.xlane.f32.xlu0 %v528_v15  ;;  %523 = vmax.xlane.f32.xlu1 %v522_v13 }
 0x2b9   : > { %v509_v17 = vpop.f32.mrf.mxu3 }
 0x2bb   : > { %609 = vrot.lane.b32.xlu2 %v874_v16, %s830_s25 }
 0x316   : > { %v521_v18 = vpop.xlane.xlu2 %520 }
 0x317   : > { %v531_v19 = vsub.f32 %v515_v58, %v521_v18 }
 0x319   : > { %v535_v20 = vmul.f32 1.442695, %v531_v19 }
 0x31b   : > { %802 = vpow2.f32 %v535_v20 }
 0x31e   : > { %v610_v16 = vpop.permute.xlu2 %609 }
 0x31f   : > { %v615_v35 = vsel %vm314_vm1, %v610_v16, 0 }
 0x320   : > { %624 = vmatpush.bf16.msrb.mxu2 %v615_v35 }
 0x321   : > { %v803_v21 = vpop.eup %802 }
 0x322   : > { %v527_v22 = vpop.xlane.xlu1 %526  ;;  %v543_v23 = vsel %vm161_vm0, %v803_v21, 0.0 }
 0x323   : > { %544 = vadd.xlane.f32.xlu1 %v543_v23  ;;  %v533_v32 = vsub.f32 %v517_v6, %v527_v22 }
 0x325   : > { %v539_v33 = vmul.f32 1.442695, %v533_v32 }
 0x32a   : > { %v530_v25 = vpop.xlane.xlu0 %529  ;;  %v524_v26 = vpop.xlane.xlu1 %523 }
 0x32b   : > { %v534_v28 = vsub.f32 %v518_v12, %v530_v25  ;;  %v532_v29 = vsub.f32 %v516_v7, %v524_v26 }
 0x32d   : > { %v541_v30 = vmul.f32 1.442695, %v534_v28  ;;  %v537_v31 = vmul.f32 1.442695, %v532_v29 }
 0x32f   : > { %804 = vpow2.f32 %v541_v30 }
 0x330   : > { %806 = vpow2.f32 %v537_v31 }
 0x331   : > { %808 = vpow2.f32 %v539_v33 }
 0x335   : > { %v805_v34 = vpop.eup %804 }
 0x336   : > { %v807_v36 = vpop.eup %806  ;;  %v552_v37 = vsel %vm161_vm0, %v805_v34, 0.0 }
 0x337   : > { %553 = vadd.xlane.f32.xlu2 %v552_v37  ;;  %v546_v38 = vsel %vm161_vm0, %v807_v36, 0.0  ;;  %v809_v39 = vpop.eup %808 }
 0x338   : > { %547 = vadd.xlane.f32.xlu0 %v546_v38  ;;  %v549_v40 = vsel %vm161_vm0, %v809_v39, 0.0 }
 0x33c   : > { %630 = vrot.lane.b32.xlu1 %v870_v14, %s830_s25 }
 0x340   : > { %550 = vadd.xlane.f32.xlu0 %v549_v40 }
 0x34f   : > { %588 = vrot.lane.b32.xlu2 %v920_v24, %s830_s25 }
 0x354   : > { %567 = vrot.lane.b32.xlu0 %v906_v59, %s830_s25 }
 0x396   : > { %v545_v41 = vpop.xlane.xlu1 %544 }
 0x3aa   : > { %v554_v42 = vpop.xlane.xlu2 %553 }
 0x3ab   : > { %810 = vrcp.f32 %v554_v42  ;;  %v548_v43 = vpop.xlane.xlu0 %547 }
 0x3ac   : > { %812 = vrcp.f32 %v548_v43 }
 0x3ae   : > { %v631_v44 = vpop.permute.xlu1 %630 }
 0x3af   : > { %v636_v45 = vsel %vm314_vm1, %v631_v44, 0 }
 0x3b0   : > { %645 = vmatpush.bf16.msrb.mxu3 %v636_v45 }
 0x3b1   : > { %v811_v46 = vpop.eup %810 }
 0x3b2   : > { %v813_v14 = vpop.eup %812  ;;  %v562_v47 = vmul.f32 %v811_v46, %v805_v34  ;;  %v589_v48 = vpop.permute.xlu2 %588 }
 0x3b3   : > { %v560_v49 = vmul.f32 %v813_v14, %v807_v36  ;;  %v594_v50 = vsel %vm314_vm1, %v589_v48, 0  ;;  %v551_v24 = vpop.xlane.xlu0 %550 }
 0x3b4   : > { %v566_v51 = vpack.c.bf16 %v562_v47, %v562_v47  ;;  %814 = vrcp.f32 %v551_v24  ;;  %603 = vmatpush.bf16.msrb.mxu1 %v594_v50 }
 0x3b5   : > { %v564_v59 = vpack.c.bf16 %v560_v49, %v560_v49  ;;  %816 = vrcp.f32 %v545_v41 }
 0x3b6   : > { %756 = vmatmul.msk.bf16.vlgmr.msrb.gmra.mxu3 %vm161_vm0, %v566_v51 }
 0x3b7   : > { %754 = vmatmul.msk.bf16.vlgmr.msrb.gmra.mxu1 %vm161_vm0, %v564_v59 }
 0x3ba   : > { %v815_v52 = vpop.eup %814 }
 0x3bb   : > { %v561_v53 = vmul.f32 %v815_v52, %v809_v39  ;;  %v817_v55 = vpop.eup %816 }
 0x3bc   : > { %v559_v56 = vmul.f32 %v817_v55, %v803_v21 }
 0x3bd   : > { %v565_v54 = vpack.c.bf16 %v561_v53, %v561_v53 }
 0x3be   : > { %v563_v60 = vpack.c.bf16 %v559_v56, %v559_v56 }
 0x3bf   : > { %755 = vmatmul.msk.bf16.vlgmr.msrb.gmra.mxu2 %vm161_vm0, %v565_v54 }
 0x3c6   : > { %v568_v57 = vpop.permute.xlu0 %567 }
 0x3c7   : > { %v573_v58 = vsel %vm314_vm1, %v568_v57, 0 }
 0x3c8   : > { %582 = vmatpush.bf16.msrb.mxu0 %v573_v58 }
 0x3cb   : > { %753 = vmatmul.msk.bf16.vlgmr.msrb.gmra.mxu0 %vm161_vm0, %v563_v60 }
 0x434   : > { %v605_v61 = vpop.f32.mrf.mxu1 }
 0x435   : > { %v652_v62 = vpack.c.bf16 %v605_v61, %v605_v61 }
 0x437   : > { %661 = vrot.lane.b32.xlu1 %v652_v62, %s831_s26 }
 0x439   : > { %v647_v63 = vpop.f32.mrf.mxu3 }
 0x43a   : > { %v654_v7 = vpack.c.bf16 %v647_v63, %v647_v63 }
 0x43c   : > { %v607_v0 = vpop.f32.mrf.mxu1 }
 0x441   : > { %v649_v1 = vpop.f32.mrf.mxu3 }
 0x442   : > { %v626_v2 = vpop.f32.mrf.mxu2 }
 0x443   : > { %v653_v3 = vpack.c.bf16 %v626_v2, %v626_v2 }
 0x445   : > { %663 = vrot.lane.b32.xlu2 %v653_v3, %s831_s26 }
 0x448   : > { %v584_v4 = vpop.f32.mrf.mxu0 }
 0x449   : > { %v651_v5 = vpack.c.bf16 %v584_v4, %v584_v4 }
 0x44a   : > { %v628_v6 = vpop.f32.mrf.mxu2 }
 0x44b   : > { %659 = vrot.lane.b32.xlu0 %v651_v5, %s831_s26 }
 0x450   : > { %v586_v27 = vpop.f32.mrf.mxu0 }
 0x453   : > { %665 = vrot.lane.b32.xlu0 %v654_v7, %s831_s26 }
 0x49f   : > { %v664_v10 = vpop.permute.xlu2 %663 }
 0x4a0   : > { %674 = vst.msk [vmem:[%s941_s24 + $0x8] sm:$0xf] %vm671_vm3, %v664_v10 }
 0x4a9   : > { %v662_v9 = vpop.permute.xlu1 %661 }
 0x4aa   : > { %673 = vst.msk [vmem:[%s941_s24 + $0x4] sm:$0xf] %vm671_vm3, %v662_v9 }
 0x4bd   : > { %v660_v8 = vpop.permute.xlu0 %659 }
 0x4be   : > { %672 = vst.msk [vmem:[%s941_s24] sm:$0xf] %vm671_vm3, %v660_v8 }
 0x4c5   : > { %v666_v11 = vpop.permute.xlu0 %665 }
 0x4c6   : > { %675 = vst.msk [vmem:[%s941_s24 + $0xc] sm:$0xf] %vm671_vm3, %v666_v11 }
 0x4c7 PF: > { %s12_s9 = sadd.s32 1, %s824_s9  }
 0x4c8   : > { %p9_p4 = scmp.ge.s32.totalorder %s12_s9, 4  }
 0x4ca   :  { %11 = sbr.rel (!%p9_p4) target bundleno = 1 (0x1), region = 58 }

// kernel: _lambda_.37
= control target key start
LH: loop header
LB: loop body
LE: loop exit
PB: predicated region body
PF: predicated region fallthrough
CT: control target
= control target key end

     0   :  { %s891_s12 = smov 0   ;;  %s1055_s0 = inlined_call_operand.vmem [shape: bf16[8,8,48], index: 0, kind: input, shape index: {}]   ;;  %s1056_s1 = inlined_call_operand.vmem [shape: bf16[2,8,8], index: 1, kind: input, shape index: {}]   ;;  %s1057_s2 = inlined_call_operand.vmem [shape: f32[4,8,8], index: 2, kind: input, shape index: {}]   ;;  %s1058_s3 = inlined_call_operand.vmem [shape: bf16[8,8,16], index: 3, kind: output, shape index: {}]  }
   0x1 LB: > { %s771_s13 = sadd.s32 4294967295, %s863_s12   ;;  %p775_p0 = scmp.ge.s32.totalorder %s863_s12, 1  ;;  %s863_s12 = sphi %s891_s12, %s13_s12  }
   0x2   : > { %p138_p1 = scmp.lt.s32.totalorder %s863_s12, 3 }
   0x4   : > { %p139_p2 = pnand %p775_p0, %p138_p1 }
   0x5   : > { %s776_s14 = sshll.u32 (!%p139_p2), %s771_s13, 2  ;;  %s865_s19 = smov (!%p139_p2), 112  }
   0x6   : > { %142 = sbr.rel (%p139_p2) target bundleno = 1227 (0x4cb), region = 32  ;;  %p163_p3 = scmp.lt.s32.totalorder (!%p139_p2), %s776_s14, 7 }
   0x7   : > { %s866_s20 = smov (!%p139_p2), 96   ;;  %s867_s21 = smov (!%p139_p2), 104  }
   0x8   : > { %s868_s22 = smov (!%p139_p2), 120   ;;  %s869_s9 = smov (!%p139_p2), 88  }
   0x9   : > { %s870_s10 = smov (!%p139_p2), 8  }
   0xb   : > { %s1060_s14 = smov (!%p163_p3, %s776_s14), 7  ;;  %vm192_vm0 = vcmask 64512   ;;  %vm349_vm1 = vcmask 1043456   ;;  %v934_v27 = vld [vmem:[%s1056_s1] sm:$0xff]   ;;  %v949_v42 = vld [vmem:[%s1057_s2 + $0x10] sm:$0xff]  ;;  %v954_v46 = vld [vmem:[%s1057_s2 + $0x8] sm:$0xff] }
   0xc   : > { %s777_s15 = sshll.u32 %s1060_s14, 2  ;;  %v800_v29 = vunpack.c.l.bf16 %v934_v27  ;;  %v941_v33 = vld [vmem:[%s1057_s2] sm:$0xff]  ;;  %v963_v58 = vld [vmem:[%s1057_s2 + $0x18] sm:$0xff]  ;;  %vm433_vm2 = vcmask 60416   ;;  %vm710_vm3 = vcmask 126016  }
   0xd   : > { %s907_s18 = scalar_lea.vmem %s1055_s0, %s777_s15  ;;  %s1009_s8 = scalar_lea.vmem %s1058_s3, %s777_s15 }
   0xe   : > { %v185_v0 = vld [vmem:[%s907_s18 + $0x8] sm:$0xf]  ;;  %v183_v1 = vld [vmem:[%s907_s18] sm:$0xf]  ;;  %v186_v4 = vld [vmem:[%s907_s18 + $0xc] sm:$0xf] }
   0xf   : > { %v237_v2 = vunpack.c.l.b16 %v185_v0  ;;  %v188_v3 = vunpack.c.l.b16 %v183_v1  ;;  %v184_v5 = vld [vmem:[%s907_s18 + $0x4] sm:$0xf]  ;;  %v261_v8 = vunpack.c.l.b16 %v186_v4  ;;  %v810_v12 = vld [vmem:[%s907_s18 + $0x8] sm:$0xff]  }
  0x10   : > { %v213_v9 = vunpack.c.l.b16 %v184_v5  ;;  %v809_v13 = vunpack.c.h.b16 %v810_v12  ;;  %v808_v15 = vunpack.c.l.b16 %v810_v12 }
  0x11   : > { %v238_v6 = vpack.c.b16 %v237_v2, %v237_v2  ;;  %v189_v7 = vpack.c.b16 %v188_v3, %v188_v3  ;;  %v262_v10 = vpack.c.b16 %v261_v8, %v261_v8 }
  0x12   : > { %v214_v11 = vpack.c.b16 %v213_v9, %v213_v9  ;;  %v914_v14 = vpack.c.b16 %v809_v13, %v809_v13  ;;  %v918_v16 = vpack.c.b16 %v808_v15, %v808_v15 }
  0x13   : > { %239 = vrot.lane.b32.xlu0 %v238_v6, %s865_s19  ;;  %190 = vrot.lane.b32.xlu1 %v189_v7, %s865_s19 }
  0x14   : > { %387 = vrot.lane.b32.xlu2 %v238_v6, %s866_s20 }
  0x1b   : > { %263 = vrot.lane.b32.xlu0 %v262_v10, %s865_s19  ;;  %215 = vrot.lane.b32.xlu1 %v214_v11, %s865_s19 }
  0x1c   : > { %408 = vrot.lane.b32.xlu2 %v262_v10, %s866_s20 }
  0x23   : > { %366 = vrot.lane.b32.xlu0 %v214_v11, %s866_s20 }
  0x24   : > { %344 = vrot.lane.b32.xlu2 %v189_v7, %s866_s20 }
  0x2c   : > { %525 = vrot.lane.b32.xlu2 %v914_v14, %s867_s21 }
  0x34   : > { %497 = vrot.lane.b32.xlu2 %v918_v16, %s868_s22 }
  0x6e   : > { %v388_v25 = vpop.permute.xlu2 %387 }
  0x6f   : > { %v393_v26 = vsel %vm349_vm1, %v388_v25, 0 }
  0x76   : > { %v409_v28 = vpop.permute.xlu2 %408 }
  0x77   : > { %v414_v30 = vsel %vm349_vm1, %v409_v28, 0 }
  0x7e   : > { %v345_v37 = vpop.permute.xlu2 %344 }
  0x7f   : > { %v351_v40 = vsel %vm349_vm1, %v345_v37, 0 }
  0x85   : > { %v240_v17 = vpop.permute.xlu0 %239  ;;  %v191_v18 = vpop.permute.xlu1 %190 }
  0x86   : > { %v197_v19 = vsel %vm192_vm0, %v191_v18, 0  ;;  %v245_v20 = vsel %vm192_vm0, %v240_v17, 0  ;;  %v526_v55 = vpop.permute.xlu2 %525 }
  0x87   : > { %206 = vmatpush.bf16.xpose.msra.mxu0 %v197_v19  ;;  %254 = vmatpush.bf16.xpose.msra.mxu2 %v245_v20  ;;  %v531_v59 = vsel %vm192_vm0, %v526_v55, 0 }
  0x8d   : > { %v264_v21 = vpop.permute.xlu0 %263  ;;  %v216_v22 = vpop.permute.xlu1 %215 }
  0x8e   : > { %780 = vmatmul.msk.bf16.vlgmr.msra.gmra.mxu0 %vm192_vm0, %v183_v1  ;;  %782 = vmatmul.msk.bf16.vlgmr.msra.gmra.mxu2 %vm192_vm0, %v185_v0  ;;  %v221_v23 = vsel %vm192_vm0, %v216_v22, 0  ;;  %v269_v24 = vsel %vm192_vm0, %v264_v21, 0  ;;  %v803_v1 = vld [vmem:[%s907_s18] sm:$0xff]  }
  0x8f   : > { %230 = vmatpush.bf16.xpose.msra.mxu1 %v221_v23  ;;  %278 = vmatpush.bf16.xpose.msra.mxu3 %v269_v24  ;;  %v804_v2 = vunpack.c.l.b16 %v803_v1 }
  0x90   : > { %402 = vmatpush.bf16.msrb.mxu2 %v393_v26  ;;  %360 = vmatpush.bf16.msrb.mxu0 %v351_v40 }
  0x91   : > { %v974_v3 = vpack.c.b16 %v804_v2, %v804_v2  ;;  %v801_v2 = vunpack.c.h.bf16 %v934_v27 }
  0x95   : > { %v367_v56 = vpop.permute.xlu0 %366 }
  0x96   : > { %781 = vmatmul.msk.bf16.vlgmr.msra.gmra.mxu1 %vm192_vm0, %v184_v5  ;;  %783 = vmatmul.msk.bf16.vlgmr.msra.gmra.mxu3 %vm192_vm0, %v186_v4  ;;  %v372_v60 = vsel %vm349_vm1, %v367_v56, 0  ;;  %v978_v4 = vpop.permute.xlu2 %497 }
  0x97   : > { %423 = vmatpush.bf16.msrb.mxu3 %v414_v30  ;;  %381 = vmatpush.bf16.msrb.mxu1 %v372_v60 }
  0x9b   : > { %540 = vmatpush.bf16.xpose.msra.mxu3 %v531_v59 }
 0x10b   : > { %v208_v31 = vpop.f32.mrf.mxu0 }
 0x10c   : > { %v284_v32 = vmul.f32 0.35355338, %v208_v31 }
 0x10e   : > { %v288_v34 = vadd.f32 %v800_v29, %v284_v32  ;;  %v805_v32 = vunpack.c.h.b16 %v803_v1 }
 0x110   : > { %v292_v35 = vadd.f32 %v288_v34, %v941_v33  ;;  %v988_v34 = vpack.c.b16 %v805_v32, %v805_v32 }
 0x111   : > { %v256_v36 = vpop.f32.mrf.mxu2 }
 0x112   : > { %v286_v38 = vmul.f32 0.35355338, %v256_v36  ;;  %v296_v39 = vsel %vm192_vm0, %v292_v35, -inf }
 0x113   : > { %297 = vmax.xlane.f32.xlu0 %v296_v39  ;;  %v232_v41 = vpop.f32.mrf.mxu1  ;;  %v210_v43 = vpop.f32.mrf.mxu0 }
 0x114   : > { %v290_v44 = vadd.f32 %v800_v29, %v286_v38  ;;  %v285_v45 = vmul.f32 0.35355338, %v232_v41 }
 0x116   : > { %v289_v47 = vadd.f32 %v800_v29, %v285_v45  ;;  %v294_v48 = vadd.f32 %v290_v44, %v949_v42 }
 0x118   : > { %v302_v49 = vsel %vm192_vm0, %v294_v48, -inf  ;;  %v293_v50 = vadd.f32 %v289_v47, %v954_v46 }
 0x119   : > { %v258_v51 = vpop.f32.mrf.mxu2  ;;  %v280_v52 = vpop.f32.mrf.mxu3  ;;  %303 = vmax.xlane.f32.xlu2 %v302_v49 }
 0x11a   : > { %v287_v53 = vmul.f32 0.35355338, %v280_v52  ;;  %v299_v54 = vsel %vm192_vm0, %v293_v50, -inf }
 0x11b   : > { %300 = vmax.xlane.f32.xlu1 %v299_v54  ;;  %v234_v57 = vpop.f32.mrf.mxu1 }
 0x11c   : > { %v291_v61 = vadd.f32 %v800_v29, %v287_v53 }
 0x11e   : > { %v295_v62 = vadd.f32 %v291_v61, %v963_v58 }
 0x120   : > { %v305_v63 = vsel %vm192_vm0, %v295_v62, -inf }
 0x121   : > { %306 = vmax.xlane.f32.xlu2 %v305_v63  ;;  %v282_v0 = vpop.f32.mrf.mxu3 }
 0x127   : > { %523 = vrot.lane.b32.xlu0 %v914_v14, %s868_s22 }
 0x134   : > { %499 = vrot.lane.b32.xlu1 %v918_v16, %s867_s21 }
 0x139   : > { %447 = vrot.lane.b32.xlu2 %v974_v3, %s867_s21 }
 0x186   : > { %v298_v5 = vpop.xlane.xlu0 %297 }
 0x187   : > { %v308_v6 = vsub.f32 %v292_v35, %v298_v5 }
 0x189   : > { %v312_v7 = vmul.f32 1.442695, %v308_v6 }
 0x18b   : > { %825 = vpow2.f32 %v312_v7 }
 0x18c   : > { %v304_v8 = vpop.xlane.xlu2 %303 }
 0x18d   : > { %v310_v9 = vsub.f32 %v294_v48, %v304_v8 }
 0x18e   : > { %v301_v10 = vpop.xlane.xlu1 %300 }
 0x18f   : > { %v316_v11 = vmul.f32 1.442695, %v310_v9  ;;  %v309_v12 = vsub.f32 %v293_v50, %v301_v10 }
 0x191   : > { %v826_v13 = vpop.eup %825  ;;  %827 = vpow2.f32 %v316_v11  ;;  %v314_v15 = vmul.f32 1.442695, %v309_v12 }
 0x192   : > { %v320_v17 = vsel %vm192_vm0, %v826_v13, 0.0 }
 0x193   : > { %829 = vpow2.f32 %v314_v15  ;;  %321 = vadd.xlane.f32.xlu0 %v320_v17 }
 0x194   : > { %v307_v18 = vpop.xlane.xlu2 %306 }
 0x195   : > { %v311_v19 = vsub.f32 %v295_v62, %v307_v18 }
 0x197   : > { %v828_v20 = vpop.eup %827  ;;  %v318_v21 = vmul.f32 1.442695, %v311_v19 }
 0x198   : > { %v326_v22 = vsel %vm192_vm0, %v828_v20, 0.0 }
 0x199   : > { %v830_v23 = vpop.eup %829  ;;  %831 = vpow2.f32 %v318_v21  ;;  %327 = vadd.xlane.f32.xlu2 %v326_v22  ;;  %v524_v35 = vpop.permute.xlu0 %523 }
 0x19a   : > { %v323_v24 = vsel %vm192_vm0, %v830_v23, 0.0 }
 0x19b   : > { %324 = vadd.xlane.f32.xlu1 %v323_v24 }
 0x19c   : > { %v448_v25 = vpop.permute.xlu2 %447 }
 0x19d   : > { %v453_v26 = vsel %vm192_vm0, %v448_v25, 0 }
 0x19e   : > { %462 = vmatpush.bf16.xpose.msra.mxu0 %v453_v26 }
 0x19f   : > { %v832_v28 = vpop.eup %831 }
 0x1a0   : > { %v329_v29 = vsel %vm192_vm0, %v832_v28, 0.0 }
 0x1a1   : > { %330 = vadd.xlane.f32.xlu2 %v329_v29 }
 0x1a6   : > { %v500_v30 = vpop.permute.xlu1 %499 }
 0x1a7   : > { %445 = vrot.lane.b32.xlu0 %v974_v3, %s868_s22  ;;  %v505_v31 = vsel %vm192_vm0, %v500_v30, 0 }
 0x1a8   : > { %514 = vmatpush.bf16.xpose.msra.mxu2 %v505_v31 }
 0x1b4   : > { %473 = vrot.lane.b32.xlu1 %v988_v34, %s867_s21 }
 0x1b9   : > { %471 = vrot.lane.b32.xlu2 %v988_v34, %s868_s22 }
 0x206   : > { %v322_v36 = vpop.xlane.xlu0 %321 }
 0x207   : > { %833 = vrcp.f32 %v322_v36 }
 0x20c   : > { %v328_v37 = vpop.xlane.xlu2 %327 }
 0x20d   : > { %v834_v38 = vpop.eup %833  ;;  %835 = vrcp.f32 %v328_v37 }
 0x20e   : > { %v336_v39 = vmul.f32 %v834_v38, %v826_v13  ;;  %v325_v40 = vpop.xlane.xlu1 %324 }
 0x20f   : > { %837 = vrcp.f32 %v325_v40 }
 0x210   : > { %v340_v41 = vpack.c.bf16 %v336_v39, %v336_v39 }
 0x212   : > { %784 = vmatmul.msk.bf16.vlgmr.msrb.gmra.mxu0 %vm192_vm0, %v340_v41 }
 0x213   : > { %v836_v43 = vpop.eup %835 }
 0x214   : > { %v338_v44 = vmul.f32 %v836_v43, %v828_v20  ;;  %v331_v45 = vpop.xlane.xlu2 %330 }
 0x215   : > { %v838_v47 = vpop.eup %837  ;;  %839 = vrcp.f32 %v331_v45 }
 0x216   : > { %v337_v48 = vmul.f32 %v838_v47, %v830_v23  ;;  %v342_v49 = vpack.c.bf16 %v338_v44, %v338_v44 }
 0x218   : > { %786 = vmatmul.msk.bf16.vlgmr.msrb.gmra.mxu2 %vm192_vm0, %v342_v49  ;;  %v341_v50 = vpack.c.bf16 %v337_v48, %v337_v48 }
 0x219   : > { %v446_v54 = vpop.permute.xlu0 %445 }
 0x21a   : > { %785 = vmatmul.msk.bf16.vlgmr.msrb.gmra.mxu1 %vm192_vm0, %v341_v50 }
 0x21b   : > { %v840_v51 = vpop.eup %839 }
 0x21c   : > { %v339_v52 = vmul.f32 %v840_v51, %v832_v28  ;;  %v472_v57 = vpop.permute.xlu2 %471 }
 0x21e   : > { %v343_v53 = vpack.c.bf16 %v339_v52, %v339_v52 }
 0x220   : > { %787 = vmatmul.msk.bf16.vlgmr.msrb.gmra.mxu3 %vm192_vm0, %v343_v53 }
 0x222   : > { %788 = vmatmul.msk.bf16.vlgmr.msra.gmra.mxu0 %vm192_vm0, %v446_v54 }
 0x226   : > { %v474_v55 = vpop.permute.xlu1 %473 }
 0x227   : > { %v479_v56 = vsel %vm192_vm0, %v474_v55, 0 }
 0x228   : > { %488 = vmatpush.bf16.xpose.msra.mxu1 %v479_v56  ;;  %790 = vmatmul.msk.bf16.vlgmr.msra.gmra.mxu2 %vm192_vm0, %v978_v4 }
 0x22f   : > { %789 = vmatmul.msk.bf16.vlgmr.msra.gmra.mxu1 %vm192_vm0, %v472_v57 }
 0x230   : > { %791 = vmatmul.msk.bf16.vlgmr.msra.gmra.mxu3 %vm192_vm0, %v524_v35 }
 0x28f   : > { %v362_v59 = vpop.f32.mrf.mxu0 }
 0x290   : > { %v429_v60 = vpack.c.bf16 %v362_v59, %v362_v59 }
 0x292   : > { %434 = vst.msk [vmem:[%s1009_s8] sm:$0xf] %vm433_vm2, %v429_v60 }
 0x297   : > { %v364_v61 = vpop.f32.mrf.mxu0  ;;  %v383_v62 = vpop.f32.mrf.mxu1 }
 0x298   : > { %v430_v63 = vpack.c.bf16 %v383_v62, %v383_v62 }
 0x29a   : > { %435 = vst.msk [vmem:[%s1009_s8 + $0x4] sm:$0xf] %vm433_vm2, %v430_v63 }
 0x29b   : > { %v404_v0 = vpop.f32.mrf.mxu2 }
 0x29c   : > { %v431_v1 = vpack.c.bf16 %v404_v0, %v404_v0 }
 0x29e   : > { %436 = vst.msk [vmem:[%s1009_s8 + $0x8] sm:$0xf] %vm433_vm2, %v431_v1 }
 0x29f   : > { %v385_v4 = vpop.f32.mrf.mxu1  ;;  %v464_v5 = vpop.f32.mrf.mxu0 }
 0x2a0   : > { %v546_v6 = vmul.f32 0.35355338, %v464_v5 }
 0x2a2   : > { %v550_v7 = vadd.f32 %v801_v2, %v546_v6 }
 0x2a3   : > { %v406_v8 = vpop.f32.mrf.mxu2  ;;  %v425_v9 = vpop.f32.mrf.mxu3 }
 0x2a4   : > { %v432_v10 = vpack.c.bf16 %v425_v9, %v425_v9  ;;  %v554_v11 = vadd.f32 %v550_v7, %v941_v33 }
 0x2a6   : > { %437 = vst.msk [vmem:[%s1009_s8 + $0xc] sm:$0xf] %vm433_vm2, %v432_v10  ;;  %v558_v12 = vsel %vm192_vm0, %v554_v11, -inf }
 0x2a7   : > { %559 = vmax.xlane.f32.xlu2 %v558_v12  ;;  %v466_v13 = vpop.f32.mrf.mxu0 }
 0x2ab   : > { %v427_v15 = vpop.f32.mrf.mxu3  ;;  %v516_v17 = vpop.f32.mrf.mxu2 }
 0x2ac   : > { %v548_v18 = vmul.f32 0.35355338, %v516_v17  ;;  %v490_v19 = vpop.f32.mrf.mxu1 }
 0x2ad   : > { %v547_v27 = vmul.f32 0.35355338, %v490_v19 }
 0x2ae   : > { %v552_v20 = vadd.f32 %v801_v2, %v548_v18 }
 0x2af   : > { %v551_v21 = vadd.f32 %v801_v2, %v547_v27 }
 0x2b0   : > { %v556_v22 = vadd.f32 %v552_v20, %v949_v42 }
 0x2b1   : > { %v555_v28 = vadd.f32 %v551_v21, %v954_v46 }
 0x2b2   : > { %v564_v23 = vsel %vm192_vm0, %v556_v22, -inf }
 0x2b3   : > { %v542_v24 = vpop.f32.mrf.mxu3  ;;  %565 = vmax.xlane.f32.xlu1 %v564_v23  ;;  %v518_v33 = vpop.f32.mrf.mxu2  ;;  %v561_v31 = vsel %vm192_vm0, %v555_v28, -inf }
 0x2b4   : > { %v549_v25 = vmul.f32 0.35355338, %v542_v24  ;;  %v492_v26 = vpop.f32.mrf.mxu1 }
 0x2b6   : > { %v553_v29 = vadd.f32 %v801_v2, %v549_v25 }
 0x2b8   : > { %v557_v30 = vadd.f32 %v553_v29, %v963_v58 }
 0x2ba   : > { %v567_v32 = vsel %vm192_vm0, %v557_v30, -inf }
 0x2bb   : > { %568 = vmax.xlane.f32.xlu0 %v567_v32  ;;  %v544_v35 = vpop.f32.mrf.mxu3  ;;  %562 = vmax.xlane.f32.xlu1 %v561_v31 }
 0x2bf   : > { %648 = vrot.lane.b32.xlu2 %v918_v16, %s869_s9 }
 0x31a   : > { %v560_v42 = vpop.xlane.xlu2 %559 }
 0x31b   : > { %v570_v36 = vsub.f32 %v554_v11, %v560_v42 }
 0x31d   : > { %v574_v37 = vmul.f32 1.442695, %v570_v36 }
 0x31f   : > { %841 = vpow2.f32 %v574_v37 }
 0x322   : > { %v649_v16 = vpop.permute.xlu2 %648 }
 0x323   : > { %v654_v50 = vsel %vm349_vm1, %v649_v16, 0 }
 0x324   : > { %663 = vmatpush.bf16.msrb.mxu2 %v654_v50 }
 0x325   : > { %v842_v38 = vpop.eup %841 }
 0x326   : > { %v566_v46 = vpop.xlane.xlu1 %565  ;;  %v582_v39 = vsel %vm192_vm0, %v842_v38, 0.0 }
 0x327   : > { %583 = vadd.xlane.f32.xlu1 %v582_v39  ;;  %v572_v47 = vsub.f32 %v556_v22, %v566_v46 }
 0x329   : > { %v578_v48 = vmul.f32 1.442695, %v572_v47 }
 0x32e   : > { %v569_v58 = vpop.xlane.xlu0 %568  ;;  %v563_v40 = vpop.xlane.xlu1 %562 }
 0x32f   : > { %v573_v41 = vsub.f32 %v557_v30, %v569_v58  ;;  %v571_v43 = vsub.f32 %v555_v28, %v563_v40 }
 0x331   : > { %v580_v44 = vmul.f32 1.442695, %v573_v41  ;;  %v576_v45 = vmul.f32 1.442695, %v571_v43 }
 0x333   : > { %843 = vpow2.f32 %v580_v44 }
 0x334   : > { %845 = vpow2.f32 %v576_v45 }
 0x335   : > { %847 = vpow2.f32 %v578_v48 }
 0x339   : > { %v844_v49 = vpop.eup %843 }
 0x33a   : > { %v846_v51 = vpop.eup %845  ;;  %v591_v52 = vsel %vm192_vm0, %v844_v49, 0.0 }
 0x33b   : > { %592 = vadd.xlane.f32.xlu2 %v591_v52  ;;  %v585_v53 = vsel %vm192_vm0, %v846_v51, 0.0  ;;  %v848_v54 = vpop.eup %847 }
 0x33c   : > { %586 = vadd.xlane.f32.xlu0 %v585_v53  ;;  %v588_v55 = vsel %vm192_vm0, %v848_v54, 0.0 }
 0x340   : > { %669 = vrot.lane.b32.xlu1 %v914_v14, %s869_s9 }
 0x344   : > { %589 = vadd.xlane.f32.xlu0 %v588_v55 }
 0x353   : > { %627 = vrot.lane.b32.xlu2 %v988_v34, %s869_s9 }
 0x358   : > { %606 = vrot.lane.b32.xlu0 %v974_v3, %s869_s9 }
 0x39a   : > { %v584_v56 = vpop.xlane.xlu1 %583 }
 0x3ae   : > { %v593_v57 = vpop.xlane.xlu2 %592 }
 0x3af   : > { %849 = vrcp.f32 %v593_v57  ;;  %v587_v59 = vpop.xlane.xlu0 %586 }
 0x3b0   : > { %851 = vrcp.f32 %v587_v59 }
 0x3b2   : > { %v670_v60 = vpop.permute.xlu1 %669 }
 0x3b3   : > { %v675_v61 = vsel %vm349_vm1, %v670_v60, 0 }
 0x3b4   : > { %684 = vmatpush.bf16.msrb.mxu3 %v675_v61 }
 0x3b5   : > { %v850_v62 = vpop.eup %849 }
 0x3b6   : > { %v852_v14 = vpop.eup %851  ;;  %v601_v63 = vmul.f32 %v850_v62, %v844_v49  ;;  %v628_v0 = vpop.permute.xlu2 %627 }
 0x3b7   : > { %v599_v1 = vmul.f32 %v852_v14, %v846_v51  ;;  %v633_v2 = vsel %vm349_vm1, %v628_v0, 0  ;;  %v590_v34 = vpop.xlane.xlu0 %589 }
 0x3b8   : > { %v605_v4 = vpack.c.bf16 %v601_v63, %v601_v63  ;;  %853 = vrcp.f32 %v590_v34  ;;  %642 = vmatpush.bf16.msrb.mxu1 %v633_v2 }
 0x3b9   : > { %v603_v3 = vpack.c.bf16 %v599_v1, %v599_v1  ;;  %855 = vrcp.f32 %v584_v56 }
 0x3ba   : > { %795 = vmatmul.msk.bf16.vlgmr.msrb.gmra.mxu3 %vm192_vm0, %v605_v4 }
 0x3bb   : > { %793 = vmatmul.msk.bf16.vlgmr.msrb.gmra.mxu1 %vm192_vm0, %v603_v3 }
 0x3be   : > { %v854_v5 = vpop.eup %853 }
 0x3bf   : > { %v600_v6 = vmul.f32 %v854_v5, %v848_v54  ;;  %v856_v8 = vpop.eup %855 }
 0x3c0   : > { %v598_v9 = vmul.f32 %v856_v8, %v842_v38 }
 0x3c1   : > { %v604_v7 = vpack.c.bf16 %v600_v6, %v600_v6 }
 0x3c2   : > { %v602_v12 = vpack.c.bf16 %v598_v9, %v598_v9 }
 0x3c3   : > { %794 = vmatmul.msk.bf16.vlgmr.msrb.gmra.mxu2 %vm192_vm0, %v604_v7 }
 0x3ca   : > { %v607_v10 = vpop.permute.xlu0 %606 }
 0x3cb   : > { %v612_v11 = vsel %vm349_vm1, %v607_v10, 0 }
 0x3cc   : > { %621 = vmatpush.bf16.msrb.mxu0 %v612_v11 }
 0x3cf   : > { %792 = vmatmul.msk.bf16.vlgmr.msrb.gmra.mxu0 %vm192_vm0, %v602_v12 }
 0x438   : > { %v644_v13 = vpop.f32.mrf.mxu1 }
 0x439   : > { %v691_v15 = vpack.c.bf16 %v644_v13, %v644_v13 }
 0x43b   : > { %700 = vrot.lane.b32.xlu1 %v691_v15, %s870_s10 }
 0x43d   : > { %v686_v17 = vpop.f32.mrf.mxu3 }
 0x43e   : > { %v693_v33 = vpack.c.bf16 %v686_v17, %v686_v17 }
 0x440   : > { %v646_v18 = vpop.f32.mrf.mxu1 }
 0x445   : > { %v688_v19 = vpop.f32.mrf.mxu3 }
 0x446   : > { %v665_v27 = vpop.f32.mrf.mxu2 }
 0x447   : > { %v692_v20 = vpack.c.bf16 %v665_v27, %v665_v27 }
 0x449   : > { %702 = vrot.lane.b32.xlu2 %v692_v20, %s870_s10 }
 0x44c   : > { %v623_v21 = vpop.f32.mrf.mxu0 }
 0x44d   : > { %v690_v22 = vpack.c.bf16 %v623_v21, %v623_v21 }
 0x44e   : > { %v667_v23 = vpop.f32.mrf.mxu2 }
 0x44f   : > { %698 = vrot.lane.b32.xlu0 %v690_v22, %s870_s10 }
 0x454   : > { %v625_v24 = vpop.f32.mrf.mxu0 }
 0x457   : > { %704 = vrot.lane.b32.xlu0 %v693_v33, %s870_s10 }
 0x4a3   : > { %v703_v28 = vpop.permute.xlu2 %702 }
 0x4a4   : > { %713 = vst.msk [vmem:[%s1009_s8 + $0x8] sm:$0xf] %vm710_vm3, %v703_v28 }
 0x4ad   : > { %v701_v26 = vpop.permute.xlu1 %700 }
 0x4ae   : > { %712 = vst.msk [vmem:[%s1009_s8 + $0x4] sm:$0xf] %vm710_vm3, %v701_v26 }
 0x4c1   : > { %v699_v25 = vpop.permute.xlu0 %698 }
 0x4c2   : > { %711 = vst.msk [vmem:[%s1009_s8] sm:$0xf] %vm710_vm3, %v699_v25 }
 0x4c9   : > { %v705_v29 = vpop.permute.xlu0 %704 }
 0x4ca   : > { %714 = vst.msk [vmem:[%s1009_s8 + $0xc] sm:$0xf] %vm710_vm3, %v705_v29 }
 0x4cb PF: > { %s13_s12 = sadd.s32 1, %s863_s12  }
 0x4cc   : > { %p10_p4 = scmp.ge.s32.totalorder %s13_s12, 4  }
 0x4ce   :  { %12 = sbr.rel (!%p10_p4) target bundleno = 1 (0x1), region = 62 }

// kernel: _lambda_.43
= control target key start
LH: loop header
LB: loop body
LE: loop exit
PB: predicated region body
PF: predicated region fallthrough
CT: control target
= control target key end

     0   :  { %vm19_vm0 = vcmask 261120   ;;  %v107_v1 = vmov 0.0   ;;  %vm82_vm1 = vcmask 257024   ;;  %s151_s1 = inlined_call_operand.vmem [shape: bf16[32,32], index: 1, kind: input, shape index: {}]   ;;  %s152_s2 = inlined_call_operand.vmem [shape: f32[1,32], index: 2, kind: input, shape index: {}]   ;;  %s153_s0 = inlined_call_operand.vmem [shape: bf16[16,32], index: 0, kind: input, shape index: {}]   ;;  %s154_s3 = inlined_call_operand.vmem [shape: bf16[16,32], index: 3, kind: output, shape index: {}]  }
   0x1   :  { %v104_v0 = vld [vmem:[%s151_s1 + $0x8] sm:$0xff]  ;;  %20 = vst.msk [vmem:[#allocation2] sm:$0xff] %vm19_vm0, %v107_v1  ;;  %v103_v2 = vld [vmem:[%s151_s1] sm:$0xff] }
   0x2   :  { %21 = vst.msk [vmem:[#allocation2 + $0x8] sm:$0xff] %vm19_vm0, %v107_v1  ;;  %57 = vmatpush.bf16.msra.mxu0 %v104_v0  ;;  %v102_v3 = vld [vmem:[%s153_s0] sm:$0xff] }
   0x3   :  { %v106_v8 = vld [vmem:[%s152_s2] ss:$0 sm:$0xff] }
   0x6   :  { %58 = vmatpush.bf16.msra.mxu0 %v103_v2 }
   0x8   :  { %v22_v4 = vld [vmem:[#allocation2] sm:$0xff] }
   0x9   :  { %101 = vmatmul.msk.bf16.vlgmr.msra.gmra.mxu0 %vm19_vm0, %v102_v3  ;;  %v23_v7 = vld [vmem:[#allocation2 + $0x8] sm:$0xff] }
  0x86   :  { %v60_v5 = vpop.f32.mrf.mxu0 }
  0x87   :  { %v65_v6 = vadd.f32 %v60_v5, %v22_v4 }
  0x89   :  { %67 = vst.msk [vmem:[#allocation2] sm:$0xff] %vm19_vm0, %v65_v6 }
  0x8e   :  { %v62_v9 = vpop.f32.mrf.mxu0 }
  0x8f   :  { %v66_v10 = vadd.f32 %v62_v9, %v23_v7 }
  0x90   :  { %v72_v11 = vld [vmem:[#allocation2] sm:$0xff] }
  0x91   :  { %v78_v12 = vadd.f32 %v106_v8, %v72_v11  ;;  %68 = vst.msk [vmem:[#allocation2 + $0x8] sm:$0xff] %vm19_vm0, %v66_v10 }
  0x93   :  { %v80_v13 = vpack.c.bf16 %v78_v12, %v78_v12 }
  0x95   :  { %83 = vst.msk [vmem:[%s154_s3] sm:$0xf] %vm82_vm1, %v80_v13 }
  0x98   :  { %v73_v14 = vld [vmem:[#allocation2 + $0x8] sm:$0xff] }
  0x99   :  { %v79_v15 = vadd.f32 %v106_v8, %v73_v14 }
  0x9b   :  { %v81_v16 = vpack.c.bf16 %v79_v15, %v79_v15 }
  0x9d   :  { %84 = vst.msk [vmem:[%s154_s3 + $0x4] sm:$0xf] %vm82_vm1, %v81_v16 }

// kernel: _lambda_.40
= control target key start
LH: loop header
LB: loop body
LE: loop exit
PB: predicated region body
PF: predicated region fallthrough
CT: control target
= control target key end

     0   :  { %vm25_vm0 = vcmask 523264   ;;  %v187_v5 = vmov 64.0   ;;  %vm145_vm8 = vcmask 257024   ;;  %s253_s0 = inlined_call_operand.vmem [shape: bf16[16,64], index: 0, kind: input, shape index: {}]   ;;  %s254_s1 = inlined_call_operand.vmem [shape: f32[1,64], index: 1, kind: input, shape index: {}]   ;;  %s255_s2 = inlined_call_operand.vmem [shape: f32[1,64], index: 2, kind: input, shape index: {}]   ;;  %s256_s4 = inlined_call_operand.vmem [shape: f32[1,32], index: 4, kind: input, shape index: {}]   ;;  %s257_s3 = inlined_call_operand.vmem [shape: bf16[64,32], index: 3, kind: input, shape index: {}]   ;;  %s258_s5 = inlined_call_operand.vmem [shape: bf16[16,32], index: 5, kind: output, shape index: {}]  }
   0x1   :  { %v174_v0 = vld [vmem:[%s253_s0] sm:$0xff]   ;;  %181 = vrcp.f32 %v187_v5  ;;  %v172_v22 = vld [vmem:[%s257_s3 + $0x18] sm:$0xff]  ;;  %v171_v23 = vld [vmem:[%s257_s3 + $0x10] sm:$0xff] }
   0x2   :  { %v175_v1 = vunpack.c.l.bf16 %v174_v0  ;;  %v176_v3 = vunpack.c.h.bf16 %v174_v0  ;;  %133 = vmatpush.bf16.msra.mxu0 %v172_v22  ;;  %v170_v24 = vld [vmem:[%s257_s3 + $0x8] sm:$0xff]  ;;  %v169_v26 = vld [vmem:[%s257_s3] sm:$0xff] }
   0x3   :  { %v178_v45 = vld [vmem:[%s254_s1] ss:$0 sm:$0xff] }
   0x4   :  { %v26_v2 = vsel %vm25_vm0, %v175_v1, 0.0  ;;  %v29_v4 = vsel %vm25_vm0, %v176_v3, 0.0  ;;  %v179_v50 = vld [vmem:[%s255_s2] ss:$0 sm:$0xff] }
   0x5   :  { %27 = vadd.xlane.f32.xlu0 %v26_v2  ;;  %v180_v55 = vld [vmem:[%s256_s4] ss:$0 sm:$0xff] }
   0x6   :  { %134 = vmatpush.bf16.msra.mxu0 %v171_v23 }
   0x7   :  { %v182_v6 = vpop.eup %181 }
   0x8   :  { %v33_v7 = vmul.f32 64.0, %v182_v6  ;;  %vm37_vm1 = vweird.f32 %v182_v6 }
   0xa   :  { %v34_v8 = vsub.f32 1.0, %v33_v7  ;;  %135 = vmatpush.bf16.msra.mxu0 %v170_v24 }
   0xc   :  { %v35_v9 = vmul.f32 %v182_v6, %v34_v8 }
   0xd   :  { %30 = vadd.xlane.f32.xlu0 %v29_v4 }
   0xe   :  { %v36_v10 = vadd.f32 %v182_v6, %v35_v9  ;;  %136 = vmatpush.bf16.msra.mxu0 %v169_v26 }
  0x10   :  { %v38_v11 = vsel %vm37_vm1, %v182_v6, %v36_v10 }
  0x78   :  { %v28_v12 = vpop.xlane.xlu0 %27 }
  0x79   :  { %v39_v13 = vmul.f32 %v38_v11, %v28_v12 }
  0x7b   :  { %v41_v14 = vsub.f32 %v175_v1, %v39_v13 }
  0x7d   :  { %v43_v15 = vmul.f32 %v41_v14, %v41_v14 }
  0x7f   :  { %v45_v16 = vsel %vm25_vm0, %v43_v15, 0.0 }
  0x80   :  { %46 = vadd.xlane.f32.xlu1 %v45_v16  ;;  %v31_v17 = vpop.xlane.xlu0 %30 }
  0x81   :  { %v40_v18 = vmul.f32 %v38_v11, %v31_v17 }
  0x83   :  { %v42_v19 = vsub.f32 %v176_v3, %v40_v18 }
  0x85   :  { %v44_v20 = vmul.f32 %v42_v19, %v42_v19 }
  0x87   :  { %v48_v21 = vsel %vm25_vm0, %v44_v20, 0.0 }
  0x88   :  { %49 = vadd.xlane.f32.xlu1 %v48_v21 }
  0xf3   :  { %v47_v25 = vpop.xlane.xlu1 %46 }
  0xf4   :  { %v51_v27 = vmul.f32 %v47_v25, %v38_v11 }
  0xf6   :  { %v53_v28 = vadd.f32 1e-05, %v51_v27 }
  0xf8   :  { %183 = vrsqrt.f32 %v53_v28  ;;  %vm61_vm3 = vweird.f32 %v53_v28 }
  0xfb   :  { %v50_v29 = vpop.xlane.xlu1 %49 }
  0xfc   :  { %v52_v30 = vmul.f32 %v50_v29, %v38_v11 }
  0xfe   :  { %v184_v31 = vpop.eup %183  ;;  %v54_v32 = vadd.f32 1e-05, %v52_v30 }
  0xff   :  { %v56_v33 = vmul.f32 %v184_v31, %v53_v28  ;;  %vm62_vm2 = vweird.f32 %v184_v31 }
 0x100   :  { %185 = vrsqrt.f32 %v54_v32  ;;  %vm63_vm4 = vmor %vm61_vm3, %vm62_vm2  ;;  %vm71_vm6 = vweird.f32 %v54_v32 }
 0x101   :  { %v57_v34 = vmul.f32 %v184_v31, %v56_v33 }
 0x103   :  { %v58_v35 = vmul.f32 0.5, %v57_v34 }
 0x105   :  { %v59_v36 = vsub.f32 1.5, %v58_v35 }
 0x106   :  { %v186_v37 = vpop.eup %185 }
 0x107   :  { %v60_v38 = vmul.f32 %v184_v31, %v59_v36  ;;  %v66_v39 = vmul.f32 %v186_v37, %v54_v32  ;;  %vm72_vm5 = vweird.f32 %v186_v37 }
 0x108   :  { %vm73_vm7 = vmor %vm71_vm6, %vm72_vm5 }
 0x109   :  { %v67_v40 = vmul.f32 %v186_v37, %v66_v39  ;;  %v64_v41 = vsel %vm63_vm4, %v184_v31, %v60_v38 }
 0x10a   :  { %v75_v44 = vmul.f32 %v64_v41, %v41_v14 }
 0x10b   :  { %v68_v42 = vmul.f32 0.5, %v67_v40 }
 0x10c   :  { %v81_v49 = vmul.f32 %v178_v45, %v75_v44 }
 0x10d   :  { %v69_v43 = vsub.f32 1.5, %v68_v42 }
 0x10e   :  { %v87_v52 = vadd.f32 %v179_v50, %v81_v49 }
 0x10f   :  { %v70_v46 = vmul.f32 %v186_v37, %v69_v43 }
 0x111   :  { %v74_v47 = vsel %vm73_vm7, %v186_v37, %v70_v46 }
 0x112   :  { %v76_v48 = vmul.f32 %v74_v47, %v42_v19 }
 0x114   :  { %v82_v51 = vmul.f32 %v178_v45, %v76_v48 }
 0x116   :  { %v88_v53 = vadd.f32 %v179_v50, %v82_v51 }
 0x118   :  { %v89_v54 = vpack.c.bf16 %v88_v53, %v87_v52 }
 0x11a   :  { %168 = vmatmul.msk.bf16.vlgmr.msra.gmra.mxu0 %vm25_vm0, %v89_v54 }
 0x197   :  { %v138_v56 = vpop.f32.mrf.mxu0 }
 0x198   :  { %v139_v57 = vadd.f32 %v180_v55, %v138_v56 }
 0x19a   :  { %v143_v58 = vpack.c.bf16 %v139_v57, %v139_v57 }
 0x19c   :  { %146 = vst.msk [vmem:[%s258_s5] sm:$0xf] %vm145_vm8, %v143_v58 }
 0x19f   :  { %v140_v59 = vpop.f32.mrf.mxu0 }
 0x1a0   :  { %v141_v60 = vadd.f32 %v180_v55, %v140_v59 }
 0x1a2   :  { %v144_v61 = vpack.c.bf16 %v141_v60, %v141_v60 }
 0x1a4   :  { %147 = vst.msk [vmem:[%s258_s5 + $0x4] sm:$0xf] %vm145_vm8, %v144_v61 }

// kernel: _lambda_.42
= control target key start
LH: loop header
LB: loop body
LE: loop exit
PB: predicated region body
PF: predicated region fallthrough
CT: control target
= control target key end

     0   :  { %s400_s9 = smov 0   ;;  %s433_s0 = inlined_call_operand.vmem [shape: bf16[2,8,96], index: 0, kind: input, shape index: {}]   ;;  %s434_s1 = inlined_call_operand.vmem [shape: bf16[2,8,8], index: 1, kind: input, shape index: {}]   ;;  %s435_s2 = inlined_call_operand.vmem [shape: bf16[2,8,32], index: 2, kind: output, shape index: {}]  }
   0x1 LB: > { %s332_s10 = sadd.s32 4294967295, %s377_s9   ;;  %p336_p0 = scmp.ge.s32.totalorder %s377_s9, 1  ;;  %s377_s9 = sphi %s400_s9, %s12_s9  }
   0x2   : > { %p111_p1 = scmp.lt.s32.totalorder %s377_s9, 3 }
   0x4   : > { %p112_p2 = pnand %p336_p0, %p111_p1 }
   0x5   : > { %p131_p3 = scmp.lt.s32.totalorder (!%p112_p2), %s332_s10, 1  ;;  %s379_s15 = smov (!%p112_p2), 80  }
   0x6   : > { %115 = sbr.rel (%p112_p2) target bundleno = 760 (0x2f8), region = 28  ;;  %s380_s16 = smov (!%p112_p2), 96  }
   0x7   : > { %s381_s17 = smov (!%p112_p2), 112   ;;  %s382_s20 = smov (!%p112_p2), 48  }
   0x8   : > { %s383_s21 = smov (!%p112_p2), 64   ;;  %s384_s25 = smov (!%p112_p2), 16  }
   0xb   : > { %s437_s10 = smov (!%p131_p3, %s332_s10), 1  ;;  %vm150_vm0 = vcmask 130048   ;;  %v346_v11 = vld [vmem:[%s434_s1] sm:$0xff]   ;;  %vm172_vm1 = vcmask 64512   ;;  %vm190_vm2 = vcmask 1043456   ;;  %vm208_vm3 = vcmask 125952  }
   0xc   : > { %s337_s11 = sshll.u32 %s437_s10, 2  ;;  %v347_v12 = vunpack.c.l.bf16 %v346_v11  ;;  %v348_v17 = vunpack.c.h.bf16 %v346_v11  ;;  %vm277_vm4 = vcmask 257152  }
   0xd   : > { %s134_s14 = scalar_lea.vmem %s433_s0, %s337_s11  ;;  %s138_s24 = scalar_lea.vmem %s435_s2, %s337_s11 }
   0xe   : > { %v210_v0 = vld [vmem:[%s134_s14] sm:$0xf] }
   0xf   : > { %v144_v1 = vld [vmem:[%s134_s14] sm:$0xf]  ;;  %v212_v2 = vunpack.c.l.b16 %v210_v0 }
  0x10   : > { %v146_v3 = vunpack.c.l.b16 %v144_v1 }
  0x11   : > { %v213_v4 = vpack.c.b16 %v212_v2, %v212_v2 }
  0x12   : > { %v147_v5 = vpack.c.b16 %v146_v3, %v146_v3 }
  0x13   : > { %216 = vrot.lane.b32.xlu0 %v213_v4, %s379_s15 }
  0x14   : > { %148 = vrot.lane.b32.xlu1 %v147_v5, %s380_s16 }
  0x1b   : > { %214 = vrot.lane.b32.xlu0 %v213_v4, %s381_s17 }
  0x23   : > { %251 = vrot.lane.b32.xlu0 %v213_v4, %s382_s20 }
  0x2b   : > { %185 = vrot.lane.b32.xlu0 %v147_v5, %s383_s21 }
  0x85   : > { %v217_v6 = vpop.permute.xlu0 %216 }
  0x86   : > { %v149_v7 = vpop.permute.xlu1 %148  ;;  %v222_v9 = vsel %vm150_vm0, %v217_v6, 0 }
  0x87   : > { %v155_v8 = vsel %vm150_vm0, %v149_v7, 0  ;;  %231 = vmatpush.bf16.xpose.msra.mxu2 %v222_v9 }
  0x88   : > { %164 = vmatpush.bf16.xpose.msra.mxu0 %v155_v8 }
  0x8d   : > { %v215_v10 = vpop.permute.xlu0 %214 }
  0x8e   : > { %341 = vmatmul.msk.bf16.vlgmr.msra.gmra.mxu2 %vm150_vm0, %v215_v10 }
  0x8f   : > { %339 = vmatmul.msk.bf16.vlgmr.msra.gmra.mxu0 %vm150_vm0, %v144_v1 }
  0x95   : > { %v252_v34 = vpop.permute.xlu0 %251 }
  0x96   : > { %v257_v35 = vsel %vm190_vm2, %v252_v34, 0 }
  0x97   : > { %266 = vmatpush.bf16.msra.mxu3 %v257_v35 }
  0x9d   : > { %v186_v36 = vpop.permute.xlu0 %185 }
  0x9e   : > { %v192_v37 = vsel %vm190_vm2, %v186_v36, 0 }
  0x9f   : > { %201 = vmatpush.bf16.msra.mxu1 %v192_v37 }
 0x10c   : > { %v166_v13 = vpop.f32.mrf.mxu0 }
 0x10d   : > { %v170_v14 = vmul.f32 0.25, %v166_v13 }
 0x10f   : > { %v171_v15 = vadd.f32 %v347_v12, %v170_v14 }
 0x111   : > { %v173_v16 = vsel %vm172_vm1, %v171_v15, -inf  ;;  %v233_v18 = vpop.f32.mrf.mxu2 }
 0x112   : > { %174 = vmax.xlane.f32.xlu2 %v173_v16  ;;  %v237_v19 = vmul.f32 0.25, %v233_v18 }
 0x114   : > { %v168_v20 = vpop.f32.mrf.mxu0  ;;  %v238_v21 = vadd.f32 %v348_v17, %v237_v19 }
 0x116   : > { %v239_v22 = vsel %vm172_vm1, %v238_v21, -inf }
 0x117   : > { %240 = vmax.xlane.f32.xlu1 %v239_v22 }
 0x119   : > { %v235_v23 = vpop.f32.mrf.mxu2 }
 0x185   : > { %v175_v24 = vpop.xlane.xlu2 %174 }
 0x186   : > { %v176_v27 = vsub.f32 %v171_v15, %v175_v24 }
 0x188   : > { %v177_v29 = vmul.f32 1.442695, %v176_v27 }
 0x18a   : > { %v241_v25 = vpop.xlane.xlu1 %240 }
 0x18b   : > { %v242_v26 = vsub.f32 %v238_v21, %v241_v25 }
 0x18d   : > { %v243_v28 = vmul.f32 1.442695, %v242_v26 }
 0x18f   : > { %363 = vpow2.f32 %v243_v28 }
 0x190   : > { %365 = vpow2.f32 %v177_v29 }
 0x195   : > { %v364_v30 = vpop.eup %363 }
 0x196   : > { %v245_v31 = vsel %vm172_vm1, %v364_v30, 0.0  ;;  %v366_v32 = vpop.eup %365 }
 0x197   : > { %246 = vadd.xlane.f32.xlu2 %v245_v31  ;;  %v179_v33 = vsel %vm172_vm1, %v366_v32, 0.0 }
 0x19f   : > { %180 = vadd.xlane.f32.xlu2 %v179_v33 }
 0x20a   : > { %v247_v38 = vpop.xlane.xlu2 %246 }
 0x20b   : > { %367 = vrcp.f32 %v247_v38 }
 0x211   : > { %v368_v39 = vpop.eup %367 }
 0x212   : > { %v181_v40 = vpop.xlane.xlu2 %180  ;;  %v249_v41 = vmul.f32 %v368_v39, %v364_v30 }
 0x213   : > { %369 = vrcp.f32 %v181_v40 }
 0x214   : > { %v250_v42 = vpack.c.bf16 %v249_v41, %v249_v41 }
 0x216   : > { %342 = vmatmul.msk.bf16.vlgmr.msra.gmra.mxu3 %vm172_vm1, %v250_v42 }
 0x219   : > { %v370_v43 = vpop.eup %369 }
 0x21a   : > { %v183_v44 = vmul.f32 %v370_v43, %v366_v32 }
 0x21c   : > { %v184_v45 = vpack.c.bf16 %v183_v44, %v183_v44 }
 0x21e   : > { %340 = vmatmul.msk.bf16.vlgmr.msra.gmra.mxu1 %vm172_vm1, %v184_v45 }
 0x299   : > { %v268_v46 = vpop.f32.mrf.mxu3 }
 0x29a   : > { %v272_v47 = vpack.c.bf16 %v268_v46, %v268_v46 }
 0x29b   : > { %v203_v48 = vpop.f32.mrf.mxu1 }
 0x29c   : > { %v207_v49 = vpack.c.bf16 %v203_v48, %v203_v48  ;;  %274 = vrot.lane.b32.xlu2 %v272_v47, %s384_s25 }
 0x29e   : > { %209 = vst.msk [vmem:[%s138_s24] sm:$0xf] %vm208_vm3, %v207_v49 }
 0x2a1   : > { %v270_v50 = vpop.f32.mrf.mxu3 }
 0x2a3   : > { %v205_v51 = vpop.f32.mrf.mxu1 }
 0x2f6   : > { %v275_v52 = vpop.permute.xlu2 %274 }
 0x2f7   : > { %278 = vst.msk [vmem:[%s138_s24] sm:$0xf] %vm277_vm4, %v275_v52 }
 0x2f8 PF: > { %s12_s9 = sadd.s32 1, %s377_s9  }
 0x2f9   : > { %p9_p4 = scmp.ge.s32.totalorder %s12_s9, 4  }
 0x2fb   :  { %11 = sbr.rel (!%p9_p4) target bundleno = 1 (0x1), region = 58 }

// kernel: _lambda_.41
= control target key start
LH: loop header
LB: loop body
LE: loop exit
PB: predicated region body
PF: predicated region fallthrough
CT: control target
= control target key end

     0   :  { %vm25_vm0 = vcmask 261120   ;;  %v161_v5 = vmov 32.0   ;;  %vm129_vm8 = vcmask 781312   ;;  %s221_s0 = inlined_call_operand.vmem [shape: bf16[16,32], index: 0, kind: input, shape index: {}]   ;;  %s222_s1 = inlined_call_operand.vmem [shape: f32[1,32], index: 1, kind: input, shape index: {}]   ;;  %s223_s2 = inlined_call_operand.vmem [shape: f32[1,32], index: 2, kind: input, shape index: {}]   ;;  %s224_s4 = inlined_call_operand.vmem [shape: f32[1,96], index: 4, kind: input, shape index: {}]   ;;  %s225_s3 = inlined_call_operand.vmem [shape: bf16[32,96], index: 3, kind: input, shape index: {}]   ;;  %s226_s5 = inlined_call_operand.vmem [shape: bf16[16,96], index: 5, kind: output, shape index: {}]  }
   0x1   :  { %v148_v0 = vld [vmem:[%s221_s0] sm:$0xff]   ;;  %155 = vrcp.f32 %v161_v5  ;;  %v146_v22 = vld [vmem:[%s225_s3 + $0x8] sm:$0xff] }
   0x2   :  { %v149_v1 = vunpack.c.l.bf16 %v148_v0  ;;  %v150_v3 = vunpack.c.h.bf16 %v148_v0  ;;  %119 = vmatpush.bf16.msra.mxu0 %v146_v22  ;;  %v145_v24 = vld [vmem:[%s225_s3] sm:$0xff] }
   0x3   :  { %v152_v43 = vld [vmem:[%s222_s1] ss:$0 sm:$0xff] }
   0x4   :  { %v26_v2 = vsel %vm25_vm0, %v149_v1, 0.0  ;;  %v29_v4 = vsel %vm25_vm0, %v150_v3, 0.0  ;;  %v153_v48 = vld [vmem:[%s223_s2] ss:$0 sm:$0xff] }
   0x5   :  { %27 = vadd.xlane.f32.xlu0 %v26_v2  ;;  %v154_v53 = vld [vmem:[%s224_s4] ss:$0 sm:$0xff] }
   0x6   :  { %120 = vmatpush.bf16.msra.mxu0 %v145_v24 }
   0x7   :  { %v156_v6 = vpop.eup %155 }
   0x8   :  { %v33_v7 = vmul.f32 32.0, %v156_v6  ;;  %vm37_vm1 = vweird.f32 %v156_v6 }
   0xa   :  { %v34_v8 = vsub.f32 1.0, %v33_v7 }
   0xc   :  { %v35_v9 = vmul.f32 %v156_v6, %v34_v8 }
   0xd   :  { %30 = vadd.xlane.f32.xlu0 %v29_v4 }
   0xe   :  { %v36_v10 = vadd.f32 %v156_v6, %v35_v9 }
  0x10   :  { %v38_v11 = vsel %vm37_vm1, %v156_v6, %v36_v10 }
  0x78   :  { %v28_v12 = vpop.xlane.xlu0 %27 }
  0x79   :  { %v39_v13 = vmul.f32 %v38_v11, %v28_v12 }
  0x7b   :  { %v41_v14 = vsub.f32 %v149_v1, %v39_v13 }
  0x7d   :  { %v43_v15 = vmul.f32 %v41_v14, %v41_v14 }
  0x7f   :  { %v45_v16 = vsel %vm25_vm0, %v43_v15, 0.0 }
  0x80   :  { %46 = vadd.xlane.f32.xlu1 %v45_v16  ;;  %v31_v17 = vpop.xlane.xlu0 %30 }
  0x81   :  { %v40_v18 = vmul.f32 %v38_v11, %v31_v17 }
  0x83   :  { %v42_v19 = vsub.f32 %v150_v3, %v40_v18 }
  0x85   :  { %v44_v20 = vmul.f32 %v42_v19, %v42_v19 }
  0x87   :  { %v48_v21 = vsel %vm25_vm0, %v44_v20, 0.0 }
  0x88   :  { %49 = vadd.xlane.f32.xlu1 %v48_v21 }
  0xf3   :  { %v47_v23 = vpop.xlane.xlu1 %46 }
  0xf4   :  { %v51_v25 = vmul.f32 %v47_v23, %v38_v11 }
  0xf6   :  { %v53_v26 = vadd.f32 1e-05, %v51_v25 }
  0xf8   :  { %157 = vrsqrt.f32 %v53_v26  ;;  %vm61_vm3 = vweird.f32 %v53_v26 }
  0xfb   :  { %v50_v27 = vpop.xlane.xlu1 %49 }
  0xfc   :  { %v52_v28 = vmul.f32 %v50_v27, %v38_v11 }
  0xfe   :  { %v158_v29 = vpop.eup %157  ;;  %v54_v30 = vadd.f32 1e-05, %v52_v28 }
  0xff   :  { %v56_v31 = vmul.f32 %v158_v29, %v53_v26  ;;  %vm62_vm2 = vweird.f32 %v158_v29 }
 0x100   :  { %159 = vrsqrt.f32 %v54_v30  ;;  %vm63_vm4 = vmor %vm61_vm3, %vm62_vm2  ;;  %vm71_vm6 = vweird.f32 %v54_v30 }
 0x101   :  { %v57_v32 = vmul.f32 %v158_v29, %v56_v31 }
 0x103   :  { %v58_v33 = vmul.f32 0.5, %v57_v32 }
 0x105   :  { %v59_v34 = vsub.f32 1.5, %v58_v33 }
 0x106   :  { %v160_v35 = vpop.eup %159 }
 0x107   :  { %v60_v36 = vmul.f32 %v158_v29, %v59_v34  ;;  %v66_v37 = vmul.f32 %v160_v35, %v54_v30  ;;  %vm72_vm5 = vweird.f32 %v160_v35 }
 0x108   :  { %vm73_vm7 = vmor %vm71_vm6, %vm72_vm5 }
 0x109   :  { %v67_v38 = vmul.f32 %v160_v35, %v66_v37  ;;  %v64_v39 = vsel %vm63_vm4, %v158_v29, %v60_v36 }
 0x10a   :  { %v75_v42 = vmul.f32 %v64_v39, %v41_v14 }
 0x10b   :  { %v68_v40 = vmul.f32 0.5, %v67_v38 }
 0x10c   :  { %v81_v47 = vmul.f32 %v152_v43, %v75_v42 }
 0x10d   :  { %v69_v41 = vsub.f32 1.5, %v68_v40 }
 0x10e   :  { %v87_v50 = vadd.f32 %v153_v48, %v81_v47 }
 0x10f   :  { %v70_v44 = vmul.f32 %v160_v35, %v69_v41 }
 0x111   :  { %v74_v45 = vsel %vm73_vm7, %v160_v35, %v70_v44 }
 0x112   :  { %v76_v46 = vmul.f32 %v74_v45, %v42_v19 }
 0x114   :  { %v82_v49 = vmul.f32 %v152_v43, %v76_v46 }
 0x116   :  { %v88_v51 = vadd.f32 %v153_v48, %v82_v49 }
 0x118   :  { %v89_v52 = vpack.c.bf16 %v88_v51, %v87_v50 }
 0x11a   :  { %144 = vmatmul.msk.bf16.vlgmr.msra.gmra.mxu0 %vm25_vm0, %v89_v52 }
 0x197   :  { %v122_v54 = vpop.f32.mrf.mxu0 }
 0x198   :  { %v123_v55 = vadd.f32 %v154_v53, %v122_v54 }
 0x19a   :  { %v127_v56 = vpack.c.bf16 %v123_v55, %v123_v55 }
 0x19c   :  { %130 = vst.msk [vmem:[%s226_s5] sm:$0xf] %vm129_vm8, %v127_v56 }
 0x19f   :  { %v124_v57 = vpop.f32.mrf.mxu0 }
 0x1a0   :  { %v125_v58 = vadd.f32 %v154_v53, %v124_v57 }
 0x1a2   :  { %v128_v59 = vpack.c.bf16 %v125_v58, %v125_v58 }
 0x1a4   :  { %131 = vst.msk [vmem:[%s226_s5 + $0x4] sm:$0xf] %vm129_vm8, %v128_v59 }

// kernel: _lambda_.44
= control target key start
LH: loop header
LB: loop body
LE: loop exit
PB: predicated region body
PF: predicated region fallthrough
CT: control target
= control target key end

     0   :  { %vm31_vm0 = vcmask 261120   ;;  %v360_v5 = vmov 32.0   ;;  %vm103_vm6 = vcmask 257024   ;;  %s476_s0 = inlined_call_operand.vmem [shape: bf16[16,32], index: 0, kind: input, shape index: {}]   ;;  %s477_s1 = inlined_call_operand.vmem [shape: f32[1,32], index: 1, kind: input, shape index: {}]   ;;  %s478_s2 = inlined_call_operand.vmem [shape: f32[1,32], index: 2, kind: input, shape index: {}]   ;;  %s479_s4 = inlined_call_operand.vmem [shape: f32[1,128], index: 4, kind: input, shape index: {}]   ;;  %s480_s3 = inlined_call_operand.vmem [shape: bf16[32,128], index: 3, kind: input, shape index: {}]   ;;  %s481_s6 = inlined_call_operand.vmem [shape: f32[1,32], index: 6, kind: input, shape index: {}]   ;;  %s482_s5 = inlined_call_operand.vmem [shape: bf16[128,32], index: 5, kind: input, shape index: {}]   ;;  %s483_s7 = inlined_call_operand.vmem [shape: bf16[16,32], index: 7, kind: output, shape index: {}]  }
   0x1   :  { %v337_v0 = vld [vmem:[%s476_s0] sm:$0xff]   ;;  %350 = vrcp.f32 %v360_v5  ;;  %v327_v25 = vld [vmem:[%s480_s3 + $0x8] sm:$0xff]  ;;  %v335_v55 = vld [vmem:[%s482_s5 + $0x38] sm:$0xff]  ;;  %v361_v5 = vmov 0.0  }
   0x2   :  { %v405_v1 = vunpack.c.l.bf16 %v337_v0  ;;  %v409_v3 = vunpack.c.h.bf16 %v337_v0  ;;  %143 = vmatpush.bf16.msra.mxu0 %v327_v25  ;;  %v326_v28 = vld [vmem:[%s480_s3] sm:$0xff]  ;;  %236 = vmatpush.bf16.msra.mxu1 %v335_v55  ;;  %v334_v56 = vld [vmem:[%s482_s5 + $0x30] sm:$0xff]  ;;  %v333_v57 = vld [vmem:[%s482_s5 + $0x28] sm:$0xff]  ;;  %32 = vst.msk [vmem:[#allocation2] sm:$0xff] %vm31_vm0, %v361_v5 }
   0x3   :  { %v346_v38 = vld [vmem:[%s477_s1] ss:$0 sm:$0xff]  ;;  %v331_v59 = vld [vmem:[%s482_s5 + $0x18] sm:$0xff]  ;;  %v330_v60 = vld [vmem:[%s482_s5 + $0x10] sm:$0xff]  ;;  %33 = vst.msk [vmem:[#allocation2 + $0x8] sm:$0xff] %vm31_vm0, %v361_v5 }
   0x4   :  { %v38_v2 = vsel %vm31_vm0, %v405_v1, 0.0  ;;  %v41_v4 = vsel %vm31_vm0, %v409_v3, 0.0  ;;  %v347_v41 = vld [vmem:[%s478_s2] ss:$0 sm:$0xff]  ;;  %v329_v61 = vld [vmem:[%s482_s5 + $0x8] sm:$0xff] }
   0x5   :  { %39 = vadd.xlane.f32.xlu0 %v38_v2  ;;  %v332_v58 = vld [vmem:[%s482_s5 + $0x20] sm:$0xff] }
   0x6   :  { %144 = vmatpush.bf16.msra.mxu0 %v326_v28  ;;  %237 = vmatpush.bf16.msra.mxu1 %v334_v56  ;;  %v328_v62 = vld [vmem:[%s482_s5] sm:$0xff] }
   0x7   :  { %v351_v6 = vpop.eup %350  ;;  %v348_v63 = vld [vmem:[%s479_s4] ss:$0 sm:$0xff] }
   0x8   :  { %v45_v7 = vmul.f32 32.0, %v351_v6  ;;  %vm49_vm1 = vweird.f32 %v351_v6 }
   0xa   :  { %v46_v8 = vsub.f32 1.0, %v45_v7  ;;  %238 = vmatpush.bf16.msra.mxu1 %v333_v57 }
   0xc   :  { %v47_v9 = vmul.f32 %v351_v6, %v46_v8 }
   0xd   :  { %42 = vadd.xlane.f32.xlu0 %v41_v4 }
   0xe   :  { %v48_v10 = vadd.f32 %v351_v6, %v47_v9  ;;  %239 = vmatpush.bf16.msra.mxu1 %v332_v58 }
  0x10   :  { %v50_v11 = vsel %vm49_vm1, %v351_v6, %v48_v10 }
  0x12   :  { %240 = vmatpush.bf16.msra.mxu1 %v331_v59 }
  0x16   :  { %241 = vmatpush.bf16.msra.mxu1 %v330_v60 }
  0x1a   :  { %242 = vmatpush.bf16.msra.mxu1 %v329_v61 }
  0x1e   :  { %243 = vmatpush.bf16.msra.mxu1 %v328_v62 }
  0x78   :  { %v40_v12 = vpop.xlane.xlu0 %39 }
  0x79   :  { %v51_v13 = vmul.f32 %v50_v11, %v40_v12 }
  0x7b   :  { %v53_v14 = vsub.f32 %v405_v1, %v51_v13 }
  0x7d   :  { %v55_v15 = vmul.f32 %v53_v14, %v53_v14 }
  0x7f   :  { %v57_v16 = vsel %vm31_vm0, %v55_v15, 0.0 }
  0x80   :  { %58 = vadd.xlane.f32.xlu1 %v57_v16  ;;  %v43_v17 = vpop.xlane.xlu0 %42 }
  0x81   :  { %v52_v18 = vmul.f32 %v50_v11, %v43_v17 }
  0x83   :  { %v54_v19 = vsub.f32 %v409_v3, %v52_v18 }
  0x85   :  { %v56_v20 = vmul.f32 %v54_v19, %v54_v19 }
  0x87   :  { %v60_v21 = vsel %vm31_vm0, %v56_v20, 0.0 }
  0x88   :  { %61 = vadd.xlane.f32.xlu1 %v60_v21 }
  0xf3   :  { %v59_v22 = vpop.xlane.xlu1 %58 }
  0xf4   :  { %v63_v23 = vmul.f32 %v59_v22, %v50_v11 }
  0xf6   :  { %v65_v24 = vadd.f32 1e-05, %v63_v23 }
  0xf8   :  { %352 = vrsqrt.f32 %v65_v24  ;;  %vm73_vm3 = vweird.f32 %v65_v24 }
  0xfb   :  { %v62_v26 = vpop.xlane.xlu1 %61 }
  0xfc   :  { %v64_v27 = vmul.f32 %v62_v26, %v50_v11  ;;  %v169_v26 = vld [vmem:[#allocation2] sm:$0xff] }
  0xfe   :  { %v353_v29 = vpop.eup %352  ;;  %v66_v30 = vadd.f32 1e-05, %v64_v27 }
  0xff   :  { %v68_v31 = vmul.f32 %v353_v29, %v65_v24  ;;  %vm74_vm2 = vweird.f32 %v353_v29 }
 0x100   :  { %354 = vrsqrt.f32 %v66_v30  ;;  %vm75_vm4 = vmor %vm73_vm3, %vm74_vm2  ;;  %vm83_vm7 = vweird.f32 %v66_v30 }
 0x101   :  { %v69_v32 = vmul.f32 %v353_v29, %v68_v31  ;;  %v349_v31 = vld [vmem:[%s481_s6] ss:$0 sm:$0xff] }
 0x103   :  { %v70_v33 = vmul.f32 0.5, %v69_v32 }
 0x105   :  { %v71_v34 = vsub.f32 1.5, %v70_v33 }
 0x106   :  { %v355_v35 = vpop.eup %354 }
 0x107   :  { %v72_v36 = vmul.f32 %v353_v29, %v71_v34  ;;  %v78_v37 = vmul.f32 %v355_v35, %v66_v30  ;;  %vm84_vm5 = vweird.f32 %v355_v35 }
 0x108   :  { %vm85_vm8 = vmor %vm83_vm7, %vm84_vm5 }
 0x109   :  { %v76_v39 = vsel %vm75_vm4, %v353_v29, %v72_v36  ;;  %v79_v40 = vmul.f32 %v355_v35, %v78_v37  ;;  %v170_v29 = vld [vmem:[#allocation2 + $0x8] sm:$0xff] }
 0x10a   :  { %v87_v42 = vmul.f32 %v76_v39, %v53_v14 }
 0x10b   :  { %v80_v43 = vmul.f32 0.5, %v79_v40 }
 0x10c   :  { %v93_v44 = vmul.f32 %v346_v38, %v87_v42 }
 0x10d   :  { %v81_v45 = vsub.f32 1.5, %v80_v43 }
 0x10e   :  { %v99_v46 = vadd.f32 %v347_v41, %v93_v44 }
 0x10f   :  { %v82_v47 = vmul.f32 %v355_v35, %v81_v45 }
 0x110   :  { %v101_v48 = vpack.c.bf16 %v99_v46, %v99_v46 }
 0x111   :  { %v86_v49 = vsel %vm85_vm8, %v355_v35, %v82_v47 }
 0x112   :  { %104 = vst.msk [vmem:[#allocation3] sm:$0xf] %vm103_vm6, %v101_v48  ;;  %v88_v50 = vmul.f32 %v86_v49, %v54_v19 }
 0x114   :  { %v94_v51 = vmul.f32 %v346_v38, %v88_v50 }
 0x116   :  { %v100_v52 = vadd.f32 %v347_v41, %v94_v51 }
 0x118   :  { %v102_v53 = vpack.c.bf16 %v100_v52, %v100_v52 }
 0x11a   :  { %105 = vst.msk [vmem:[#allocation3 + $0x4] sm:$0xf] %vm103_vm6, %v102_v53 }
 0x121   :  { %v325_v54 = vld [vmem:[#allocation3] sm:$0xff] }
 0x122   :  { %292 = vmatmul.msk.bf16.vlgmr.msra.gmra.mxu0 %vm31_vm0, %v325_v54 }
 0x19f   :  { %v146_v0 = vpop.f32.mrf.mxu0 }
 0x1a0   :  { %v147_v2 = vadd.f32 %v348_v63, %v146_v0 }
 0x1a2   :  { %v153_v4 = vmul.f32 0.044715, %v147_v2  ;;  %v151_v20 = vmul.f32 0.5, %v147_v2 }
 0x1a4   :  { %v155_v6 = vmul.f32 %v153_v4, %v147_v2 }
 0x1a6   :  { %v157_v7 = vmul.f32 %v155_v6, %v147_v2 }
 0x1a7   :  { %v148_v8 = vpop.f32.mrf.mxu0 }
 0x1a8   :  { %v149_v9 = vadd.f32 %v348_v63, %v148_v8  ;;  %v159_v10 = vadd.f32 %v157_v7, %v147_v2 }
 0x1aa   :  { %v154_v11 = vmul.f32 0.044715, %v149_v9  ;;  %v161_v13 = vmul.f32 0.7978846, %v159_v10  ;;  %v152_v21 = vmul.f32 0.5, %v149_v9 }
 0x1ac   :  { %v156_v12 = vmul.f32 %v154_v11, %v149_v9  ;;  %356 = vtanh.f32 %v161_v13 }
 0x1ae   :  { %v158_v14 = vmul.f32 %v156_v12, %v149_v9 }
 0x1b0   :  { %v160_v15 = vadd.f32 %v158_v14, %v149_v9 }
 0x1b2   :  { %v162_v16 = vmul.f32 0.7978846, %v160_v15  ;;  %v357_v17 = vpop.eup %356 }
 0x1b3   :  { %v165_v18 = vadd.f32 1.0, %v357_v17 }
 0x1b4   :  { %358 = vtanh.f32 %v162_v16 }
 0x1b5   :  { %v167_v23 = vmul.f32 %v165_v18, %v151_v20 }
 0x1ba   :  { %v359_v19 = vpop.eup %358 }
 0x1bb   :  { %v166_v22 = vadd.f32 1.0, %v359_v19 }
 0x1bd   :  { %v168_v24 = vmul.f32 %v166_v22, %v152_v21 }
 0x1bf   :  { %v171_v25 = vpack.c.bf16 %v168_v24, %v167_v23 }
 0x1c1   :  { %244 = vmatmul.bf16.vlgmr.msra.gmra.mxu1 %v171_v25 }
 0x23e   :  { %v245_v27 = vpop.f32.mrf.mxu1 }
 0x23f   :  { %v250_v28 = vadd.f32 %v245_v27, %v169_v26 }
 0x241   :  { %252 = vst.msk [vmem:[#allocation2] sm:$0xff] %vm31_vm0, %v250_v28 }
 0x246   :  { %v247_v30 = vpop.f32.mrf.mxu1 }
 0x247   :  { %v251_v32 = vadd.f32 %v247_v30, %v170_v29 }
 0x248   :  { %v261_v33 = vld [vmem:[#allocation2] sm:$0xff] }
 0x249   :  { %v263_v34 = vadd.f32 %v405_v1, %v261_v33  ;;  %253 = vst.msk [vmem:[#allocation2 + $0x8] sm:$0xff] %vm31_vm0, %v251_v32 }
 0x24b   :  { %v269_v35 = vadd.f32 %v349_v31, %v263_v34 }
 0x24d   :  { %v271_v36 = vpack.c.bf16 %v269_v35, %v269_v35 }
 0x24f   :  { %274 = vst.msk [vmem:[%s483_s7] sm:$0xf] %vm103_vm6, %v271_v36 }
 0x250   :  { %v262_v37 = vld [vmem:[#allocation2 + $0x8] sm:$0xff] }
 0x251   :  { %v264_v38 = vadd.f32 %v409_v3, %v262_v37 }
 0x253   :  { %v270_v39 = vadd.f32 %v349_v31, %v264_v38 }
 0x255   :  { %v272_v40 = vpack.c.bf16 %v270_v39, %v270_v39 }
 0x257   :  { %275 = vst.msk [vmem:[%s483_s7 + $0x4] sm:$0xf] %vm103_vm6, %v272_v40 }

// kernel: _lambda_.49
= control target key start
LH: loop header
LB: loop body
LE: loop exit
PB: predicated region body
PF: predicated region fallthrough
CT: control target
= control target key end

     0   :  { %v229_v3 = vmov 128.0   ;;  %vm168_vm7 = vcmask 519168   ;;  %s302_s0 = inlined_call_operand.vmem [shape: bf16[16,128], index: 0, kind: input, shape index: {}]   ;;  %s303_s1 = inlined_call_operand.vmem [shape: f32[1,128], index: 1, kind: input, shape index: {}]   ;;  %s304_s2 = inlined_call_operand.vmem [shape: f32[1,128], index: 2, kind: input, shape index: {}]   ;;  %s305_s4 = inlined_call_operand.vmem [shape: f32[1,64], index: 4, kind: input, shape index: {}]   ;;  %s306_s3 = inlined_call_operand.vmem [shape: bf16[128,64], index: 3, kind: input, shape index: {}]   ;;  %s307_s5 = inlined_call_operand.vmem [shape: bf16[16,64], index: 5, kind: output, shape index: {}]  }
   0x1   :  { %v216_v0 = vld [vmem:[%s302_s0] sm:$0xff]   ;;  %223 = vrcp.f32 %v229_v3  ;;  %v214_v18 = vld [vmem:[%s306_s3 + $0x38] sm:$0xff]  ;;  %v213_v19 = vld [vmem:[%s306_s3 + $0x30] sm:$0xff] }
   0x2   :  { %v217_v1 = vunpack.c.l.bf16 %v216_v0  ;;  %v218_v2 = vunpack.c.h.bf16 %v216_v0  ;;  %152 = vmatpush.bf16.msra.mxu0 %v214_v18  ;;  %v212_v20 = vld [vmem:[%s306_s3 + $0x28] sm:$0xff]  ;;  %v211_v21 = vld [vmem:[%s306_s3 + $0x20] sm:$0xff]  ;;  %v210_v22 = vld [vmem:[%s306_s3 + $0x18] sm:$0xff] }
   0x3   :  { %v209_v23 = vld [vmem:[%s306_s3 + $0x10] sm:$0xff]  ;;  %v208_v24 = vld [vmem:[%s306_s3 + $0x8] sm:$0xff]  ;;  %v207_v26 = vld [vmem:[%s306_s3] sm:$0xff] }
   0x4   :  { %24 = vadd.xlane.f32.xlu0 %v217_v1  ;;  %v220_v45 = vld [vmem:[%s303_s1] ss:$0 sm:$0xff] }
   0x5   :  { %v221_v50 = vld [vmem:[%s304_s2] ss:$0 sm:$0xff] }
   0x6   :  { %153 = vmatpush.bf16.msra.mxu0 %v213_v19  ;;  %v222_v55 = vld [vmem:[%s305_s4] ss:$0 sm:$0xff] }
   0x7   :  { %v224_v4 = vpop.eup %223 }
   0x8   :  { %v29_v5 = vmul.f32 128.0, %v224_v4  ;;  %vm33_vm0 = vweird.f32 %v224_v4 }
   0xa   :  { %v30_v6 = vsub.f32 1.0, %v29_v5  ;;  %154 = vmatpush.bf16.msra.mxu0 %v212_v20 }
   0xc   :  { %26 = vadd.xlane.f32.xlu0 %v218_v2  ;;  %v31_v7 = vmul.f32 %v224_v4, %v30_v6 }
   0xe   :  { %v32_v8 = vadd.f32 %v224_v4, %v31_v7  ;;  %155 = vmatpush.bf16.msra.mxu0 %v211_v21 }
  0x10   :  { %v34_v9 = vsel %vm33_vm0, %v224_v4, %v32_v8 }
  0x12   :  { %156 = vmatpush.bf16.msra.mxu0 %v210_v22 }
  0x16   :  { %157 = vmatpush.bf16.msra.mxu0 %v209_v23 }
  0x1a   :  { %158 = vmatpush.bf16.msra.mxu0 %v208_v24 }
  0x1e   :  { %159 = vmatpush.bf16.msra.mxu0 %v207_v26 }
  0x77   :  { %v25_v10 = vpop.xlane.xlu0 %24 }
  0x78   :  { %v35_v11 = vmul.f32 %v34_v9, %v25_v10 }
  0x7a   :  { %v37_v12 = vsub.f32 %v217_v1, %v35_v11 }
  0x7c   :  { %v39_v13 = vmul.f32 %v37_v12, %v37_v12 }
  0x7e   :  { %41 = vadd.xlane.f32.xlu1 %v39_v13 }
  0x7f   :  { %v27_v14 = vpop.xlane.xlu0 %26 }
  0x80   :  { %v36_v15 = vmul.f32 %v34_v9, %v27_v14 }
  0x82   :  { %v38_v16 = vsub.f32 %v218_v2, %v36_v15 }
  0x84   :  { %v40_v17 = vmul.f32 %v38_v16, %v38_v16 }
  0x86   :  { %43 = vadd.xlane.f32.xlu1 %v40_v17 }
  0xf1   :  { %v42_v25 = vpop.xlane.xlu1 %41 }
  0xf2   :  { %v45_v27 = vmul.f32 %v42_v25, %v34_v9 }
  0xf4   :  { %v47_v28 = vadd.f32 1e-05, %v45_v27 }
  0xf6   :  { %225 = vrsqrt.f32 %v47_v28  ;;  %vm55_vm2 = vweird.f32 %v47_v28 }
  0xf9   :  { %v44_v29 = vpop.xlane.xlu1 %43 }
  0xfa   :  { %v46_v30 = vmul.f32 %v44_v29, %v34_v9 }
  0xfc   :  { %v226_v31 = vpop.eup %225  ;;  %v48_v32 = vadd.f32 1e-05, %v46_v30 }
  0xfd   :  { %v50_v33 = vmul.f32 %v226_v31, %v47_v28  ;;  %vm56_vm1 = vweird.f32 %v226_v31 }
  0xfe   :  { %227 = vrsqrt.f32 %v48_v32  ;;  %vm57_vm3 = vmor %vm55_vm2, %vm56_vm1  ;;  %vm65_vm5 = vweird.f32 %v48_v32 }
  0xff   :  { %v51_v34 = vmul.f32 %v226_v31, %v50_v33 }
 0x101   :  { %v52_v35 = vmul.f32 0.5, %v51_v34 }
 0x103   :  { %v53_v36 = vsub.f32 1.5, %v52_v35 }
 0x104   :  { %v228_v37 = vpop.eup %227 }
 0x105   :  { %v54_v38 = vmul.f32 %v226_v31, %v53_v36  ;;  %v60_v39 = vmul.f32 %v228_v37, %v48_v32  ;;  %vm66_vm4 = vweird.f32 %v228_v37 }
 0x106   :  { %vm67_vm6 = vmor %vm65_vm5, %vm66_vm4 }
 0x107   :  { %v61_v40 = vmul.f32 %v228_v37, %v60_v39  ;;  %v58_v42 = vsel %vm57_vm3, %v226_v31, %v54_v38 }
 0x108   :  { %v69_v44 = vmul.f32 %v58_v42, %v37_v12 }
 0x109   :  { %v62_v41 = vmul.f32 0.5, %v61_v40 }
 0x10a   :  { %v75_v49 = vmul.f32 %v220_v45, %v69_v44 }
 0x10b   :  { %v63_v43 = vsub.f32 1.5, %v62_v41 }
 0x10c   :  { %v81_v52 = vadd.f32 %v221_v50, %v75_v49 }
 0x10d   :  { %v64_v46 = vmul.f32 %v228_v37, %v63_v43 }
 0x10f   :  { %v68_v47 = vsel %vm67_vm6, %v228_v37, %v64_v46 }
 0x110   :  { %v70_v48 = vmul.f32 %v68_v47, %v38_v16 }
 0x112   :  { %v76_v51 = vmul.f32 %v220_v45, %v70_v48 }
 0x114   :  { %v82_v53 = vadd.f32 %v221_v50, %v76_v51 }
 0x116   :  { %v83_v54 = vpack.c.bf16 %v82_v53, %v81_v52 }
 0x118   :  { %160 = vmatmul.bf16.vlgmr.msra.gmra.mxu0 %v83_v54 }
 0x195   :  { %v161_v56 = vpop.f32.mrf.mxu0 }
 0x196   :  { %v162_v57 = vadd.f32 %v222_v55, %v161_v56 }
 0x198   :  { %v166_v58 = vpack.c.bf16 %v162_v57, %v162_v57 }
 0x19a   :  { %169 = vst.msk [vmem:[%s307_s5] sm:$0xf] %vm168_vm7, %v166_v58 }
 0x19d   :  { %v163_v59 = vpop.f32.mrf.mxu0 }
 0x19e   :  { %v164_v60 = vadd.f32 %v222_v55, %v163_v59 }
 0x1a0   :  { %v167_v61 = vpack.c.bf16 %v164_v60, %v164_v60 }
 0x1a2   :  { %170 = vst.msk [vmem:[%s307_s5 + $0x4] sm:$0xf] %vm168_vm7, %v167_v61 }

// kernel: _lambda_.50
= control target key start
LH: loop header
LB: loop body
LE: loop exit
PB: predicated region body
PF: predicated region fallthrough
CT: control target
= control target key end

     0   :  { %vm25_vm0 = vcmask 523264   ;;  %v241_v5 = vmov 64.0   ;;  %vm177_vm8 = vcmask 1043456   ;;  %vm178_vm9 = vcmask 523268   ;;  %s354_s0 = inlined_call_operand.vmem [shape: bf16[16,64], index: 0, kind: input, shape index: {}]   ;;  %s355_s1 = inlined_call_operand.vmem [shape: f32[1,64], index: 1, kind: input, shape index: {}]   ;;  %s356_s2 = inlined_call_operand.vmem [shape: f32[1,64], index: 2, kind: input, shape index: {}]   ;;  %s357_s3 = inlined_call_operand.vmem [shape: bf16[64,192], index: 3, kind: input, shape index: {}]   ;;  %s358_s4 = inlined_call_operand.vmem [shape: f32[1,192], index: 4, kind: input, shape index: {}]   ;;  %s359_s5 = inlined_call_operand.vmem [shape: bf16[16,192], index: 5, kind: output, shape index: {}]  }
   0x1   :  { %v229_v0 = vld [vmem:[%s354_s0] sm:$0xff]   ;;  %235 = vrcp.f32 %v241_v5  ;;  %v212_v22 = vld [vmem:[%s357_s3 + $0x30] sm:$0xf]  ;;  %v227_v23 = vld [vmem:[%s357_s3 + $0x34] sm:$0xf0] }
   0x2   :  { %v230_v1 = vunpack.c.l.bf16 %v229_v0  ;;  %v231_v3 = vunpack.c.h.bf16 %v229_v0  ;;  %v226_v24 = vld [vmem:[%s357_s3 + $0x34] sm:$0xf]  ;;  %v213_v25 = vor.u32 %v227_v23, %v212_v22  ;;  %v214_v26 = vld [vmem:[%s357_s3 + $0x38] sm:$0xf0]  ;;  %v204_v28 = vld [vmem:[%s357_s3 + $0x20] sm:$0xf] }
   0x3   :  { %v217_v27 = vor.u32 %v226_v24, %v214_v26  ;;  %v225_v29 = vld [vmem:[%s357_s3 + $0x24] sm:$0xf0]  ;;  %v224_v30 = vld [vmem:[%s357_s3 + $0x24] sm:$0xf]  ;;  %v206_v32 = vld [vmem:[%s357_s3 + $0x28] sm:$0xf0] }
   0x4   :  { %v26_v2 = vsel %vm25_vm0, %v230_v1, 0.0  ;;  %v29_v4 = vsel %vm25_vm0, %v231_v3, 0.0  ;;  %151 = vmatpush.bf16.msra.mxu0 %v213_v25  ;;  %v205_v31 = vor.u32 %v225_v29, %v204_v28  ;;  %v209_v33 = vor.u32 %v224_v30, %v206_v32  ;;  %v196_v34 = vld [vmem:[%s357_s3 + $0x10] sm:$0xf]  ;;  %v223_v35 = vld [vmem:[%s357_s3 + $0x14] sm:$0xf0]  ;;  %vm179_vm10 = vmor %vm178_vm9, %vm177_vm8 }
   0x5   :  { %27 = vadd.xlane.f32.xlu0 %v26_v2  ;;  %165 = vmatpush.bf16.msra.mxu1 %v217_v27  ;;  %v222_v36 = vld [vmem:[%s357_s3 + $0x14] sm:$0xf]  ;;  %v197_v37 = vor.u32 %v223_v35, %v196_v34  ;;  %v198_v38 = vld [vmem:[%s357_s3 + $0x18] sm:$0xf0]  ;;  %v188_v40 = vld [vmem:[%s357_s3] sm:$0xf] }
   0x6   :  { %v201_v39 = vor.u32 %v222_v36, %v198_v38  ;;  %v221_v41 = vld [vmem:[%s357_s3 + $0x4] sm:$0xf0]  ;;  %v220_v42 = vld [vmem:[%s357_s3 + $0x4] sm:$0xf]  ;;  %v190_v45 = vld [vmem:[%s357_s3 + $0x8] sm:$0xf0] }
   0x7   :  { %v236_v6 = vpop.eup %235  ;;  %v189_v44 = vor.u32 %v221_v41, %v188_v40  ;;  %v193_v47 = vor.u32 %v220_v42, %v190_v45 }
   0x8   :  { %v33_v7 = vmul.f32 64.0, %v236_v6  ;;  %vm37_vm1 = vweird.f32 %v236_v6  ;;  %152 = vmatpush.bf16.msra.mxu0 %v205_v31 }
   0x9   :  { %166 = vmatpush.bf16.msra.mxu1 %v209_v33 }
   0xa   :  { %v34_v8 = vsub.f32 1.0, %v33_v7 }
   0xc   :  { %v35_v9 = vmul.f32 %v236_v6, %v34_v8  ;;  %153 = vmatpush.bf16.msra.mxu0 %v197_v37 }
   0xd   :  { %30 = vadd.xlane.f32.xlu0 %v29_v4  ;;  %167 = vmatpush.bf16.msra.mxu1 %v201_v39 }
   0xe   :  { %v36_v10 = vadd.f32 %v236_v6, %v35_v9 }
  0x10   :  { %v38_v11 = vsel %vm37_vm1, %v236_v6, %v36_v10  ;;  %154 = vmatpush.bf16.msra.mxu0 %v189_v44  ;;  %v234_v6 = vld [vmem:[%s356_s2] ss:$0 sm:$0xff] }
  0x11   :  { %168 = vmatpush.bf16.msra.mxu1 %v193_v47 }
  0x78   :  { %v28_v12 = vpop.xlane.xlu0 %27 }
  0x79   :  { %v39_v13 = vmul.f32 %v38_v11, %v28_v12 }
  0x7b   :  { %v277_v14 = vsub.f32 %v230_v1, %v39_v13  ;;  %v233_v1 = vld [vmem:[%s355_s1] ss:$0 sm:$0xff] }
  0x7d   :  { %v43_v15 = vmul.f32 %v277_v14, %v277_v14 }
  0x7f   :  { %v45_v16 = vsel %vm25_vm0, %v43_v15, 0.0 }
  0x80   :  { %46 = vadd.xlane.f32.xlu1 %v45_v16  ;;  %v31_v17 = vpop.xlane.xlu0 %30 }
  0x81   :  { %v40_v18 = vmul.f32 %v38_v11, %v31_v17 }
  0x83   :  { %v282_v19 = vsub.f32 %v231_v3, %v40_v18 }
  0x85   :  { %v44_v20 = vmul.f32 %v282_v19, %v282_v19 }
  0x87   :  { %v48_v21 = vsel %vm25_vm0, %v44_v20, 0.0 }
  0x88   :  { %49 = vadd.xlane.f32.xlu1 %v48_v21 }
  0xf3   :  { %v47_v43 = vpop.xlane.xlu1 %46 }
  0xf4   :  { %v51_v46 = vmul.f32 %v47_v43, %v38_v11 }
  0xf6   :  { %v53_v48 = vadd.f32 1e-05, %v51_v46 }
  0xf8   :  { %237 = vrsqrt.f32 %v53_v48  ;;  %vm61_vm3 = vweird.f32 %v53_v48 }
  0xfb   :  { %v50_v49 = vpop.xlane.xlu1 %49 }
  0xfc   :  { %v52_v50 = vmul.f32 %v50_v49, %v38_v11  ;;  %v98_v11 = vld [vmem:[%s358_s4] sm:$0x3] }
  0xfd   :  { %v100_v12 = vperm.slane %v98_v11, 0  ;;  %v101_v13 = vperm.slane %v98_v11, 1 }
  0xfe   :  { %v238_v51 = vpop.eup %237  ;;  %v54_v52 = vadd.f32 1e-05, %v52_v50 }
  0xff   :  { %v56_v53 = vmul.f32 %v238_v51, %v53_v48  ;;  %vm62_vm2 = vweird.f32 %v238_v51 }
 0x100   :  { %239 = vrsqrt.f32 %v54_v52  ;;  %vm63_vm4 = vmor %vm61_vm3, %vm62_vm2  ;;  %vm71_vm6 = vweird.f32 %v54_v52 }
 0x101   :  { %v57_v54 = vmul.f32 %v238_v51, %v56_v53 }
 0x103   :  { %v58_v55 = vmul.f32 0.5, %v57_v54 }
 0x105   :  { %v59_v56 = vsub.f32 1.5, %v58_v55 }
 0x106   :  { %v240_v57 = vpop.eup %239 }
 0x107   :  { %v60_v58 = vmul.f32 %v238_v51, %v59_v56  ;;  %v66_v59 = vmul.f32 %v240_v57, %v54_v52  ;;  %vm72_vm5 = vweird.f32 %v240_v57 }
 0x108   :  { %vm73_vm7 = vmor %vm71_vm6, %vm72_vm5 }
 0x109   :  { %v67_v60 = vmul.f32 %v240_v57, %v66_v59  ;;  %v64_v61 = vsel %vm63_vm4, %v238_v51, %v60_v58 }
 0x10a   :  { %v75_v0 = vmul.f32 %v64_v61, %v277_v14 }
 0x10b   :  { %v68_v62 = vmul.f32 0.5, %v67_v60 }
 0x10c   :  { %v81_v5 = vmul.f32 %v233_v1, %v75_v0 }
 0x10d   :  { %v69_v63 = vsub.f32 1.5, %v68_v62 }
 0x10e   :  { %v87_v8 = vadd.f32 %v234_v6, %v81_v5 }
 0x10f   :  { %v70_v2 = vmul.f32 %v240_v57, %v69_v63 }
 0x111   :  { %v74_v3 = vsel %vm73_vm7, %v240_v57, %v70_v2 }
 0x112   :  { %v76_v4 = vmul.f32 %v74_v3, %v282_v19 }
 0x114   :  { %v82_v7 = vmul.f32 %v233_v1, %v76_v4 }
 0x116   :  { %v88_v9 = vadd.f32 %v234_v6, %v82_v7 }
 0x118   :  { %v89_v10 = vpack.c.bf16 %v88_v9, %v87_v8 }
 0x11a   :  { %218 = vmatmul.msk.bf16.vlgmr.msra.gmra.mxu0 %vm25_vm0, %v89_v10  ;;  %219 = vmatmul.msk.bf16.vlgmr.msra.gmra.mxu1 %vm25_vm0, %v89_v10 }
 0x197   :  { %v156_v14 = vpop.f32.mrf.mxu0  ;;  %v170_v15 = vpop.f32.mrf.mxu1 }
 0x198   :  { %v157_v16 = vadd.f32 %v156_v14, %v100_v12  ;;  %v171_v17 = vadd.f32 %v170_v15, %v101_v13 }
 0x19a   :  { %v175_v18 = vpack.c.bf16 %v171_v17, %v157_v16 }
 0x19c   :  { %180 = vst.msk [vmem:[%s359_s5] sm:$0xff] %vm179_vm10, %v175_v18 }
 0x19f   :  { %v158_v19 = vpop.f32.mrf.mxu0  ;;  %v172_v20 = vpop.f32.mrf.mxu1 }
 0x1a0   :  { %v159_v21 = vadd.f32 %v158_v19, %v100_v12  ;;  %v173_v22 = vadd.f32 %v172_v20, %v101_v13 }
 0x1a2   :  { %v176_v23 = vpack.c.bf16 %v173_v22, %v159_v21 }
 0x1a4   :  { %181 = vst.msk [vmem:[%s359_s5 + $0x8] sm:$0xff] %vm179_vm10, %v176_v23 }

// kernel: _lambda_.51
= control target key start
LH: loop header
LB: loop body
LE: loop exit
PB: predicated region body
PF: predicated region fallthrough
CT: control target
= control target key end

     0   :  { %s585_s9 = smov 0   ;;  %s676_s0 = inlined_call_operand.vmem [shape: bf16[2,2,192], index: 0, kind: input, shape index: {}]   ;;  %s677_s1 = inlined_call_operand.vmem [shape: bf16[4,2,2], index: 1, kind: input, shape index: {}]   ;;  %s678_s2 = inlined_call_operand.vmem [shape: bf16[2,2,64], index: 2, kind: output, shape index: {}]  }
   0x1 LB: > { %s508_s10 = sadd.s32 4294967295, %s561_s9   ;;  %p512_p0 = scmp.ge.s32.totalorder %s561_s9, 1  ;;  %s561_s9 = sphi %s585_s9, %s12_s9  }
   0x2   : > { %p111_p1 = scmp.lt.s32.totalorder %s561_s9, 3 }
   0x4   : > { %p112_p2 = pnand %p512_p0, %p111_p1 }
   0x5   : > { %p130_p3 = scmp.lt.s32.totalorder (!%p112_p2), %s508_s10, 1  ;;  %s563_s15 = smov (!%p112_p2), 64  }
   0x6   : > { %115 = sbr.rel (%p112_p2) target bundleno = 1199 (0x4af), region = 28  ;;  %s564_s16 = smov (!%p112_p2), 48  }
   0x7   : > { %s565_s17 = smov (!%p112_p2), 112   ;;  %s566_s18 = smov (!%p112_p2), 32  }
   0x8   : > { %s567_s21 = smov (!%p112_p2), 16   ;;  %s568_s22 = smov (!%p112_p2), 96  }
   0x9   : > { %s569_s23 = smov (!%p112_p2), 80  }
   0xb   : > { %s680_s10 = smov (!%p130_p3, %s508_s10), 1  ;;  %vm154_vm0 = vcmask 130048   ;;  %v138_v19 = vld [vmem:[%s677_s1] sm:$0x1]  ;;  %vm175_vm1 = vcmask 9216   ;;  %vm192_vm2 = vcmask 1040384  }
   0xc   : > { %s513_s11 = sshll.u32 %s680_s10, 1  ;;  %v142_v21 = vunpack.c.l.bf16 %v138_v19  ;;  %v139_v42 = vld [vmem:[%s677_s1 + $0x1] sm:$0x1]  ;;  %v141_v49 = vld [vmem:[%s677_s1 + $0x3] sm:$0x1]  ;;  %vm188_vm3 = vcmask 15360   ;;  %s647_s30 = scalar_lea.vmem %s678_s2, %s680_s10 }
   0xd   : > { %s599_s14 = scalar_lea.vmem %s676_s0, %s513_s11  ;;  %v143_v44 = vunpack.c.l.bf16 %v139_v42  ;;  %v145_v51 = vunpack.c.l.bf16 %v141_v49  ;;  %vm210_vm4 = vcmask 122880   ;;  %vm293_vm5 = vcmask 254080  }
   0xe   : > { %v146_v0 = vld [vmem:[%s599_s14] sm:$0x1]  ;;  %v213_v4 = vld [vmem:[%s599_s14 + $0x1] sm:$0x1]  ;;  %vm376_vm6 = vcmask 385280   ;;  %vm459_vm7 = vcmask 516480  }
   0xf   : > { %149 = vst [vmem:[#allocation1] ss:$9 sm:$0xff] %v146_v0  ;;  %v212_v2 = vld [vmem:[%s599_s14] sm:$0x1]  ;;  %v296_v11 = vld [vmem:[%s599_s14 + $0x1] sm:$0x1] }
  0x10   : > { %v295_v6 = vld [vmem:[%s599_s14] sm:$0x1]  ;;  %v379_v20 = vld [vmem:[%s599_s14 + $0x1] sm:$0x1] }
  0x11   : > { %v378_v13 = vld [vmem:[%s599_s14] sm:$0x1]  ;;  %v147_v30 = vld [vmem:[%s599_s14 + $0x1] sm:$0x1] }
  0x12   : > { %v194_v33 = vsel %vm192_vm2, %v147_v30, 0 }
  0x13   : > { %203 = vmatpush.bf16.msra.mxu1 %v194_v33 }
  0x16   : > { %v150_v1 = vld [vmem:[#allocation1] sm:$0xff] }
  0x17   : > { %152 = vrot.lane.b32.xlu0 %v150_v1, %s563_s15  ;;  %215 = vst [vmem:[#allocation1] ss:$9 sm:$0xff] %v212_v2 }
  0x1e   : > { %v216_v3 = vld [vmem:[#allocation1] sm:$0xff] }
  0x1f   : > { %220 = vst [vmem:[#allocation1] ss:$9 sm:$0xff] %v212_v2  ;;  %218 = vrot.lane.b32.xlu2 %v216_v3, %s565_s17 }
  0x26   : > { %v221_v5 = vld [vmem:[#allocation1] sm:$0xff] }
  0x27   : > { %223 = vrot.lane.b32.xlu1 %v221_v5, %s564_s16  ;;  %259 = vst [vmem:[#allocation1] ss:$9 sm:$0xff] %v213_v4 }
  0x2e   : > { %v607_v9 = vld [vmem:[#allocation1] sm:$0xff] }
  0x2f   : > { %298 = vst [vmem:[#allocation1] ss:$9 sm:$0xff] %v295_v6 }
  0x36   : > { %v299_v10 = vld [vmem:[#allocation1] sm:$0xff] }
  0x37   : > { %303 = vst [vmem:[#allocation1] ss:$9 sm:$0xff] %v295_v6 }
  0x3e   : > { %v304_v12 = vld [vmem:[#allocation1] sm:$0xff] }
  0x3f   : > { %306 = vrot.lane.b32.xlu2 %v304_v12, %s566_s18  ;;  %342 = vst [vmem:[#allocation1] ss:$9 sm:$0xff] %v296_v11 }
  0x46   : > { %v343_v14 = vld [vmem:[#allocation1] sm:$0xff] }
  0x47   : > { %381 = vst [vmem:[#allocation1] ss:$9 sm:$0xff] %v378_v13 }
  0x4e   : > { %v382_v18 = vld [vmem:[#allocation1] sm:$0xff] }
  0x4f   : > { %386 = vst [vmem:[#allocation1] ss:$9 sm:$0xff] %v378_v13 }
  0x56   : > { %v387_v23 = vld [vmem:[#allocation1] sm:$0xff] }
  0x57   : > { %389 = vrot.lane.b32.xlu2 %v387_v23, %s567_s21  ;;  %425 = vst [vmem:[#allocation1] ss:$9 sm:$0xff] %v379_v20 }
  0x5f   : > { %301 = vrot.lane.b32.xlu2 %v299_v10, %s568_s22 }
  0x67   : > { %384 = vrot.lane.b32.xlu2 %v382_v18, %s569_s23 }
  0x79   : > { %v219_v17 = vpop.permute.xlu2 %218 }
  0x89   : > { %v153_v7 = vpop.permute.xlu0 %152 }
  0x8a   : > { %v158_v8 = vsel %vm154_vm0, %v153_v7, 0 }
  0x8b   : > { %167 = vmatpush.bf16.xpose.msra.mxu0 %v158_v8 }
  0x92   : > { %514 = vmatmul.msk.bf16.vlgmr.msra.gmra.mxu0 %vm154_vm0, %v146_v0  ;;  %v140_v0 = vld [vmem:[%s677_s1 + $0x2] sm:$0x1] }
  0x93   : > { %v144_v1 = vunpack.c.l.bf16 %v140_v0 }
  0x99   : > { %v224_v15 = vpop.permute.xlu1 %223  ;;  %v307_v28 = vpop.permute.xlu2 %306 }
  0x9a   : > { %v229_v16 = vsel %vm154_vm0, %v224_v15, 0  ;;  %v312_v31 = vsel %vm154_vm0, %v307_v28, 0 }
  0x9b   : > { %238 = vmatpush.bf16.xpose.msra.mxu2 %v229_v16  ;;  %321 = vmatpush.bf16.xpose.msrb.mxu1 %v312_v31 }
  0xa2   : > { %516 = vmatmul.msk.bf16.vlgmr.msra.gmra.mxu2 %vm154_vm0, %v219_v17 }
  0xb1   : > { %v390_v29 = vpop.permute.xlu2 %389 }
  0xb2   : > { %v395_v32 = vsel %vm154_vm0, %v390_v29, 0 }
  0xb3   : > { %404 = vmatpush.bf16.xpose.msrb.mxu0 %v395_v32 }
  0xb9   : > { %v302_v34 = vpop.permute.xlu2 %301 }
  0xc1   : > { %v385_v35 = vpop.permute.xlu2 %384 }
  0xc2   : > { %520 = vmatmul.msk.bf16.vlgmr.msrb.gmra.mxu0 %vm154_vm0, %v385_v35 }
 0x10f   : > { %v169_v22 = vpop.f32.mrf.mxu0 }
 0x110   : > { %v173_v24 = vmul.f32 0.25, %v169_v22 }
 0x112   : > { %v174_v25 = vadd.f32 %v173_v24, %v142_v21 }
 0x114   : > { %v176_v26 = vsel %vm175_vm1, %v174_v25, -inf }
 0x115   : > { %177 = vmax.xlane.f32.xlu0 %v176_v26  ;;  %v426_v26 = vld [vmem:[#allocation1] sm:$0xff] }
 0x117   : > { %v171_v27 = vpop.f32.mrf.mxu0 }
 0x125   : > { %v240_v41 = vpop.f32.mrf.mxu2 }
 0x126   : > { %v244_v43 = vmul.f32 0.25, %v240_v41 }
 0x128   : > { %v245_v45 = vadd.f32 %v244_v43, %v143_v44 }
 0x12a   : > { %v246_v46 = vsel %vm175_vm1, %v245_v45, -inf }
 0x12b   : > { %247 = vmax.xlane.f32.xlu2 %v246_v46 }
 0x12d   : > { %v242_v47 = vpop.f32.mrf.mxu2 }
 0x13f   : > { %v406_v48 = vpop.f32.mrf.mxu0 }
 0x140   : > { %v410_v50 = vmul.f32 0.25, %v406_v48 }
 0x142   : > { %v411_v52 = vadd.f32 %v410_v50, %v145_v51 }
 0x143   : > { %345 = vrot.lane.b32.xlu2 %v343_v14, %s568_s22 }
 0x144   : > { %v412_v54 = vsel %vm175_vm1, %v411_v52, -inf }
 0x147   : > { %v408_v55 = vpop.f32.mrf.mxu0 }
 0x188   : > { %v178_v36 = vpop.xlane.xlu0 %177 }
 0x189   : > { %v179_v37 = vsub.f32 %v174_v25, %v178_v36 }
 0x18b   : > { %v180_v38 = vmul.f32 1.442695, %v179_v37 }
 0x18d   : > { %539 = vpow2.f32 %v180_v38 }
 0x193   : > { %v540_v39 = vpop.eup %539 }
 0x194   : > { %v182_v40 = vsel %vm175_vm1, %v540_v39, 0.0 }
 0x195   : > { %183 = vadd.xlane.f32.xlu1 %v182_v40 }
 0x19d   : > { %413 = vmax.xlane.f32.xlu1 %v412_v54 }
 0x19e   : > { %v248_v62 = vpop.xlane.xlu2 %247 }
 0x19f   : > { %v249_v63 = vsub.f32 %v245_v45, %v248_v62 }
 0x1a1   : > { %v250_v2 = vmul.f32 1.442695, %v249_v63 }
 0x1a6   : > { %v346_v27 = vpop.permute.xlu2 %345 }
 0x1a7   : > { %v351_v28 = vsel %vm192_vm2, %v346_v27, 0 }
 0x1b6   : > { %262 = vrot.lane.b32.xlu1 %v607_v9, %s565_s17 }
 0x208   : > { %v184_v53 = vpop.xlane.xlu1 %183 }
 0x209   : > { %541 = vrcp.f32 %v184_v53 }
 0x20a   : > { %543 = vpow2.f32 %v250_v2 }
 0x20f   : > { %v542_v56 = vpop.eup %541 }
 0x210   : > { %v186_v57 = vmul.f32 %v542_v56, %v540_v39  ;;  %v414_v4 = vpop.xlane.xlu1 %413  ;;  %v544_v11 = vpop.eup %543 }
 0x211   : > { %v415_v7 = vsub.f32 %v411_v52, %v414_v4  ;;  %v252_v12 = vsel %vm175_vm1, %v544_v11, 0.0 }
 0x212   : > { %v187_v58 = vpack.c.bf16 %v186_v57, %v186_v57 }
 0x213   : > { %v416_v9 = vmul.f32 1.442695, %v415_v7 }
 0x214   : > { %515 = vmatmul.msk.bf16.vlgmr.msra.gmra.mxu1 %vm188_vm3, %v187_v58 }
 0x215   : > { %545 = vpow2.f32 %v416_v9 }
 0x21b   : > { %v546_v13 = vpop.eup %545 }
 0x21c   : > { %v418_v14 = vsel %vm175_vm1, %v546_v13, 0.0 }
 0x224   : > { %518 = vmatmul.msk.bf16.vlgmr.msrb.gmra.mxu1 %vm154_vm0, %v302_v34 }
 0x228   : > { %v263_v15 = vpop.permute.xlu1 %262 }
 0x229   : > { %v268_v16 = vsel %vm192_vm2, %v263_v15, 0 }
 0x22a   : > { %277 = vmatpush.bf16.msra.mxu3 %v268_v16 }
 0x22e   : > { %360 = vmatpush.bf16.msrb.mxu3 %v351_v28 }
 0x291   : > { %v205_v59 = vpop.f32.mrf.mxu1 }
 0x292   : > { %v209_v60 = vpack.c.bf16 %v205_v59, %v205_v59 }
 0x294   : > { %211 = vst.msk [vmem:[%s647_s30] sm:$0x1] %vm210_vm4, %v209_v60 }
 0x299   : > { %v207_v61 = vpop.f32.mrf.mxu1 }
 0x2a1   : > { %v323_v3 = vpop.f32.mrf.mxu1 }
 0x2a2   : > { %v327_v5 = vmul.f32 0.25, %v323_v3 }
 0x2a4   : > { %v328_v6 = vadd.f32 %v327_v5, %v144_v1 }
 0x2a6   : > { %v329_v8 = vsel %vm175_vm1, %v328_v6, -inf }
 0x2a7   : > { %330 = vmax.xlane.f32.xlu0 %v329_v8 }
 0x2a9   : > { %v325_v10 = vpop.f32.mrf.mxu1 }
 0x2af   : > { %253 = vadd.xlane.f32.xlu0 %v252_v12 }
 0x2b7   : > { %419 = vadd.xlane.f32.xlu0 %v418_v14 }
 0x31a   : > { %v331_v17 = vpop.xlane.xlu0 %330 }
 0x31b   : > { %v332_v18 = vsub.f32 %v328_v6, %v331_v17 }
 0x31d   : > { %v333_v19 = vmul.f32 1.442695, %v332_v18 }
 0x31f   : > { %547 = vpow2.f32 %v333_v19 }
 0x322   : > { %v254_v20 = vpop.xlane.xlu0 %253 }
 0x323   : > { %549 = vrcp.f32 %v254_v20 }
 0x325   : > { %v548_v21 = vpop.eup %547 }
 0x326   : > { %v335_v22 = vsel %vm175_vm1, %v548_v21, 0.0 }
 0x327   : > { %336 = vadd.xlane.f32.xlu0 %v335_v22 }
 0x329   : > { %v550_v23 = vpop.eup %549 }
 0x32a   : > { %v256_v24 = vmul.f32 %v550_v23, %v544_v11  ;;  %v420_v29 = vpop.xlane.xlu0 %419 }
 0x32c   : > { %v257_v25 = vpack.c.bf16 %v256_v24, %v256_v24 }
 0x32e   : > { %517 = vmatmul.msk.bf16.vlgmr.msra.gmra.mxu3 %vm188_vm3, %v257_v25 }
 0x33b   : > { %428 = vrot.lane.b32.xlu0 %v426_v26, %s569_s23 }
 0x39a   : > { %v337_v30 = vpop.xlane.xlu0 %336 }
 0x39b   : > { %551 = vrcp.f32 %v337_v30 }
 0x39c   : > { %553 = vrcp.f32 %v420_v29 }
 0x3a1   : > { %v552_v31 = vpop.eup %551 }
 0x3a2   : > { %v339_v32 = vmul.f32 %v552_v31, %v548_v21  ;;  %v554_v34 = vpop.eup %553 }
 0x3a3   : > { %v422_v35 = vmul.f32 %v554_v34, %v546_v13 }
 0x3a4   : > { %v340_v33 = vpack.c.bf16 %v339_v32, %v339_v32 }
 0x3a5   : > { %v423_v38 = vpack.c.bf16 %v422_v35, %v422_v35 }
 0x3a6   : > { %519 = vmatmul.msk.bf16.vlgmr.msrb.gmra.mxu3 %vm188_vm3, %v340_v33 }
 0x3ad   : > { %v429_v36 = vpop.permute.xlu0 %428 }
 0x3ae   : > { %v434_v37 = vsel %vm192_vm2, %v429_v36, 0 }
 0x3af   : > { %443 = vmatpush.bf16.msrb.mxu2 %v434_v37 }
 0x3b1   : > { %v279_v39 = vpop.f32.mrf.mxu3 }
 0x3b2   : > { %v283_v40 = vpack.c.bf16 %v279_v39, %v279_v39  ;;  %521 = vmatmul.msk.bf16.vlgmr.msrb.gmra.mxu2 %vm188_vm3, %v423_v38 }
 0x3b4   : > { %v285_v41 = vrot.slane %v283_v40, 3 }
 0x3b6   : > { %v288_v42 = vsel %vm192_vm2, %v283_v40, %v285_v41 }
 0x3b7   : > { %290 = vrot.lane.b32.xlu1 %v288_v42, %s567_s21 }
 0x3b9   : > { %v281_v43 = vpop.f32.mrf.mxu3 }
 0x429   : > { %v291_v44 = vpop.permute.xlu1 %290  ;;  %v362_v45 = vpop.f32.mrf.mxu3 }
 0x42a   : > { %294 = vst.msk [vmem:[%s647_s30] sm:$0x1] %vm293_vm5, %v291_v44  ;;  %v366_v46 = vpack.c.bf16 %v362_v45, %v362_v45 }
 0x42c   : > { %v368_v47 = vrot.slane %v366_v46, 3 }
 0x42e   : > { %v371_v48 = vsel %vm192_vm2, %v366_v46, %v368_v47 }
 0x42f   : > { %373 = vrot.lane.b32.xlu1 %v371_v48, %s566_s18 }
 0x431   : > { %v364_v49 = vpop.f32.mrf.mxu3 }
 0x435   : > { %v445_v50 = vpop.f32.mrf.mxu2 }
 0x436   : > { %v449_v51 = vpack.c.bf16 %v445_v50, %v445_v50 }
 0x438   : > { %v451_v52 = vrot.slane %v449_v51, 3 }
 0x43a   : > { %v454_v53 = vsel %vm192_vm2, %v449_v51, %v451_v52 }
 0x43b   : > { %456 = vrot.lane.b32.xlu1 %v454_v53, %s564_s16 }
 0x43d   : > { %v447_v54 = vpop.f32.mrf.mxu2 }
 0x4a1   : > { %v374_v55 = vpop.permute.xlu1 %373 }
 0x4a2   : > { %377 = vst.msk [vmem:[%s647_s30] sm:$0x1] %vm376_vm6, %v374_v55 }
 0x4ad   : > { %v457_v56 = vpop.permute.xlu1 %456 }
 0x4ae   : > { %460 = vst.msk [vmem:[%s647_s30] sm:$0x1] %vm459_vm7, %v457_v56 }
 0x4af PF: > { %s12_s9 = sadd.s32 1, %s561_s9  }
 0x4b0   : > { %p9_p4 = scmp.ge.s32.totalorder %s12_s9, 4  }
 0x4b2   :  { %11 = sbr.rel (!%p9_p4) target bundleno = 1 (0x1), region = 58 }

// kernel: _lambda_.52
= control target key start
LH: loop header
LB: loop body
LE: loop exit
PB: predicated region body
PF: predicated region fallthrough
CT: control target
= control target key end

     0   :  { %vm19_vm0 = vcmask 523264   ;;  %v133_v1 = vmov 0.0   ;;  %vm98_vm1 = vcmask 519168   ;;  %s183_s1 = inlined_call_operand.vmem [shape: bf16[64,64], index: 1, kind: input, shape index: {}]   ;;  %s184_s2 = inlined_call_operand.vmem [shape: f32[1,64], index: 2, kind: input, shape index: {}]   ;;  %s185_s0 = inlined_call_operand.vmem [shape: bf16[16,64], index: 0, kind: input, shape index: {}]   ;;  %s186_s3 = inlined_call_operand.vmem [shape: bf16[16,64], index: 3, kind: output, shape index: {}]  }
   0x1   :  { %v130_v0 = vld [vmem:[%s183_s1 + $0x18] sm:$0xff]  ;;  %20 = vst.msk [vmem:[#allocation2] sm:$0xff] %vm19_vm0, %v133_v1  ;;  %v129_v2 = vld [vmem:[%s183_s1 + $0x10] sm:$0xff]  ;;  %v128_v3 = vld [vmem:[%s183_s1 + $0x8] sm:$0xff] }
   0x2   :  { %21 = vst.msk [vmem:[#allocation2 + $0x8] sm:$0xff] %vm19_vm0, %v133_v1  ;;  %71 = vmatpush.bf16.msra.mxu0 %v130_v0  ;;  %v127_v4 = vld [vmem:[%s183_s1] sm:$0xff] }
   0x3   :  { %v126_v5 = vld [vmem:[%s185_s0] sm:$0xff] }
   0x4   :  { %v132_v10 = vld [vmem:[%s184_s2] ss:$0 sm:$0xff] }
   0x6   :  { %72 = vmatpush.bf16.msra.mxu0 %v129_v2 }
   0x8   :  { %v22_v6 = vld [vmem:[#allocation2] sm:$0xff] }
   0x9   :  { %v23_v9 = vld [vmem:[#allocation2 + $0x8] sm:$0xff] }
   0xa   :  { %73 = vmatpush.bf16.msra.mxu0 %v128_v3 }
   0xe   :  { %74 = vmatpush.bf16.msra.mxu0 %v127_v4 }
  0x11   :  { %125 = vmatmul.msk.bf16.vlgmr.msra.gmra.mxu0 %vm19_vm0, %v126_v5 }
  0x8e   :  { %v76_v7 = vpop.f32.mrf.mxu0 }
  0x8f   :  { %v81_v8 = vadd.f32 %v76_v7, %v22_v6 }
  0x91   :  { %83 = vst.msk [vmem:[#allocation2] sm:$0xff] %vm19_vm0, %v81_v8 }
  0x96   :  { %v78_v11 = vpop.f32.mrf.mxu0 }
  0x97   :  { %v82_v12 = vadd.f32 %v78_v11, %v23_v9 }
  0x98   :  { %v88_v13 = vld [vmem:[#allocation2] sm:$0xff] }
  0x99   :  { %v94_v14 = vadd.f32 %v132_v10, %v88_v13  ;;  %84 = vst.msk [vmem:[#allocation2 + $0x8] sm:$0xff] %vm19_vm0, %v82_v12 }
  0x9b   :  { %v96_v15 = vpack.c.bf16 %v94_v14, %v94_v14 }
  0x9d   :  { %99 = vst.msk [vmem:[%s186_s3] sm:$0xf] %vm98_vm1, %v96_v15 }
  0xa0   :  { %v89_v16 = vld [vmem:[#allocation2 + $0x8] sm:$0xff] }
  0xa1   :  { %v95_v17 = vadd.f32 %v132_v10, %v89_v16 }
  0xa3   :  { %v97_v18 = vpack.c.bf16 %v95_v17, %v95_v17 }
  0xa5   :  { %100 = vst.msk [vmem:[%s186_s3 + $0x4] sm:$0xf] %vm98_vm1, %v97_v18 }

// kernel: _lambda_.54
= control target key start
LH: loop header
LB: loop body
LE: loop exit
PB: predicated region body
PF: predicated region fallthrough
CT: control target
= control target key end

     0   :  { %v366_v8 = vmov 256.0   ;;  %s483_s0 = inlined_call_operand.vmem [shape: bf16[16,256], index: 0, kind: input, shape index: {}]   ;;  %s484_s4 = inlined_call_operand.vmem [shape: f32[1,128], index: 4, kind: input, shape index: {}]   ;;  %s485_s3 = inlined_call_operand.vmem [shape: bf16[256,128], index: 3, kind: input, shape index: {}]   ;;  %s486_s1 = inlined_call_operand.vmem [shape: f32[1,256], index: 1, kind: input, shape index: {}]   ;;  %s487_s2 = inlined_call_operand.vmem [shape: f32[1,256], index: 2, kind: input, shape index: {}]   ;;  %s488_s5 = inlined_call_operand.vmem [shape: bf16[16,128], index: 5, kind: output, shape index: {}]  }
   0x1   :  { %v20_v0 = vld [vmem:[%s483_s0] sm:$0xff]  ;;  %v21_v3 = vld [vmem:[%s483_s0 + $0x8] sm:$0xff]  ;;  %360 = vrcp.f32 %v366_v8  ;;  %v344_v29 = vld [vmem:[%s485_s3 + $0x38] sm:$0xff] }
   0x2   :  { %v22_v1 = vunpack.c.l.bf16 %v20_v0  ;;  %v23_v2 = vunpack.c.h.bf16 %v20_v0  ;;  %v24_v5 = vunpack.c.l.bf16 %v21_v3  ;;  %v25_v6 = vunpack.c.h.bf16 %v21_v3  ;;  %v352_v30 = vld [vmem:[%s485_s3 + $0x78] sm:$0xff]  ;;  %237 = vmatpush.bf16.msra.mxu0 %v344_v29  ;;  %v343_v31 = vld [vmem:[%s485_s3 + $0x30] sm:$0xff]  ;;  %v342_v33 = vld [vmem:[%s485_s3 + $0x28] sm:$0xff] }
   0x3   :  { %251 = vmatpush.bf16.msra.mxu1 %v352_v30  ;;  %v351_v32 = vld [vmem:[%s485_s3 + $0x70] sm:$0xff]  ;;  %v350_v34 = vld [vmem:[%s485_s3 + $0x68] sm:$0xff]  ;;  %v341_v35 = vld [vmem:[%s485_s3 + $0x20] sm:$0xff] }
   0x4   :  { %v26_v4 = vadd.f32 %v23_v2, %v22_v1  ;;  %v29_v7 = vadd.f32 %v25_v6, %v24_v5  ;;  %v349_v36 = vld [vmem:[%s485_s3 + $0x60] sm:$0xff]  ;;  %v340_v37 = vld [vmem:[%s485_s3 + $0x18] sm:$0xff]  ;;  %v339_v39 = vld [vmem:[%s485_s3 + $0x10] sm:$0xff] }
   0x5   :  { %v348_v38 = vld [vmem:[%s485_s3 + $0x58] sm:$0xff]  ;;  %v347_v40 = vld [vmem:[%s485_s3 + $0x50] sm:$0xff]  ;;  %v338_v41 = vld [vmem:[%s485_s3 + $0x8] sm:$0xff] }
   0x6   :  { %27 = vadd.xlane.f32.xlu0 %v26_v4  ;;  %238 = vmatpush.bf16.msra.mxu0 %v343_v31  ;;  %v346_v42 = vld [vmem:[%s485_s3 + $0x48] sm:$0xff]  ;;  %v337_v44 = vld [vmem:[%s485_s3] sm:$0xff] }
   0x7   :  { %v361_v9 = vpop.eup %360  ;;  %252 = vmatpush.bf16.msra.mxu1 %v351_v32  ;;  %v345_v45 = vld [vmem:[%s485_s3 + $0x40] sm:$0xff] }
   0x8   :  { %v33_v10 = vmul.f32 256.0, %v361_v9  ;;  %vm37_vm0 = vweird.f32 %v361_v9  ;;  %v83_v62 = vld [vmem:[%s486_s1] sm:$0x3] }
   0x9   :  { %v86_v4 = vperm.slane %v83_v62, 1 }
   0xa   :  { %v34_v11 = vsub.f32 1.0, %v33_v10  ;;  %239 = vmatpush.bf16.msra.mxu0 %v342_v33 }
   0xb   :  { %253 = vmatpush.bf16.msra.mxu1 %v350_v34 }
   0xc   :  { %v35_v12 = vmul.f32 %v361_v9, %v34_v11 }
   0xe   :  { %30 = vadd.xlane.f32.xlu0 %v29_v7  ;;  %v36_v13 = vadd.f32 %v361_v9, %v35_v12  ;;  %240 = vmatpush.bf16.msra.mxu0 %v341_v35 }
   0xf   :  { %254 = vmatpush.bf16.msra.mxu1 %v349_v36 }
  0x10   :  { %v38_v14 = vsel %vm37_vm0, %v361_v9, %v36_v13 }
  0x12   :  { %241 = vmatpush.bf16.msra.mxu0 %v340_v37 }
  0x13   :  { %255 = vmatpush.bf16.msra.mxu1 %v348_v38 }
  0x16   :  { %242 = vmatpush.bf16.msra.mxu0 %v339_v39 }
  0x17   :  { %256 = vmatpush.bf16.msra.mxu1 %v347_v40 }
  0x1a   :  { %243 = vmatpush.bf16.msra.mxu0 %v338_v41 }
  0x1b   :  { %257 = vmatpush.bf16.msra.mxu1 %v346_v42 }
  0x1e   :  { %244 = vmatpush.bf16.msra.mxu0 %v337_v44 }
  0x1f   :  { %258 = vmatpush.bf16.msra.mxu1 %v345_v45 }
  0x79   :  { %v28_v15 = vpop.xlane.xlu0 %27 }
  0x7a   :  { %v39_v16 = vmul.f32 %v38_v14, %v28_v15 }
  0x7c   :  { %v403_v17 = vsub.f32 %v22_v1, %v39_v16  ;;  %v405_v18 = vsub.f32 %v23_v2, %v39_v16  ;;  %v85_v1 = vperm.slane %v83_v62, 0  ;;  %v93_v2 = vld [vmem:[%s487_s2] sm:$0x3] }
  0x7d   :  { %v95_v7 = vperm.slane %v93_v2, 0  ;;  %v96_v8 = vperm.slane %v93_v2, 1 }
  0x7e   :  { %v45_v19 = vmul.f32 %v403_v17, %v403_v17  ;;  %v46_v20 = vmul.f32 %v405_v18, %v405_v18 }
  0x80   :  { %v49_v21 = vadd.f32 %v46_v20, %v45_v19 }
  0x81   :  { %v31_v22 = vpop.xlane.xlu0 %30 }
  0x82   :  { %v40_v23 = vmul.f32 %v38_v14, %v31_v22  ;;  %50 = vadd.xlane.f32.xlu1 %v49_v21 }
  0x84   :  { %v411_v24 = vsub.f32 %v24_v5, %v40_v23  ;;  %v413_v25 = vsub.f32 %v25_v6, %v40_v23  ;;  %v359_v23 = vld [vmem:[%s484_s4] ss:$0 sm:$0xff] }
  0x86   :  { %v47_v26 = vmul.f32 %v411_v24, %v411_v24  ;;  %v48_v27 = vmul.f32 %v413_v25, %v413_v25 }
  0x88   :  { %v52_v28 = vadd.f32 %v48_v27, %v47_v26 }
  0x8a   :  { %53 = vadd.xlane.f32.xlu1 %v52_v28 }
  0xf5   :  { %v51_v43 = vpop.xlane.xlu1 %50 }
  0xf6   :  { %v55_v46 = vmul.f32 %v51_v43, %v38_v14 }
  0xf8   :  { %v57_v47 = vadd.f32 1e-05, %v55_v46 }
  0xfa   :  { %362 = vrsqrt.f32 %v57_v47  ;;  %vm65_vm2 = vweird.f32 %v57_v47 }
  0xfd   :  { %v54_v48 = vpop.xlane.xlu1 %53 }
  0xfe   :  { %v56_v49 = vmul.f32 %v54_v48, %v38_v14 }
 0x100   :  { %v363_v50 = vpop.eup %362  ;;  %v58_v51 = vadd.f32 1e-05, %v56_v49 }
 0x101   :  { %v60_v52 = vmul.f32 %v363_v50, %v57_v47  ;;  %vm66_vm1 = vweird.f32 %v363_v50 }
 0x102   :  { %364 = vrsqrt.f32 %v58_v51  ;;  %vm67_vm3 = vmor %vm65_vm2, %vm66_vm1  ;;  %vm75_vm5 = vweird.f32 %v58_v51 }
 0x103   :  { %v61_v53 = vmul.f32 %v363_v50, %v60_v52 }
 0x105   :  { %v62_v54 = vmul.f32 0.5, %v61_v53 }
 0x107   :  { %v63_v55 = vsub.f32 1.5, %v62_v54 }
 0x108   :  { %v365_v56 = vpop.eup %364 }
 0x109   :  { %v64_v57 = vmul.f32 %v363_v50, %v63_v55  ;;  %v70_v58 = vmul.f32 %v365_v56, %v58_v51  ;;  %vm76_vm4 = vweird.f32 %v365_v56 }
 0x10a   :  { %vm77_vm6 = vmor %vm75_vm5, %vm76_vm4 }
 0x10b   :  { %v71_v59 = vmul.f32 %v365_v56, %v70_v58  ;;  %v68_v61 = vsel %vm67_vm3, %v363_v50, %v64_v57 }
 0x10c   :  { %v79_v0 = vmul.f32 %v68_v61, %v403_v17  ;;  %v80_v3 = vmul.f32 %v68_v61, %v405_v18 }
 0x10d   :  { %v72_v60 = vmul.f32 0.5, %v71_v59 }
 0x10e   :  { %v89_v10 = vmul.f32 %v85_v1, %v79_v0  ;;  %v90_v12 = vmul.f32 %v86_v4, %v80_v3 }
 0x10f   :  { %v73_v63 = vsub.f32 1.5, %v72_v60 }
 0x110   :  { %v99_v15 = vadd.f32 %v95_v7, %v89_v10  ;;  %v100_v17 = vadd.f32 %v96_v8, %v90_v12 }
 0x111   :  { %v74_v5 = vmul.f32 %v365_v56, %v73_v63 }
 0x113   :  { %v78_v6 = vsel %vm77_vm6, %v365_v56, %v74_v5 }
 0x114   :  { %v81_v9 = vmul.f32 %v78_v6, %v411_v24  ;;  %v82_v11 = vmul.f32 %v78_v6, %v413_v25 }
 0x116   :  { %v91_v13 = vmul.f32 %v85_v1, %v81_v9  ;;  %v92_v14 = vmul.f32 %v86_v4, %v82_v11 }
 0x118   :  { %v101_v16 = vadd.f32 %v95_v7, %v91_v13  ;;  %v102_v19 = vadd.f32 %v96_v8, %v92_v14 }
 0x11a   :  { %v103_v18 = vpack.c.bf16 %v101_v16, %v99_v15  ;;  %v104_v20 = vpack.c.bf16 %v102_v19, %v100_v17 }
 0x11c   :  { %245 = vmatmul.bf16.vlgmr.msra.gmra.mxu0 %v103_v18  ;;  %259 = vmatmul.bf16.vlgmr.msra.gmra.mxu1 %v104_v20 }
 0x199   :  { %v246_v21 = vpop.f32.mrf.mxu0  ;;  %v260_v22 = vpop.f32.mrf.mxu1 }
 0x19a   :  { %v247_v24 = vadd.f32 %v359_v23, %v246_v21 }
 0x19c   :  { %v261_v28 = vadd.f32 %v260_v22, %v247_v24 }
 0x1a1   :  { %v248_v26 = vpop.f32.mrf.mxu0  ;;  %v262_v27 = vpop.f32.mrf.mxu1 }
 0x1a2   :  { %v249_v25 = vadd.f32 %v359_v23, %v248_v26 }
 0x1a4   :  { %v263_v29 = vadd.f32 %v262_v27, %v249_v25 }
 0x1a6   :  { %v356_v30 = vpack.c.bf16 %v263_v29, %v261_v28 }
 0x1a8   :  { %357 = vst [vmem:[%s488_s5] sm:$0xff] %v356_v30  }

// kernel: _lambda_.53
= control target key start
LH: loop header
LB: loop body
LE: loop exit
PB: predicated region body
PF: predicated region fallthrough
CT: control target
= control target key end

     0   :  { %vm31_vm0 = vcmask 523264   ;;  %v579_v5 = vmov 64.0   ;;  %vm103_vm6 = vcmask 519168   ;;  %s772_s0 = inlined_call_operand.vmem [shape: bf16[16,64], index: 0, kind: input, shape index: {}]   ;;  %s773_s1 = inlined_call_operand.vmem [shape: f32[1,64], index: 1, kind: input, shape index: {}]   ;;  %s774_s2 = inlined_call_operand.vmem [shape: f32[1,64], index: 2, kind: input, shape index: {}]   ;;  %s775_s3 = inlined_call_operand.vmem [shape: bf16[64,256], index: 3, kind: input, shape index: {}]   ;;  %s776_s5 = inlined_call_operand.vmem [shape: bf16[256,64], index: 5, kind: input, shape index: {}]   ;;  %s777_s4 = inlined_call_operand.vmem [shape: f32[1,256], index: 4, kind: input, shape index: {}]   ;;  %s778_s6 = inlined_call_operand.vmem [shape: f32[1,64], index: 6, kind: input, shape index: {}]   ;;  %s779_s7 = inlined_call_operand.vmem [shape: bf16[16,64], index: 7, kind: output, shape index: {}]  }
   0x1   :  { %v553_v0 = vld [vmem:[%s772_s0] sm:$0xff]   ;;  %565 = vrcp.f32 %v579_v5  ;;  %v455_v22 = vld [vmem:[%s775_s3 + $0x30] sm:$0xf]  ;;  %v535_v23 = vld [vmem:[%s775_s3 + $0x34] sm:$0xf0] }
   0x2   :  { %v624_v1 = vunpack.c.l.bf16 %v553_v0  ;;  %v628_v3 = vunpack.c.h.bf16 %v553_v0  ;;  %v534_v24 = vld [vmem:[%s775_s3 + $0x34] sm:$0xf]  ;;  %v456_v25 = vor.u32 %v535_v23, %v455_v22  ;;  %v457_v26 = vld [vmem:[%s775_s3 + $0x38] sm:$0xf0]  ;;  %v447_v30 = vld [vmem:[%s775_s3 + $0x20] sm:$0xf] }
   0x3   :  { %v460_v28 = vor.u32 %v534_v24, %v457_v26  ;;  %v533_v31 = vld [vmem:[%s775_s3 + $0x24] sm:$0xf0]  ;;  %v532_v32 = vld [vmem:[%s775_s3 + $0x24] sm:$0xf]  ;;  %v449_v35 = vld [vmem:[%s775_s3 + $0x28] sm:$0xf0] }
   0x4   :  { %v38_v2 = vsel %vm31_vm0, %v624_v1, 0.0  ;;  %v41_v4 = vsel %vm31_vm0, %v628_v3, 0.0  ;;  %175 = vmatpush.bf16.msra.mxu0 %v456_v25  ;;  %v448_v34 = vor.u32 %v533_v31, %v447_v30  ;;  %v452_v36 = vor.u32 %v532_v32, %v449_v35  ;;  %v439_v37 = vld [vmem:[%s775_s3 + $0x10] sm:$0xf]  ;;  %v531_v38 = vld [vmem:[%s775_s3 + $0x14] sm:$0xf0] }
   0x5   :  { %39 = vadd.xlane.f32.xlu0 %v38_v2  ;;  %189 = vmatpush.bf16.msra.mxu1 %v460_v28  ;;  %v530_v39 = vld [vmem:[%s775_s3 + $0x14] sm:$0xf]  ;;  %v440_v40 = vor.u32 %v531_v38, %v439_v37  ;;  %v441_v41 = vld [vmem:[%s775_s3 + $0x18] sm:$0xf0]  ;;  %v431_v42 = vld [vmem:[%s775_s3] sm:$0xf] }
   0x6   :  { %v529_v43 = vld [vmem:[%s775_s3 + $0x4] sm:$0xf0]  ;;  %v444_v45 = vor.u32 %v530_v39, %v441_v41  ;;  %v528_v46 = vld [vmem:[%s775_s3 + $0x4] sm:$0xf]  ;;  %v433_v47 = vld [vmem:[%s775_s3 + $0x8] sm:$0xf0] }
   0x7   :  { %v566_v6 = vpop.eup %565  ;;  %v432_v49 = vor.u32 %v529_v43, %v431_v42  ;;  %v436_v50 = vor.u32 %v528_v46, %v433_v47  ;;  %v562_v60 = vld [vmem:[%s773_s1] ss:$0 sm:$0xff]  ;;  %v539_v23 = vld [vmem:[%s776_s5 + $0x18] sm:$0xff]  ;;  %v538_v25 = vld [vmem:[%s776_s5 + $0x10] sm:$0xff] }
   0x8   :  { %v45_v7 = vmul.f32 64.0, %v566_v6  ;;  %vm49_vm1 = vweird.f32 %v566_v6  ;;  %176 = vmatpush.bf16.msra.mxu0 %v448_v34  ;;  %v563_v63 = vld [vmem:[%s774_s2] ss:$0 sm:$0xff]  ;;  %v547_v24 = vld [vmem:[%s776_s5 + $0x58] sm:$0xff]  ;;  %v546_v26 = vld [vmem:[%s776_s5 + $0x50] sm:$0xff] }
   0x9   :  { %190 = vmatpush.bf16.msra.mxu1 %v452_v36  ;;  %v548_v22 = vld [vmem:[%s776_s5 + $0x60] sm:$0xff]  ;;  %v545_v28 = vld [vmem:[%s776_s5 + $0x48] sm:$0xff] }
   0xa   :  { %v46_v8 = vsub.f32 1.0, %v45_v7  ;;  %v536_v30 = vld [vmem:[%s776_s5] sm:$0xff] }
   0xb   :  { %v544_v31 = vld [vmem:[%s776_s5 + $0x40] sm:$0xff] }
   0xc   :  { %v47_v9 = vmul.f32 %v566_v6, %v46_v8  ;;  %177 = vmatpush.bf16.msra.mxu0 %v440_v40 }
   0xd   :  { %42 = vadd.xlane.f32.xlu0 %v41_v4  ;;  %191 = vmatpush.bf16.msra.mxu1 %v444_v45 }
   0xe   :  { %v48_v10 = vadd.f32 %v566_v6, %v47_v9 }
  0x10   :  { %v50_v11 = vsel %vm49_vm1, %v566_v6, %v48_v10  ;;  %178 = vmatpush.bf16.msra.mxu0 %v432_v49 }
  0x11   :  { %192 = vmatpush.bf16.msra.mxu1 %v436_v50 }
  0x78   :  { %v40_v12 = vpop.xlane.xlu0 %39 }
  0x79   :  { %v51_v13 = vmul.f32 %v50_v11, %v40_v12 }
  0x7b   :  { %v633_v14 = vsub.f32 %v624_v1, %v51_v13 }
  0x7d   :  { %v55_v15 = vmul.f32 %v633_v14, %v633_v14 }
  0x7f   :  { %v57_v16 = vsel %vm31_vm0, %v55_v15, 0.0  ;;  %v543_v15 = vld [vmem:[%s776_s5 + $0x38] sm:$0xff] }
  0x80   :  { %58 = vadd.xlane.f32.xlu1 %v57_v16  ;;  %v43_v17 = vpop.xlane.xlu0 %42  ;;  %v551_v16 = vld [vmem:[%s776_s5 + $0x78] sm:$0xff]  ;;  %367 = vmatpush.bf16.msra.mxu2 %v543_v15 }
  0x81   :  { %v52_v18 = vmul.f32 %v50_v11, %v43_v17  ;;  %381 = vmatpush.bf16.msra.mxu3 %v551_v16  ;;  %v542_v17 = vld [vmem:[%s776_s5 + $0x30] sm:$0xff] }
  0x83   :  { %v639_v19 = vsub.f32 %v628_v3, %v52_v18  ;;  %v550_v18 = vld [vmem:[%s776_s5 + $0x70] sm:$0xff] }
  0x84   :  { %368 = vmatpush.bf16.msra.mxu2 %v542_v17 }
  0x85   :  { %v56_v20 = vmul.f32 %v639_v19, %v639_v19  ;;  %382 = vmatpush.bf16.msra.mxu3 %v550_v18  ;;  %v580_v18 = vmov 0.0  }
  0x86   :  { %32 = vst.msk [vmem:[#allocation2] sm:$0xff] %vm31_vm0, %v580_v18 }
  0x87   :  { %v60_v21 = vsel %vm31_vm0, %v56_v20, 0.0  ;;  %v549_v20 = vld [vmem:[%s776_s5 + $0x68] sm:$0xff]  ;;  %33 = vst.msk [vmem:[#allocation2 + $0x8] sm:$0xff] %vm31_vm0, %v580_v18 }
  0x88   :  { %61 = vadd.xlane.f32.xlu1 %v60_v21  ;;  %v540_v21 = vld [vmem:[%s776_s5 + $0x20] sm:$0xff] }
  0x89   :  { %383 = vmatpush.bf16.msra.mxu3 %v549_v20 }
  0x8d   :  { %384 = vmatpush.bf16.msra.mxu3 %v548_v22  ;;  %v235_v20 = vld [vmem:[#allocation2] sm:$0xff] }
  0x91   :  { %385 = vmatpush.bf16.msra.mxu3 %v547_v24 }
  0x95   :  { %386 = vmatpush.bf16.msra.mxu3 %v546_v26 }
  0x99   :  { %387 = vmatpush.bf16.msra.mxu3 %v545_v28  ;;  %v564_v28 = vld [vmem:[%s778_s6] ss:$0 sm:$0xff] }
  0x9d   :  { %388 = vmatpush.bf16.msra.mxu3 %v544_v31 }
  0xf3   :  { %v59_v27 = vpop.xlane.xlu1 %58 }
  0xf4   :  { %v63_v29 = vmul.f32 %v59_v27, %v50_v11  ;;  %v537_v27 = vld [vmem:[%s776_s5 + $0x8] sm:$0xff] }
  0xf6   :  { %v65_v33 = vadd.f32 1e-05, %v63_v29  ;;  %v116_v29 = vld [vmem:[%s777_s4] sm:$0x3] }
  0xf7   :  { %v118_v32 = vperm.slane %v116_v29, 0 }
  0xf8   :  { %567 = vrsqrt.f32 %v65_v33  ;;  %vm73_vm3 = vweird.f32 %v65_v33 }
  0xfb   :  { %v62_v44 = vpop.xlane.xlu1 %61 }
  0xfc   :  { %v64_v48 = vmul.f32 %v62_v44, %v50_v11 }
  0xfe   :  { %v568_v51 = vpop.eup %567  ;;  %v66_v52 = vadd.f32 1e-05, %v64_v48 }
  0xff   :  { %v68_v53 = vmul.f32 %v568_v51, %v65_v33  ;;  %vm74_vm2 = vweird.f32 %v568_v51  ;;  %v119_v33 = vperm.slane %v116_v29, 1 }
 0x100   :  { %569 = vrsqrt.f32 %v66_v52  ;;  %vm75_vm4 = vmor %vm73_vm3, %vm74_vm2  ;;  %vm83_vm7 = vweird.f32 %v66_v52 }
 0x101   :  { %v69_v54 = vmul.f32 %v568_v51, %v68_v53 }
 0x103   :  { %v70_v55 = vmul.f32 0.5, %v69_v54 }
 0x105   :  { %v71_v56 = vsub.f32 1.5, %v70_v55 }
 0x106   :  { %v570_v57 = vpop.eup %569 }
 0x107   :  { %v72_v58 = vmul.f32 %v568_v51, %v71_v56  ;;  %v78_v59 = vmul.f32 %v570_v57, %v66_v52  ;;  %vm84_vm5 = vweird.f32 %v570_v57 }
 0x108   :  { %vm85_vm8 = vmor %vm83_vm7, %vm84_vm5 }
 0x109   :  { %v76_v61 = vsel %vm75_vm4, %v568_v51, %v72_v58  ;;  %v79_v62 = vmul.f32 %v570_v57, %v78_v59 }
 0x10a   :  { %v87_v0 = vmul.f32 %v76_v61, %v633_v14 }
 0x10b   :  { %v80_v2 = vmul.f32 0.5, %v79_v62 }
 0x10c   :  { %v93_v4 = vmul.f32 %v562_v60, %v87_v0 }
 0x10d   :  { %v81_v5 = vsub.f32 1.5, %v80_v2 }
 0x10e   :  { %v99_v6 = vadd.f32 %v563_v63, %v93_v4 }
 0x10f   :  { %v82_v7 = vmul.f32 %v570_v57, %v81_v5 }
 0x110   :  { %v101_v8 = vpack.c.bf16 %v99_v6, %v99_v6 }
 0x111   :  { %v86_v9 = vsel %vm85_vm8, %v570_v57, %v82_v7 }
 0x112   :  { %104 = vst.msk [vmem:[#allocation3] sm:$0xf] %vm103_vm6, %v101_v8  ;;  %v88_v10 = vmul.f32 %v86_v9, %v639_v19  ;;  %v541_v19 = vld [vmem:[%s776_s5 + $0x28] sm:$0xff] }
 0x113   :  { %369 = vmatpush.bf16.msra.mxu2 %v541_v19 }
 0x114   :  { %v94_v11 = vmul.f32 %v562_v60, %v88_v10 }
 0x116   :  { %v100_v12 = vadd.f32 %v563_v63, %v94_v11 }
 0x117   :  { %370 = vmatpush.bf16.msra.mxu2 %v540_v21 }
 0x118   :  { %v102_v13 = vpack.c.bf16 %v100_v12, %v100_v12 }
 0x11a   :  { %105 = vst.msk [vmem:[#allocation3 + $0x4] sm:$0xf] %vm103_vm6, %v102_v13 }
 0x11b   :  { %371 = vmatpush.bf16.msra.mxu2 %v539_v23 }
 0x11f   :  { %372 = vmatpush.bf16.msra.mxu2 %v538_v25  ;;  %v236_v25 = vld [vmem:[#allocation2 + $0x8] sm:$0xff] }
 0x121   :  { %v527_v14 = vld [vmem:[#allocation3] sm:$0xff] }
 0x122   :  { %461 = vmatmul.msk.bf16.vlgmr.msra.gmra.mxu0 %vm31_vm0, %v527_v14  ;;  %462 = vmatmul.msk.bf16.vlgmr.msra.gmra.mxu1 %vm31_vm0, %v527_v14 }
 0x123   :  { %373 = vmatpush.bf16.msra.mxu2 %v537_v27 }
 0x127   :  { %374 = vmatpush.bf16.msra.mxu2 %v536_v30 }
 0x19f   :  { %v180_v34 = vpop.f32.mrf.mxu0  ;;  %v194_v35 = vpop.f32.mrf.mxu1 }
 0x1a0   :  { %v181_v36 = vadd.f32 %v180_v34, %v118_v32  ;;  %v195_v37 = vadd.f32 %v194_v35, %v119_v33 }
 0x1a2   :  { %v203_v38 = vmul.f32 0.044715, %v181_v36  ;;  %v204_v39 = vmul.f32 0.044715, %v195_v37  ;;  %v199_v6 = vmul.f32 0.5, %v181_v36  ;;  %v200_v9 = vmul.f32 0.5, %v195_v37 }
 0x1a4   :  { %v207_v40 = vmul.f32 %v203_v38, %v181_v36  ;;  %v208_v41 = vmul.f32 %v204_v39, %v195_v37 }
 0x1a6   :  { %v211_v42 = vmul.f32 %v207_v40, %v181_v36  ;;  %v212_v43 = vmul.f32 %v208_v41, %v195_v37 }
 0x1a7   :  { %v182_v44 = vpop.f32.mrf.mxu0  ;;  %v196_v45 = vpop.f32.mrf.mxu1 }
 0x1a8   :  { %v183_v46 = vadd.f32 %v182_v44, %v118_v32  ;;  %v197_v47 = vadd.f32 %v196_v45, %v119_v33  ;;  %v215_v48 = vadd.f32 %v211_v42, %v181_v36  ;;  %v216_v49 = vadd.f32 %v212_v43, %v195_v37 }
 0x1aa   :  { %v205_v50 = vmul.f32 0.044715, %v183_v46  ;;  %v206_v51 = vmul.f32 0.044715, %v197_v47  ;;  %v219_v53 = vmul.f32 0.7978846, %v215_v48 }
 0x1ab   :  { %v220_v55 = vmul.f32 0.7978846, %v216_v49  ;;  %v201_v7 = vmul.f32 0.5, %v183_v46  ;;  %v202_v10 = vmul.f32 0.5, %v197_v47 }
 0x1ac   :  { %v209_v52 = vmul.f32 %v205_v50, %v183_v46  ;;  %v210_v54 = vmul.f32 %v206_v51, %v197_v47  ;;  %571 = vtanh.f32 %v219_v53 }
 0x1ad   :  { %573 = vtanh.f32 %v220_v55 }
 0x1ae   :  { %v213_v56 = vmul.f32 %v209_v52, %v183_v46  ;;  %v214_v57 = vmul.f32 %v210_v54, %v197_v47 }
 0x1b0   :  { %v217_v58 = vadd.f32 %v213_v56, %v183_v46  ;;  %v218_v59 = vadd.f32 %v214_v57, %v197_v47 }
 0x1b2   :  { %v221_v60 = vmul.f32 0.7978846, %v217_v58  ;;  %v222_v61 = vmul.f32 0.7978846, %v218_v59  ;;  %v572_v62 = vpop.eup %571 }
 0x1b3   :  { %v574_v63 = vpop.eup %573  ;;  %v227_v0 = vadd.f32 1.0, %v572_v62 }
 0x1b4   :  { %575 = vtanh.f32 %v221_v60  ;;  %v228_v4 = vadd.f32 1.0, %v574_v63 }
 0x1b5   :  { %577 = vtanh.f32 %v222_v61  ;;  %v231_v12 = vmul.f32 %v227_v0, %v199_v6 }
 0x1b6   :  { %v232_v14 = vmul.f32 %v228_v4, %v200_v9 }
 0x1ba   :  { %v576_v2 = vpop.eup %575 }
 0x1bb   :  { %v578_v5 = vpop.eup %577  ;;  %v229_v8 = vadd.f32 1.0, %v576_v2 }
 0x1bc   :  { %v230_v11 = vadd.f32 1.0, %v578_v5 }
 0x1bd   :  { %v233_v13 = vmul.f32 %v229_v8, %v201_v7 }
 0x1be   :  { %v234_v15 = vmul.f32 %v230_v11, %v202_v10 }
 0x1bf   :  { %v237_v16 = vpack.c.bf16 %v233_v13, %v231_v12 }
 0x1c0   :  { %v238_v17 = vpack.c.bf16 %v234_v15, %v232_v14 }
 0x1c1   :  { %375 = vmatmul.bf16.vlgmr.msra.gmra.mxu2 %v237_v16 }
 0x1c2   :  { %389 = vmatmul.bf16.vlgmr.msra.gmra.mxu3 %v238_v17 }
 0x244   :  { %v376_v19 = vpop.f32.mrf.mxu2 }
 0x245   :  { %v390_v21 = vpop.f32.mrf.mxu3 }
 0x246   :  { %v391_v22 = vadd.f32 %v390_v21, %v376_v19 }
 0x248   :  { %v395_v23 = vadd.f32 %v391_v22, %v235_v20 }
 0x24a   :  { %397 = vst.msk [vmem:[#allocation2] sm:$0xff] %vm31_vm0, %v395_v23 }
 0x24c   :  { %v378_v24 = vpop.f32.mrf.mxu2 }
 0x24d   :  { %v392_v26 = vpop.f32.mrf.mxu3 }
 0x24e   :  { %v393_v27 = vadd.f32 %v392_v26, %v378_v24 }
 0x250   :  { %v396_v29 = vadd.f32 %v393_v27, %v236_v25 }
 0x251   :  { %v406_v30 = vld [vmem:[#allocation2] sm:$0xff] }
 0x252   :  { %v408_v31 = vadd.f32 %v624_v1, %v406_v30  ;;  %398 = vst.msk [vmem:[#allocation2 + $0x8] sm:$0xff] %vm31_vm0, %v396_v29 }
 0x254   :  { %v414_v32 = vadd.f32 %v564_v28, %v408_v31 }
 0x256   :  { %v416_v33 = vpack.c.bf16 %v414_v32, %v414_v32 }
 0x258   :  { %419 = vst.msk [vmem:[%s779_s7] sm:$0xf] %vm103_vm6, %v416_v33 }
 0x259   :  { %v407_v34 = vld [vmem:[#allocation2 + $0x8] sm:$0xff] }
 0x25a   :  { %v409_v35 = vadd.f32 %v628_v3, %v407_v34 }
 0x25c   :  { %v415_v36 = vadd.f32 %v564_v28, %v409_v35 }
 0x25e   :  { %v417_v37 = vpack.c.bf16 %v415_v36, %v415_v36 }
 0x260   :  { %420 = vst.msk [vmem:[%s779_s7 + $0x4] sm:$0xf] %vm103_vm6, %v417_v37 }

// kernel: _lambda_.55
= control target key start
LH: loop header
LB: loop body
LE: loop exit
PB: predicated region body
PF: predicated region fallthrough
CT: control target
= control target key end

     0   :  { %s855_s18 = smov 0   ;;  %s857_s19 = smov 0   ;;  %s971_s0 = inlined_call_operand.vmem [shape: bf16[16,128], index: 0, kind: input, shape index: {}]   ;;  %s972_s1 = inlined_call_operand.vmem [shape: f32[1,128], index: 1, kind: input, shape index: {}]   ;;  %s973_s2 = inlined_call_operand.vmem [shape: f32[1,128], index: 2, kind: input, shape index: {}]   ;;  %s974_s3 = inlined_call_operand.vmem [shape: bf16[128,384], index: 3, kind: input, shape index: {}]   ;;  %s975_s4 = inlined_call_operand.vmem [shape: f32[1,384], index: 4, kind: input, shape index: {}]   ;;  %s976_s5 = inlined_call_operand.vmem [shape: bf16[16,384], index: 5, kind: output, shape index: {}]  }
   0x1   :  { %s859_s20 = smov 0   ;;  %s861_s21 = smov 0  }
   0x2   :  { %s863_s22 = smov 0  }
   0x3 LB: > { %s24_s23 = sadd.s32 1, %s818_s21  ;;  %s671_s24 = sadd.s32 4294967295, %s822_s22   ;;  %s822_s22 = sphi %s863_s22, %s15_s22   ;;  %s818_s21 = sphi %s861_s21, %s981_s21   ;;  %s814_s20 = sphi %s859_s20, %s980_s20   ;;  %s810_s19 = sphi %s857_s19, %s979_s19   ;;  %s806_s18 = sphi %s855_s18, %s978_s18  }
   0x4   : > { %p25_p0 = scmp.ge.s32.totalorder %s24_s23, 3  ;;  %p109_p1 = scmp.ne.s32.totalorder %s810_s19, %s806_s18 }
   0x5   : > { %p110_p2 = scmp.eq.s32.totalorder %s822_s22, 0  ;;  %p167_p4 = scmp.eq.s32.totalorder %s671_s24, 2 }
   0x6   : > { %s983_s23 = smov (%p25_p0, %s24_s23), 0  ;;  %s102_s26 = sadd.s32 1, %s810_s19 }
   0x7   : > { %p111_p3 = por %p110_p2, %p109_p1  ;;  %s99_s25 = ssub.s32 %s818_s21, %s983_s23 }
   0x8   : > { %p100_p5 = scmp.eq.s32.totalorder %s99_s25, 0  ;;  %p890_p6 = por %p167_p4, %p109_p1 }
   0x9   : > { %p675_p7 = scmp.ge.s32.totalorder %s822_s22, 3 }
   0xa   : > { %s895_s28 = scalar_select %p100_p5, %s810_s19, %s102_s26  }
   0xb   : > { %204 = sbr.rel (%p675_p7) target bundleno = 36 (0x24), region = 28 }
  0x10   : > { %207 = sbr.rel (!%p111_p3) target bundleno = 36 (0x24), region = 32  ;;  %s209_s29 = sand.u32 (%p111_p3), 1, %s810_s19  }
  0x11   : > { %s677_s30 = sshll.u32 (%p111_p3), %s818_s21, 2  ;;  %s676_s6 = sshll.u32 (%p111_p3), %s209_s29, 6 }
  0x12   : > { %s903_s9 = scalar_lea.vmem (%p111_p3), %s974_s3, %s677_s30  ;;  %s211_s10 = scalar_lea.vmem (%p111_p3), [#allocation2], %s676_s6 }
  0x13   : > { %v230_v0 = vld [vmem:[%s903_s9] sm:$0xf] (%p111_p3)  ;;  %v232_v1 = vld [vmem:[%s903_s9 + $0xc] sm:$0xf] (%p111_p3)  ;;  %v234_v2 = vld [vmem:[%s903_s9 + $0x18] sm:$0xf] (%p111_p3) }
  0x14   : > { %231 = vst [vmem:[%s211_s10] sm:$0xf] (%p111_p3), %v230_v0  ;;  %v236_v3 = vld [vmem:[%s903_s9 + $0x24] sm:$0xf] (%p111_p3)  ;;  %v238_v4 = vld [vmem:[%s903_s9 + $0x30] sm:$0xf] (%p111_p3) }
  0x15   : > { %233 = vst [vmem:[%s211_s10 + $0x4] sm:$0xf] %v232_v1  ;;  %v240_v5 = vld [vmem:[%s903_s9 + $0x3c] sm:$0xf]  ;;  %v242_v6 = vld [vmem:[%s903_s9 + $0x48] sm:$0xf] }
  0x16   : > { %235 = vst [vmem:[%s211_s10 + $0x8] sm:$0xf] %v234_v2  ;;  %v244_v7 = vld [vmem:[%s903_s9 + $0x54] sm:$0xf]  ;;  %v246_v8 = vld [vmem:[%s903_s9 + $0x60] sm:$0xf] }
  0x17   : > { %237 = vst [vmem:[%s211_s10 + $0xc] sm:$0xf] %v236_v3  ;;  %v248_v9 = vld [vmem:[%s903_s9 + $0x6c] sm:$0xf]  ;;  %v250_v10 = vld [vmem:[%s903_s9 + $0x78] sm:$0xf] }
  0x18   : > { %239 = vst [vmem:[%s211_s10 + $0x10] sm:$0xf] %v238_v4  ;;  %v252_v11 = vld [vmem:[%s903_s9 + $0x84] sm:$0xf]  ;;  %v254_v12 = vld [vmem:[%s903_s9 + $0x90] sm:$0xf] }
  0x19   : > { %241 = vst [vmem:[%s211_s10 + $0x14] sm:$0xf] %v240_v5  ;;  %v256_v13 = vld [vmem:[%s903_s9 + $0x9c] sm:$0xf]  ;;  %v258_v14 = vld [vmem:[%s903_s9 + $0xa8] sm:$0xf] }
  0x1a   : > { %243 = vst [vmem:[%s211_s10 + $0x18] sm:$0xf] %v242_v6  ;;  %v260_v15 = vld [vmem:[%s903_s9 + $0xb4] sm:$0xf] }
  0x1b   : > { %245 = vst [vmem:[%s211_s10 + $0x1c] sm:$0xf] %v244_v7 }
  0x1c   : > { %247 = vst [vmem:[%s211_s10 + $0x20] sm:$0xf] %v246_v8 }
  0x1d   : > { %249 = vst [vmem:[%s211_s10 + $0x24] sm:$0xf] %v248_v9 }
  0x1e   : > { %251 = vst [vmem:[%s211_s10 + $0x28] sm:$0xf] %v250_v10 }
  0x1f   : > { %253 = vst [vmem:[%s211_s10 + $0x2c] sm:$0xf] %v252_v11 }
  0x20   : > { %255 = vst [vmem:[%s211_s10 + $0x30] sm:$0xf] %v254_v12 }
  0x21   : > { %257 = vst [vmem:[%s211_s10 + $0x34] sm:$0xf] %v256_v13 }
  0x22   : > { %259 = vst [vmem:[%s211_s10 + $0x38] sm:$0xf] %v258_v14 }
  0x23   : > { %261 = vst [vmem:[%s211_s10 + $0x3c] sm:$0xf] %v260_v15 }
  0x24 PF: > { %p678_p8 = scmp.ge.s32.totalorder %s822_s22, 1  ;;  %p322_p9 = scmp.lt.s32.totalorder %s822_s22, 4 }
  0x26   : > { %p323_p10 = pnand %p678_p8, %p322_p9 }
  0x27   : > { %p369_p11 = scmp.lt.s32.totalorder (!%p323_p10), %s814_s20, 2  ;;  %s329_s17 = sand.u32 (!%p323_p10), 1, %s806_s18  }
  0x28   : > { %326 = sbr.rel (%p323_p10) target bundleno = 472 (0x1d8), region = 77  ;;  %s679_s24 = sshll.u32 (!%p323_p10), %s329_s17, 6 }
  0x29   : > { %s331_s25 = scalar_lea.vmem (!%p323_p10), [#allocation2], %s679_s24  ;;  %s680_s9 = sshll.u32 (!%p323_p10), %s329_s17, 3 }
  0x2a   : > { %s362_s10 = scalar_lea.vmem (!%p323_p10), [#allocation3], %s680_s9 }
  0x2d   : > { %v726_v16 = vld [vmem:[%s971_s0] sm:$0xff]   ;;  %v824_v19 = vmov 128.0   ;;  %s928_s13 = scalar_select %p369_p11, %s814_s20, 2  ;;  %v724_v34 = vld [vmem:[%s331_s25 + $0x38] sm:$0xff]  ;;  %v723_v35 = vld [vmem:[%s331_s25 + $0x30] sm:$0xff] }
  0x2e   : > { %v727_v17 = vunpack.c.l.bf16 %v726_v16  ;;  %v728_v18 = vunpack.c.h.bf16 %v726_v16  ;;  %778 = vrcp.f32 %v824_v19  ;;  %505 = vmatpush.bf16.msra.mxu0 %v724_v34  ;;  %v722_v36 = vld [vmem:[%s331_s25 + $0x28] sm:$0xff]  ;;  %v721_v37 = vld [vmem:[%s331_s25 + $0x20] sm:$0xff]  ;;  %v720_v38 = vld [vmem:[%s331_s25 + $0x18] sm:$0xff]  ;;  %s714_s11 = sshll.u32 (%p890_p6), %s814_s20, 2 }
  0x2f   : > { %s371_s16 = scalar_lea.vmem %s975_s4, %s928_s13  ;;  %v719_v39 = vld [vmem:[%s331_s25 + $0x10] sm:$0xff]  ;;  %v718_v40 = vld [vmem:[%s331_s25 + $0x8] sm:$0xff]  ;;  %v717_v42 = vld [vmem:[%s331_s25] sm:$0xff]  ;;  %s534_s13 = scalar_lea.vmem (%p890_p6), %s976_s5, %s714_s11 }
  0x30   : > { %377 = vadd.xlane.f32.xlu0 %v727_v17  ;;  %v775_v61 = vld [vmem:[%s972_s1] ss:$0 sm:$0xff] }
  0x31   : > { %v776_v2 = vld [vmem:[%s973_s2] ss:$0 sm:$0xff] }
  0x32   : > { %506 = vmatpush.bf16.msra.mxu0 %v723_v35  ;;  %v777_v8 = vld [vmem:[%s371_s16] ss:$0 sm:$0xff] }
  0x34   : > { %v779_v20 = vpop.eup %778 }
  0x35   : > { %v382_v21 = vmul.f32 128.0, %v779_v20  ;;  %vm386_vm0 = vweird.f32 %v779_v20 }
  0x36   : > { %507 = vmatpush.bf16.msra.mxu0 %v722_v36 }
  0x37   : > { %v383_v22 = vsub.f32 1.0, %v382_v21 }
  0x38   : > { %379 = vadd.xlane.f32.xlu0 %v728_v18 }
  0x39   : > { %v384_v23 = vmul.f32 %v779_v20, %v383_v22 }
  0x3a   : > { %508 = vmatpush.bf16.msra.mxu0 %v721_v37 }
  0x3b   : > { %v385_v24 = vadd.f32 %v779_v20, %v384_v23 }
  0x3d   : > { %v387_v25 = vsel %vm386_vm0, %v779_v20, %v385_v24 }
  0x3e   : > { %509 = vmatpush.bf16.msra.mxu0 %v720_v38 }
  0x42   : > { %510 = vmatpush.bf16.msra.mxu0 %v719_v39 }
  0x46   : > { %511 = vmatpush.bf16.msra.mxu0 %v718_v40 }
  0x4a   : > { %512 = vmatpush.bf16.msra.mxu0 %v717_v42 }
  0xa3   : > { %v378_v26 = vpop.xlane.xlu0 %377 }
  0xa4   : > { %v388_v27 = vmul.f32 %v387_v25, %v378_v26 }
  0xa6   : > { %v390_v28 = vsub.f32 %v727_v17, %v388_v27 }
  0xa8   : > { %v392_v29 = vmul.f32 %v390_v28, %v390_v28 }
  0xaa   : > { %394 = vadd.xlane.f32.xlu1 %v392_v29 }
  0xab   : > { %v380_v30 = vpop.xlane.xlu0 %379 }
  0xac   : > { %v389_v31 = vmul.f32 %v387_v25, %v380_v30 }
  0xae   : > { %v391_v32 = vsub.f32 %v728_v18, %v389_v31 }
  0xb0   : > { %v393_v33 = vmul.f32 %v391_v32, %v391_v32 }
  0xb2   : > { %396 = vadd.xlane.f32.xlu1 %v393_v33 }
 0x11d   : > { %v395_v41 = vpop.xlane.xlu1 %394 }
 0x11e   : > { %v398_v43 = vmul.f32 %v395_v41, %v387_v25 }
 0x120   : > { %v400_v44 = vadd.f32 1e-05, %v398_v43 }
 0x122   : > { %780 = vrsqrt.f32 %v400_v44  ;;  %vm408_vm2 = vweird.f32 %v400_v44 }
 0x125   : > { %v397_v45 = vpop.xlane.xlu1 %396 }
 0x126   : > { %v399_v46 = vmul.f32 %v397_v45, %v387_v25 }
 0x128   : > { %v781_v47 = vpop.eup %780  ;;  %v401_v48 = vadd.f32 1e-05, %v399_v46 }
 0x129   : > { %v403_v49 = vmul.f32 %v781_v47, %v400_v44  ;;  %vm409_vm1 = vweird.f32 %v781_v47 }
 0x12a   : > { %782 = vrsqrt.f32 %v401_v48  ;;  %vm410_vm3 = vmor %vm408_vm2, %vm409_vm1  ;;  %vm418_vm5 = vweird.f32 %v401_v48 }
 0x12b   : > { %v404_v50 = vmul.f32 %v781_v47, %v403_v49 }
 0x12d   : > { %v405_v51 = vmul.f32 0.5, %v404_v50 }
 0x12f   : > { %v406_v52 = vsub.f32 1.5, %v405_v51 }
 0x130   : > { %v783_v53 = vpop.eup %782 }
 0x131   : > { %v407_v54 = vmul.f32 %v781_v47, %v406_v52  ;;  %v413_v55 = vmul.f32 %v783_v53, %v401_v48  ;;  %vm419_vm4 = vweird.f32 %v783_v53 }
 0x132   : > { %vm420_vm6 = vmor %vm418_vm5, %vm419_vm4 }
 0x133   : > { %v414_v56 = vmul.f32 %v783_v53, %v413_v55  ;;  %v411_v58 = vsel %vm410_vm3, %v781_v47, %v407_v54 }
 0x134   : > { %v422_v60 = vmul.f32 %v411_v58, %v390_v28 }
 0x135   : > { %v415_v57 = vmul.f32 0.5, %v414_v56 }
 0x136   : > { %v428_v1 = vmul.f32 %v775_v61, %v422_v60 }
 0x137   : > { %v416_v59 = vsub.f32 1.5, %v415_v57 }
 0x138   : > { %v434_v4 = vadd.f32 %v776_v2, %v428_v1 }
 0x139   : > { %v417_v62 = vmul.f32 %v783_v53, %v416_v59 }
 0x13b   : > { %v421_v63 = vsel %vm420_vm6, %v783_v53, %v417_v62 }
 0x13c   : > { %v423_v0 = vmul.f32 %v421_v63, %v391_v32 }
 0x13e   : > { %v429_v3 = vmul.f32 %v775_v61, %v423_v0 }
 0x140   : > { %v435_v5 = vadd.f32 %v776_v2, %v429_v3 }
 0x142   : > { %v436_v6 = vpack.c.bf16 %v435_v5, %v434_v4 }
 0x144   : > { %513 = vmatmul.bf16.vlgmr.msra.gmra.mxu0 %v436_v6 }
 0x1c1   : > { %v514_v7 = vpop.f32.mrf.mxu0 }
 0x1c2   : > { %v515_v10 = vadd.f32 %v777_v8, %v514_v7 }
 0x1c9   : > { %v516_v9 = vpop.f32.mrf.mxu0 }
 0x1ca   : > { %v517_v11 = vadd.f32 %v777_v8, %v516_v9  ;;  %529 = sbr.rel (!%p890_p6) target bundleno = 472 (0x1d8), region = 85 }
 0x1cc   : > { %v732_v12 = vpack.c.bf16 %v517_v11, %v515_v10 }
 0x1ce   : > { %733 = vst [vmem:[%s362_s10] sm:$0xff] %v732_v12  }
 0x1d5   : > { %v551_v13 = vld [vmem:[%s362_s10] sm:$0xf]  ;;  %v553_v14 = vld [vmem:[%s362_s10 + $0x4] sm:$0xf] }
 0x1d6   : > { %552 = vst [vmem:[%s534_s13] sm:$0xf] %v551_v13 }
 0x1d7   : > { %554 = vst [vmem:[%s534_s13 + $0xc] sm:$0xf] %v553_v14 }
 0x1d8 PF: > { %s15_s22 = sadd.s32 1, %s822_s22   ;;  %s978_s18 = smov %s810_s19 }
 0x1d9   : > { %p12_p12 = scmp.ge.s32.totalorder %s15_s22, 5   ;;  %s979_s19 = smov %s895_s28 }
 0x1da   : > { %s980_s20 = smov %s818_s21  ;;  %s981_s21 = smov %s983_s23 }
 0x1db   :  { %14 = sbr.rel (!%p12_p12) target bundleno = 3 (0x3), region = 163 }

// kernel: _lambda_.57
= control target key start
LH: loop header
LB: loop body
LE: loop exit
PB: predicated region body
PF: predicated region fallthrough
CT: control target
= control target key end

     0   :  { %s235_s1 = inlined_call_operand.vmem [shape: bf16[128,128], index: 1, kind: input, shape index: {}]   ;;  %s236_s2 = inlined_call_operand.vmem [shape: f32[1,128], index: 2, kind: input, shape index: {}]   ;;  %s237_s0 = inlined_call_operand.vmem [shape: bf16[16,128], index: 0, kind: input, shape index: {}]   ;;  %s238_s3 = inlined_call_operand.vmem [shape: bf16[16,128], index: 3, kind: output, shape index: {}]  }
   0x1   :  { %v175_v0 = vld [vmem:[%s235_s1 + $0x38] sm:$0xff]  ;;  %v174_v1 = vld [vmem:[%s235_s1 + $0x30] sm:$0xff]  ;;  %v173_v2 = vld [vmem:[%s235_s1 + $0x28] sm:$0xff] }
   0x2   :  { %94 = vmatpush.bf16.msra.mxu0 %v175_v0  ;;  %v172_v3 = vld [vmem:[%s235_s1 + $0x20] sm:$0xff]  ;;  %v171_v4 = vld [vmem:[%s235_s1 + $0x18] sm:$0xff]  ;;  %v170_v5 = vld [vmem:[%s235_s1 + $0x10] sm:$0xff] }
   0x3   :  { %v169_v6 = vld [vmem:[%s235_s1 + $0x8] sm:$0xff]  ;;  %v168_v7 = vld [vmem:[%s235_s1] sm:$0xff] }
   0x4   :  { %v167_v8 = vld [vmem:[%s237_s0] sm:$0xff] }
   0x5   :  { %v181_v10 = vld [vmem:[%s236_s2] ss:$0 sm:$0xff] }
   0x6   :  { %95 = vmatpush.bf16.msra.mxu0 %v174_v1 }
   0xa   :  { %96 = vmatpush.bf16.msra.mxu0 %v173_v2 }
   0xe   :  { %97 = vmatpush.bf16.msra.mxu0 %v172_v3 }
  0x12   :  { %98 = vmatpush.bf16.msra.mxu0 %v171_v4 }
  0x16   :  { %99 = vmatpush.bf16.msra.mxu0 %v170_v5 }
  0x1a   :  { %100 = vmatpush.bf16.msra.mxu0 %v169_v6 }
  0x1e   :  { %101 = vmatpush.bf16.msra.mxu0 %v168_v7 }
  0x21   :  { %102 = vmatmul.bf16.vlgmr.msra.gmra.mxu0 %v167_v8 }
  0x9e   :  { %v103_v9 = vpop.f32.mrf.mxu0 }
  0x9f   :  { %v121_v12 = vadd.f32 %v181_v10, %v103_v9 }
  0xa6   :  { %v105_v11 = vpop.f32.mrf.mxu0 }
  0xa7   :  { %v122_v13 = vadd.f32 %v181_v10, %v105_v11 }
  0xa9   :  { %v179_v14 = vpack.c.bf16 %v122_v13, %v121_v12 }
  0xab   :  { %180 = vst [vmem:[%s238_s3] sm:$0xff] %v179_v14  }

// kernel: _lambda_.59
= control target key start
LH: loop header
LB: loop body
LE: loop exit
PB: predicated region body
PF: predicated region fallthrough
CT: control target
= control target key end

     0   :  { %v103_v3 = vmov 128.0   ;;  %s136_s0 = inlined_call_operand.vmem [shape: bf16[16,128], index: 0, kind: input, shape index: {}]   ;;  %s137_s1 = inlined_call_operand.vmem [shape: f32[1,128], index: 1, kind: input, shape index: {}]   ;;  %s138_s2 = inlined_call_operand.vmem [shape: f32[1,128], index: 2, kind: input, shape index: {}]   ;;  %s139_s3 = inlined_call_operand.vmem [shape: bf16[16,128], index: 3, kind: output, shape index: {}]  }
   0x1   :  { %v86_v0 = vld [vmem:[%s136_s0] sm:$0xff]   ;;  %97 = vrcp.f32 %v103_v3 }
   0x2   :  { %v87_v1 = vunpack.c.l.bf16 %v86_v0  ;;  %v88_v2 = vunpack.c.h.bf16 %v86_v0  ;;  %v95_v36 = vld [vmem:[%s137_s1] ss:$0 sm:$0xff] }
   0x3   :  { %v96_v40 = vld [vmem:[%s138_s2] ss:$0 sm:$0xff] }
   0x4   :  { %18 = vadd.xlane.f32.xlu0 %v87_v1 }
   0x7   :  { %v98_v4 = vpop.eup %97 }
   0x8   :  { %v23_v5 = vmul.f32 128.0, %v98_v4  ;;  %vm27_vm0 = vweird.f32 %v98_v4 }
   0xa   :  { %v24_v6 = vsub.f32 1.0, %v23_v5 }
   0xc   :  { %20 = vadd.xlane.f32.xlu0 %v88_v2  ;;  %v25_v7 = vmul.f32 %v98_v4, %v24_v6 }
   0xe   :  { %v26_v8 = vadd.f32 %v98_v4, %v25_v7 }
  0x10   :  { %v28_v9 = vsel %vm27_vm0, %v98_v4, %v26_v8 }
  0x77   :  { %v19_v10 = vpop.xlane.xlu0 %18 }
  0x78   :  { %v29_v11 = vmul.f32 %v28_v9, %v19_v10 }
  0x7a   :  { %v31_v12 = vsub.f32 %v87_v1, %v29_v11 }
  0x7c   :  { %v33_v13 = vmul.f32 %v31_v12, %v31_v12 }
  0x7e   :  { %35 = vadd.xlane.f32.xlu1 %v33_v13 }
  0x7f   :  { %v21_v14 = vpop.xlane.xlu0 %20 }
  0x80   :  { %v30_v15 = vmul.f32 %v28_v9, %v21_v14 }
  0x82   :  { %v32_v16 = vsub.f32 %v88_v2, %v30_v15 }
  0x84   :  { %v34_v17 = vmul.f32 %v32_v16, %v32_v16 }
  0x86   :  { %37 = vadd.xlane.f32.xlu1 %v34_v17 }
  0xf1   :  { %v36_v18 = vpop.xlane.xlu1 %35 }
  0xf2   :  { %v39_v19 = vmul.f32 %v36_v18, %v28_v9 }
  0xf4   :  { %v41_v20 = vadd.f32 1e-05, %v39_v19 }
  0xf6   :  { %99 = vrsqrt.f32 %v41_v20  ;;  %vm49_vm2 = vweird.f32 %v41_v20 }
  0xf9   :  { %v38_v21 = vpop.xlane.xlu1 %37 }
  0xfa   :  { %v40_v22 = vmul.f32 %v38_v21, %v28_v9 }
  0xfc   :  { %v100_v23 = vpop.eup %99  ;;  %v42_v24 = vadd.f32 1e-05, %v40_v22 }
  0xfd   :  { %v44_v25 = vmul.f32 %v100_v23, %v41_v20  ;;  %vm50_vm1 = vweird.f32 %v100_v23 }
  0xfe   :  { %101 = vrsqrt.f32 %v42_v24  ;;  %vm51_vm3 = vmor %vm49_vm2, %vm50_vm1  ;;  %vm59_vm5 = vweird.f32 %v42_v24 }
  0xff   :  { %v45_v26 = vmul.f32 %v100_v23, %v44_v25 }
 0x101   :  { %v46_v27 = vmul.f32 0.5, %v45_v26 }
 0x103   :  { %v47_v28 = vsub.f32 1.5, %v46_v27 }
 0x104   :  { %v102_v29 = vpop.eup %101 }
 0x105   :  { %v48_v30 = vmul.f32 %v100_v23, %v47_v28  ;;  %v54_v31 = vmul.f32 %v102_v29, %v42_v24  ;;  %vm60_vm4 = vweird.f32 %v102_v29 }
 0x106   :  { %vm61_vm6 = vmor %vm59_vm5, %vm60_vm4 }
 0x107   :  { %v55_v32 = vmul.f32 %v102_v29, %v54_v31  ;;  %v52_v33 = vsel %vm51_vm3, %v100_v23, %v48_v30 }
 0x108   :  { %v63_v37 = vmul.f32 %v52_v33, %v31_v12 }
 0x109   :  { %v56_v34 = vmul.f32 0.5, %v55_v32 }
 0x10a   :  { %v69_v41 = vmul.f32 %v95_v36, %v63_v37 }
 0x10b   :  { %v57_v35 = vsub.f32 1.5, %v56_v34 }
 0x10c   :  { %v75_v44 = vadd.f32 %v96_v40, %v69_v41 }
 0x10d   :  { %v58_v38 = vmul.f32 %v102_v29, %v57_v35 }
 0x10f   :  { %v62_v39 = vsel %vm61_vm6, %v102_v29, %v58_v38 }
 0x110   :  { %v64_v42 = vmul.f32 %v62_v39, %v32_v16 }
 0x112   :  { %v70_v43 = vmul.f32 %v95_v36, %v64_v42 }
 0x114   :  { %v76_v45 = vadd.f32 %v96_v40, %v70_v43 }
 0x116   :  { %v92_v46 = vpack.c.bf16 %v76_v45, %v75_v44 }
 0x118   :  { %93 = vst [vmem:[%s139_s3] sm:$0xff] %v92_v46  }

// kernel: _lambda_.58
= control target key start
LH: loop header
LB: loop body
LE: loop exit
PB: predicated region body
PF: predicated region fallthrough
CT: control target
= control target key end

     0   :  { %s1332_s24 = smov 0   ;;  %s1334_s25 = smov 0   ;;  %s1499_s0 = inlined_call_operand.vmem [shape: bf16[16,128], index: 0, kind: input, shape index: {}]   ;;  %s1500_s1 = inlined_call_operand.vmem [shape: f32[1,128], index: 1, kind: input, shape index: {}]   ;;  %s1501_s2 = inlined_call_operand.vmem [shape: f32[1,128], index: 2, kind: input, shape index: {}]   ;;  %s1502_s3 = inlined_call_operand.vmem [shape: bf16[128,512], index: 3, kind: input, shape index: {}]   ;;  %s1503_s4 = inlined_call_operand.vmem [shape: f32[1,512], index: 4, kind: input, shape index: {}]   ;;  %s1504_s5 = inlined_call_operand.vmem [shape: bf16[512,128], index: 5, kind: input, shape index: {}]   ;;  %s1505_s6 = inlined_call_operand.vmem [shape: f32[1,128], index: 6, kind: input, shape index: {}]   ;;  %s1506_s7 = inlined_call_operand.vmem [shape: bf16[16,128], index: 7, kind: output, shape index: {}]  }
   0x1   :  { %s1336_s26 = smov 0   ;;  %s1338_s27 = smov 0  }
   0x2   :  { %s1340_s28 = smov 0  }
   0x3 LB: > { %s26_s29 = sadd.s32 1, %s1284_s27  ;;  %p111_p1 = scmp.ne.s32.totalorder %s1276_s25, %s1272_s24  ;;  %s1288_s28 = sphi %s1340_s28, %s17_s28   ;;  %s1284_s27 = sphi %s1338_s27, %s1510_s27   ;;  %s1280_s26 = sphi %s1336_s26, %s1509_s26   ;;  %s1276_s25 = sphi %s1334_s25, %s1508_s25   ;;  %s1272_s24 = sphi %s1332_s24, %s1507_s24  }
   0x4   : > { %p27_p0 = scmp.ge.s32.totalorder %s26_s29, 2  ;;  %p112_p2 = scmp.eq.s32.totalorder %s1288_s28, 0 }
   0x5   : > { %s104_s8 = sadd.s32 1, %s1276_s25  ;;  %p992_p5 = scmp.ge.s32.totalorder %s1288_s28, 2 }
   0x6   : > { %s1512_s29 = smov (%p27_p0, %s26_s29), 0  ;;  %p113_p3 = por %p112_p2, %p111_p1 }
   0x7   : > { %s101_s30 = ssub.s32 %s1284_s27, %s1512_s29  ;;  %254 = sbr.rel (%p992_p5) target bundleno = 32 (0x20), region = 32 }
   0x8   : > { %p102_p4 = scmp.eq.s32.totalorder %s101_s30, 0 }
   0xa   : > { %s1367_s9 = scalar_select %p102_p4, %s1276_s25, %s104_s8  }
   0xc   : > { %257 = sbr.rel (!%p113_p3) target bundleno = 32 (0x20), region = 36  ;;  %s259_s10 = sand.u32 (%p113_p3), 1, %s1276_s25  }
   0xd   : > { %s1139_s11 = sshll.u32 (%p113_p3), %s1284_s27, 3  ;;  %s993_s12 = sshll.u32 (%p113_p3), %s259_s10, 7 }
   0xe   : > { %s1375_s15 = scalar_lea.vmem (%p113_p3), %s1502_s3, %s1139_s11  ;;  %s261_s16 = scalar_lea.vmem (%p113_p3), [#allocation4], %s993_s12 }
   0xf   : > { %v323_v0 = vld [vmem:[%s1375_s15] sm:$0xff] (%p113_p3)  ;;  %v325_v1 = vld [vmem:[%s1375_s15 + $0x10] sm:$0xff] (%p113_p3) }
  0x10   : > { %v327_v2 = vld [vmem:[%s1375_s15 + $0x20] sm:$0xff] (%p113_p3)  ;;  %324 = vst [vmem:[%s261_s16] sm:$0xff] (%p113_p3), %v323_v0  ;;  %v329_v3 = vld [vmem:[%s1375_s15 + $0x30] sm:$0xff] (%p113_p3) }
  0x11   : > { %326 = vst [vmem:[%s261_s16 + $0x8] sm:$0xff] %v325_v1  ;;  %v331_v4 = vld [vmem:[%s1375_s15 + $0x40] sm:$0xff]  ;;  %v333_v5 = vld [vmem:[%s1375_s15 + $0x50] sm:$0xff] }
  0x12   : > { %328 = vst [vmem:[%s261_s16 + $0x10] sm:$0xff] %v327_v2  ;;  %v335_v6 = vld [vmem:[%s1375_s15 + $0x60] sm:$0xff]  ;;  %v337_v7 = vld [vmem:[%s1375_s15 + $0x70] sm:$0xff] }
  0x13   : > { %330 = vst [vmem:[%s261_s16 + $0x18] sm:$0xff] %v329_v3  ;;  %v339_v8 = vld [vmem:[%s1375_s15 + $0x80] sm:$0xff]  ;;  %v341_v9 = vld [vmem:[%s1375_s15 + $0x90] sm:$0xff] }
  0x14   : > { %332 = vst [vmem:[%s261_s16 + $0x20] sm:$0xff] %v331_v4  ;;  %v343_v10 = vld [vmem:[%s1375_s15 + $0xa0] sm:$0xff]  ;;  %v345_v11 = vld [vmem:[%s1375_s15 + $0xb0] sm:$0xff] }
  0x15   : > { %334 = vst [vmem:[%s261_s16 + $0x28] sm:$0xff] %v333_v5  ;;  %v347_v12 = vld [vmem:[%s1375_s15 + $0xc0] sm:$0xff]  ;;  %v349_v13 = vld [vmem:[%s1375_s15 + $0xd0] sm:$0xff] }
  0x16   : > { %336 = vst [vmem:[%s261_s16 + $0x30] sm:$0xff] %v335_v6  ;;  %v351_v14 = vld [vmem:[%s1375_s15 + $0xe0] sm:$0xff]  ;;  %v353_v15 = vld [vmem:[%s1375_s15 + $0xf0] sm:$0xff] }
  0x17   : > { %338 = vst [vmem:[%s261_s16 + $0x38] sm:$0xff] %v337_v7 }
  0x18   : > { %340 = vst [vmem:[%s261_s16 + $0x40] sm:$0xff] %v339_v8 }
  0x19   : > { %342 = vst [vmem:[%s261_s16 + $0x48] sm:$0xff] %v341_v9 }
  0x1a   : > { %344 = vst [vmem:[%s261_s16 + $0x50] sm:$0xff] %v343_v10 }
  0x1b   : > { %346 = vst [vmem:[%s261_s16 + $0x58] sm:$0xff] %v345_v11 }
  0x1c   : > { %348 = vst [vmem:[%s261_s16 + $0x60] sm:$0xff] %v347_v12 }
  0x1d   : > { %350 = vst [vmem:[%s261_s16 + $0x68] sm:$0xff] %v349_v13 }
  0x1e   : > { %352 = vst [vmem:[%s261_s16 + $0x70] sm:$0xff] %v351_v14 }
  0x1f   : > { %354 = vst [vmem:[%s261_s16 + $0x78] sm:$0xff] %v353_v15 }
  0x20 PF: > { %p996_p6 = scmp.ge.s32.totalorder %s1288_s28, 1  ;;  %p376_p7 = scmp.lt.s32.totalorder %s1288_s28, 3 }
  0x22   : > { %p377_p8 = pnand %p996_p6, %p376_p7 }
  0x23   : > { %s383_s17 = sand.u32 (!%p377_p8), 1, %s1272_s24   ;;  %s998_s18 = sshll.u32 (!%p377_p8), %s1280_s26, 1 }
  0x24   : > { %380 = sbr.rel (%p377_p8) target bundleno = 681 (0x2a9), region = 82  ;;  %s997_s19 = sshll.u32 (!%p377_p8), %s383_s17, 7 }
  0x25   : > { %p436_p9 = scmp.lt.s32.totalorder (!%p377_p8), %s998_s18, 3  ;;  %s999_s20 = sshll.u32 (!%p377_p8), %s1280_s26, 5 }
  0x26   : > { %p441_p10 = scmp.lt.s32.totalorder (!%p377_p8), %s999_s20, 63  ;;  %s1409_s24 = scalar_lea.vmem (!%p377_p8), [#allocation4], %s997_s19 }
  0x27   : > { %p1001_p11 = scmp.ne.s32.totalorder (!%p377_p8), %s1280_s26, 0 }
  0x29   : > { %s1514_s18 = smov (!%p436_p9, %s998_s18), 3  ;;  %s1516_s20 = smov (!%p441_p10, %s999_s20), 63 }
  0x2a   : > { %s438_s23 = scalar_lea.vmem %s1503_s4, %s1514_s18  ;;  %s1000_s30 = sshll.u32 %s1516_s20, 2 }
  0x2b   : > { %s1407_s11 = scalar_lea.vmem %s1504_s5, %s1000_s30  ;;  %455 = sbr.rel (%p1001_p11) target bundleno = 328 (0x148), region = 90 }
  0x30   : > { %v1174_v16 = vld [vmem:[%s1499_s0] sm:$0xff]   ;;  %v1290_v19 = vmov 128.0   ;;  %v1291_v37 = vmov 0.0  }
  0x31   : > { %v1175_v17 = vunpack.c.l.bf16 %v1174_v16  ;;  %v1176_v18 = vunpack.c.h.bf16 %v1174_v16  ;;  %1235 = vrcp.f32 %v1290_v19  ;;  %456 = vst [vmem:[#allocation2] sm:$0xff] %v1291_v37  ;;  %v1233_v53 = vld [vmem:[%s1500_s1] ss:$0 sm:$0xff] }
  0x32   : > { %457 = vst [vmem:[#allocation2 + $0x8] sm:$0xff] %v1291_v37  ;;  %v1234_v57 = vld [vmem:[%s1501_s2] ss:$0 sm:$0xff] }
  0x33   : > { %462 = vadd.xlane.f32.xlu0 %v1175_v17 }
  0x37   : > { %v1236_v20 = vpop.eup %1235 }
  0x38   : > { %v467_v21 = vmul.f32 128.0, %v1236_v20  ;;  %vm471_vm0 = vweird.f32 %v1236_v20 }
  0x3a   : > { %v468_v22 = vsub.f32 1.0, %v467_v21 }
  0x3b   : > { %464 = vadd.xlane.f32.xlu0 %v1176_v18 }
  0x3c   : > { %v469_v23 = vmul.f32 %v1236_v20, %v468_v22 }
  0x3e   : > { %v470_v24 = vadd.f32 %v1236_v20, %v469_v23 }
  0x40   : > { %v472_v25 = vsel %vm471_vm0, %v1236_v20, %v470_v24 }
  0xa6   : > { %v463_v26 = vpop.xlane.xlu0 %462 }
  0xa7   : > { %v473_v27 = vmul.f32 %v472_v25, %v463_v26 }
  0xa9   : > { %v475_v28 = vsub.f32 %v1175_v17, %v473_v27 }
  0xab   : > { %v477_v29 = vmul.f32 %v475_v28, %v475_v28 }
  0xad   : > { %479 = vadd.xlane.f32.xlu1 %v477_v29 }
  0xae   : > { %v465_v30 = vpop.xlane.xlu0 %464 }
  0xaf   : > { %v474_v31 = vmul.f32 %v472_v25, %v465_v30 }
  0xb1   : > { %v476_v32 = vsub.f32 %v1176_v18, %v474_v31 }
  0xb3   : > { %v478_v33 = vmul.f32 %v476_v32, %v476_v32 }
  0xb5   : > { %481 = vadd.xlane.f32.xlu1 %v478_v33 }
 0x120   : > { %v480_v34 = vpop.xlane.xlu1 %479 }
 0x121   : > { %v483_v35 = vmul.f32 %v480_v34, %v472_v25 }
 0x123   : > { %v485_v36 = vadd.f32 1e-05, %v483_v35 }
 0x125   : > { %1237 = vrsqrt.f32 %v485_v36  ;;  %vm493_vm2 = vweird.f32 %v485_v36 }
 0x128   : > { %v482_v38 = vpop.xlane.xlu1 %481 }
 0x129   : > { %v484_v39 = vmul.f32 %v482_v38, %v472_v25 }
 0x12b   : > { %v1238_v40 = vpop.eup %1237  ;;  %v486_v41 = vadd.f32 1e-05, %v484_v39 }
 0x12c   : > { %v488_v42 = vmul.f32 %v1238_v40, %v485_v36  ;;  %vm494_vm1 = vweird.f32 %v1238_v40 }
 0x12d   : > { %1239 = vrsqrt.f32 %v486_v41  ;;  %vm495_vm3 = vmor %vm493_vm2, %vm494_vm1  ;;  %vm503_vm5 = vweird.f32 %v486_v41 }
 0x12e   : > { %v489_v43 = vmul.f32 %v1238_v40, %v488_v42 }
 0x130   : > { %v490_v44 = vmul.f32 0.5, %v489_v43 }
 0x132   : > { %v491_v45 = vsub.f32 1.5, %v490_v44 }
 0x133   : > { %v1240_v46 = vpop.eup %1239 }
 0x134   : > { %v492_v47 = vmul.f32 %v1238_v40, %v491_v45  ;;  %v498_v48 = vmul.f32 %v1240_v46, %v486_v41  ;;  %vm504_vm4 = vweird.f32 %v1240_v46 }
 0x135   : > { %vm505_vm6 = vmor %vm503_vm5, %vm504_vm4 }
 0x136   : > { %v499_v49 = vmul.f32 %v1240_v46, %v498_v48  ;;  %v496_v50 = vsel %vm495_vm3, %v1238_v40, %v492_v47 }
 0x137   : > { %v507_v54 = vmul.f32 %v496_v50, %v475_v28 }
 0x138   : > { %v500_v51 = vmul.f32 0.5, %v499_v49 }
 0x139   : > { %v513_v58 = vmul.f32 %v1233_v53, %v507_v54 }
 0x13a   : > { %v501_v52 = vsub.f32 1.5, %v500_v51 }
 0x13b   : > { %v519_v61 = vadd.f32 %v1234_v57, %v513_v58 }
 0x13c   : > { %v502_v55 = vmul.f32 %v1240_v46, %v501_v52 }
 0x13e   : > { %v506_v56 = vsel %vm505_vm6, %v1240_v46, %v502_v55 }
 0x13f   : > { %v508_v59 = vmul.f32 %v506_v56, %v476_v32 }
 0x141   : > { %v514_v60 = vmul.f32 %v1233_v53, %v508_v59 }
 0x143   : > { %v520_v62 = vadd.f32 %v1234_v57, %v514_v60 }
 0x145   : > { %v1180_v63 = vpack.c.bf16 %v520_v62, %v519_v61 }
 0x147   : > { %1181 = vst [vmem:[#allocation3] sm:$0xff] %v1180_v63  }
 0x148 PF: > { %v1064_v0 = vld [vmem:[%s1409_s24 + $0x70] sm:$0xf]  ;;  %v1156_v1 = vld [vmem:[%s1409_s24 + $0x74] sm:$0xf0]  ;;  %v1155_v2 = vld [vmem:[%s1409_s24 + $0x74] sm:$0xf] }
 0x149   : > { %v1065_v3 = vor.u32 %v1156_v1, %v1064_v0  ;;  %v1066_v4 = vld [vmem:[%s1409_s24 + $0x78] sm:$0xf0]  ;;  %v1056_v5 = vld [vmem:[%s1409_s24 + $0x60] sm:$0xf]  ;;  %v1154_v6 = vld [vmem:[%s1409_s24 + $0x64] sm:$0xf0] }
 0x14a   : > { %v1069_v7 = vor.u32 %v1155_v2, %v1066_v4  ;;  %v1153_v8 = vld [vmem:[%s1409_s24 + $0x64] sm:$0xf]  ;;  %v1058_v9 = vld [vmem:[%s1409_s24 + $0x68] sm:$0xf0]  ;;  %v1057_v10 = vor.u32 %v1154_v6, %v1056_v5  ;;  %v1048_v12 = vld [vmem:[%s1409_s24 + $0x50] sm:$0xf] }
 0x14b   : > { %635 = vmatpush.bf16.msra.mxu0 %v1065_v3  ;;  %v1061_v11 = vor.u32 %v1153_v8, %v1058_v9  ;;  %v1152_v13 = vld [vmem:[%s1409_s24 + $0x54] sm:$0xf0]  ;;  %v1151_v14 = vld [vmem:[%s1409_s24 + $0x54] sm:$0xf]  ;;  %v1050_v15 = vld [vmem:[%s1409_s24 + $0x58] sm:$0xf0] }
 0x14c   : > { %649 = vmatpush.bf16.msra.mxu1 %v1069_v7  ;;  %v1049_v16 = vor.u32 %v1152_v13, %v1048_v12  ;;  %v1053_v17 = vor.u32 %v1151_v14, %v1050_v15  ;;  %v1040_v18 = vld [vmem:[%s1409_s24 + $0x40] sm:$0xf]  ;;  %v1150_v19 = vld [vmem:[%s1409_s24 + $0x44] sm:$0xf0]  ;;  %v1149_v20 = vld [vmem:[%s1409_s24 + $0x44] sm:$0xf] }
 0x14d   : > { %v1042_v21 = vld [vmem:[%s1409_s24 + $0x48] sm:$0xf0]  ;;  %v1041_v22 = vor.u32 %v1150_v19, %v1040_v18  ;;  %v1032_v24 = vld [vmem:[%s1409_s24 + $0x30] sm:$0xf]  ;;  %v1148_v25 = vld [vmem:[%s1409_s24 + $0x34] sm:$0xf0] }
 0x14e   : > { %v1045_v23 = vor.u32 %v1149_v20, %v1042_v21  ;;  %v1147_v26 = vld [vmem:[%s1409_s24 + $0x34] sm:$0xf]  ;;  %v1034_v27 = vld [vmem:[%s1409_s24 + $0x38] sm:$0xf0]  ;;  %v1033_v28 = vor.u32 %v1148_v25, %v1032_v24  ;;  %v1024_v30 = vld [vmem:[%s1409_s24 + $0x20] sm:$0xf] }
 0x14f   : > { %636 = vmatpush.bf16.msra.mxu0 %v1057_v10  ;;  %v1037_v29 = vor.u32 %v1147_v26, %v1034_v27  ;;  %v1146_v31 = vld [vmem:[%s1409_s24 + $0x24] sm:$0xf0]  ;;  %v1145_v32 = vld [vmem:[%s1409_s24 + $0x24] sm:$0xf]  ;;  %v1026_v33 = vld [vmem:[%s1409_s24 + $0x28] sm:$0xf0] }
 0x150   : > { %650 = vmatpush.bf16.msra.mxu1 %v1061_v11  ;;  %v1025_v34 = vor.u32 %v1146_v31, %v1024_v30  ;;  %v1029_v35 = vor.u32 %v1145_v32, %v1026_v33  ;;  %v1016_v36 = vld [vmem:[%s1409_s24 + $0x10] sm:$0xf]  ;;  %v1144_v37 = vld [vmem:[%s1409_s24 + $0x14] sm:$0xf0]  ;;  %v1143_v38 = vld [vmem:[%s1409_s24 + $0x14] sm:$0xf] }
 0x151   : > { %v1018_v39 = vld [vmem:[%s1409_s24 + $0x18] sm:$0xf0]  ;;  %v1017_v40 = vor.u32 %v1144_v37, %v1016_v36  ;;  %v1008_v42 = vld [vmem:[%s1409_s24] sm:$0xf]  ;;  %v1142_v43 = vld [vmem:[%s1409_s24 + $0x4] sm:$0xf0] }
 0x152   : > { %v1021_v41 = vor.u32 %v1143_v38, %v1018_v39  ;;  %v1141_v44 = vld [vmem:[%s1409_s24 + $0x4] sm:$0xf]  ;;  %v1010_v45 = vld [vmem:[%s1409_s24 + $0x8] sm:$0xf0]  ;;  %v1009_v46 = vor.u32 %v1142_v43, %v1008_v42  ;;  %v1140_v48 = vld [vmem:[#allocation3] sm:$0xff]  ;;  %p1134_p12 = scmp.ne.s32.totalorder %s1280_s26, 1 }
 0x153   : > { %637 = vmatpush.bf16.msra.mxu0 %v1049_v16  ;;  %v1013_v47 = vor.u32 %v1141_v44, %v1010_v45  ;;  %v1164_v49 = vld [vmem:[%s1407_s11 + $0x38] sm:$0xff]  ;;  %v1163_v51 = vld [vmem:[%s1407_s11 + $0x30] sm:$0xff]  ;;  %v1162_v53 = vld [vmem:[%s1407_s11 + $0x28] sm:$0xff] }
 0x154   : > { %651 = vmatpush.bf16.msra.mxu1 %v1053_v17  ;;  %v1172_v50 = vld [vmem:[%s1407_s11 + $0x78] sm:$0xff]  ;;  %831 = vmatpush.bf16.msra.mxu2 %v1164_v49  ;;  %v1171_v52 = vld [vmem:[%s1407_s11 + $0x70] sm:$0xff]  ;;  %v1170_v54 = vld [vmem:[%s1407_s11 + $0x68] sm:$0xff] }
 0x155   : > { %845 = vmatpush.bf16.msra.mxu3 %v1172_v50  ;;  %v1161_v55 = vld [vmem:[%s1407_s11 + $0x20] sm:$0xff]  ;;  %v1160_v57 = vld [vmem:[%s1407_s11 + $0x18] sm:$0xff]  ;;  %v1159_v59 = vld [vmem:[%s1407_s11 + $0x10] sm:$0xff] }
 0x156   : > { %v1169_v56 = vld [vmem:[%s1407_s11 + $0x60] sm:$0xff]  ;;  %v1168_v58 = vld [vmem:[%s1407_s11 + $0x58] sm:$0xff]  ;;  %v1167_v60 = vld [vmem:[%s1407_s11 + $0x50] sm:$0xff] }
 0x157   : > { %638 = vmatpush.bf16.msra.mxu0 %v1041_v22  ;;  %v1158_v61 = vld [vmem:[%s1407_s11 + $0x8] sm:$0xff]  ;;  %v543_v63 = vld [vmem:[%s438_s23] sm:$0x3] }
 0x158   : > { %652 = vmatpush.bf16.msra.mxu1 %v1045_v23  ;;  %832 = vmatpush.bf16.msra.mxu2 %v1163_v51  ;;  %v1166_v62 = vld [vmem:[%s1407_s11 + $0x48] sm:$0xff]  ;;  %v1157_v0 = vld [vmem:[%s1407_s11] sm:$0xff]  ;;  %v545_v2 = vperm.slane %v543_v63, 0  ;;  %v546_v3 = vperm.slane %v543_v63, 1 }
 0x159   : > { %846 = vmatpush.bf16.msra.mxu3 %v1171_v52  ;;  %v1165_v1 = vld [vmem:[%s1407_s11 + $0x40] sm:$0xff] }
 0x15a   : > { %v699_v51 = vld [vmem:[#allocation2] sm:$0xff] }
 0x15b   : > { %639 = vmatpush.bf16.msra.mxu0 %v1033_v28 }
 0x15c   : > { %653 = vmatpush.bf16.msra.mxu1 %v1037_v29  ;;  %833 = vmatpush.bf16.msra.mxu2 %v1162_v53 }
 0x15d   : > { %847 = vmatpush.bf16.msra.mxu3 %v1170_v54 }
 0x15f   : > { %640 = vmatpush.bf16.msra.mxu0 %v1025_v34 }
 0x160   : > { %654 = vmatpush.bf16.msra.mxu1 %v1029_v35  ;;  %834 = vmatpush.bf16.msra.mxu2 %v1161_v55 }
 0x161   : > { %848 = vmatpush.bf16.msra.mxu3 %v1169_v56  ;;  %v700_v56 = vld [vmem:[#allocation2 + $0x8] sm:$0xff] }
 0x163   : > { %641 = vmatpush.bf16.msra.mxu0 %v1017_v40 }
 0x164   : > { %655 = vmatpush.bf16.msra.mxu1 %v1021_v41  ;;  %835 = vmatpush.bf16.msra.mxu2 %v1160_v57 }
 0x165   : > { %849 = vmatpush.bf16.msra.mxu3 %v1168_v58 }
 0x167   : > { %642 = vmatpush.bf16.msra.mxu0 %v1009_v46 }
 0x168   : > { %656 = vmatpush.bf16.msra.mxu1 %v1013_v47  ;;  %836 = vmatpush.bf16.msra.mxu2 %v1159_v59 }
 0x169   : > { %850 = vmatpush.bf16.msra.mxu3 %v1167_v60 }
 0x16a   : > { %643 = vmatmul.bf16.vlgmr.msra.gmra.mxu0 %v1140_v48 }
 0x16b   : > { %657 = vmatmul.bf16.vlgmr.msra.gmra.mxu1 %v1140_v48 }
 0x16c   : > { %837 = vmatpush.bf16.msra.mxu2 %v1158_v61 }
 0x16d   : > { %851 = vmatpush.bf16.msra.mxu3 %v1166_v62 }
 0x170   : > { %838 = vmatpush.bf16.msra.mxu2 %v1157_v0 }
 0x171   : > { %852 = vmatpush.bf16.msra.mxu3 %v1165_v1 }
 0x1e7   : > { %v644_v4 = vpop.f32.mrf.mxu0 }
 0x1e8   : > { %v645_v5 = vadd.f32 %v644_v4, %v545_v2  ;;  %v658_v6 = vpop.f32.mrf.mxu1 }
 0x1e9   : > { %v659_v7 = vadd.f32 %v658_v6, %v546_v3 }
 0x1ea   : > { %v667_v8 = vmul.f32 0.044715, %v645_v5  ;;  %v663_v38 = vmul.f32 0.5, %v645_v5 }
 0x1eb   : > { %v668_v9 = vmul.f32 0.044715, %v659_v7  ;;  %v664_v41 = vmul.f32 0.5, %v659_v7 }
 0x1ec   : > { %v671_v10 = vmul.f32 %v667_v8, %v645_v5 }
 0x1ed   : > { %v672_v11 = vmul.f32 %v668_v9, %v659_v7 }
 0x1ee   : > { %v675_v12 = vmul.f32 %v671_v10, %v645_v5 }
 0x1ef   : > { %v646_v13 = vpop.f32.mrf.mxu0  ;;  %v676_v14 = vmul.f32 %v672_v11, %v659_v7 }
 0x1f0   : > { %v647_v15 = vadd.f32 %v646_v13, %v545_v2  ;;  %v660_v16 = vpop.f32.mrf.mxu1  ;;  %v679_v17 = vadd.f32 %v675_v12, %v645_v5 }
 0x1f1   : > { %v661_v18 = vadd.f32 %v660_v16, %v546_v3  ;;  %v680_v19 = vadd.f32 %v676_v14, %v659_v7 }
 0x1f2   : > { %v669_v20 = vmul.f32 0.044715, %v647_v15  ;;  %v683_v23 = vmul.f32 0.7978846, %v679_v17  ;;  %v665_v39 = vmul.f32 0.5, %v647_v15 }
 0x1f3   : > { %v670_v21 = vmul.f32 0.044715, %v661_v18  ;;  %v684_v25 = vmul.f32 0.7978846, %v680_v19  ;;  %v666_v42 = vmul.f32 0.5, %v661_v18 }
 0x1f4   : > { %v673_v22 = vmul.f32 %v669_v20, %v647_v15  ;;  %1241 = vtanh.f32 %v683_v23 }
 0x1f5   : > { %v674_v24 = vmul.f32 %v670_v21, %v661_v18  ;;  %1243 = vtanh.f32 %v684_v25 }
 0x1f6   : > { %v677_v26 = vmul.f32 %v673_v22, %v647_v15 }
 0x1f7   : > { %v678_v27 = vmul.f32 %v674_v24, %v661_v18 }
 0x1f8   : > { %v681_v28 = vadd.f32 %v677_v26, %v647_v15 }
 0x1f9   : > { %v682_v29 = vadd.f32 %v678_v27, %v661_v18 }
 0x1fa   : > { %v685_v30 = vmul.f32 0.7978846, %v681_v28  ;;  %v1242_v32 = vpop.eup %1241 }
 0x1fb   : > { %v686_v31 = vmul.f32 0.7978846, %v682_v29  ;;  %v1244_v33 = vpop.eup %1243  ;;  %v691_v34 = vadd.f32 1.0, %v1242_v32 }
 0x1fc   : > { %1245 = vtanh.f32 %v685_v30  ;;  %v692_v36 = vadd.f32 1.0, %v1244_v33 }
 0x1fd   : > { %1247 = vtanh.f32 %v686_v31  ;;  %v695_v44 = vmul.f32 %v691_v34, %v663_v38 }
 0x1fe   : > { %v696_v46 = vmul.f32 %v692_v36, %v664_v41 }
 0x202   : > { %v1246_v35 = vpop.eup %1245 }
 0x203   : > { %v1248_v37 = vpop.eup %1247  ;;  %v693_v40 = vadd.f32 1.0, %v1246_v35 }
 0x204   : > { %v694_v43 = vadd.f32 1.0, %v1248_v37 }
 0x205   : > { %v697_v45 = vmul.f32 %v693_v40, %v665_v39 }
 0x206   : > { %v698_v47 = vmul.f32 %v694_v43, %v666_v42 }
 0x207   : > { %v701_v48 = vpack.c.bf16 %v697_v45, %v695_v44 }
 0x208   : > { %v702_v49 = vpack.c.bf16 %v698_v47, %v696_v46 }
 0x209   : > { %839 = vmatmul.bf16.vlgmr.msra.gmra.mxu2 %v701_v48 }
 0x20a   : > { %853 = vmatmul.bf16.vlgmr.msra.gmra.mxu3 %v702_v49 }
 0x28c   : > { %v840_v50 = vpop.f32.mrf.mxu2 }
 0x28d   : > { %v854_v52 = vpop.f32.mrf.mxu3 }
 0x28e   : > { %v855_v53 = vadd.f32 %v854_v52, %v840_v50 }
 0x290   : > { %v859_v54 = vadd.f32 %v855_v53, %v699_v51 }
 0x292   : > { %861 = vst [vmem:[#allocation2] sm:$0xff] %v859_v54 }
 0x294   : > { %v842_v55 = vpop.f32.mrf.mxu2 }
 0x295   : > { %v856_v57 = vpop.f32.mrf.mxu3 }
 0x296   : > { %v857_v58 = vadd.f32 %v856_v57, %v842_v55  ;;  %866 = sbr.rel (%p1134_p12) target bundleno = 681 (0x2a9), region = 94 }
 0x298   : > { %v860_v59 = vadd.f32 %v857_v58, %v700_v56 }
 0x29a   : > { %862 = vst [vmem:[#allocation2 + $0x8] sm:$0xff] %v860_v59 }
 0x29b   : > { %v1183_v60 = vld [vmem:[%s1499_s0] sm:$0xff]  }
 0x29c   : > { %v871_v61 = vld [vmem:[#allocation2] sm:$0xff]  ;;  %v1184_v63 = vunpack.c.l.bf16 %v1183_v60  ;;  %v1185_v0 = vunpack.c.h.bf16 %v1183_v60 }
 0x29d   : > { %v1249_v1 = vld [vmem:[%s1505_s6] ss:$0 sm:$0xff] }
 0x29e   : > { %v873_v2 = vadd.f32 %v1184_v63, %v871_v61 }
 0x2a0   : > { %v879_v4 = vadd.f32 %v1249_v1, %v873_v2 }
 0x2a1   : > { %v872_v62 = vld [vmem:[#allocation2 + $0x8] sm:$0xff] }
 0x2a2   : > { %v874_v3 = vadd.f32 %v1185_v0, %v872_v62 }
 0x2a4   : > { %v880_v5 = vadd.f32 %v1249_v1, %v874_v3 }
 0x2a6   : > { %v1189_v6 = vpack.c.bf16 %v880_v5, %v879_v4 }
 0x2a8   : > { %1190 = vst [vmem:[%s1506_s7] sm:$0xff] %v1189_v6  }
 0x2a9 PF: > { %s17_s28 = sadd.s32 1, %s1288_s28   ;;  %s1507_s24 = smov %s1276_s25 }
 0x2aa   : > { %p14_p13 = scmp.ge.s32.totalorder %s17_s28, 4   ;;  %s1508_s25 = smov %s1367_s9 }
 0x2ab   : > { %s1509_s26 = smov %s1284_s27  ;;  %s1510_s27 = smov %s1512_s29 }
 0x2ac   :  { %16 = sbr.rel (!%p14_p13) target bundleno = 3 (0x3), region = 138 }

// kernel: _lambda_.56
= control target key start
LH: loop header
LB: loop body
LE: loop exit
PB: predicated region body
PF: predicated region fallthrough
CT: control target
= control target key end

     0   :  { %s959_s9 = smov 0   ;;  %s1172_s0 = inlined_call_operand.vmem [shape: bf16[2,2,384], index: 0, kind: input, shape index: {}]   ;;  %s1173_s1 = inlined_call_operand.vmem [shape: bf16[8,2,2], index: 1, kind: input, shape index: {}]   ;;  %s1174_s2 = inlined_call_operand.vmem [shape: bf16[2,2,128], index: 2, kind: output, shape index: {}]  }
   0x1 LB: > { %s858_s10 = sadd.s32 4294967295, %s935_s9   ;;  %p862_p0 = scmp.ge.s32.totalorder %s935_s9, 1  ;;  %s935_s9 = sphi %s959_s9, %s12_s9  }
   0x2   : > { %p111_p1 = scmp.lt.s32.totalorder %s935_s9, 3 }
   0x4   : > { %p112_p2 = pnand %p862_p0, %p111_p1 }
   0x5   : > { %p130_p3 = scmp.lt.s32.totalorder (!%p112_p2), %s858_s10, 1  ;;  %s937_s17 = smov (!%p112_p2), 96  }
   0x6   : > { %115 = sbr.rel (%p112_p2) target bundleno = 1272 (0x4f8), region = 28  ;;  %s938_s18 = smov (!%p112_p2), 112  }
   0x7   : > { %s939_s19 = smov (!%p112_p2), 80   ;;  %s940_s20 = smov (!%p112_p2), 64  }
   0x8   : > { %s941_s21 = smov (!%p112_p2), 48   ;;  %s942_s22 = smov (!%p112_p2), 32  }
   0x9   : > { %s943_s23 = smov (!%p112_p2), 16  }
   0xb   : > { %s1176_s10 = smov (!%p130_p3, %s858_s10), 1  ;;  %vm157_vm0 = vcmask 130048   ;;  %v138_v6 = vld [vmem:[%s1173_s1] sm:$0x1]  ;;  %vm179_vm1 = vcmask 9216   ;;  %vm196_vm2 = vcmask 1040384  }
   0xc   : > { %s881_s11 = smul.u32 3, %s1176_s10  ;;  %v146_v9 = vunpack.c.l.bf16 %v138_v6  ;;  %vm192_vm3 = vcmask 15360   ;;  %s1072_s30 = scalar_lea.vmem %s1174_s2, %s1176_s10  ;;  %vm214_vm4 = vcmask 122880   ;;  %vm299_vm5 = vcmask 254080  }
   0xd   : > { %vm384_vm6 = vcmask 385280   ;;  %vm469_vm7 = vcmask 516480   ;;  %vm554_vm8 = vcmask 647680   ;;  %vm639_vm9 = vcmask 778880  }
   0xe   : > { %s973_s14 = scalar_lea.vmem %s1172_s0, %s881_s11  ;;  %vm724_vm10 = vcmask 910080   ;;  %vm809_vm11 = vcmask 1041280  }
   0xf   : > { %v155_v0 = vld [vmem:[%s973_s14 + $0x1] sm:$0x1]  ;;  %v154_v2 = vld [vmem:[%s973_s14] sm:$0x1]  ;;  %v218_v7 = vld [vmem:[%s973_s14 + $0x2] sm:$0x1] }
  0x10   : > { %v162_v1 = vsel %vm157_vm0, %v155_v0, 0  ;;  %v216_v3 = vld [vmem:[%s973_s14] sm:$0x1]  ;;  %v217_v4 = vld [vmem:[%s973_s14 + $0x1] sm:$0x1] }
  0x11   : > { %171 = vmatpush.bf16.xpose.msra.mxu0 %v162_v1  ;;  %220 = vst [vmem:[#allocation1] ss:$9 sm:$0xff] %v216_v3  ;;  %v301_v15 = vld [vmem:[%s973_s14] sm:$0x1]  ;;  %v302_v17 = vld [vmem:[%s973_s14 + $0x1] sm:$0x1] }
  0x12   : > { %v303_v19 = vld [vmem:[%s973_s14 + $0x2] sm:$0x1]  ;;  %v386_v22 = vld [vmem:[%s973_s14] sm:$0x1]  ;;  %v387_v23 = vld [vmem:[%s973_s14 + $0x1] sm:$0x1] }
  0x13   : > { %v388_v25 = vld [vmem:[%s973_s14 + $0x2] sm:$0x1]  ;;  %v471_v27 = vld [vmem:[%s973_s14] sm:$0x1]  ;;  %v472_v29 = vld [vmem:[%s973_s14 + $0x1] sm:$0x1] }
  0x14   : > { %v473_v31 = vld [vmem:[%s973_s14 + $0x2] sm:$0x1]  ;;  %v556_v34 = vld [vmem:[%s973_s14] sm:$0x1]  ;;  %v557_v35 = vld [vmem:[%s973_s14 + $0x1] sm:$0x1] }
  0x15   : > { %v558_v37 = vld [vmem:[%s973_s14 + $0x2] sm:$0x1]  ;;  %v641_v40 = vld [vmem:[%s973_s14] sm:$0x1]  ;;  %v642_v41 = vld [vmem:[%s973_s14 + $0x1] sm:$0x1] }
  0x16   : > { %v643_v43 = vld [vmem:[%s973_s14 + $0x2] sm:$0x1]  ;;  %v726_v49 = vld [vmem:[%s973_s14] sm:$0x1]  ;;  %v727_v52 = vld [vmem:[%s973_s14 + $0x1] sm:$0x1] }
  0x17   : > { %v156_v59 = vld [vmem:[%s973_s14 + $0x2] sm:$0x1] }
  0x18   : > { %863 = vmatmul.msk.bf16.vlgmr.msra.gmra.mxu0 %vm157_vm0, %v154_v2  ;;  %v981_v5 = vld [vmem:[#allocation1] sm:$0xff]  ;;  %v198_v61 = vsel %vm196_vm2, %v156_v59, 0 }
  0x19   : > { %226 = vst [vmem:[#allocation1] ss:$9 sm:$0xff] %v217_v4  ;;  %207 = vmatpush.bf16.msra.mxu1 %v198_v61 }
  0x20   : > { %v227_v8 = vld [vmem:[#allocation1] sm:$0xff] }
  0x21   : > { %265 = vst [vmem:[#allocation1] ss:$9 sm:$0xff] %v218_v7 }
  0x28   : > { %v991_v14 = vld [vmem:[#allocation1] sm:$0xff] }
  0x29   : > { %305 = vst [vmem:[#allocation1] ss:$9 sm:$0xff] %v301_v15 }
  0x30   : > { %v306_v18 = vld [vmem:[#allocation1] sm:$0xff] }
  0x31   : > { %311 = vst [vmem:[#allocation1] ss:$9 sm:$0xff] %v302_v17 }
  0x38   : > { %v312_v20 = vld [vmem:[#allocation1] sm:$0xff] }
  0x39   : > { %314 = vrot.lane.b32.xlu2 %v312_v20, %s937_s17  ;;  %350 = vst [vmem:[#allocation1] ss:$9 sm:$0xff] %v303_v19 }
  0x40   : > { %v998_v21 = vld [vmem:[#allocation1] sm:$0xff] }
  0x41   : > { %390 = vst [vmem:[#allocation1] ss:$9 sm:$0xff] %v386_v22  ;;  %v141_v22 = vld [vmem:[%s1173_s1 + $0x3] sm:$0x1] }
  0x48   : > { %v391_v24 = vld [vmem:[#allocation1] sm:$0xff] }
  0x49   : > { %396 = vst [vmem:[#allocation1] ss:$9 sm:$0xff] %v387_v23  ;;  %v149_v23 = vunpack.c.l.bf16 %v141_v22 }
  0x50   : > { %v397_v26 = vld [vmem:[#allocation1] sm:$0xff] }
  0x51   : > { %399 = vrot.lane.b32.xlu2 %v397_v26, %s939_s19  ;;  %435 = vst [vmem:[#allocation1] ss:$9 sm:$0xff] %v388_v25 }
  0x58   : > { %v1005_v28 = vld [vmem:[#allocation1] sm:$0xff] }
  0x59   : > { %475 = vst [vmem:[#allocation1] ss:$9 sm:$0xff] %v471_v27  ;;  %308 = vrot.lane.b32.xlu2 %v306_v18, %s937_s17 }
  0x60   : > { %v476_v30 = vld [vmem:[#allocation1] sm:$0xff] }
  0x61   : > { %481 = vst [vmem:[#allocation1] ss:$9 sm:$0xff] %v472_v29  ;;  %393 = vrot.lane.b32.xlu2 %v391_v24, %s939_s19 }
  0x68   : > { %v482_v32 = vld [vmem:[#allocation1] sm:$0xff] }
  0x69   : > { %520 = vst [vmem:[#allocation1] ss:$9 sm:$0xff] %v473_v31 }
  0x70   : > { %v1012_v33 = vld [vmem:[#allocation1] sm:$0xff] }
  0x71   : > { %560 = vst [vmem:[#allocation1] ss:$9 sm:$0xff] %v556_v34 }
  0x78   : > { %v561_v36 = vld [vmem:[#allocation1] sm:$0xff] }
  0x79   : > { %566 = vst [vmem:[#allocation1] ss:$9 sm:$0xff] %v557_v35 }
  0x80   : > { %v567_v38 = vld [vmem:[#allocation1] sm:$0xff] }
  0x81   : > { %605 = vst [vmem:[#allocation1] ss:$9 sm:$0xff] %v558_v37  ;;  %569 = vrot.lane.b32.xlu2 %v567_v38, %s941_s21 }
  0x88   : > { %v1019_v39 = vld [vmem:[#allocation1] sm:$0xff] }
  0x89   : > { %645 = vst [vmem:[#allocation1] ss:$9 sm:$0xff] %v641_v40  ;;  %v139_v40 = vld [vmem:[%s1173_s1 + $0x1] sm:$0x1] }
  0x90   : > { %v646_v42 = vld [vmem:[#allocation1] sm:$0xff] }
  0x91   : > { %651 = vst [vmem:[#allocation1] ss:$9 sm:$0xff] %v642_v41 }
  0x93   : > { %v315_v55 = vpop.permute.xlu2 %314 }
  0x95   : > { %v173_v10 = vpop.f32.mrf.mxu0 }
  0x96   : > { %v177_v11 = vmul.f32 0.25, %v173_v10 }
  0x98   : > { %v987_v12 = vadd.f32 %v177_v11, %v146_v9  ;;  %v652_v44 = vld [vmem:[#allocation1] sm:$0xff] }
  0x99   : > { %690 = vst [vmem:[#allocation1] ss:$9 sm:$0xff] %v643_v43  ;;  %654 = vrot.lane.b32.xlu2 %v652_v44, %s942_s22 }
  0x9a   : > { %v180_v13 = vsel %vm179_vm1, %v987_v12, -inf }
  0x9b   : > { %181 = vmax.xlane.f32.xlu0 %v180_v13 }
  0x9d   : > { %v175_v16 = vpop.f32.mrf.mxu0 }
  0xa0   : > { %v1027_v48 = vld [vmem:[#allocation1] sm:$0xff] }
  0xa1   : > { %730 = vst [vmem:[#allocation1] ss:$9 sm:$0xff] %v726_v49 }
  0xa8   : > { %v731_v53 = vld [vmem:[#allocation1] sm:$0xff] }
  0xa9   : > { %736 = vst [vmem:[#allocation1] ss:$9 sm:$0xff] %v727_v52  ;;  %733 = vrot.lane.b32.xlu2 %v731_v53, %s943_s23 }
  0xab   : > { %v400_v56 = vpop.permute.xlu2 %399 }
  0xac   : > { %v405_v58 = vsel %vm157_vm0, %v400_v56, 0 }
  0xad   : > { %414 = vmatpush.bf16.xpose.msrb.mxu0 %v405_v58 }
  0xaf   : > { %229 = vrot.lane.b32.xlu0 %v227_v8, %s938_s18 }
  0xb0   : > { %v737_v54 = vld [vmem:[#allocation1] sm:$0xff] }
  0xb3   : > { %v309_v57 = vpop.permute.xlu2 %308 }
  0xb7   : > { %484 = vrot.lane.b32.xlu0 %v482_v32, %s940_s20 }
  0xbb   : > { %v394_v60 = vpop.permute.xlu2 %393 }
  0xbc   : > { %869 = vmatmul.msk.bf16.vlgmr.msrb.gmra.mxu0 %vm157_vm0, %v394_v60 }
  0xbf   : > { %563 = vrot.lane.b32.xlu0 %v561_v36, %s941_s21 }
  0xc7   : > { %648 = vrot.lane.b32.xlu0 %v646_v42, %s942_s22  ;;  %v147_v42 = vunpack.c.l.bf16 %v139_v40 }
  0xdb   : > { %v570_v63 = vpop.permute.xlu2 %569 }
  0xdc   : > { %v575_v1 = vsel %vm157_vm0, %v570_v63, 0 }
  0xdd   : > { %584 = vmatpush.bf16.xpose.msra.mxu0 %v575_v1 }
  0xf3   : > { %v655_v11 = vpop.permute.xlu2 %654 }
 0x103   : > { %v734_v17 = vpop.permute.xlu2 %733 }
 0x10e   : > { %v182_v45 = vpop.xlane.xlu0 %181 }
 0x10f   : > { %v183_v46 = vsub.f32 %v987_v12, %v182_v45  ;;  %v660_v12 = vsel %vm157_vm0, %v655_v11, 0  ;;  %v140_v11 = vld [vmem:[%s1173_s1 + $0x2] sm:$0x1] }
 0x111   : > { %v184_v47 = vmul.f32 1.442695, %v183_v46 }
 0x113   : > { %897 = vpow2.f32 %v184_v47 }
 0x119   : > { %v898_v50 = vpop.eup %897 }
 0x11a   : > { %v186_v51 = vsel %vm179_vm1, %v898_v50, 0.0 }
 0x11b   : > { %187 = vadd.xlane.f32.xlu1 %v186_v51  ;;  %v145_v51 = vld [vmem:[%s1173_s1 + $0x7] sm:$0x1] }
 0x11c   : > { %v153_v52 = vunpack.c.l.bf16 %v145_v51 }
 0x121   : > { %v230_v62 = vpop.permute.xlu0 %229 }
 0x122   : > { %v235_v0 = vsel %vm157_vm0, %v230_v62, 0  ;;  %v144_v62 = vld [vmem:[%s1173_s1 + $0x6] sm:$0x1] }
 0x123   : > { %244 = vmatpush.bf16.xpose.msra.mxu2 %v235_v0  ;;  %v152_v0 = vunpack.c.l.bf16 %v144_v62 }
 0x129   : > { %v485_v2 = vpop.permute.xlu0 %484 }
 0x12a   : > { %v490_v9 = vsel %vm157_vm0, %v485_v2, 0 }
 0x131   : > { %v564_v4 = vpop.permute.xlu0 %563 }
 0x132   : > { %873 = vmatmul.msk.bf16.vlgmr.msra.gmra.mxu0 %vm157_vm0, %v564_v4 }
 0x134   : > { %223 = vrot.lane.b32.xlu1 %v981_v5, %s938_s18  ;;  %v320_v5 = vsel %vm157_vm0, %v315_v55, 0 }
 0x135   : > { %329 = vmatpush.bf16.xpose.msrb.mxu1 %v320_v5 }
 0x139   : > { %v649_v18 = vpop.permute.xlu0 %648  ;;  %v416_v19 = vpop.f32.mrf.mxu0 }
 0x13a   : > { %v420_v20 = vmul.f32 0.25, %v416_v19 }
 0x13c   : > { %478 = vrot.lane.b32.xlu1 %v476_v30, %s940_s20  ;;  %v1057_v25 = vadd.f32 %v420_v20, %v149_v23  ;;  %v143_v30 = vld [vmem:[%s1173_s1 + $0x5] sm:$0x1] }
 0x13d   : > { %v151_v31 = vunpack.c.l.bf16 %v143_v30 }
 0x13e   : > { %v422_v26 = vsel %vm179_vm1, %v1057_v25, -inf }
 0x13f   : > { %423 = vmax.xlane.f32.xlu2 %v422_v26 }
 0x141   : > { %v418_v24 = vpop.f32.mrf.mxu0 }
 0x144   : > { %739 = vrot.lane.b32.xlu1 %v737_v54, %s943_s23  ;;  %v142_v54 = vld [vmem:[%s1173_s1 + $0x4] sm:$0x1] }
 0x145   : > { %v150_v58 = vunpack.c.l.bf16 %v142_v54 }
 0x18e   : > { %v188_v3 = vpop.xlane.xlu1 %187 }
 0x18f   : > { %899 = vrcp.f32 %v188_v3 }
 0x195   : > { %v900_v6 = vpop.eup %899 }
 0x196   : > { %v190_v7 = vmul.f32 %v900_v6, %v898_v50 }
 0x198   : > { %v191_v8 = vpack.c.bf16 %v190_v7, %v190_v7 }
 0x19a   : > { %864 = vmatmul.msk.bf16.vlgmr.msra.gmra.mxu1 %vm192_vm3, %v191_v8 }
 0x19b   : > { %499 = vmatpush.bf16.xpose.msra.mxu1 %v490_v9 }
 0x1a6   : > { %v224_v10 = vpop.permute.xlu1 %223 }
 0x1a7   : > { %865 = vmatmul.msk.bf16.vlgmr.msra.gmra.mxu2 %vm157_vm0, %v224_v10 }
 0x1aa   : > { %867 = vmatmul.msk.bf16.vlgmr.msrb.gmra.mxu1 %vm157_vm0, %v309_v57 }
 0x1ab   : > { %669 = vmatpush.bf16.xpose.msrb.mxu1 %v660_v12 }
 0x1ae   : > { %v479_v13 = vpop.permute.xlu1 %478 }
 0x1af   : > { %v586_v27 = vpop.f32.mrf.mxu0 }
 0x1b0   : > { %v590_v29 = vmul.f32 0.25, %v586_v27 }
 0x1b2   : > { %v1064_v32 = vadd.f32 %v590_v29, %v151_v31  ;;  %v424_v10 = vpop.xlane.xlu2 %423 }
 0x1b4   : > { %v592_v34 = vsel %vm179_vm1, %v1064_v32, -inf }
 0x1b5   : > { %593 = vmax.xlane.f32.xlu0 %v592_v34 }
 0x1b6   : > { %v740_v15 = vpop.permute.xlu1 %739 }
 0x1b7   : > { %v745_v16 = vsel %vm157_vm0, %v740_v15, 0  ;;  %v588_v35 = vpop.f32.mrf.mxu0 }
 0x1b8   : > { %754 = vmatpush.bf16.xpose.msrb.mxu0 %v745_v16  ;;  %v148_v16 = vunpack.c.l.bf16 %v140_v11 }
 0x1ba   : > { %871 = vmatmul.msk.bf16.vlgmr.msra.gmra.mxu1 %vm157_vm0, %v479_v13  ;;  %v425_v13 = vsub.f32 %v1057_v25, %v424_v10 }
 0x1bf   : > { %877 = vmatmul.msk.bf16.vlgmr.msrb.gmra.mxu0 %vm157_vm0, %v734_v17 }
 0x1ca   : > { %875 = vmatmul.msk.bf16.vlgmr.msrb.gmra.mxu1 %vm157_vm0, %v649_v18 }
 0x217   : > { %v209_v36 = vpop.f32.mrf.mxu1 }
 0x218   : > { %v213_v37 = vpack.c.bf16 %v209_v36, %v209_v36 }
 0x21a   : > { %215 = vst.msk [vmem:[%s1072_s30] sm:$0x1] %vm214_vm4, %v213_v37 }
 0x21f   : > { %v211_v38 = vpop.f32.mrf.mxu1 }
 0x227   : > { %v331_v41 = vpop.f32.mrf.mxu1 }
 0x228   : > { %v335_v15 = vmul.f32 0.25, %v331_v41  ;;  %v594_v34 = vpop.xlane.xlu0 %593 }
 0x229   : > { %v595_v35 = vsub.f32 %v1064_v32, %v594_v34 }
 0x22a   : > { %v246_v43 = vpop.f32.mrf.mxu2  ;;  %v336_v17 = vadd.f32 %v335_v15, %v148_v16 }
 0x22b   : > { %v250_v44 = vmul.f32 0.25, %v246_v43  ;;  %v596_v36 = vmul.f32 1.442695, %v595_v35 }
 0x22c   : > { %v337_v18 = vsel %vm179_vm1, %v336_v17, -inf }
 0x22d   : > { %v251_v45 = vadd.f32 %v250_v44, %v147_v42 }
 0x22f   : > { %v252_v46 = vsel %vm179_vm1, %v251_v45, -inf  ;;  %v333_v47 = vpop.f32.mrf.mxu1 }
 0x230   : > { %253 = vmax.xlane.f32.xlu1 %v252_v46  ;;  %v728_v47 = vld [vmem:[%s973_s14 + $0x2] sm:$0x1] }
 0x231   : > { %775 = vst [vmem:[#allocation1] ss:$9 sm:$0xff] %v728_v47 }
 0x232   : > { %v248_v49 = vpop.f32.mrf.mxu2 }
 0x237   : > { %v501_v50 = vpop.f32.mrf.mxu1 }
 0x238   : > { %v505_v57 = vmul.f32 0.25, %v501_v50 }
 0x23a   : > { %v506_v61 = vadd.f32 %v505_v57, %v150_v58 }
 0x23c   : > { %v756_v53 = vpop.f32.mrf.mxu0  ;;  %v507_v1 = vsel %vm179_vm1, %v506_v61, -inf }
 0x23d   : > { %v760_v55 = vmul.f32 0.25, %v756_v53 }
 0x23f   : > { %v761_v56 = vadd.f32 %v760_v55, %v153_v52  ;;  %v503_v59 = vpop.f32.mrf.mxu1  ;;  %v776_v52 = vld [vmem:[#allocation1] sm:$0xff] }
 0x241   : > { %v762_v60 = vsel %vm179_vm1, %v761_v56, -inf }
 0x242   : > { %763 = vmax.xlane.f32.xlu1 %v762_v60 }
 0x244   : > { %v758_v63 = vpop.f32.mrf.mxu0 }
 0x247   : > { %v671_v2 = vpop.f32.mrf.mxu1 }
 0x248   : > { %v675_v3 = vmul.f32 0.25, %v671_v2 }
 0x24a   : > { %508 = vmax.xlane.f32.xlu1 %v507_v1  ;;  %v1090_v4 = vadd.f32 %v675_v3, %v152_v0 }
 0x24c   : > { %v677_v5 = vsel %vm179_vm1, %v1090_v4, -inf }
 0x24d   : > { %678 = vmax.xlane.f32.xlu2 %v677_v5 }
 0x24f   : > { %v673_v6 = vpop.f32.mrf.mxu1 }
 0x263   : > { %353 = vrot.lane.b32.xlu1 %v998_v21, %s937_s17 }
 0x265   : > { %268 = vrot.lane.b32.xlu2 %v991_v14, %s938_s18  ;;  %v426_v14 = vmul.f32 1.442695, %v425_v13 }
 0x26b   : > { %523 = vrot.lane.b32.xlu1 %v1012_v33, %s940_s20 }
 0x2a3   : > { %v254_v7 = vpop.xlane.xlu1 %253 }
 0x2a4   : > { %v255_v8 = vsub.f32 %v251_v45, %v254_v7 }
 0x2a6   : > { %v256_v9 = vmul.f32 1.442695, %v255_v8 }
 0x2a8   : > { %901 = vpow2.f32 %v256_v9 }
 0x2a9   : > { %903 = vpow2.f32 %v426_v14 }
 0x2ae   : > { %v902_v12 = vpop.eup %901 }
 0x2af   : > { %v258_v21 = vsel %vm179_vm1, %v902_v12, 0.0  ;;  %v904_v19 = vpop.eup %903 }
 0x2b0   : > { %259 = vadd.xlane.f32.xlu0 %v258_v21  ;;  %v428_v24 = vsel %vm179_vm1, %v904_v19, 0.0 }
 0x2b5   : > { %v764_v33 = vpop.xlane.xlu1 %763 }
 0x2b6   : > { %v765_v22 = vsub.f32 %v761_v56, %v764_v33 }
 0x2b8   : > { %338 = vmax.xlane.f32.xlu0 %v337_v18  ;;  %v766_v25 = vmul.f32 1.442695, %v765_v22 }
 0x2bd   : > { %v509_v20 = vpop.xlane.xlu1 %508 }
 0x2be   : > { %v510_v23 = vsub.f32 %v506_v61, %v509_v20 }
 0x2c0   : > { %v511_v26 = vmul.f32 1.442695, %v510_v23  ;;  %429 = vadd.xlane.f32.xlu0 %v428_v24  ;;  %v679_v40 = vpop.xlane.xlu2 %678 }
 0x2c1   : > { %v680_v62 = vsub.f32 %v1090_v4, %v679_v40 }
 0x2c2   : > { %905 = vpow2.f32 %v511_v26 }
 0x2c3   : > { %907 = vpow2.f32 %v766_v25  ;;  %v681_v63 = vmul.f32 1.442695, %v680_v62 }
 0x2c4   : > { %909 = vpow2.f32 %v596_v36 }
 0x2c8   : > { %v1107_v27 = vpop.eup %905  ;;  %v269_v41 = vpop.permute.xlu2 %268 }
 0x2c9   : > { %v513_v29 = vsel %vm179_vm1, %v1107_v27, 0.0  ;;  %v1111_v30 = vpop.eup %907  ;;  %v274_v42 = vsel %vm196_vm2, %v269_v41, 0 }
 0x2ca   : > { %514 = vadd.xlane.f32.xlu2 %v513_v29  ;;  %v768_v31 = vsel %vm179_vm1, %v1111_v30, 0.0  ;;  %v1120_v37 = vpop.eup %909  ;;  %283 = vmatpush.bf16.msra.mxu3 %v274_v42 }
 0x2cb   : > { %v598_v38 = vsel %vm179_vm1, %v1120_v37, 0.0 }
 0x2d2   : > { %769 = vadd.xlane.f32.xlu2 %v768_v31 }
 0x2d4   : > { %438 = vrot.lane.b32.xlu0 %v1005_v28, %s939_s19 }
 0x2d5   : > { %v354_v58 = vpop.permute.xlu1 %353 }
 0x2d6   : > { %v359_v59 = vsel %vm196_vm2, %v354_v58, 0 }
 0x2d7   : > { %368 = vmatpush.bf16.msrb.mxu3 %v359_v59 }
 0x2dd   : > { %v524_v60 = vpop.permute.xlu1 %523 }
 0x2de   : > { %v529_v61 = vsel %vm196_vm2, %v524_v60, 0 }
 0x2ea   : > { %693 = vrot.lane.b32.xlu2 %v1027_v48, %s942_s22 }
 0x2fe   : > { %599 = vadd.xlane.f32.xlu0 %v598_v38 }
 0x312   : > { %778 = vrot.lane.b32.xlu0 %v776_v52, %s943_s23 }
 0x323   : > { %v260_v28 = vpop.xlane.xlu0 %259 }
 0x324   : > { %911 = vrcp.f32 %v260_v28 }
 0x32a   : > { %v912_v43 = vpop.eup %911 }
 0x32b   : > { %v339_v48 = vpop.xlane.xlu0 %338  ;;  %v262_v44 = vmul.f32 %v912_v43, %v902_v12 }
 0x32c   : > { %v340_v32 = vsub.f32 %v336_v17, %v339_v48 }
 0x32d   : > { %v263_v45 = vpack.c.bf16 %v262_v44, %v262_v44 }
 0x32e   : > { %v341_v46 = vmul.f32 1.442695, %v340_v32 }
 0x32f   : > { %866 = vmatmul.msk.bf16.vlgmr.msra.gmra.mxu3 %vm192_vm3, %v263_v45 }
 0x330   : > { %913 = vpow2.f32 %v341_v46  ;;  %538 = vmatpush.bf16.msra.mxu3 %v529_v61 }
 0x333   : > { %v430_v51 = vpop.xlane.xlu0 %429 }
 0x334   : > { %915 = vrcp.f32 %v430_v51 }
 0x335   : > { %917 = vpow2.f32 %v681_v63 }
 0x336   : > { %v914_v49 = vpop.eup %913 }
 0x337   : > { %v343_v50 = vsel %vm179_vm1, %v914_v49, 0.0 }
 0x338   : > { %344 = vadd.xlane.f32.xlu1 %v343_v50 }
 0x33a   : > { %v916_v53 = vpop.eup %915 }
 0x33b   : > { %v432_v54 = vmul.f32 %v916_v53, %v904_v19  ;;  %v918_v0 = vpop.eup %917 }
 0x33c   : > { %v683_v1 = vsel %vm179_vm1, %v918_v0, 0.0 }
 0x33d   : > { %v433_v57 = vpack.c.bf16 %v432_v54, %v432_v54  ;;  %v515_v2 = vpop.xlane.xlu2 %514 }
 0x346   : > { %v439_v55 = vpop.permute.xlu0 %438 }
 0x347   : > { %v444_v56 = vsel %vm196_vm2, %v439_v55, 0 }
 0x348   : > { %453 = vmatpush.bf16.msrb.mxu2 %v444_v56 }
 0x34b   : > { %870 = vmatmul.msk.bf16.vlgmr.msrb.gmra.mxu2 %vm192_vm3, %v433_v57 }
 0x351   : > { %608 = vrot.lane.b32.xlu1 %v1019_v39, %s941_s21  ;;  %v770_v39 = vpop.xlane.xlu2 %769 }
 0x359   : > { %v694_v12 = vpop.permute.xlu2 %693 }
 0x35a   : > { %v699_v13 = vsel %vm196_vm2, %v694_v12, 0 }
 0x371   : > { %v600_v11 = vpop.xlane.xlu0 %599 }
 0x37b   : > { %684 = vadd.xlane.f32.xlu1 %v683_v1 }
 0x384   : > { %v779_v14 = vpop.permute.xlu0 %778 }
 0x385   : > { %v784_v19 = vsel %vm196_vm2, %v779_v14, 0 }
 0x3ab   : > { %v345_v3 = vpop.xlane.xlu1 %344 }
 0x3ac   : > { %919 = vrcp.f32 %v345_v3 }
 0x3ad   : > { %921 = vrcp.f32 %v515_v2 }
 0x3ae   : > { %923 = vrcp.f32 %v600_v11 }
 0x3af   : > { %925 = vrcp.f32 %v770_v39 }
 0x3b2   : > { %v920_v5 = vpop.eup %919  ;;  %v285_v6 = vpop.f32.mrf.mxu3 }
 0x3b3   : > { %v347_v7 = vmul.f32 %v920_v5, %v914_v49  ;;  %v289_v8 = vpack.c.bf16 %v285_v6, %v285_v6  ;;  %v922_v21 = vpop.eup %921 }
 0x3b4   : > { %v924_v16 = vpop.eup %923  ;;  %v517_v17 = vmul.f32 %v922_v21, %v1107_v27 }
 0x3b5   : > { %v291_v9 = vrot.slane %v289_v8, 3  ;;  %v348_v10 = vpack.c.bf16 %v347_v7, %v347_v7  ;;  %v602_v33 = vmul.f32 %v924_v16, %v1120_v37  ;;  %v926_v26 = vpop.eup %925 }
 0x3b6   : > { %v518_v22 = vpack.c.bf16 %v517_v17, %v517_v17  ;;  %v772_v29 = vmul.f32 %v926_v26, %v1111_v30 }
 0x3b7   : > { %868 = vmatmul.msk.bf16.vlgmr.msrb.gmra.mxu3 %vm192_vm3, %v348_v10  ;;  %v294_v4 = vsel %vm196_vm2, %v289_v8, %v291_v9  ;;  %v603_v23 = vpack.c.bf16 %v602_v33, %v602_v33 }
 0x3b8   : > { %296 = vrot.lane.b32.xlu1 %v294_v4, %s943_s23  ;;  %708 = vmatpush.bf16.msrb.mxu3 %v699_v13  ;;  %v773_v34 = vpack.c.bf16 %v772_v29, %v772_v29 }
 0x3ba   : > { %v287_v15 = vpop.f32.mrf.mxu3 }
 0x3c3   : > { %v609_v18 = vpop.permute.xlu1 %608 }
 0x3c4   : > { %v614_v20 = vsel %vm196_vm2, %v609_v18, 0 }
 0x3c5   : > { %623 = vmatpush.bf16.msra.mxu2 %v614_v20 }
 0x3c7   : > { %872 = vmatmul.msk.bf16.vlgmr.msra.gmra.mxu3 %vm192_vm3, %v518_v22 }
 0x3c8   : > { %874 = vmatmul.msk.bf16.vlgmr.msra.gmra.mxu2 %vm192_vm3, %v603_v23 }
 0x3c9   : > { %793 = vmatpush.bf16.msrb.mxu2 %v784_v19 }
 0x3ce   : > { %v455_v24 = vpop.f32.mrf.mxu2 }
 0x3cf   : > { %v459_v25 = vpack.c.bf16 %v455_v24, %v455_v24 }
 0x3d1   : > { %v461_v27 = vrot.slane %v459_v25, 3 }
 0x3d3   : > { %v464_v31 = vsel %vm196_vm2, %v459_v25, %v461_v27 }
 0x3d4   : > { %466 = vrot.lane.b32.xlu2 %v464_v31, %s941_s21 }
 0x3d6   : > { %v457_v35 = vpop.f32.mrf.mxu2 }
 0x3d8   : > { %878 = vmatmul.msk.bf16.vlgmr.msrb.gmra.mxu2 %vm192_vm3, %v773_v34 }
 0x3ee   : > { %v685_v36 = vpop.xlane.xlu1 %684 }
 0x3ef   : > { %927 = vrcp.f32 %v685_v36 }
 0x3f5   : > { %v928_v37 = vpop.eup %927 }
 0x3f6   : > { %v687_v38 = vmul.f32 %v928_v37, %v918_v0 }
 0x3f8   : > { %v688_v40 = vpack.c.bf16 %v687_v38, %v687_v38 }
 0x3fa   : > { %876 = vmatmul.msk.bf16.vlgmr.msrb.gmra.mxu3 %vm192_vm3, %v688_v40 }
 0x42a   : > { %v297_v41 = vpop.permute.xlu1 %296 }
 0x42b   : > { %300 = vst.msk [vmem:[%s1072_s30] sm:$0x1] %vm299_vm5, %v297_v41 }
 0x42e   : > { %v467_v1 = vpop.permute.xlu2 %466 }
 0x43a   : > { %v370_v42 = vpop.f32.mrf.mxu3 }
 0x43b   : > { %v374_v30 = vpack.c.bf16 %v370_v42, %v370_v42 }
 0x43d   : > { %v376_v28 = vrot.slane %v374_v30, 3 }
 0x43f   : > { %v379_v43 = vsel %vm196_vm2, %v374_v30, %v376_v28 }
 0x440   : > { %381 = vrot.lane.b32.xlu0 %v379_v43, %s942_s22 }
 0x442   : > { %v372_v48 = vpop.f32.mrf.mxu3 }
 0x44a   : > { %v540_v44 = vpop.f32.mrf.mxu3 }
 0x44b   : > { %v544_v32 = vpack.c.bf16 %v540_v44, %v540_v44  ;;  %v625_v45 = vpop.f32.mrf.mxu2 }
 0x44c   : > { %v629_v46 = vpack.c.bf16 %v625_v45, %v625_v45 }
 0x44d   : > { %v546_v47 = vrot.slane %v544_v32, 3 }
 0x44e   : > { %v631_v49 = vrot.slane %v629_v46, 3 }
 0x44f   : > { %v549_v50 = vsel %vm196_vm2, %v544_v32, %v546_v47 }
 0x450   : > { %551 = vrot.lane.b32.xlu0 %v549_v50, %s940_s20  ;;  %v634_v51 = vsel %vm196_vm2, %v629_v46, %v631_v49 }
 0x451   : > { %636 = vrot.lane.b32.xlu2 %v634_v51, %s939_s19 }
 0x452   : > { %v542_v52 = vpop.f32.mrf.mxu3 }
 0x453   : > { %v627_v53 = vpop.f32.mrf.mxu2 }
 0x45b   : > { %v795_v54 = vpop.f32.mrf.mxu2 }
 0x45c   : > { %v799_v55 = vpack.c.bf16 %v795_v54, %v795_v54 }
 0x45e   : > { %v801_v56 = vrot.slane %v799_v55, 3 }
 0x460   : > { %v804_v57 = vsel %vm196_vm2, %v799_v55, %v801_v56 }
 0x461   : > { %806 = vrot.lane.b32.xlu2 %v804_v57, %s938_s18 }
 0x463   : > { %v797_v58 = vpop.f32.mrf.mxu2 }
 0x47d   : > { %v710_v59 = vpop.f32.mrf.mxu3 }
 0x47e   : > { %v714_v60 = vpack.c.bf16 %v710_v59, %v710_v59 }
 0x480   : > { %v716_v61 = vrot.slane %v714_v60, 3 }
 0x482   : > { %v719_v62 = vsel %vm196_vm2, %v714_v60, %v716_v61 }
 0x483   : > { %721 = vrot.lane.b32.xlu0 %v719_v62, %s937_s17 }
 0x485   : > { %v712_v63 = vpop.f32.mrf.mxu3 }
 0x4ab   : > { %v637_v3 = vpop.permute.xlu2 %636 }
 0x4b2   : > { %v382_v0 = vpop.permute.xlu0 %381 }
 0x4b3   : > { %385 = vst.msk [vmem:[%s1072_s30] sm:$0x1] %vm384_vm6, %v382_v0 }
 0x4b4   : > { %470 = vst.msk [vmem:[%s1072_s30] sm:$0x1] %vm469_vm7, %v467_v1 }
 0x4bb   : > { %v807_v5 = vpop.permute.xlu2 %806 }
 0x4c2   : > { %v552_v2 = vpop.permute.xlu0 %551 }
 0x4c3   : > { %555 = vst.msk [vmem:[%s1072_s30] sm:$0x1] %vm554_vm8, %v552_v2 }
 0x4c4   : > { %640 = vst.msk [vmem:[%s1072_s30] sm:$0x1] %vm639_vm9, %v637_v3 }
 0x4f5   : > { %v722_v39 = vpop.permute.xlu0 %721 }
 0x4f6   : > { %725 = vst.msk [vmem:[%s1072_s30] sm:$0x1] %vm724_vm10, %v722_v39 }
 0x4f7   : > { %810 = vst.msk [vmem:[%s1072_s30] sm:$0x1] %vm809_vm11, %v807_v5 }
 0x4f8 PF: > { %s12_s9 = sadd.s32 1, %s935_s9  }
 0x4f9   : > { %p9_p4 = scmp.ge.s32.totalorder %s12_s9, 4  }
 0x4fb   :  { %11 = sbr.rel (!%p9_p4) target bundleno = 1 (0x1), region = 58 }

</bundles_post_ra>
